<compile_context>
chip_gen: v6e
topology: v6e:2x2x1
jax: 0.10.0
libtpu: 0.0.40
codegen_flags: <defaults>
</compile_context>

<pallas_src>
import functools

import jax
import jax.numpy as jnp
from jax.experimental import pallas as pl
from jax.experimental.pallas import tpu as pltpu

IN_F = 28       # per-row feature dim (nn.Linear(28, 500) applied over last axis)
HID = 500       # hidden width
ROWS = 28       # rows per sample
OUT_F = 10      # final classes (nn.Linear(28*500, 10))
OUT_PAD = 128   # lane-dense padded class dim (classes live in lanes 0..9)


def splitnn_kernel(x_ref, w1_ref, b1_ref, w2_ref, b2_ref, w3_ref, b3_ref,
                   w45_ref, b5_ref, o_ref):
    # x_ref block: (28, TB, 28) bf16, grouped by row index r, so the flattened
    # LHS row index is r * TB + t  (t = sample within this batch tile).
    rows, tb, _ = x_ref.shape
    m = rows * tb
    x = x_ref[...].reshape(m, IN_F)   # merge major dims; last (lane) dim unchanged

    def dense(lhs_bf16, w_ref, b_ref):
        # bf16 MXU inputs, f32 accumulation, f32 bias-add.
        return jnp.dot(lhs_bf16, w_ref[...],
                       preferred_element_type=jnp.float32) + b_ref[...]

    # first_part: Linear(28,500)+ReLU ; second_part[:4]: 500->500+ReLU, 500->28+ReLU
    y = jnp.maximum(dense(x, w1_ref, b1_ref), 0.0)
    y = jnp.maximum(dense(y.astype(jnp.bfloat16), w2_ref, b2_ref), 0.0)
    y = jnp.maximum(dense(y.astype(jnp.bfloat16), w3_ref, b3_ref), 0.0)
    y = y.astype(jnp.bfloat16)        # (28*TB, 28)

    # Fused second_part[4] + third_part (linear -> linear, no nonlinearity):
    #   out[t] = b5' + sum_r y3[r*TB + t, :] @ (W4 @ W5[r])
    # W45 is (28, 28, 128) bf16 (classes zero-padded to 128 lanes); each partial
    # product is a tiny tile-aligned (TB,28)@(28,128) MXU matmul; acc stays f32
    # and the output block is lane-dense (no masked partial stores).
    acc = jnp.broadcast_to(b5_ref[...], (tb, OUT_PAD))          # f32 (TB, 128)
    for r in range(ROWS):             # static, sublane-tile-aligned slices
        acc = acc + jnp.dot(y[r * tb:(r + 1) * tb, :], w45_ref[r],
                            preferred_element_type=jnp.float32)
    o_ref[...] = acc


def _round_up(v, m):
    return -(-v // m) * m


@functools.partial(jax.jit, static_argnames=("tb",))
def splitnn_forward(x, params, *, tb=128):
    """x: (B, 28, 28) float32 -> (B, 10) float32."""
    B = x.shape[0]
    w1, b1, w2, b2, w3, b3, w4, b4, w5, b5 = params
    bf16 = jnp.bfloat16

    # --- batch-tile selection (plain-Python, shapes are static under jit) ---
    # tb=128 fills the MXU M dim on v5e/v6e/v7x; tb=256 is only for v6e and
    # automatically raises the VMEM limit (would exceed v7x's 64 MiB physical).
    tb = int(max(16, min(256, tb)))
    tb = _round_up(tb, 16)                                   # bf16 sublane packing
    # Megacore guard: keep >= 2 grid steps when the batch allows, so both v7x
    # TensorCores get work (and small batches are not over-padded).
    tb = min(tb, max(16, _round_up((B + 1) // 2, 16)))
    b_pad = _round_up(B, tb)                                 # pad batch to tile multiple
    grid = (b_pad // tb,)
    vmem_limit = (40 if tb <= 128 else 80) * 1024 * 1024

    # --- x layout plumbing (fused by XLA into one pass under this jit) ---
    xp = jnp.pad(x, ((0, b_pad - B), (0, 0), (0, 0)))
    # (B,28,28) -> (28,B,28): rows grouped by r so the head slices are contiguous.
    xt = jnp.transpose(xp, (1, 0, 2)).astype(bf16)

    # --- weight prep: bf16 MXU weights, W4/W5 fused in f32, biases as (1,N) ---
    b1r, b2r, b3r = (b.reshape(1, -1) for b in (b1, b2, b3))
    w1c, w2c, w3c = (w.astype(bf16) for w in (w1, w2, w3))
    w5r = w5.reshape(ROWS, HID, OUT_F)                            # (28,500,10) f32
    w45 = jnp.einsum("kh,rhc->rkc", w4, w5r)                      # (28,28,10)  f32
    w45 = jnp.pad(w45, ((0, 0), (0, 0), (0, OUT_PAD - OUT_F))).astype(bf16)
    b5p = b5 + b4 @ w5r.sum(axis=0)                               # (10,) f32
    b5p = jnp.pad(b5p, (0, OUT_PAD - OUT_F)).reshape(1, OUT_PAD)

    const2d = lambda shape: pl.BlockSpec(shape, lambda i: (0, 0))

    out = pl.pallas_call(
        splitnn_kernel,
        out_shape=jax.ShapeDtypeStruct((b_pad, OUT_PAD), jnp.float32),
        grid=grid,
        in_specs=[
            pl.BlockSpec((ROWS, tb, IN_F), lambda i: (0, i, 0)),      # x (28,B,28)
            const2d((IN_F, HID)), const2d((1, HID)),                  # w1, b1
            const2d((HID, HID)), const2d((1, HID)),                   # w2, b2
            const2d((HID, IN_F)), const2d((1, IN_F)),                 # w3, b3
            pl.BlockSpec((ROWS, IN_F, OUT_PAD), lambda i: (0, 0, 0)), # W45 fused
            const2d((1, OUT_PAD)),                                    # b5' padded
        ],
        out_specs=pl.BlockSpec((tb, OUT_PAD), lambda i: (i, 0)),
        compiler_params=pltpu.CompilerParams(
            dimension_semantics=("parallel",),
            vmem_limit_bytes=vmem_limit),
    )(xt, w1c, b1r, w2c, b2r, w3c, b3r, w45, b5p)

    return out[:B, :OUT_F]


def init_params(key):
    """Deterministic PyTorch-Linear-style init (uniform +-1/sqrt(fan_in))."""
    ks = jax.random.split(key, 10)

    def linear(kw, kb, fan_in, fan_out):
        lim = 1.0 / (fan_in ** 0.5)
        w = jax.random.uniform(kw, (fan_in, fan_out), jnp.float32, -lim, lim)
        b = jax.random.uniform(kb, (fan_out,), jnp.float32, -lim, lim)
        return w, b

    w1, b1 = linear(ks[0], ks[1], IN_F, HID)          # first_part
    w2, b2 = linear(ks[2], ks[3], HID, HID)           # second_part[0]
    w3, b3 = linear(ks[4], ks[5], HID, IN_F)          # second_part[2]
    w4, b4 = linear(ks[6], ks[7], IN_F, HID)          # second_part[4]
    w5, b5 = linear(ks[8], ks[9], ROWS * HID, OUT_F)  # third_part
    return (w1, b1, w2, b2, w3, b3, w4, b4, w5, b5)


def splitnn_reference(x, params):
    """Pure-JAX layer-by-layer (un-fused) reference with bf16 MXU inputs / f32 accum."""
    w1, b1, w2, b2, w3, b3, w4, b4, w5, b5 = params
    B = x.shape[0]
    mm = lambda a, w: jnp.dot(a.astype(jnp.bfloat16), w.astype(jnp.bfloat16),
                              preferred_element_type=jnp.float32)
    y = jnp.maximum(mm(x, w1) + b1, 0.0)
    y = jnp.maximum(mm(y, w2) + b2, 0.0)
    y = jnp.maximum(mm(y, w3) + b3, 0.0)
    y = mm(y, w4) + b4
    y = y.reshape(B, ROWS * HID)
    return mm(y, w5) + b5


if __name__ == "__main__":
    key = jax.random.PRNGKey(0)
    k_x, k_p = jax.random.split(key)

    B = 2
    x = jax.random.normal(k_x, (B, ROWS, IN_F), dtype=jnp.float32)
    params = init_params(k_p)

    out = splitnn_forward(x, params)
    out = jax.block_until_ready(out)

    ref = splitnn_reference(x, params)
    assert out.shape == (B, OUT_F), out.shape
    err = jnp.max(jnp.abs(out - ref))
    assert jnp.allclose(out, ref, atol=1e-2, rtol=1e-2), f"mismatch: max abs err {err}"

    print("KERNEL_OK")
</pallas_src>

<mosaic_0001>
module attributes {stable_mosaic.version = 11 : i64} {
  func.func @splitnn_kernel(%arg0: i32, %arg1: memref<28x16x28xbf16, #tpu.memory_space<vmem>>, %arg2: memref<28x500xbf16, #tpu.memory_space<vmem>>, %arg3: memref<1x500xf32, #tpu.memory_space<vmem>>, %arg4: memref<500x500xbf16, #tpu.memory_space<vmem>>, %arg5: memref<1x500xf32, #tpu.memory_space<vmem>>, %arg6: memref<500x28xbf16, #tpu.memory_space<vmem>>, %arg7: memref<1x28xf32, #tpu.memory_space<vmem>>, %arg8: memref<28x28x128xbf16, #tpu.memory_space<vmem>>, %arg9: memref<1x128xf32, #tpu.memory_space<vmem>>, %arg10: memref<16x128xf32, #tpu.memory_space<vmem>>) attributes {dimension_semantics = [#tpu.dimension_semantics<parallel>], iteration_bounds = array<i64: 1>, scalar_prefetch = 0 : i64, scratch_operands = 0 : i64, tpu.core_type = #tpu.core_type<tc>, window_params = [{transform_indices = @transform_0, window_bounds = array<i64: 28, 16, 28>}, {pipeline_mode = #tpu.pipeline_mode<synchronous>, transform_indices = @transform_1, window_bounds = array<i64: 28, 500>}, {pipeline_mode = #tpu.pipeline_mode<synchronous>, transform_indices = @transform_2, window_bounds = array<i64: 1, 500>}, {pipeline_mode = #tpu.pipeline_mode<synchronous>, transform_indices = @transform_3, window_bounds = array<i64: 500, 500>}, {pipeline_mode = #tpu.pipeline_mode<synchronous>, transform_indices = @transform_4, window_bounds = array<i64: 1, 500>}, {pipeline_mode = #tpu.pipeline_mode<synchronous>, transform_indices = @transform_5, window_bounds = array<i64: 500, 28>}, {pipeline_mode = #tpu.pipeline_mode<synchronous>, transform_indices = @transform_6, window_bounds = array<i64: 1, 28>}, {pipeline_mode = #tpu.pipeline_mode<synchronous>, transform_indices = @transform_7, window_bounds = array<i64: 28, 28, 128>}, {pipeline_mode = #tpu.pipeline_mode<synchronous>, transform_indices = @transform_8, window_bounds = array<i64: 1, 128>}, {transform_indices = @transform_9, window_bounds = array<i64: 16, 128>}]} {
    %c0 = arith.constant 0 : index
    %c0_0 = arith.constant 0 : index
    %c0_1 = arith.constant 0 : index
    %0 = vector.load %arg1[%c0, %c0_0, %c0_1] : memref<28x16x28xbf16, #tpu.memory_space<vmem>>, vector<28x16x28xbf16>
    %1 = vector.shape_cast %0 : vector<28x16x28xbf16> to vector<448x28xbf16>
    %c0_2 = arith.constant 0 : index
    %c0_3 = arith.constant 0 : index
    %2 = vector.load %arg2[%c0_2, %c0_3] : memref<28x500xbf16, #tpu.memory_space<vmem>>, vector<28x500xbf16>
    %cst = arith.constant dense<0.000000e+00> : vector<448x500xf32>
    %3 = tpu.matmul %1, %2, %cst {dimension_numbers = #tpu.dot_dimension_numbers<[1], [0], [0], [1], [0, 0, 1, 1], [], []>} : vector<448x28xbf16>, vector<28x500xbf16>, vector<448x500xf32> -> vector<448x500xf32>
    %c0_4 = arith.constant 0 : index
    %c0_5 = arith.constant 0 : index
    %4 = vector.load %arg3[%c0_4, %c0_5] : memref<1x500xf32, #tpu.memory_space<vmem>>, vector<1x500xf32>
    %5 = vector.broadcast %4 : vector<1x500xf32> to vector<448x500xf32>
    %6 = arith.addf %3, %5 : vector<448x500xf32>
    %cst_6 = arith.constant 0.000000e+00 : f32
    %7 = vector.broadcast %cst_6 : f32 to vector<448x500xf32>
    %8 = arith.maximumf %6, %7 : vector<448x500xf32>
    %9 = arith.truncf %8 : vector<448x500xf32> to vector<448x500xbf16>
    %c0_7 = arith.constant 0 : index
    %c0_8 = arith.constant 0 : index
    %10 = vector.load %arg4[%c0_7, %c0_8] : memref<500x500xbf16, #tpu.memory_space<vmem>>, vector<500x500xbf16>
    %cst_9 = arith.constant dense<0.000000e+00> : vector<448x500xf32>
    %11 = tpu.matmul %9, %10, %cst_9 {dimension_numbers = #tpu.dot_dimension_numbers<[1], [0], [0], [1], [0, 0, 1, 1], [], []>} : vector<448x500xbf16>, vector<500x500xbf16>, vector<448x500xf32> -> vector<448x500xf32>
    %c0_10 = arith.constant 0 : index
    %c0_11 = arith.constant 0 : index
    %12 = vector.load %arg5[%c0_10, %c0_11] : memref<1x500xf32, #tpu.memory_space<vmem>>, vector<1x500xf32>
    %13 = vector.broadcast %12 : vector<1x500xf32> to vector<448x500xf32>
    %14 = arith.addf %11, %13 : vector<448x500xf32>
    %cst_12 = arith.constant 0.000000e+00 : f32
    %15 = vector.broadcast %cst_12 : f32 to vector<448x500xf32>
    %16 = arith.maximumf %14, %15 : vector<448x500xf32>
    %17 = arith.truncf %16 : vector<448x500xf32> to vector<448x500xbf16>
    %c0_13 = arith.constant 0 : index
    %c0_14 = arith.constant 0 : index
    %18 = vector.load %arg6[%c0_13, %c0_14] : memref<500x28xbf16, #tpu.memory_space<vmem>>, vector<500x28xbf16>
    %cst_15 = arith.constant dense<0.000000e+00> : vector<448x28xf32>
    %19 = tpu.matmul %17, %18, %cst_15 {dimension_numbers = #tpu.dot_dimension_numbers<[1], [0], [0], [1], [0, 0, 1, 1], [], []>} : vector<448x500xbf16>, vector<500x28xbf16>, vector<448x28xf32> -> vector<448x28xf32>
    %c0_16 = arith.constant 0 : index
    %c0_17 = arith.constant 0 : index
    %20 = vector.load %arg7[%c0_16, %c0_17] : memref<1x28xf32, #tpu.memory_space<vmem>>, vector<1x28xf32>
    %21 = vector.broadcast %20 : vector<1x28xf32> to vector<448x28xf32>
    %22 = arith.addf %19, %21 : vector<448x28xf32>
    %cst_18 = arith.constant 0.000000e+00 : f32
    %23 = vector.broadcast %cst_18 : f32 to vector<448x28xf32>
    %24 = arith.maximumf %22, %23 : vector<448x28xf32>
    %25 = arith.truncf %24 : vector<448x28xf32> to vector<448x28xbf16>
    %c0_19 = arith.constant 0 : index
    %c0_20 = arith.constant 0 : index
    %26 = vector.load %arg9[%c0_19, %c0_20] : memref<1x128xf32, #tpu.memory_space<vmem>>, vector<1x128xf32>
    %27 = vector.shape_cast %26 : vector<1x128xf32> to vector<1x128xf32>
    %28 = vector.broadcast %27 : vector<1x128xf32> to vector<16x128xf32>
    %29 = vector.extract_strided_slice %25 {offsets = [0, 0], sizes = [16, 28], strides = [1, 1]} : vector<448x28xbf16> to vector<16x28xbf16>
    %c0_21 = arith.constant 0 : index
    %c0_22 = arith.constant 0 : index
    %c0_23 = arith.constant 0 : index
    %30 = vector.load %arg8[%c0_21, %c0_22, %c0_23] : memref<28x28x128xbf16, #tpu.memory_space<vmem>>, vector<1x28x128xbf16>
    %31 = vector.shape_cast %30 : vector<1x28x128xbf16> to vector<28x128xbf16>
    %cst_24 = arith.constant dense<0.000000e+00> : vector<16x128xf32>
    %32 = tpu.matmul %29, %31, %cst_24 {dimension_numbers = #tpu.dot_dimension_numbers<[1], [0], [0], [1], [0, 0, 1, 1], [], []>} : vector<16x28xbf16>, vector<28x128xbf16>, vector<16x128xf32> -> vector<16x128xf32>
    %33 = arith.addf %28, %32 : vector<16x128xf32>
    %34 = vector.extract_strided_slice %25 {offsets = [16, 0], sizes = [16, 28], strides = [1, 1]} : vector<448x28xbf16> to vector<16x28xbf16>
    %c1 = arith.constant 1 : index
    %c0_25 = arith.constant 0 : index
    %c0_26 = arith.constant 0 : index
    %35 = vector.load %arg8[%c1, %c0_25, %c0_26] : memref<28x28x128xbf16, #tpu.memory_space<vmem>>, vector<1x28x128xbf16>
    %36 = vector.shape_cast %35 : vector<1x28x128xbf16> to vector<28x128xbf16>
    %cst_27 = arith.constant dense<0.000000e+00> : vector<16x128xf32>
    %37 = tpu.matmul %34, %36, %cst_27 {dimension_numbers = #tpu.dot_dimension_numbers<[1], [0], [0], [1], [0, 0, 1, 1], [], []>} : vector<16x28xbf16>, vector<28x128xbf16>, vector<16x128xf32> -> vector<16x128xf32>
    %38 = arith.addf %33, %37 : vector<16x128xf32>
    %39 = vector.extract_strided_slice %25 {offsets = [32, 0], sizes = [16, 28], strides = [1, 1]} : vector<448x28xbf16> to vector<16x28xbf16>
    %c2 = arith.constant 2 : index
    %c0_28 = arith.constant 0 : index
    %c0_29 = arith.constant 0 : index
    %40 = vector.load %arg8[%c2, %c0_28, %c0_29] : memref<28x28x128xbf16, #tpu.memory_space<vmem>>, vector<1x28x128xbf16>
    %41 = vector.shape_cast %40 : vector<1x28x128xbf16> to vector<28x128xbf16>
    %cst_30 = arith.constant dense<0.000000e+00> : vector<16x128xf32>
    %42 = tpu.matmul %39, %41, %cst_30 {dimension_numbers = #tpu.dot_dimension_numbers<[1], [0], [0], [1], [0, 0, 1, 1], [], []>} : vector<16x28xbf16>, vector<28x128xbf16>, vector<16x128xf32> -> vector<16x128xf32>
    %43 = arith.addf %38, %42 : vector<16x128xf32>
    %44 = vector.extract_strided_slice %25 {offsets = [48, 0], sizes = [16, 28], strides = [1, 1]} : vector<448x28xbf16> to vector<16x28xbf16>
    %c3 = arith.constant 3 : index
    %c0_31 = arith.constant 0 : index
    %c0_32 = arith.constant 0 : index
    %45 = vector.load %arg8[%c3, %c0_31, %c0_32] : memref<28x28x128xbf16, #tpu.memory_space<vmem>>, vector<1x28x128xbf16>
    %46 = vector.shape_cast %45 : vector<1x28x128xbf16> to vector<28x128xbf16>
    %cst_33 = arith.constant dense<0.000000e+00> : vector<16x128xf32>
    %47 = tpu.matmul %44, %46, %cst_33 {dimension_numbers = #tpu.dot_dimension_numbers<[1], [0], [0], [1], [0, 0, 1, 1], [], []>} : vector<16x28xbf16>, vector<28x128xbf16>, vector<16x128xf32> -> vector<16x128xf32>
    %48 = arith.addf %43, %47 : vector<16x128xf32>
    %49 = vector.extract_strided_slice %25 {offsets = [64, 0], sizes = [16, 28], strides = [1, 1]} : vector<448x28xbf16> to vector<16x28xbf16>
    %c4 = arith.constant 4 : index
    %c0_34 = arith.constant 0 : index
    %c0_35 = arith.constant 0 : index
    %50 = vector.load %arg8[%c4, %c0_34, %c0_35] : memref<28x28x128xbf16, #tpu.memory_space<vmem>>, vector<1x28x128xbf16>
    %51 = vector.shape_cast %50 : vector<1x28x128xbf16> to vector<28x128xbf16>
    %cst_36 = arith.constant dense<0.000000e+00> : vector<16x128xf32>
    %52 = tpu.matmul %49, %51, %cst_36 {dimension_numbers = #tpu.dot_dimension_numbers<[1], [0], [0], [1], [0, 0, 1, 1], [], []>} : vector<16x28xbf16>, vector<28x128xbf16>, vector<16x128xf32> -> vector<16x128xf32>
    %53 = arith.addf %48, %52 : vector<16x128xf32>
    %54 = vector.extract_strided_slice %25 {offsets = [80, 0], sizes = [16, 28], strides = [1, 1]} : vector<448x28xbf16> to vector<16x28xbf16>
    %c5 = arith.constant 5 : index
    %c0_37 = arith.constant 0 : index
    %c0_38 = arith.constant 0 : index
    %55 = vector.load %arg8[%c5, %c0_37, %c0_38] : memref<28x28x128xbf16, #tpu.memory_space<vmem>>, vector<1x28x128xbf16>
    %56 = vector.shape_cast %55 : vector<1x28x128xbf16> to vector<28x128xbf16>
    %cst_39 = arith.constant dense<0.000000e+00> : vector<16x128xf32>
    %57 = tpu.matmul %54, %56, %cst_39 {dimension_numbers = #tpu.dot_dimension_numbers<[1], [0], [0], [1], [0, 0, 1, 1], [], []>} : vector<16x28xbf16>, vector<28x128xbf16>, vector<16x128xf32> -> vector<16x128xf32>
    %58 = arith.addf %53, %57 : vector<16x128xf32>
    %59 = vector.extract_strided_slice %25 {offsets = [96, 0], sizes = [16, 28], strides = [1, 1]} : vector<448x28xbf16> to vector<16x28xbf16>
    %c6 = arith.constant 6 : index
    %c0_40 = arith.constant 0 : index
    %c0_41 = arith.constant 0 : index
    %60 = vector.load %arg8[%c6, %c0_40, %c0_41] : memref<28x28x128xbf16, #tpu.memory_space<vmem>>, vector<1x28x128xbf16>
    %61 = vector.shape_cast %60 : vector<1x28x128xbf16> to vector<28x128xbf16>
    %cst_42 = arith.constant dense<0.000000e+00> : vector<16x128xf32>
    %62 = tpu.matmul %59, %61, %cst_42 {dimension_numbers = #tpu.dot_dimension_numbers<[1], [0], [0], [1], [0, 0, 1, 1], [], []>} : vector<16x28xbf16>, vector<28x128xbf16>, vector<16x128xf32> -> vector<16x128xf32>
    %63 = arith.addf %58, %62 : vector<16x128xf32>
    %64 = vector.extract_strided_slice %25 {offsets = [112, 0], sizes = [16, 28], strides = [1, 1]} : vector<448x28xbf16> to vector<16x28xbf16>
    %c7 = arith.constant 7 : index
    %c0_43 = arith.constant 0 : index
    %c0_44 = arith.constant 0 : index
    %65 = vector.load %arg8[%c7, %c0_43, %c0_44] : memref<28x28x128xbf16, #tpu.memory_space<vmem>>, vector<1x28x128xbf16>
    %66 = vector.shape_cast %65 : vector<1x28x128xbf16> to vector<28x128xbf16>
    %cst_45 = arith.constant dense<0.000000e+00> : vector<16x128xf32>
    %67 = tpu.matmul %64, %66, %cst_45 {dimension_numbers = #tpu.dot_dimension_numbers<[1], [0], [0], [1], [0, 0, 1, 1], [], []>} : vector<16x28xbf16>, vector<28x128xbf16>, vector<16x128xf32> -> vector<16x128xf32>
    %68 = arith.addf %63, %67 : vector<16x128xf32>
    %69 = vector.extract_strided_slice %25 {offsets = [128, 0], sizes = [16, 28], strides = [1, 1]} : vector<448x28xbf16> to vector<16x28xbf16>
    %c8 = arith.constant 8 : index
    %c0_46 = arith.constant 0 : index
    %c0_47 = arith.constant 0 : index
    %70 = vector.load %arg8[%c8, %c0_46, %c0_47] : memref<28x28x128xbf16, #tpu.memory_space<vmem>>, vector<1x28x128xbf16>
    %71 = vector.shape_cast %70 : vector<1x28x128xbf16> to vector<28x128xbf16>
    %cst_48 = arith.constant dense<0.000000e+00> : vector<16x128xf32>
    %72 = tpu.matmul %69, %71, %cst_48 {dimension_numbers = #tpu.dot_dimension_numbers<[1], [0], [0], [1], [0, 0, 1, 1], [], []>} : vector<16x28xbf16>, vector<28x128xbf16>, vector<16x128xf32> -> vector<16x128xf32>
    %73 = arith.addf %68, %72 : vector<16x128xf32>
    %74 = vector.extract_strided_slice %25 {offsets = [144, 0], sizes = [16, 28], strides = [1, 1]} : vector<448x28xbf16> to vector<16x28xbf16>
    %c9 = arith.constant 9 : index
    %c0_49 = arith.constant 0 : index
    %c0_50 = arith.constant 0 : index
    %75 = vector.load %arg8[%c9, %c0_49, %c0_50] : memref<28x28x128xbf16, #tpu.memory_space<vmem>>, vector<1x28x128xbf16>
    %76 = vector.shape_cast %75 : vector<1x28x128xbf16> to vector<28x128xbf16>
    %cst_51 = arith.constant dense<0.000000e+00> : vector<16x128xf32>
    %77 = tpu.matmul %74, %76, %cst_51 {dimension_numbers = #tpu.dot_dimension_numbers<[1], [0], [0], [1], [0, 0, 1, 1], [], []>} : vector<16x28xbf16>, vector<28x128xbf16>, vector<16x128xf32> -> vector<16x128xf32>
    %78 = arith.addf %73, %77 : vector<16x128xf32>
    %79 = vector.extract_strided_slice %25 {offsets = [160, 0], sizes = [16, 28], strides = [1, 1]} : vector<448x28xbf16> to vector<16x28xbf16>
    %c10 = arith.constant 10 : index
    %c0_52 = arith.constant 0 : index
    %c0_53 = arith.constant 0 : index
    %80 = vector.load %arg8[%c10, %c0_52, %c0_53] : memref<28x28x128xbf16, #tpu.memory_space<vmem>>, vector<1x28x128xbf16>
    %81 = vector.shape_cast %80 : vector<1x28x128xbf16> to vector<28x128xbf16>
    %cst_54 = arith.constant dense<0.000000e+00> : vector<16x128xf32>
    %82 = tpu.matmul %79, %81, %cst_54 {dimension_numbers = #tpu.dot_dimension_numbers<[1], [0], [0], [1], [0, 0, 1, 1], [], []>} : vector<16x28xbf16>, vector<28x128xbf16>, vector<16x128xf32> -> vector<16x128xf32>
    %83 = arith.addf %78, %82 : vector<16x128xf32>
    %84 = vector.extract_strided_slice %25 {offsets = [176, 0], sizes = [16, 28], strides = [1, 1]} : vector<448x28xbf16> to vector<16x28xbf16>
    %c11 = arith.constant 11 : index
    %c0_55 = arith.constant 0 : index
    %c0_56 = arith.constant 0 : index
    %85 = vector.load %arg8[%c11, %c0_55, %c0_56] : memref<28x28x128xbf16, #tpu.memory_space<vmem>>, vector<1x28x128xbf16>
    %86 = vector.shape_cast %85 : vector<1x28x128xbf16> to vector<28x128xbf16>
    %cst_57 = arith.constant dense<0.000000e+00> : vector<16x128xf32>
    %87 = tpu.matmul %84, %86, %cst_57 {dimension_numbers = #tpu.dot_dimension_numbers<[1], [0], [0], [1], [0, 0, 1, 1], [], []>} : vector<16x28xbf16>, vector<28x128xbf16>, vector<16x128xf32> -> vector<16x128xf32>
    %88 = arith.addf %83, %87 : vector<16x128xf32>
    %89 = vector.extract_strided_slice %25 {offsets = [192, 0], sizes = [16, 28], strides = [1, 1]} : vector<448x28xbf16> to vector<16x28xbf16>
    %c12 = arith.constant 12 : index
    %c0_58 = arith.constant 0 : index
    %c0_59 = arith.constant 0 : index
    %90 = vector.load %arg8[%c12, %c0_58, %c0_59] : memref<28x28x128xbf16, #tpu.memory_space<vmem>>, vector<1x28x128xbf16>
    %91 = vector.shape_cast %90 : vector<1x28x128xbf16> to vector<28x128xbf16>
    %cst_60 = arith.constant dense<0.000000e+00> : vector<16x128xf32>
    %92 = tpu.matmul %89, %91, %cst_60 {dimension_numbers = #tpu.dot_dimension_numbers<[1], [0], [0], [1], [0, 0, 1, 1], [], []>} : vector<16x28xbf16>, vector<28x128xbf16>, vector<16x128xf32> -> vector<16x128xf32>
    %93 = arith.addf %88, %92 : vector<16x128xf32>
    %94 = vector.extract_strided_slice %25 {offsets = [208, 0], sizes = [16, 28], strides = [1, 1]} : vector<448x28xbf16> to vector<16x28xbf16>
    %c13 = arith.constant 13 : index
    %c0_61 = arith.constant 0 : index
    %c0_62 = arith.constant 0 : index
    %95 = vector.load %arg8[%c13, %c0_61, %c0_62] : memref<28x28x128xbf16, #tpu.memory_space<vmem>>, vector<1x28x128xbf16>
    %96 = vector.shape_cast %95 : vector<1x28x128xbf16> to vector<28x128xbf16>
    %cst_63 = arith.constant dense<0.000000e+00> : vector<16x128xf32>
    %97 = tpu.matmul %94, %96, %cst_63 {dimension_numbers = #tpu.dot_dimension_numbers<[1], [0], [0], [1], [0, 0, 1, 1], [], []>} : vector<16x28xbf16>, vector<28x128xbf16>, vector<16x128xf32> -> vector<16x128xf32>
    %98 = arith.addf %93, %97 : vector<16x128xf32>
    %99 = vector.extract_strided_slice %25 {offsets = [224, 0], sizes = [16, 28], strides = [1, 1]} : vector<448x28xbf16> to vector<16x28xbf16>
    %c14 = arith.constant 14 : index
    %c0_64 = arith.constant 0 : index
    %c0_65 = arith.constant 0 : index
    %100 = vector.load %arg8[%c14, %c0_64, %c0_65] : memref<28x28x128xbf16, #tpu.memory_space<vmem>>, vector<1x28x128xbf16>
    %101 = vector.shape_cast %100 : vector<1x28x128xbf16> to vector<28x128xbf16>
    %cst_66 = arith.constant dense<0.000000e+00> : vector<16x128xf32>
    %102 = tpu.matmul %99, %101, %cst_66 {dimension_numbers = #tpu.dot_dimension_numbers<[1], [0], [0], [1], [0, 0, 1, 1], [], []>} : vector<16x28xbf16>, vector<28x128xbf16>, vector<16x128xf32> -> vector<16x128xf32>
    %103 = arith.addf %98, %102 : vector<16x128xf32>
    %104 = vector.extract_strided_slice %25 {offsets = [240, 0], sizes = [16, 28], strides = [1, 1]} : vector<448x28xbf16> to vector<16x28xbf16>
    %c15 = arith.constant 15 : index
    %c0_67 = arith.constant 0 : index
    %c0_68 = arith.constant 0 : index
    %105 = vector.load %arg8[%c15, %c0_67, %c0_68] : memref<28x28x128xbf16, #tpu.memory_space<vmem>>, vector<1x28x128xbf16>
    %106 = vector.shape_cast %105 : vector<1x28x128xbf16> to vector<28x128xbf16>
    %cst_69 = arith.constant dense<0.000000e+00> : vector<16x128xf32>
    %107 = tpu.matmul %104, %106, %cst_69 {dimension_numbers = #tpu.dot_dimension_numbers<[1], [0], [0], [1], [0, 0, 1, 1], [], []>} : vector<16x28xbf16>, vector<28x128xbf16>, vector<16x128xf32> -> vector<16x128xf32>
    %108 = arith.addf %103, %107 : vector<16x128xf32>
    %109 = vector.extract_strided_slice %25 {offsets = [256, 0], sizes = [16, 28], strides = [1, 1]} : vector<448x28xbf16> to vector<16x28xbf16>
    %c16 = arith.constant 16 : index
    %c0_70 = arith.constant 0 : index
    %c0_71 = arith.constant 0 : index
    %110 = vector.load %arg8[%c16, %c0_70, %c0_71] : memref<28x28x128xbf16, #tpu.memory_space<vmem>>, vector<1x28x128xbf16>
    %111 = vector.shape_cast %110 : vector<1x28x128xbf16> to vector<28x128xbf16>
    %cst_72 = arith.constant dense<0.000000e+00> : vector<16x128xf32>
    %112 = tpu.matmul %109, %111, %cst_72 {dimension_numbers = #tpu.dot_dimension_numbers<[1], [0], [0], [1], [0, 0, 1, 1], [], []>} : vector<16x28xbf16>, vector<28x128xbf16>, vector<16x128xf32> -> vector<16x128xf32>
    %113 = arith.addf %108, %112 : vector<16x128xf32>
    %114 = vector.extract_strided_slice %25 {offsets = [272, 0], sizes = [16, 28], strides = [1, 1]} : vector<448x28xbf16> to vector<16x28xbf16>
    %c17 = arith.constant 17 : index
    %c0_73 = arith.constant 0 : index
    %c0_74 = arith.constant 0 : index
    %115 = vector.load %arg8[%c17, %c0_73, %c0_74] : memref<28x28x128xbf16, #tpu.memory_space<vmem>>, vector<1x28x128xbf16>
    %116 = vector.shape_cast %115 : vector<1x28x128xbf16> to vector<28x128xbf16>
    %cst_75 = arith.constant dense<0.000000e+00> : vector<16x128xf32>
    %117 = tpu.matmul %114, %116, %cst_75 {dimension_numbers = #tpu.dot_dimension_numbers<[1], [0], [0], [1], [0, 0, 1, 1], [], []>} : vector<16x28xbf16>, vector<28x128xbf16>, vector<16x128xf32> -> vector<16x128xf32>
    %118 = arith.addf %113, %117 : vector<16x128xf32>
    %119 = vector.extract_strided_slice %25 {offsets = [288, 0], sizes = [16, 28], strides = [1, 1]} : vector<448x28xbf16> to vector<16x28xbf16>
    %c18 = arith.constant 18 : index
    %c0_76 = arith.constant 0 : index
    %c0_77 = arith.constant 0 : index
    %120 = vector.load %arg8[%c18, %c0_76, %c0_77] : memref<28x28x128xbf16, #tpu.memory_space<vmem>>, vector<1x28x128xbf16>
    %121 = vector.shape_cast %120 : vector<1x28x128xbf16> to vector<28x128xbf16>
    %cst_78 = arith.constant dense<0.000000e+00> : vector<16x128xf32>
    %122 = tpu.matmul %119, %121, %cst_78 {dimension_numbers = #tpu.dot_dimension_numbers<[1], [0], [0], [1], [0, 0, 1, 1], [], []>} : vector<16x28xbf16>, vector<28x128xbf16>, vector<16x128xf32> -> vector<16x128xf32>
    %123 = arith.addf %118, %122 : vector<16x128xf32>
    %124 = vector.extract_strided_slice %25 {offsets = [304, 0], sizes = [16, 28], strides = [1, 1]} : vector<448x28xbf16> to vector<16x28xbf16>
    %c19 = arith.constant 19 : index
    %c0_79 = arith.constant 0 : index
    %c0_80 = arith.constant 0 : index
    %125 = vector.load %arg8[%c19, %c0_79, %c0_80] : memref<28x28x128xbf16, #tpu.memory_space<vmem>>, vector<1x28x128xbf16>
    %126 = vector.shape_cast %125 : vector<1x28x128xbf16> to vector<28x128xbf16>
    %cst_81 = arith.constant dense<0.000000e+00> : vector<16x128xf32>
    %127 = tpu.matmul %124, %126, %cst_81 {dimension_numbers = #tpu.dot_dimension_numbers<[1], [0], [0], [1], [0, 0, 1, 1], [], []>} : vector<16x28xbf16>, vector<28x128xbf16>, vector<16x128xf32> -> vector<16x128xf32>
    %128 = arith.addf %123, %127 : vector<16x128xf32>
    %129 = vector.extract_strided_slice %25 {offsets = [320, 0], sizes = [16, 28], strides = [1, 1]} : vector<448x28xbf16> to vector<16x28xbf16>
    %c20 = arith.constant 20 : index
    %c0_82 = arith.constant 0 : index
    %c0_83 = arith.constant 0 : index
    %130 = vector.load %arg8[%c20, %c0_82, %c0_83] : memref<28x28x128xbf16, #tpu.memory_space<vmem>>, vector<1x28x128xbf16>
    %131 = vector.shape_cast %130 : vector<1x28x128xbf16> to vector<28x128xbf16>
    %cst_84 = arith.constant dense<0.000000e+00> : vector<16x128xf32>
    %132 = tpu.matmul %129, %131, %cst_84 {dimension_numbers = #tpu.dot_dimension_numbers<[1], [0], [0], [1], [0, 0, 1, 1], [], []>} : vector<16x28xbf16>, vector<28x128xbf16>, vector<16x128xf32> -> vector<16x128xf32>
    %133 = arith.addf %128, %132 : vector<16x128xf32>
    %134 = vector.extract_strided_slice %25 {offsets = [336, 0], sizes = [16, 28], strides = [1, 1]} : vector<448x28xbf16> to vector<16x28xbf16>
    %c21 = arith.constant 21 : index
    %c0_85 = arith.constant 0 : index
    %c0_86 = arith.constant 0 : index
    %135 = vector.load %arg8[%c21, %c0_85, %c0_86] : memref<28x28x128xbf16, #tpu.memory_space<vmem>>, vector<1x28x128xbf16>
    %136 = vector.shape_cast %135 : vector<1x28x128xbf16> to vector<28x128xbf16>
    %cst_87 = arith.constant dense<0.000000e+00> : vector<16x128xf32>
    %137 = tpu.matmul %134, %136, %cst_87 {dimension_numbers = #tpu.dot_dimension_numbers<[1], [0], [0], [1], [0, 0, 1, 1], [], []>} : vector<16x28xbf16>, vector<28x128xbf16>, vector<16x128xf32> -> vector<16x128xf32>
    %138 = arith.addf %133, %137 : vector<16x128xf32>
    %139 = vector.extract_strided_slice %25 {offsets = [352, 0], sizes = [16, 28], strides = [1, 1]} : vector<448x28xbf16> to vector<16x28xbf16>
    %c22 = arith.constant 22 : index
    %c0_88 = arith.constant 0 : index
    %c0_89 = arith.constant 0 : index
    %140 = vector.load %arg8[%c22, %c0_88, %c0_89] : memref<28x28x128xbf16, #tpu.memory_space<vmem>>, vector<1x28x128xbf16>
    %141 = vector.shape_cast %140 : vector<1x28x128xbf16> to vector<28x128xbf16>
    %cst_90 = arith.constant dense<0.000000e+00> : vector<16x128xf32>
    %142 = tpu.matmul %139, %141, %cst_90 {dimension_numbers = #tpu.dot_dimension_numbers<[1], [0], [0], [1], [0, 0, 1, 1], [], []>} : vector<16x28xbf16>, vector<28x128xbf16>, vector<16x128xf32> -> vector<16x128xf32>
    %143 = arith.addf %138, %142 : vector<16x128xf32>
    %144 = vector.extract_strided_slice %25 {offsets = [368, 0], sizes = [16, 28], strides = [1, 1]} : vector<448x28xbf16> to vector<16x28xbf16>
    %c23 = arith.constant 23 : index
    %c0_91 = arith.constant 0 : index
    %c0_92 = arith.constant 0 : index
    %145 = vector.load %arg8[%c23, %c0_91, %c0_92] : memref<28x28x128xbf16, #tpu.memory_space<vmem>>, vector<1x28x128xbf16>
    %146 = vector.shape_cast %145 : vector<1x28x128xbf16> to vector<28x128xbf16>
    %cst_93 = arith.constant dense<0.000000e+00> : vector<16x128xf32>
    %147 = tpu.matmul %144, %146, %cst_93 {dimension_numbers = #tpu.dot_dimension_numbers<[1], [0], [0], [1], [0, 0, 1, 1], [], []>} : vector<16x28xbf16>, vector<28x128xbf16>, vector<16x128xf32> -> vector<16x128xf32>
    %148 = arith.addf %143, %147 : vector<16x128xf32>
    %149 = vector.extract_strided_slice %25 {offsets = [384, 0], sizes = [16, 28], strides = [1, 1]} : vector<448x28xbf16> to vector<16x28xbf16>
    %c24 = arith.constant 24 : index
    %c0_94 = arith.constant 0 : index
    %c0_95 = arith.constant 0 : index
    %150 = vector.load %arg8[%c24, %c0_94, %c0_95] : memref<28x28x128xbf16, #tpu.memory_space<vmem>>, vector<1x28x128xbf16>
    %151 = vector.shape_cast %150 : vector<1x28x128xbf16> to vector<28x128xbf16>
    %cst_96 = arith.constant dense<0.000000e+00> : vector<16x128xf32>
    %152 = tpu.matmul %149, %151, %cst_96 {dimension_numbers = #tpu.dot_dimension_numbers<[1], [0], [0], [1], [0, 0, 1, 1], [], []>} : vector<16x28xbf16>, vector<28x128xbf16>, vector<16x128xf32> -> vector<16x128xf32>
    %153 = arith.addf %148, %152 : vector<16x128xf32>
    %154 = vector.extract_strided_slice %25 {offsets = [400, 0], sizes = [16, 28], strides = [1, 1]} : vector<448x28xbf16> to vector<16x28xbf16>
    %c25 = arith.constant 25 : index
    %c0_97 = arith.constant 0 : index
    %c0_98 = arith.constant 0 : index
    %155 = vector.load %arg8[%c25, %c0_97, %c0_98] : memref<28x28x128xbf16, #tpu.memory_space<vmem>>, vector<1x28x128xbf16>
    %156 = vector.shape_cast %155 : vector<1x28x128xbf16> to vector<28x128xbf16>
    %cst_99 = arith.constant dense<0.000000e+00> : vector<16x128xf32>
    %157 = tpu.matmul %154, %156, %cst_99 {dimension_numbers = #tpu.dot_dimension_numbers<[1], [0], [0], [1], [0, 0, 1, 1], [], []>} : vector<16x28xbf16>, vector<28x128xbf16>, vector<16x128xf32> -> vector<16x128xf32>
    %158 = arith.addf %153, %157 : vector<16x128xf32>
    %159 = vector.extract_strided_slice %25 {offsets = [416, 0], sizes = [16, 28], strides = [1, 1]} : vector<448x28xbf16> to vector<16x28xbf16>
    %c26 = arith.constant 26 : index
    %c0_100 = arith.constant 0 : index
    %c0_101 = arith.constant 0 : index
    %160 = vector.load %arg8[%c26, %c0_100, %c0_101] : memref<28x28x128xbf16, #tpu.memory_space<vmem>>, vector<1x28x128xbf16>
    %161 = vector.shape_cast %160 : vector<1x28x128xbf16> to vector<28x128xbf16>
    %cst_102 = arith.constant dense<0.000000e+00> : vector<16x128xf32>
    %162 = tpu.matmul %159, %161, %cst_102 {dimension_numbers = #tpu.dot_dimension_numbers<[1], [0], [0], [1], [0, 0, 1, 1], [], []>} : vector<16x28xbf16>, vector<28x128xbf16>, vector<16x128xf32> -> vector<16x128xf32>
    %163 = arith.addf %158, %162 : vector<16x128xf32>
    %164 = vector.extract_strided_slice %25 {offsets = [432, 0], sizes = [16, 28], strides = [1, 1]} : vector<448x28xbf16> to vector<16x28xbf16>
    %c27 = arith.constant 27 : index
    %c0_103 = arith.constant 0 : index
    %c0_104 = arith.constant 0 : index
    %165 = vector.load %arg8[%c27, %c0_103, %c0_104] : memref<28x28x128xbf16, #tpu.memory_space<vmem>>, vector<1x28x128xbf16>
    %166 = vector.shape_cast %165 : vector<1x28x128xbf16> to vector<28x128xbf16>
    %cst_105 = arith.constant dense<0.000000e+00> : vector<16x128xf32>
    %167 = tpu.matmul %164, %166, %cst_105 {dimension_numbers = #tpu.dot_dimension_numbers<[1], [0], [0], [1], [0, 0, 1, 1], [], []>} : vector<16x28xbf16>, vector<28x128xbf16>, vector<16x128xf32> -> vector<16x128xf32>
    %168 = arith.addf %163, %167 : vector<16x128xf32>
    %c0_106 = arith.constant 0 : index
    %c0_107 = arith.constant 0 : index
    %169 = vector.load %arg10[%c0_106, %c0_107] : memref<16x128xf32, #tpu.memory_space<vmem>>, vector<16x128xf32>
    tpu.vector_store %arg10[%c0_106, %c0_107], %168 {strides = array<i32>} : memref<16x128xf32, #tpu.memory_space<vmem>>, vector<16x128xf32>,
    return
  }
  func.func @transform_0(%arg0: i32) -> (i32, i32, i32) {
    %c0_i32 = arith.constant 0 : i32
    %c0_i32_0 = arith.constant 0 : i32
    %c0_i32_1 = arith.constant 0 : i32
    return %c0_i32, %arg0, %c0_i32_0 : i32, i32, i32
  }
  func.func @transform_1(%arg0: i32) -> (i32, i32) {
    %c0_i32 = arith.constant 0 : i32
    %c0_i32_0 = arith.constant 0 : i32
    %c0_i32_1 = arith.constant 0 : i32
    return %c0_i32, %c0_i32_0 : i32, i32
  }
  func.func @transform_2(%arg0: i32) -> (i32, i32) {
    %c0_i32 = arith.constant 0 : i32
    %c0_i32_0 = arith.constant 0 : i32
    %c0_i32_1 = arith.constant 0 : i32
    return %c0_i32, %c0_i32_0 : i32, i32
  }
  func.func @transform_3(%arg0: i32) -> (i32, i32) {
    %c0_i32 = arith.constant 0 : i32
    %c0_i32_0 = arith.constant 0 : i32
    %c0_i32_1 = arith.constant 0 : i32
    return %c0_i32, %c0_i32_0 : i32, i32
  }
  func.func @transform_4(%arg0: i32) -> (i32, i32) {
    %c0_i32 = arith.constant 0 : i32
    %c0_i32_0 = arith.constant 0 : i32
    %c0_i32_1 = arith.constant 0 : i32
    return %c0_i32, %c0_i32_0 : i32, i32
  }
  func.func @transform_5(%arg0: i32) -> (i32, i32) {
    %c0_i32 = arith.constant 0 : i32
    %c0_i32_0 = arith.constant 0 : i32
    %c0_i32_1 = arith.constant 0 : i32
    return %c0_i32, %c0_i32_0 : i32, i32
  }
  func.func @transform_6(%arg0: i32) -> (i32, i32) {
    %c0_i32 = arith.constant 0 : i32
    %c0_i32_0 = arith.constant 0 : i32
    %c0_i32_1 = arith.constant 0 : i32
    return %c0_i32, %c0_i32_0 : i32, i32
  }
  func.func @transform_7(%arg0: i32) -> (i32, i32, i32) {
    %c0_i32 = arith.constant 0 : i32
    %c0_i32_0 = arith.constant 0 : i32
    %c0_i32_1 = arith.constant 0 : i32
    %c0_i32_2 = arith.constant 0 : i32
    return %c0_i32, %c0_i32_0, %c0_i32_1 : i32, i32, i32
  }
  func.func @transform_8(%arg0: i32) -> (i32, i32) {
    %c0_i32 = arith.constant 0 : i32
    %c0_i32_0 = arith.constant 0 : i32
    %c0_i32_1 = arith.constant 0 : i32
    return %c0_i32, %c0_i32_0 : i32, i32
  }
  func.func @transform_9(%arg0: i32) -> (i32, i32) {
    %c0_i32 = arith.constant 0 : i32
    %c0_i32_0 = arith.constant 0 : i32
    return %arg0, %c0_i32 : i32, i32
  }
}

</mosaic_0001>

<bundles_post_ra>
// kernel: splitnn_forward.1
= control target key start
LH: loop header
LB: loop body
LE: loop exit
PB: predicated region body
PF: predicated region fallthrough
CT: control target
= control target key end

     0   :  { %vm380_vm0 = vcmask 1045504   ;;  %v10747_v1 = vmov 0   ;;  %vm295_vm1 = vcmask 228352   ;;  %vm2218_vm2 = vcmask 1041408   ;;  %s10733_s1 = inlined_call_operand.vmem [shape: bf16[28,500], index: 1, kind: input, shape index: {}]   ;;  %s10734_s0 = inlined_call_operand.vmem [shape: bf16[28,16,28], index: 0, kind: input, shape index: {}]   ;;  %s10735_s3 = inlined_call_operand.vmem [shape: bf16[500,500], index: 3, kind: input, shape index: {}]   ;;  %s10736_s2 = inlined_call_operand.vmem [shape: f32[1,500], index: 2, kind: input, shape index: {}]   ;;  %s10737_s5 = inlined_call_operand.vmem [shape: bf16[500,28], index: 5, kind: input, shape index: {}]   ;;  %s10738_s4 = inlined_call_operand.vmem [shape: f32[1,500], index: 4, kind: input, shape index: {}]   ;;  %s10739_s7 = inlined_call_operand.vmem [shape: bf16[28,28,128], index: 7, kind: input, shape index: {}]   ;;  %s10740_s6 = inlined_call_operand.vmem [shape: f32[1,28], index: 6, kind: input, shape index: {}]   ;;  %s10741_s8 = inlined_call_operand.vmem [shape: f32[1,128], index: 8, kind: input, shape index: {}]   ;;  %s10742_s9 = inlined_call_operand.vmem [shape: f32[16,128], index: 9, kind: output, shape index: {}]  }
   0x1   :  { %v7440_v0 = vld [vmem:[%s10733_s1 + $0x24] ss:$16 sps:$4 sm:$0x3f]   ;;  %425 = vmatprep.mubr.bf16.mxu0 %v10747_v1  ;;  %738 = vmatprep.mubr.bf16.mxu1 %v10747_v1  ;;  %v7442_v2 = vld [vmem:[%s10733_s1 + $0x2c] ss:$16 sps:$4 sm:$0x3f]  }
   0x2   :  { %6631 = vmatprep.subr.msk.bf16.mxu0 %vm380_vm0, %v7440_v0  ;;  %v7444_v3 = vld [vmem:[%s10733_s1 + $0x20] ss:$16 sps:$4 sm:$0x3f]   ;;  %v7445_v4 = vld [vmem:[%s10733_s1 + $0x28] ss:$16 sps:$4 sm:$0x3f]   ;;  %6660 = vmatprep.subr.msk.bf16.mxu1 %vm380_vm0, %v7442_v2 }
   0x3   :  { %v7446_v5 = vld [vmem:[%s10733_s1 + $0x4] ss:$16 sps:$4 sm:$0xff]   ;;  %v382_v6 = vsel %vm380_vm0, %v7444_v3, 0  ;;  %v388_v7 = vsel %vm380_vm0, %v7445_v4, 0  ;;  %v7448_v8 = vld [vmem:[%s10733_s1 + $0xc] ss:$16 sps:$4 sm:$0xff]  }
   0x4   :  { %406 = vmatpush1.bf16.msra.mxu0 %v382_v6  ;;  %719 = vmatpush1.bf16.msra.mxu1 %v388_v7  ;;  %v7450_v9 = vld [vmem:[%s10733_s1] ss:$16 sps:$4 sm:$0xff]   ;;  %v7451_v10 = vld [vmem:[%s10733_s1 + $0x8] ss:$16 sps:$4 sm:$0xff]   ;;  %v7455_v13 = vld [vmem:[%s10735_s3 + $0xe4] ss:$16 sps:$4 sm:$0xff]  }
   0x5   :  { %407 = vmatprep.subr.bf16.mxu0 %v7446_v5  ;;  %720 = vmatprep.subr.bf16.mxu1 %v7448_v8  ;;  %v7452_v11 = vld [vmem:[%s10734_s0] sm:$0xff]   ;;  %v7459_v20 = vld [vmem:[%s10734_s0 + $0x8] sm:$0xff]   ;;  %v7463_v29 = vld [vmem:[%s10734_s0 + $0x10] sm:$0xff]   ;;  %vm2133_vm3 = vcmask 949248   ;;  %vm7762_vm4 = vmmov 0  }
   0x6   :  { %v7453_v12 = vld [vmem:[%s10735_s3 + $0xe0] ss:$16 sps:$4 sm:$0xff]   ;;  %v7458_v15 = vld [vmem:[%s10735_s3 + $0x2e4] ss:$16 sps:$4 sm:$0xff]   ;;  %v7467_v38 = vld [vmem:[%s10734_s0 + $0x18] sm:$0xff]  }
   0x7   :  { %v7456_v14 = vld [vmem:[%s10735_s3 + $0x2e0] ss:$16 sps:$4 sm:$0xff]   ;;  %v7462_v16 = vld [vmem:[%s10735_s3 + $0xc4] ss:$16 sps:$4 sm:$0xff]   ;;  %v7475_v55 = vld [vmem:[%s10734_s0 + $0x28] sm:$0xff]  }
   0x8   :  { %408 = vmatpush1.bf16.msra.mxu0 %v7450_v9  ;;  %721 = vmatpush1.bf16.msra.mxu1 %v7451_v10  ;;  %v7460_v17 = vld [vmem:[%s10735_s3 + $0xc0] ss:$16 sps:$4 sm:$0xff]   ;;  %v7466_v19 = vld [vmem:[%s10735_s3 + $0x2c4] ss:$16 sps:$4 sm:$0xff]  }
   0x9   :  { %2231 = vmatprep.subr.bf16.mxu0 %v7455_v13  ;;  %2544 = vmatprep.subr.bf16.mxu1 %v7458_v15  ;;  %v7464_v18 = vld [vmem:[%s10735_s3 + $0x2c0] ss:$16 sps:$4 sm:$0xff]   ;;  %v7470_v21 = vld [vmem:[%s10735_s3 + $0xa4] ss:$16 sps:$4 sm:$0xff]   ;;  %v7494_v15 = vld [vmem:[%s10734_s0 + $0x48] sm:$0xff]  }
   0xa   :  { %v7468_v22 = vld [vmem:[%s10735_s3 + $0xa0] ss:$16 sps:$4 sm:$0xff]   ;;  %v7473_v23 = vld [vmem:[%s10735_s3 + $0x2a4] ss:$16 sps:$4 sm:$0xff]  }
   0xb   :  { %6632 = vmatmul.mubr.msk.bf16.vlgmr.msra.gmra.mxu0 %vm295_vm1, %v7452_v11  ;;  %6661 = vmatmul.mubr.msk.bf16.vlgmr.msra.gmra.mxu1 %vm295_vm1, %v7452_v11  ;;  %v7471_v24 = vld [vmem:[%s10735_s3 + $0x2a0] ss:$16 sps:$4 sm:$0xff]   ;;  %v7478_v26 = vld [vmem:[%s10735_s3 + $0x84] ss:$16 sps:$4 sm:$0xff]   ;;  %v7483_v11 = vld [vmem:[%s10734_s0 + $0x38] sm:$0xff]  }
   0xc   :  { %2232 = vmatpush1.bf16.msra.mxu0 %v7453_v12  ;;  %2545 = vmatpush1.bf16.msra.mxu1 %v7456_v14  ;;  %v7476_v25 = vld [vmem:[%s10735_s3 + $0x80] ss:$16 sps:$4 sm:$0xff]   ;;  %v7481_v28 = vld [vmem:[%s10735_s3 + $0x284] ss:$16 sps:$4 sm:$0xff]  }
   0xd   :  { %435 = vmatprep.mubr.bf16.mxu0 %v10747_v1  ;;  %748 = vmatprep.mubr.bf16.mxu1 %v10747_v1  ;;  %v7479_v27 = vld [vmem:[%s10735_s3 + $0x280] ss:$16 sps:$4 sm:$0xff]   ;;  %v7486_v30 = vld [vmem:[%s10735_s3 + $0x64] ss:$16 sps:$4 sm:$0xff]  }
   0xe   :  { %2233 = vmatprep.subr.bf16.mxu0 %v7462_v16  ;;  %2546 = vmatprep.subr.bf16.mxu1 %v7466_v19  ;;  %v7484_v31 = vld [vmem:[%s10735_s3 + $0x60] ss:$16 sps:$4 sm:$0xff]   ;;  %v7489_v32 = vld [vmem:[%s10735_s3 + $0x264] ss:$16 sps:$4 sm:$0xff]  }
   0xf   :  { %v7487_v33 = vld [vmem:[%s10735_s3 + $0x260] ss:$16 sps:$4 sm:$0xff]   ;;  %v7493_v34 = vld [vmem:[%s10735_s3 + $0x44] ss:$16 sps:$4 sm:$0xff]  }
  0x10   :  { %2234 = vmatpush1.bf16.msra.mxu0 %v7460_v17  ;;  %2547 = vmatpush1.bf16.msra.mxu1 %v7464_v18  ;;  %v7491_v35 = vld [vmem:[%s10735_s3 + $0x40] ss:$16 sps:$4 sm:$0xff]   ;;  %v7497_v37 = vld [vmem:[%s10735_s3 + $0x244] ss:$16 sps:$4 sm:$0xff]  }
  0x11   :  { %2235 = vmatprep.subr.bf16.mxu0 %v7470_v21  ;;  %2548 = vmatprep.subr.bf16.mxu1 %v7473_v23  ;;  %v7495_v36 = vld [vmem:[%s10735_s3 + $0x240] ss:$16 sps:$4 sm:$0xff]   ;;  %v7501_v40 = vld [vmem:[%s10735_s3 + $0x24] ss:$16 sps:$4 sm:$0xff]   ;;  %v7505_v21 = vld [vmem:[%s10734_s0 + $0x58] sm:$0xff]  }
  0x12   :  { %v7499_v39 = vld [vmem:[%s10735_s3 + $0x20] ss:$16 sps:$4 sm:$0xff]   ;;  %v7504_v42 = vld [vmem:[%s10735_s3 + $0x224] ss:$16 sps:$4 sm:$0xff]  }
  0x13   :  { %6633 = vmatmul.mubr.msk.bf16.gmra.mxu0 %vm295_vm1, %v7459_v20  ;;  %6662 = vmatmul.mubr.msk.bf16.gmra.mxu1 %vm295_vm1, %v7459_v20  ;;  %v7502_v41 = vld [vmem:[%s10735_s3 + $0x220] ss:$16 sps:$4 sm:$0xff]   ;;  %v7509_v44 = vld [vmem:[%s10735_s3 + $0x4] ss:$16 sps:$4 sm:$0xff]  }
  0x14   :  { %445 = vmatprep.mubr.bf16.mxu0 %v10747_v1  ;;  %758 = vmatprep.mubr.bf16.mxu1 %v10747_v1  ;;  %v7507_v43 = vld [vmem:[%s10735_s3] ss:$16 sps:$4 sm:$0xff]   ;;  %v7512_v46 = vld [vmem:[%s10735_s3 + $0x204] ss:$16 sps:$4 sm:$0xff]  }
  0x15   :  { %2236 = vmatpush1.bf16.msra.mxu0 %v7468_v22  ;;  %2549 = vmatpush1.bf16.msra.mxu1 %v7471_v24  ;;  %v7510_v45 = vld [vmem:[%s10735_s3 + $0x200] ss:$16 sps:$4 sm:$0xff]   ;;  %v7517_v49 = vld [vmem:[%s10735_s3 + $0x1e4] ss:$16 sps:$4 sm:$0xff]  }
  0x16   :  { %2237 = vmatprep.subr.bf16.mxu0 %v7478_v26  ;;  %2550 = vmatprep.subr.bf16.mxu1 %v7481_v28  ;;  %v7474_v47 = vld [vmem:[%s10734_s0 + $0x20] sm:$0xff]   ;;  %v7482_v63 = vld [vmem:[%s10734_s0 + $0x30] sm:$0xff]   ;;  %v7577_v28 = vld [vmem:[%s10735_s3 + $0xec] ss:$16 sps:$4 sm:$0xff]  }
  0x17   :  { %v7515_v48 = vld [vmem:[%s10735_s3 + $0x1e0] ss:$16 sps:$4 sm:$0xff]   ;;  %v7523_v54 = vld [vmem:[%s10735_s3 + $0x1c4] ss:$16 sps:$4 sm:$0xff]  }
  0x18   :  { %v1479_v50 = vld [vmem:[%s10735_s3 + $0x3e0] sm:$0x33]  ;;  %v7498_v18 = vld [vmem:[%s10734_s0 + $0x50] sm:$0xff]  }
  0x19   :  { %2238 = vmatpush1.bf16.msra.mxu0 %v7476_v25  ;;  %2551 = vmatpush1.bf16.msra.mxu1 %v7479_v27  ;;  %v6814_v51 = vcombine.high %v1479_v50, %v1479_v50  ;;  %v6813_v52 = vcombine.low %v1479_v50, %v1479_v50  ;;  %v7521_v53 = vld [vmem:[%s10735_s3 + $0x1c0] ss:$16 sps:$4 sm:$0xff]   ;;  %v7527_v58 = vld [vmem:[%s10735_s3 + $0x3c4] ss:$16 sps:$4 sm:$0xff]   ;;  %v7513_v27 = vld [vmem:[%s10734_s0 + $0x68] sm:$0xff]  }
  0x1a   :  { %2239 = vmatprep.subr.bf16.mxu0 %v7486_v30  ;;  %2552 = vmatprep.subr.bf16.mxu1 %v7489_v32  ;;  %v7525_v57 = vld [vmem:[%s10735_s3 + $0x3c0] ss:$16 sps:$4 sm:$0xff]   ;;  %v7531_v60 = vld [vmem:[%s10735_s3 + $0x1a4] ss:$16 sps:$4 sm:$0xff]  }
  0x1b   :  { %6634 = vmatmul.mubr.msk.bf16.gmra.mxu0 %vm295_vm1, %v7463_v29  ;;  %6663 = vmatmul.mubr.msk.bf16.gmra.mxu1 %vm295_vm1, %v7463_v29  ;;  %v2220_v56 = vsel %vm2218_vm2, %v6813_v52, 0  ;;  %v7529_v59 = vld [vmem:[%s10735_s3 + $0x1a0] ss:$16 sps:$4 sm:$0xff]   ;;  %v7534_v62 = vld [vmem:[%s10735_s3 + $0x3a4] ss:$16 sps:$4 sm:$0xff]  }
  0x1c   :  { %455 = vmatprep.mubr.bf16.mxu0 %v10747_v1  ;;  %768 = vmatprep.mubr.bf16.mxu1 %v10747_v1  ;;  %v7532_v61 = vld [vmem:[%s10735_s3 + $0x3a0] ss:$16 sps:$4 sm:$0xff]   ;;  %v7539_v2 = vld [vmem:[%s10735_s3 + $0x184] ss:$16 sps:$4 sm:$0xff]   ;;  %v7580_v29 = vld [vmem:[%s10735_s3 + $0x2ec] ss:$16 sps:$4 sm:$0xff]  }
  0x1d   :  { %2240 = vmatpush1.bf16.msra.mxu0 %v7484_v31  ;;  %2553 = vmatpush1.bf16.msra.mxu1 %v7487_v33  ;;  %v7537_v0 = vld [vmem:[%s10735_s3 + $0x180] ss:$16 sps:$4 sm:$0xff]   ;;  %v7542_v4 = vld [vmem:[%s10735_s3 + $0x384] ss:$16 sps:$4 sm:$0xff]   ;;  %v7520_v31 = vld [vmem:[%s10734_s0 + $0x78] sm:$0xff]  }
  0x1e   :  { %2241 = vmatprep.subr.bf16.mxu0 %v7493_v34  ;;  %2554 = vmatprep.subr.bf16.mxu1 %v7497_v37  ;;  %v7540_v3 = vld [vmem:[%s10735_s3 + $0x380] ss:$16 sps:$4 sm:$0xff]   ;;  %v7547_v6 = vld [vmem:[%s10735_s3 + $0x164] ss:$16 sps:$4 sm:$0xff]   ;;  %v7528_v33 = vld [vmem:[%s10734_s0 + $0x88] sm:$0xff]  }
  0x1f   :  { %v7545_v5 = vld [vmem:[%s10735_s3 + $0x160] ss:$16 sps:$4 sm:$0xff]   ;;  %v7550_v8 = vld [vmem:[%s10735_s3 + $0x364] ss:$16 sps:$4 sm:$0xff]   ;;  %v7544_v37 = vld [vmem:[%s10734_s0 + $0xa8] sm:$0xff]  }
  0x20   :  { %v7548_v7 = vld [vmem:[%s10735_s3 + $0x360] ss:$16 sps:$4 sm:$0xff]   ;;  %v7554_v10 = vld [vmem:[%s10735_s3 + $0x144] ss:$16 sps:$4 sm:$0xff]  }
  0x21   :  { %2242 = vmatpush1.bf16.msra.mxu0 %v7491_v35  ;;  %2555 = vmatpush1.bf16.msra.mxu1 %v7495_v36  ;;  %v7552_v9 = vld [vmem:[%s10735_s3 + $0x140] ss:$16 sps:$4 sm:$0xff]   ;;  %v7558_v13 = vld [vmem:[%s10735_s3 + $0x344] ss:$16 sps:$4 sm:$0xff]   ;;  %v7536_v35 = vld [vmem:[%s10734_s0 + $0x98] sm:$0xff]  }
  0x22   :  { %2243 = vmatprep.subr.bf16.mxu0 %v7501_v40  ;;  %2556 = vmatprep.subr.bf16.mxu1 %v7504_v42  ;;  %v7556_v12 = vld [vmem:[%s10735_s3 + $0x340] ss:$16 sps:$4 sm:$0xff]   ;;  %v7562_v17 = vld [vmem:[%s10735_s3 + $0x124] ss:$16 sps:$4 sm:$0xff]  }
  0x23   :  { %6635 = vmatmul.mubr.msk.bf16.gmra.mxu0 %vm295_vm1, %v7467_v38  ;;  %6664 = vmatmul.mubr.msk.bf16.gmra.mxu1 %vm295_vm1, %v7467_v38  ;;  %v7490_v14 = vld [vmem:[%s10734_s0 + $0x40] sm:$0xff]   ;;  %v7514_v30 = vld [vmem:[%s10734_s0 + $0x70] sm:$0xff]  }
  0x24   :  { %465 = vmatprep.mubr.bf16.mxu0 %v10747_v1  ;;  %778 = vmatprep.mubr.bf16.mxu1 %v10747_v1  ;;  %v7560_v16 = vld [vmem:[%s10735_s3 + $0x120] ss:$16 sps:$4 sm:$0xff]   ;;  %v7565_v20 = vld [vmem:[%s10735_s3 + $0x324] ss:$16 sps:$4 sm:$0xff]  }
  0x25   :  { %2244 = vmatpush1.bf16.msra.mxu0 %v7499_v39  ;;  %2557 = vmatpush1.bf16.msra.mxu1 %v7502_v41  ;;  %v7563_v19 = vld [vmem:[%s10735_s3 + $0x320] ss:$16 sps:$4 sm:$0xff]   ;;  %v7570_v22 = vld [vmem:[%s10735_s3 + $0x104] ss:$16 sps:$4 sm:$0xff]   ;;  %v7555_v39 = vld [vmem:[%s10734_s0 + $0xb8] sm:$0xff]  }
  0x26   :  { %2245 = vmatprep.subr.bf16.mxu0 %v7509_v44  ;;  %2558 = vmatprep.subr.bf16.mxu1 %v7512_v46  ;;  %v7568_v23 = vld [vmem:[%s10735_s3 + $0x100] ss:$16 sps:$4 sm:$0xff]   ;;  %v7573_v25 = vld [vmem:[%s10735_s3 + $0x304] ss:$16 sps:$4 sm:$0xff]  }
  0x27   :  { %v7571_v24 = vld [vmem:[%s10735_s3 + $0x300] ss:$16 sps:$4 sm:$0xff]  }
  0x28   :  { %v7506_v26 = vld [vmem:[%s10734_s0 + $0x60] sm:$0xff]   ;;  %v7535_v34 = vld [vmem:[%s10734_s0 + $0x90] sm:$0xff]  }
  0x29   :  { %2246 = vmatpush1.bf16.msra.mxu0 %v7507_v43  ;;  %2559 = vmatpush1.bf16.msra.mxu1 %v7510_v45  ;;  %v7524_v32 = vld [vmem:[%s10734_s0 + $0x80] sm:$0xff]   ;;  %v7551_v38 = vld [vmem:[%s10734_s0 + $0xb0] sm:$0xff]   ;;  %v99_v45 = vlaneseq }
  0x2a   :  { %2247 = vmatprep.subr.bf16.mxu0 %v7517_v49  ;;  %6817 = vmatprep.subr.msk.bf16.mxu1 %vm2218_vm2, %v6814_v51  ;;  %v7543_v36 = vld [vmem:[%s10734_s0 + $0xa0] sm:$0xff]  }
  0x2b   :  { %6636 = vmatmul.mubr.msk.bf16.gmra.mxu0 %vm295_vm1, %v7474_v47  ;;  %6665 = vmatmul.mubr.msk.bf16.gmra.mxu1 %vm295_vm1, %v7474_v47  ;;  %v7559_v40 = vld [vmem:[%s10734_s0 + $0xc0] sm:$0xff]   ;;  %v8222_v51 = vshrl.u32 %v99_v45, 7 }
  0x2c   :  { %475 = vmatprep.mubr.bf16.mxu0 %v10747_v1  ;;  %788 = vmatprep.mubr.bf16.mxu1 %v10747_v1 }
  0x2d   :  { %2248 = vmatpush2.bf16.msra.mxu0 %v7515_v48  ;;  %2561 = vmatpush2.bf16.msra.mxu1 %v2220_v56  ;;  %v7566_v48 = vld [vmem:[%s10734_s0 + $0xc8] sm:$0xff]   ;;  %10835 = vst [vmem:[#allocation2_spill] sm:$0xff] %v8222_v51 }
  0x2e   :  { %2249 = vmatprep.subr.bf16.mxu0 %v7523_v54  ;;  %2562 = vmatprep.subr.bf16.mxu1 %v7527_v58  ;;  %v10745_v54 = vsub.s32 1, %v8222_v51  ;;  %v97_v58 = vld [vmem:[%s10736_s2] sm:$0xf] }
  0x31   :  { %2250 = vmatpush2.bf16.msra.mxu0 %v7521_v53  ;;  %2563 = vmatpush2.bf16.msra.mxu1 %v7525_v57 }
  0x32   :  { %2251 = vmatprep.subr.bf16.mxu0 %v7531_v60  ;;  %2564 = vmatprep.subr.bf16.mxu1 %v7534_v62  ;;  %v8242_v62 = vrot.slane %v97_v58, %v10745_v54 }
  0x33   :  { %6637 = vmatmul.mubr.msk.bf16.gmra.mxu0 %vm295_vm1, %v7475_v55  ;;  %6666 = vmatmul.mubr.msk.bf16.gmra.mxu1 %vm295_vm1, %v7475_v55  ;;  %v10744_v55 = vsub.s32 3, %v8222_v51 }
  0x34   :  { %485 = vmatprep.mubr.bf16.mxu0 %v10747_v1  ;;  %798 = vmatprep.mubr.bf16.mxu1 %v10747_v1 }
  0x35   :  { %2252 = vmatpush2.bf16.msra.mxu0 %v7529_v59  ;;  %2565 = vmatpush2.bf16.msra.mxu1 %v7532_v61  ;;  %v7567_v61 = vld [vmem:[%s10734_s0 + $0xd0] sm:$0xff]  }
  0x36   :  { %2253 = vmatprep.subr.bf16.mxu0 %v7539_v2  ;;  %2566 = vmatprep.subr.bf16.mxu1 %v7542_v4 }
  0x39   :  { %2254 = vmatpush2.bf16.msra.mxu0 %v7537_v0  ;;  %2567 = vmatpush2.bf16.msra.mxu1 %v7540_v3 }
  0x3a   :  { %2255 = vmatprep.subr.bf16.mxu0 %v7547_v6  ;;  %2568 = vmatprep.subr.bf16.mxu1 %v7550_v8  ;;  %v10743_v6 = vsub.s32 2, %v8222_v51 }
  0x3b   :  { %6638 = vmatmul.mubr.msk.bf16.gmra.mxu0 %vm295_vm1, %v7482_v63  ;;  %6667 = vmatmul.mubr.msk.bf16.gmra.mxu1 %vm295_vm1, %v7482_v63  ;;  %v8246_v63 = vrot.slane %v97_v58, %v10744_v55 }
  0x3c   :  { %495 = vmatprep.mubr.bf16.mxu0 %v10747_v1  ;;  %808 = vmatprep.mubr.bf16.mxu1 %v10747_v1 }
  0x3d   :  { %2256 = vmatpush2.bf16.msra.mxu0 %v7545_v5  ;;  %2569 = vmatpush2.bf16.msra.mxu1 %v7548_v7  ;;  %v10746_v5 = vsub.s32 0, %v8222_v51 }
  0x3e   :  { %2257 = vmatprep.subr.bf16.mxu0 %v7554_v10  ;;  %2570 = vmatprep.subr.bf16.mxu1 %v7558_v13 }
  0x41   :  { %2258 = vmatpush2.bf16.msra.mxu0 %v7552_v9  ;;  %2571 = vmatpush2.bf16.msra.mxu1 %v7556_v12 }
  0x42   :  { %2259 = vmatprep.subr.bf16.mxu0 %v7562_v17  ;;  %2572 = vmatprep.subr.bf16.mxu1 %v7565_v20 }
  0x43   :  { %6639 = vmatmul.mubr.msk.bf16.gmra.mxu0 %vm295_vm1, %v7483_v11  ;;  %6668 = vmatmul.mubr.msk.bf16.gmra.mxu1 %vm295_vm1, %v7483_v11 }
  0x44   :  { %505 = vmatprep.mubr.bf16.mxu0 %v10747_v1  ;;  %818 = vmatprep.mubr.bf16.mxu1 %v10747_v1 }
  0x45   :  { %2260 = vmatpush2.bf16.msra.mxu0 %v7560_v16  ;;  %2573 = vmatpush2.bf16.msra.mxu1 %v7563_v19  ;;  %v8272_v16 = vrot.slane %v97_v58, %v10743_v6  ;;  %v7574_v19 = vld [vmem:[%s10734_s0 + $0xd8] sm:$0xff]  }
  0x46   :  { %2261 = vmatprep.subr.bf16.mxu0 %v7570_v22  ;;  %2574 = vmatprep.subr.bf16.mxu1 %v7573_v25 }
  0x49   :  { %2262 = vmatpush2.bf16.msra.mxu0 %v7568_v23  ;;  %2575 = vmatpush2.bf16.msra.mxu1 %v7571_v24 }
  0x4a   :  { %2857 = vmatprep.subr.bf16.mxu0 %v7577_v28  ;;  %3170 = vmatprep.subr.bf16.mxu1 %v7580_v29 }
  0x4b   :  { %6640 = vmatmul.mubr.msk.bf16.gmra.mxu0 %vm295_vm1, %v7490_v14  ;;  %6669 = vmatmul.mubr.msk.bf16.gmra.mxu1 %vm295_vm1, %v7490_v14 }
  0x4c   :  { %515 = vmatprep.mubr.bf16.mxu0 %v10747_v1  ;;  %828 = vmatprep.mubr.bf16.mxu1 %v10747_v1 }
  0x53   :  { %6641 = vmatmul.mubr.msk.bf16.gmra.mxu0 %vm295_vm1, %v7494_v15  ;;  %6670 = vmatmul.mubr.msk.bf16.gmra.mxu1 %vm295_vm1, %v7494_v15  ;;  %v8268_v15 = vrot.slane %v97_v58, %v10746_v5 }
  0x54   :  { %525 = vmatprep.mubr.bf16.mxu0 %v10747_v1  ;;  %838 = vmatprep.mubr.bf16.mxu1 %v10747_v1 }
  0x5b   :  { %6642 = vmatmul.mubr.msk.bf16.gmra.mxu0 %vm295_vm1, %v7498_v18  ;;  %6671 = vmatmul.mubr.msk.bf16.gmra.mxu1 %vm295_vm1, %v7498_v18 }
  0x5c   :  { %535 = vmatprep.mubr.bf16.mxu0 %v10747_v1  ;;  %848 = vmatprep.mubr.bf16.mxu1 %v10747_v1 }
  0x63   :  { %6643 = vmatmul.mubr.msk.bf16.gmra.mxu0 %vm295_vm1, %v7505_v21  ;;  %6672 = vmatmul.mubr.msk.bf16.gmra.mxu1 %vm295_vm1, %v7505_v21 }
  0x64   :  { %545 = vmatprep.mubr.bf16.mxu0 %v10747_v1  ;;  %858 = vmatprep.mubr.bf16.mxu1 %v10747_v1 }
  0x6b   :  { %6644 = vmatmul.mubr.msk.bf16.gmra.mxu0 %vm295_vm1, %v7506_v26  ;;  %6673 = vmatmul.mubr.msk.bf16.gmra.mxu1 %vm295_vm1, %v7506_v26 }
  0x6c   :  { %555 = vmatprep.mubr.bf16.mxu0 %v10747_v1  ;;  %868 = vmatprep.mubr.bf16.mxu1 %v10747_v1 }
  0x73   :  { %6645 = vmatmul.mubr.msk.bf16.gmra.mxu0 %vm295_vm1, %v7513_v27  ;;  %6674 = vmatmul.mubr.msk.bf16.gmra.mxu1 %vm295_vm1, %v7513_v27 }
  0x74   :  { %565 = vmatprep.mubr.bf16.mxu0 %v10747_v1  ;;  %878 = vmatprep.mubr.bf16.mxu1 %v10747_v1 }
  0x7b   :  { %6646 = vmatmul.mubr.msk.bf16.gmra.mxu0 %vm295_vm1, %v7514_v30  ;;  %6675 = vmatmul.mubr.msk.bf16.gmra.mxu1 %vm295_vm1, %v7514_v30 }
  0x7c   :  { %575 = vmatprep.mubr.bf16.mxu0 %v10747_v1  ;;  %888 = vmatprep.mubr.bf16.mxu1 %v10747_v1 }
  0x83   :  { %6647 = vmatmul.mubr.msk.bf16.gmra.mxu0 %vm295_vm1, %v7520_v31  ;;  %6676 = vmatmul.mubr.msk.bf16.gmra.mxu1 %vm295_vm1, %v7520_v31 }
  0x84   :  { %585 = vmatprep.mubr.bf16.mxu0 %v10747_v1  ;;  %898 = vmatprep.mubr.bf16.mxu1 %v10747_v1 }
  0x8b   :  { %6648 = vmatmul.mubr.msk.bf16.gmra.mxu0 %vm295_vm1, %v7524_v32  ;;  %6677 = vmatmul.mubr.msk.bf16.gmra.mxu1 %vm295_vm1, %v7524_v32 }
  0x8c   :  { %595 = vmatprep.mubr.bf16.mxu0 %v10747_v1  ;;  %908 = vmatprep.mubr.bf16.mxu1 %v10747_v1 }
  0x93   :  { %6649 = vmatmul.mubr.msk.bf16.gmra.mxu0 %vm295_vm1, %v7528_v33  ;;  %6678 = vmatmul.mubr.msk.bf16.gmra.mxu1 %vm295_vm1, %v7528_v33 }
  0x94   :  { %605 = vmatprep.mubr.bf16.mxu0 %v10747_v1  ;;  %918 = vmatprep.mubr.bf16.mxu1 %v10747_v1 }
  0x9b   :  { %6650 = vmatmul.mubr.msk.bf16.gmra.mxu0 %vm295_vm1, %v7535_v34  ;;  %6679 = vmatmul.mubr.msk.bf16.gmra.mxu1 %vm295_vm1, %v7535_v34 }
  0x9c   :  { %615 = vmatprep.mubr.bf16.mxu0 %v10747_v1  ;;  %928 = vmatprep.mubr.bf16.mxu1 %v10747_v1 }
  0xa3   :  { %6651 = vmatmul.mubr.msk.bf16.gmra.mxu0 %vm295_vm1, %v7536_v35  ;;  %6680 = vmatmul.mubr.msk.bf16.gmra.mxu1 %vm295_vm1, %v7536_v35 }
  0xa4   :  { %625 = vmatprep.mubr.bf16.mxu0 %v10747_v1  ;;  %938 = vmatprep.mubr.bf16.mxu1 %v10747_v1 }
  0xab   :  { %6652 = vmatmul.mubr.msk.bf16.gmra.mxu0 %vm295_vm1, %v7543_v36  ;;  %6681 = vmatmul.mubr.msk.bf16.gmra.mxu1 %vm295_vm1, %v7543_v36 }
  0xac   :  { %635 = vmatprep.mubr.bf16.mxu0 %v10747_v1  ;;  %948 = vmatprep.mubr.bf16.mxu1 %v10747_v1 }
  0xb3   :  { %6653 = vmatmul.mubr.msk.bf16.gmra.mxu0 %vm295_vm1, %v7544_v37  ;;  %6682 = vmatmul.mubr.msk.bf16.gmra.mxu1 %vm295_vm1, %v7544_v37 }
  0xb4   :  { %645 = vmatprep.mubr.bf16.mxu0 %v10747_v1  ;;  %958 = vmatprep.mubr.bf16.mxu1 %v10747_v1 }
  0xbb   :  { %6654 = vmatmul.mubr.msk.bf16.gmra.mxu0 %vm295_vm1, %v7551_v38  ;;  %6683 = vmatmul.mubr.msk.bf16.gmra.mxu1 %vm295_vm1, %v7551_v38 }
  0xbc   :  { %655 = vmatprep.mubr.bf16.mxu0 %v10747_v1  ;;  %968 = vmatprep.mubr.bf16.mxu1 %v10747_v1 }
  0xc3   :  { %6655 = vmatmul.mubr.msk.bf16.gmra.mxu0 %vm295_vm1, %v7555_v39  ;;  %6684 = vmatmul.mubr.msk.bf16.gmra.mxu1 %vm295_vm1, %v7555_v39 }
  0xc4   :  { %665 = vmatprep.mubr.bf16.mxu0 %v10747_v1  ;;  %978 = vmatprep.mubr.bf16.mxu1 %v10747_v1 }
  0xcb   :  { %v8211_v41 = vpop.f32.mrf.mxu0  ;;  %6656 = vmatmul.mubr.msk.bf16.gmra.mxu0 %vm295_vm1, %v7559_v40  ;;  %v8214_v42 = vpop.f32.mrf.mxu1  ;;  %6685 = vmatmul.mubr.msk.bf16.gmra.mxu1 %vm295_vm1, %v7559_v40 }
  0xcc   :  { %675 = vmatprep.mubr.bf16.mxu0 %v10747_v1  ;;  %988 = vmatprep.mubr.bf16.mxu1 %v10747_v1  ;;  %v428_v30 = vadd.f32 %v8211_v41, %v8268_v15  ;;  %v741_v31 = vadd.f32 %v8214_v42, %v8272_v16 }
  0xcd   :  { %v429_v43 = vpop.f32.mrf.mxu0  ;;  %v742_v44 = vpop.f32.mrf.mxu1 }
  0xce   :  { %v430_v9 = vadd.f32 %v429_v43, %v8242_v62  ;;  %v743_v10 = vadd.f32 %v742_v44, %v8246_v63  ;;  %v1019_v42 = vmax.f32 %v428_v30, 0.0  ;;  %v1021_v43 = vmax.f32 %v741_v31, 0.0  ;;  %v7589_v30 = vld [vmem:[%s10735_s3 + $0xac] ss:$16 sps:$4 sm:$0xff]  }
  0xcf   :  { %v431_v46 = vpop.f32.mrf.mxu0  ;;  %v744_v47 = vpop.f32.mrf.mxu1  ;;  %v7592_v31 = vld [vmem:[%s10735_s3 + $0x2ac] ss:$16 sps:$4 sm:$0xff]  }
  0xd0   :  { %v1020_v20 = vmax.f32 %v430_v9, 0.0  ;;  %v1022_v21 = vmax.f32 %v743_v10, 0.0  ;;  %v432_v22 = vadd.f32 %v431_v46, %v8268_v15  ;;  %v745_v23 = vadd.f32 %v744_v47, %v8272_v16  ;;  %v7586_v9 = vld [vmem:[%s10735_s3 + $0x2cc] ss:$16 sps:$4 sm:$0xff]  }
  0xd1   :  { %v433_v49 = vpop.f32.mrf.mxu0  ;;  %v746_v50 = vpop.f32.mrf.mxu1 }
  0xd2   :  { %v434_v3 = vadd.f32 %v433_v49, %v8242_v62  ;;  %v747_v4 = vadd.f32 %v746_v50, %v8246_v63  ;;  %v1023_v36 = vmax.f32 %v432_v22, 0.0  ;;  %v1025_v37 = vmax.f32 %v745_v23, 0.0 }
  0xd3   :  { %v8224_v52 = vpop.f32.mrf.mxu0  ;;  %6657 = vmatmul.mubr.msk.bf16.gmra.mxu0 %vm295_vm1, %v7566_v48  ;;  %v8227_v53 = vpop.f32.mrf.mxu1  ;;  %6686 = vmatmul.mubr.msk.bf16.gmra.mxu1 %vm295_vm1, %v7566_v48 }
  0xd4   :  { %685 = vmatprep.mubr.bf16.mxu0 %v10747_v1  ;;  %998 = vmatprep.mubr.bf16.mxu1 %v10747_v1  ;;  %v1024_v13 = vmax.f32 %v434_v3, 0.0  ;;  %v1026_v14 = vmax.f32 %v747_v4, 0.0  ;;  %v8314_v50 = vpack.c.bf16 %v1023_v36, %v1019_v42  ;;  %v751_v58 = vadd.f32 %v8227_v53, %v8272_v16  ;;  %v7583_v53 = vld [vmem:[%s10735_s3 + $0xcc] ss:$16 sps:$4 sm:$0xff]  }
  0xd5   :  { %v439_v56 = vpop.f32.mrf.mxu0  ;;  %v752_v57 = vpop.f32.mrf.mxu1 }
  0xd6   :  { %v8283_v26 = vpack.c.bf16 %v1026_v14, %v1022_v21  ;;  %v8287_v29 = vpack.c.bf16 %v1024_v13, %v1020_v20  ;;  %v440_v34 = vadd.f32 %v439_v56, %v8242_v62  ;;  %v753_v35 = vadd.f32 %v752_v57, %v8246_v63 }
  0xd7   :  { %v441_v59 = vpop.f32.mrf.mxu0  ;;  %v754_v60 = vpop.f32.mrf.mxu1  ;;  %v8316_v56 = vpack.c.bf16 %v1025_v37, %v1021_v43  ;;  %v438_v57 = vadd.f32 %v8224_v52, %v8268_v15  ;;  %v1029_v23 = vmax.f32 %v751_v58, 0.0  ;;  %v7587_v58 = vld [vmem:[%s10735_s3 + $0xa8] ss:$16 sps:$4 sm:$0xff]  }
  0xd8   :  { %v442_v44 = vadd.f32 %v441_v59, %v8268_v15  ;;  %v755_v45 = vadd.f32 %v754_v60, %v8272_v16  ;;  %v1028_v48 = vmax.f32 %v440_v34, 0.0  ;;  %v1030_v49 = vmax.f32 %v753_v35, 0.0  ;;  %v7575_v60 = vld [vmem:[%s10735_s3 + $0xe8] ss:$16 sps:$4 sm:$0xff]  }
  0xd9   :  { %v443_v0 = vpop.f32.mrf.mxu0  ;;  %v756_v2 = vpop.f32.mrf.mxu1  ;;  %v1027_v22 = vmax.f32 %v438_v57, 0.0 }
  0xda   :  { %v444_v27 = vadd.f32 %v443_v0, %v8242_v62  ;;  %v757_v28 = vadd.f32 %v756_v2, %v8246_v63  ;;  %v7578_v0 = vld [vmem:[%s10735_s3 + $0x2e8] ss:$16 sps:$4 sm:$0xff]   ;;  %v1031_v10 = vmax.f32 %v442_v44, 0.0  ;;  %v1033_v13 = vmax.f32 %v755_v45, 0.0 }
  0xdb   :  { %v8252_v7 = vpop.f32.mrf.mxu0  ;;  %6658 = vmatmul.mubr.msk.bf16.gmra.mxu0 %vm295_vm1, %v7567_v61  ;;  %v8255_v8 = vpop.f32.mrf.mxu1  ;;  %6687 = vmatmul.mubr.msk.bf16.gmra.mxu1 %vm295_vm1, %v7567_v61 }
  0xdc   :  { %695 = vmatprep.mubr.bf16.mxu0 %v10747_v1  ;;  %1008 = vmatprep.mubr.bf16.mxu1 %v10747_v1  ;;  %v1032_v40 = vmax.f32 %v444_v27, 0.0  ;;  %v1034_v41 = vmax.f32 %v757_v28, 0.0  ;;  %v8369_v34 = vpack.c.bf16 %v1031_v10, %v1027_v22  ;;  %v8371_v35 = vpack.c.bf16 %v1033_v13, %v1029_v23 }
  0xdd   :  { %v8262_v11 = vpop.f32.mrf.mxu0  ;;  %v8264_v12 = vpop.f32.mrf.mxu1  ;;  %v448_v44 = vadd.f32 %v8252_v7, %v8268_v15  ;;  %v761_v45 = vadd.f32 %v8255_v8, %v8272_v16  ;;  %v7595_v8 = vld [vmem:[%s10735_s3 + $0x8c] ss:$16 sps:$4 sm:$0xff]  }
  0xde   :  { %v8328_v2 = vpack.c.bf16 %v1034_v41, %v1030_v49  ;;  %v8332_v52 = vpack.c.bf16 %v1032_v40, %v1028_v48  ;;  %v450_v20 = vadd.f32 %v8262_v11, %v8242_v62  ;;  %v763_v21 = vadd.f32 %v8264_v12, %v8246_v63  ;;  %v7581_v11 = vld [vmem:[%s10735_s3 + $0xc8] ss:$16 sps:$4 sm:$0xff]  }
  0xdf   :  { %v8274_v17 = vpop.f32.mrf.mxu0  ;;  %v8276_v18 = vpop.f32.mrf.mxu1  ;;  %v7584_v12 = vld [vmem:[%s10735_s3 + $0x2c8] ss:$16 sps:$4 sm:$0xff]   ;;  %v1035_v22 = vmax.f32 %v448_v44, 0.0  ;;  %v1037_v23 = vmax.f32 %v761_v45, 0.0 }
  0xe0   :  { %v1036_v40 = vmax.f32 %v450_v20, 0.0  ;;  %v1038_v41 = vmax.f32 %v763_v21, 0.0  ;;  %v452_v42 = vadd.f32 %v8274_v17, %v8268_v15  ;;  %v765_v43 = vadd.f32 %v8276_v18, %v8272_v16  ;;  %v7590_v17 = vld [vmem:[%s10735_s3 + $0x2a8] ss:$16 sps:$4 sm:$0xff]   ;;  %v7601_v21 = vld [vmem:[%s10735_s3 + $0x6c] ss:$16 sps:$4 sm:$0xff]  }
  0xe1   :  { %v453_v24 = vpop.f32.mrf.mxu0  ;;  %v766_v25 = vpop.f32.mrf.mxu1 }
  0xe2   :  { %v454_v3 = vadd.f32 %v453_v24, %v8242_v62  ;;  %v767_v4 = vadd.f32 %v766_v25, %v8246_v63 }
  0xe3   :  { %v8293_v32 = vpop.f32.mrf.mxu0  ;;  %6659 = vmatmul.mubr.msk.bf16.gmra.mxu0 %vm295_vm1, %v7574_v19  ;;  %v8296_v33 = vpop.f32.mrf.mxu1  ;;  %6688 = vmatmul.mubr.msk.bf16.gmra.mxu1 %vm295_vm1, %v7574_v19 }
  0xe4   :  { %2263 = vmatprep.mubr.bf16.mxu0 %v8287_v29  ;;  %6818 = vmatprep.mubr.msk.bf16.mxu1 %vm2133_vm3, %v8283_v26  ;;  %v1040_v27 = vmax.f32 %v454_v3, 0.0  ;;  %v1042_v28 = vmax.f32 %v767_v4, 0.0  ;;  %v1039_v4 = vmax.f32 %v452_v42, 0.0  ;;  %v458_v44 = vadd.f32 %v8293_v32, %v8268_v15 }
  0xe5   :  { %v8304_v38 = vpop.f32.mrf.mxu0  ;;  %v8306_v39 = vpop.f32.mrf.mxu1  ;;  %v771_v45 = vadd.f32 %v8296_v33, %v8272_v16  ;;  %v7607_v33 = vld [vmem:[%s10735_s3 + $0x4c] ss:$16 sps:$4 sm:$0xff]  }
  0xe6   :  { %v8392_v18 = vpack.c.bf16 %v1042_v28, %v1038_v41  ;;  %v8440_v41 = vpack.c.bf16 %v1039_v4, %v1035_v22 }
  0xe7   :  { %v8310_v46 = vpop.f32.mrf.mxu0  ;;  %v8312_v47 = vpop.f32.mrf.mxu1 }
  0xe8   :  { %v462_v28 = vadd.f32 %v8310_v46, %v8268_v15 }
  0xe9   :  { %v463_v61 = vpop.f32.mrf.mxu0  ;;  %v776_v59 = vpop.f32.mrf.mxu1 }
  0xea   :  { %v777_v48 = vadd.f32 %v776_v59, %v8246_v63  ;;  %v464_v7 = vadd.f32 %v463_v61, %v8242_v62  ;;  %v773_v59 = vadd.f32 %v8306_v39, %v8246_v63  ;;  %v7598_v61 = vld [vmem:[%s10735_s3 + $0x28c] ss:$16 sps:$4 sm:$0xff]   ;;  %v7593_v39 = vld [vmem:[%s10735_s3 + $0x88] ss:$16 sps:$4 sm:$0xff]  }
  0xeb   :  { %v8340_v14 = vpop.f32.mrf.mxu0  ;;  %v8342_v19 = vpop.f32.mrf.mxu1  ;;  %2264 = vmatmul.mubr.bf16.vlgmr.msra.gmra.mxu0 %v8314_v50  ;;  %2577 = vmatmul.mubr.bf16.vlgmr.msra.gmra.mxu1 %v8316_v56 }
  0xec   :  { %2273 = vmatprep.mubr.bf16.mxu0 %v8332_v52  ;;  %6819 = vmatprep.mubr.msk.bf16.mxu1 %vm2133_vm3, %v8328_v2  ;;  %v1050_v10 = vmax.f32 %v777_v48, 0.0 }
  0xed   :  { %2858 = vmatpush1.bf16.msra.mxu0 %v7575_v60  ;;  %v8353_v24 = vpop.f32.mrf.mxu0  ;;  %v8355_v25 = vpop.f32.mrf.mxu1  ;;  %3171 = vmatpush1.bf16.msra.mxu1 %v7578_v0  ;;  %v8395_v60 = vpack.c.bf16 %v1040_v27, %v1036_v40  ;;  %v1046_v27 = vmax.f32 %v773_v59, 0.0  ;;  %v1047_v59 = vmax.f32 %v462_v28, 0.0 }
  0xee   :  { %2859 = vmatprep.subr.bf16.mxu0 %v7583_v53  ;;  %3172 = vmatprep.subr.bf16.mxu1 %v7586_v9  ;;  %v1041_v53 = vmax.f32 %v765_v43, 0.0  ;;  %v460_v9 = vadd.f32 %v8304_v38, %v8242_v62  ;;  %v7596_v38 = vld [vmem:[%s10735_s3 + $0x288] ss:$16 sps:$4 sm:$0xff]  }
  0xef   :  { %v8373_v36 = vpop.f32.mrf.mxu0  ;;  %v8375_v37 = vpop.f32.mrf.mxu1  ;;  %v8448_v46 = vpack.c.bf16 %v1050_v10, %v1046_v27  ;;  %v1045_v10 = vmax.f32 %v771_v45, 0.0 }
  0xf0   :  { %v8442_v42 = vpack.c.bf16 %v1041_v53, %v1037_v23  ;;  %v1044_v43 = vmax.f32 %v460_v9, 0.0  ;;  %v783_v9 = vadd.f32 %v8355_v25, %v8246_v63  ;;  %v7608_v25 = vld [vmem:[%s10735_s3 + $0x248] ss:$16 sps:$4 sm:$0xff]  }
  0xf1   :  { %v473_v49 = vpop.f32.mrf.mxu0  ;;  %v786_v57 = vpop.f32.mrf.mxu1  ;;  %2860 = vmatpush1.bf16.msra.mxu0 %v7581_v11  ;;  %3173 = vmatpush1.bf16.msra.mxu1 %v7584_v12  ;;  %v1048_v11 = vmax.f32 %v464_v7, 0.0  ;;  %v7604_v12 = vld [vmem:[%s10735_s3 + $0x26c] ss:$16 sps:$4 sm:$0xff]  }
  0xf2   :  { %2861 = vmatprep.subr.bf16.mxu0 %v7589_v30  ;;  %3174 = vmatprep.subr.bf16.mxu1 %v7592_v31  ;;  %v775_v30 = vadd.f32 %v8312_v47, %v8272_v16  ;;  %v474_v7 = vadd.f32 %v473_v49, %v8242_v62  ;;  %v787_v32 = vadd.f32 %v786_v57, %v8246_v63  ;;  %v7610_v49 = vld [vmem:[%s10735_s3 + $0x24c] ss:$16 sps:$4 sm:$0xff]   ;;  %v1054_v45 = vmax.f32 %v783_v9, 0.0 }
  0xf3   :  { %v8402_v0 = vpop.f32.mrf.mxu0  ;;  %v8404_v3 = vpop.f32.mrf.mxu1  ;;  %2274 = vmatmul.mubr.bf16.gmra.mxu0 %v8369_v34  ;;  %2587 = vmatmul.mubr.bf16.gmra.mxu1 %v8371_v35  ;;  %v470_v57 = vadd.f32 %v8353_v24, %v8242_v62  ;;  %v7605_v24 = vld [vmem:[%s10735_s3 + $0x48] ss:$16 sps:$4 sm:$0xff]  }
  0xf4   :  { %2283 = vmatprep.mubr.bf16.mxu0 %v8395_v60  ;;  %6820 = vmatprep.mubr.msk.bf16.mxu1 %vm2133_vm3, %v8392_v18  ;;  %v1056_v22 = vmax.f32 %v474_v7, 0.0  ;;  %v1058_v23 = vmax.f32 %v787_v32, 0.0  ;;  %v468_v7 = vadd.f32 %v8340_v14, %v8268_v15  ;;  %v781_v32 = vadd.f32 %v8342_v19, %v8272_v16  ;;  %v7619_v19 = vld [vmem:[%s10735_s3 + $0xc] ss:$16 sps:$4 sm:$0xff]  }
  0xf5   :  { %v8419_v13 = vpop.f32.mrf.mxu0  ;;  %v8421_v20 = vpop.f32.mrf.mxu1  ;;  %2862 = vmatpush1.bf16.msra.mxu0 %v7587_v58  ;;  %3175 = vmatpush1.bf16.msra.mxu1 %v7590_v17  ;;  %v7599_v58 = vld [vmem:[%s10735_s3 + $0x68] ss:$16 sps:$4 sm:$0xff]  }
  0xf6   :  { %2863 = vmatprep.subr.bf16.mxu0 %v7595_v8  ;;  %3176 = vmatprep.subr.bf16.mxu1 %v7598_v61  ;;  %v7602_v17 = vld [vmem:[%s10735_s3 + $0x268] ss:$16 sps:$4 sm:$0xff]   ;;  %v8458_v8 = vpack.c.bf16 %v1048_v11, %v1044_v43  ;;  %v1049_v61 = vmax.f32 %v775_v30, 0.0  ;;  %v7613_v11 = vld [vmem:[%s10735_s3 + $0x2c] ss:$16 sps:$4 sm:$0xff]   ;;  %v793_v9 = vadd.f32 %v8421_v20, %v8246_v63 }
  0xf7   :  { %v8436_v31 = vpop.f32.mrf.mxu0  ;;  %v8438_v40 = vpop.f32.mrf.mxu1 }
  0xf8   :  { %v8497_v28 = vpack.c.bf16 %v1049_v61, %v1045_v10  ;;  %v795_v55 = vadd.f32 %v8438_v40, %v8272_v16 }
  0xf9   :  { %v483_v48 = vpop.f32.mrf.mxu0  ;;  %v796_v47 = vpop.f32.mrf.mxu1  ;;  %2864 = vmatpush1.bf16.msra.mxu0 %v7593_v39  ;;  %3177 = vmatpush1.bf16.msra.mxu1 %v7596_v38  ;;  %v1043_v39 = vmax.f32 %v458_v44, 0.0  ;;  %v1052_v44 = vmax.f32 %v470_v57, 0.0 }
  0xfa   :  { %2865 = vmatprep.subr.bf16.mxu0 %v7601_v21  ;;  %3178 = vmatprep.subr.bf16.mxu1 %v7604_v12  ;;  %v7616_v12 = vld [vmem:[%s10735_s3 + $0x22c] ss:$16 sps:$4 sm:$0xff]   ;;  %v484_v14 = vadd.f32 %v483_v48, %v8242_v62 }
  0xfb   :  { %v8463_v4 = vpop.f32.mrf.mxu0  ;;  %v8465_v53 = vpop.f32.mrf.mxu1  ;;  %2284 = vmatmul.mubr.bf16.gmra.mxu0 %v8440_v41  ;;  %2597 = vmatmul.mubr.bf16.gmra.mxu1 %v8442_v42  ;;  %v8495_v27 = vpack.c.bf16 %v1047_v59, %v1043_v39  ;;  %v8521_v57 = vpack.c.bf16 %v1056_v22, %v1052_v44  ;;  %v7622_v48 = vld [vmem:[%s10735_s3 + $0x20c] ss:$16 sps:$4 sm:$0xff]   ;;  %v480_v22 = vadd.f32 %v8419_v13, %v8242_v62  ;;  %v7620_v13 = vld [vmem:[%s10735_s3 + $0x208] ss:$16 sps:$4 sm:$0xff]  }
  0xfc   :  { %2293 = vmatprep.mubr.bf16.mxu0 %v8458_v8  ;;  %6821 = vmatprep.mubr.msk.bf16.mxu1 %vm2133_vm3, %v8448_v46 }
  0xfd   :  { %v8479_v38 = vpop.f32.mrf.mxu0  ;;  %v8481_v21 = vpop.f32.mrf.mxu1  ;;  %2866 = vmatpush1.bf16.msra.mxu0 %v7599_v58  ;;  %3179 = vmatpush1.bf16.msra.mxu1 %v7602_v17  ;;  %v472_v58 = vadd.f32 %v8373_v36, %v8268_v15  ;;  %v785_v17 = vadd.f32 %v8375_v37, %v8272_v16  ;;  %v7614_v36 = vld [vmem:[%s10735_s3 + $0x228] ss:$16 sps:$4 sm:$0xff]   ;;  %v8518_v37 = vpack.c.bf16 %v1058_v23, %v1054_v45  ;;  %v1051_v45 = vmax.f32 %v468_v7, 0.0 }
  0xfe   :  { %2867 = vmatprep.subr.bf16.mxu0 %v7607_v33  ;;  %3180 = vmatprep.subr.bf16.mxu1 %v7610_v49  ;;  %v797_v33 = vadd.f32 %v796_v47, %v8246_v63  ;;  %v7611_v49 = vld [vmem:[%s10735_s3 + $0x28] ss:$16 sps:$4 sm:$0xff]  }
  0xff   :  { %v8499_v30 = vpop.f32.mrf.mxu0  ;;  %v8501_v43 = vpop.f32.mrf.mxu1  ;;  %v1480_v47 = vld [vmem:[%s10735_s3 + $0x3e8] sm:$0x33] }
 0x100   :  { %v1066_v20 = vmax.f32 %v797_v33, 0.0  ;;  %v6816_v44 = vcombine.high %v1480_v47, %v1480_v47  ;;  %v7625_v33 = vld [vmem:[%s10735_s3 + $0x1ec] ss:$16 sps:$4 sm:$0xff]   ;;  %v6815_v6 = vcombine.low %v1480_v47, %v1480_v47  ;;  %v791_v47 = vadd.f32 %v8404_v3, %v8272_v16 }
 0x101   :  { %v493_v59 = vpop.f32.mrf.mxu0  ;;  %v806_v61 = vpop.f32.mrf.mxu1  ;;  %2868 = vmatpush1.bf16.msra.mxu0 %v7605_v24  ;;  %3181 = vmatpush1.bf16.msra.mxu1 %v7608_v25  ;;  %v1055_v24 = vmax.f32 %v472_v58, 0.0  ;;  %v1057_v25 = vmax.f32 %v785_v17, 0.0  ;;  %v1053_v58 = vmax.f32 %v781_v32, 0.0  ;;  %v1064_v17 = vmax.f32 %v484_v14, 0.0  ;;  %v7630_v3 = vld [vmem:[%s10735_s3 + $0x1cc] ss:$16 sps:$4 sm:$0xff]  }
 0x102   :  { %2869 = vmatprep.subr.bf16.mxu0 %v7613_v11  ;;  %3182 = vmatprep.subr.bf16.mxu1 %v7616_v12  ;;  %v7617_v12 = vld [vmem:[%s10735_s3 + $0x8] ss:$16 sps:$4 sm:$0xff]   ;;  %v1060_v14 = vmax.f32 %v480_v22, 0.0  ;;  %v805_v1 = vadd.f32 %v8501_v43, %v8272_v16 }
 0x103   :  { %v8531_v39 = vpop.f32.mrf.mxu0  ;;  %v8533_v10 = vpop.f32.mrf.mxu1  ;;  %2294 = vmatmul.mubr.bf16.gmra.mxu0 %v8495_v27  ;;  %2607 = vmatmul.mubr.bf16.gmra.mxu1 %v8497_v28  ;;  %v8566_v7 = vpack.c.bf16 %v1055_v24, %v1051_v45  ;;  %v8568_v32 = vpack.c.bf16 %v1057_v25, %v1053_v58  ;;  %v494_v24 = vadd.f32 %v493_v59, %v8242_v62  ;;  %v7633_v59 = vld [vmem:[%s10735_s3 + $0x3cc] ss:$16 sps:$4 sm:$0xff]  }
 0x104   :  { %2303 = vmatprep.mubr.bf16.mxu0 %v8521_v57  ;;  %6822 = vmatprep.mubr.msk.bf16.mxu1 %vm2133_vm3, %v8518_v37  ;;  %v807_v25 = vadd.f32 %v806_v61, %v8246_v63  ;;  %v8581_v22 = vpack.c.bf16 %v1064_v17, %v1060_v14  ;;  %v803_v61 = vadd.f32 %v8481_v21, %v8246_v63  ;;  %v7631_v21 = vld [vmem:[%s10735_s3 + $0x3c8] ss:$16 sps:$4 sm:$0xff]   ;;  %v7639_v14 = vld [vmem:[%s10735_s3 + $0x3ac] ss:$16 sps:$4 sm:$0xff]  }
 0x105   :  { %v8545_v23 = vpop.f32.mrf.mxu0  ;;  %v8547_v11 = vpop.f32.mrf.mxu1  ;;  %2870 = vmatpush1.bf16.msra.mxu0 %v7611_v49  ;;  %3183 = vmatpush1.bf16.msra.mxu1 %v7614_v36  ;;  %v1062_v49 = vmax.f32 %v793_v9, 0.0  ;;  %v482_v36 = vadd.f32 %v8436_v31, %v8268_v15 }
 0x106   :  { %2871 = vmatprep.subr.bf16.mxu0 %v7619_v19  ;;  %3184 = vmatprep.subr.bf16.mxu1 %v7622_v48  ;;  %v478_v19 = vadd.f32 %v8402_v0, %v8268_v15  ;;  %v7623_v48 = vld [vmem:[%s10735_s3 + $0x1e8] ss:$16 sps:$4 sm:$0xff]   ;;  %10837 = vst [vmem:[#allocation4_spill] sm:$0xff] %v8581_v22  ;;  %v2226_v0 = vsel %vm2218_vm2, %v6815_v6, 0  ;;  %v490_v6 = vadd.f32 %v8479_v38, %v8242_v62 }
 0x107   :  { %v8562_v54 = vpop.f32.mrf.mxu0  ;;  %v8564_v5 = vpop.f32.mrf.mxu1  ;;  %v8574_v31 = vpack.c.bf16 %v1066_v20, %v1062_v49  ;;  %v1063_v20 = vmax.f32 %v482_v36, 0.0  ;;  %v7628_v38 = vld [vmem:[%s10735_s3 + $0x1c8] ss:$16 sps:$4 sm:$0xff]   ;;  %v1074_v49 = vmax.f32 %v807_v25, 0.0  ;;  %v7636_v36 = vld [vmem:[%s10735_s3 + $0x1ac] ss:$16 sps:$4 sm:$0xff]  }
 0x108   :  { %v1070_v25 = vmax.f32 %v803_v61, 0.0 }
 0x109   :  { %10836 = vst [vmem:[#allocation3_spill] sm:$0xff] %v8574_v31  ;;  %v503_v9 = vpop.f32.mrf.mxu0  ;;  %v816_v40 = vpop.f32.mrf.mxu1  ;;  %2872 = vmatpush1.bf16.msra.mxu0 %v7617_v12  ;;  %3185 = vmatpush1.bf16.msra.mxu1 %v7620_v13  ;;  %v1065_v12 = vmax.f32 %v795_v55, 0.0  ;;  %v1059_v55 = vmax.f32 %v478_v19, 0.0 }
 0x10a   :  { %2873 = vmatprep.subr.bf16.mxu0 %v7625_v33  ;;  %6846 = vmatprep.subr.msk.bf16.mxu1 %vm2218_vm2, %v6816_v44  ;;  %v1061_v44 = vmax.f32 %v791_v47, 0.0  ;;  %v1072_v33 = vmax.f32 %v494_v24, 0.0  ;;  %v1068_v24 = vmax.f32 %v490_v6, 0.0  ;;  %v8643_v43 = vpack.c.bf16 %v1074_v49, %v1070_v25 }
 0x10b   :  { %v8588_v13 = vpop.f32.mrf.mxu0  ;;  %v8590_v45 = vpop.f32.mrf.mxu1  ;;  %2304 = vmatmul.mubr.bf16.gmra.mxu0 %v8566_v7  ;;  %2617 = vmatmul.mubr.bf16.gmra.mxu1 %v8568_v32  ;;  %v8620_v19 = vpack.c.bf16 %v1063_v20, %v1059_v55  ;;  %v801_v20 = vadd.f32 %v8465_v53, %v8272_v16  ;;  %v7642_v53 = vld [vmem:[%s10735_s3 + $0x18c] ss:$16 sps:$4 sm:$0xff]   ;;  %v500_v49 = vadd.f32 %v8545_v23, %v8242_v62 }
 0x10c   :  { %2313 = vmatprep.mubr.bf16.mxu0 %v8581_v22  ;;  %6823 = vmatprep.mubr.msk.bf16.mxu1 %vm2133_vm3, %v8574_v31  ;;  %v8622_v47 = vpack.c.bf16 %v1065_v12, %v1061_v44  ;;  %v488_v31 = vadd.f32 %v8463_v4, %v8268_v15  ;;  %v817_v12 = vadd.f32 %v816_v40, %v8246_v63 }
 0x10d   :  { %v8604_v58 = vpop.f32.mrf.mxu0  ;;  %v8606_v17 = vpop.f32.mrf.mxu1  ;;  %2874 = vmatpush2.bf16.msra.mxu0 %v7623_v48  ;;  %3187 = vmatpush2.bf16.msra.mxu1 %v2226_v0  ;;  %10838 = vst [vmem:[#allocation5_spill] sm:$0xff] %v8620_v19  ;;  %10840 = vst [vmem:[#allocation7_spill] sm:$0xff] %v8643_v43  ;;  %v504_v4 = vadd.f32 %v503_v9, %v8242_v62  ;;  %v8646_v6 = vpack.c.bf16 %v1072_v33, %v1068_v24  ;;  %v7645_v9 = vld [vmem:[%s10735_s3 + $0x38c] ss:$16 sps:$4 sm:$0xff]   ;;  %v1073_v33 = vmax.f32 %v805_v1, 0.0 }
 0x10e   :  { %2875 = vmatprep.subr.bf16.mxu0 %v7630_v3  ;;  %10839 = vst [vmem:[#allocation6_spill] sm:$0xff] %v8622_v47  ;;  %3188 = vmatprep.subr.bf16.mxu1 %v7633_v59  ;;  %v492_v3 = vadd.f32 %v8499_v30, %v8268_v15  ;;  %v7634_v59 = vld [vmem:[%s10735_s3 + $0x1a8] ss:$16 sps:$4 sm:$0xff]   ;;  %v813_v40 = vadd.f32 %v8547_v11, %v8246_v63  ;;  %v1082_v11 = vmax.f32 %v817_v12, 0.0  ;;  %v1067_v23 = vmax.f32 %v488_v31, 0.0 }
 0x10f   :  { %v8624_v48 = vpop.f32.mrf.mxu0  ;;  %v8626_v0 = vpop.f32.mrf.mxu1  ;;  %v7637_v30 = vld [vmem:[%s10735_s3 + $0x3a8] ss:$16 sps:$4 sm:$0xff]   ;;  %10841 = vst [vmem:[#allocation8_spill] sm:$0xff] %v8646_v6  ;;  %v1069_v25 = vmax.f32 %v801_v20, 0.0  ;;  %v7651_v31 = vld [vmem:[%s10735_s3 + $0x36c] ss:$16 sps:$4 sm:$0xff]   ;;  %v502_v20 = vadd.f32 %v8562_v54, %v8268_v15 }
 0x110   :  { %v7640_v24 = vld [vmem:[%s10735_s3 + $0x188] ss:$16 sps:$4 sm:$0xff]  }
 0x111   :  { %v513_v55 = vpop.f32.mrf.mxu0  ;;  %v826_v44 = vpop.f32.mrf.mxu1  ;;  %2876 = vmatpush2.bf16.msra.mxu0 %v7628_v38  ;;  %3189 = vmatpush2.bf16.msra.mxu1 %v7631_v21  ;;  %v1071_v21 = vmax.f32 %v492_v3, 0.0  ;;  %v7643_v1 = vld [vmem:[%s10735_s3 + $0x388] ss:$16 sps:$4 sm:$0xff]   ;;  %v1080_v3 = vmax.f32 %v504_v4, 0.0  ;;  %v815_v4 = vadd.f32 %v8564_v5, %v8272_v16  ;;  %v498_v5 = vadd.f32 %v8531_v39, %v8268_v15 }
 0x112   :  { %2877 = vmatprep.subr.bf16.mxu0 %v7636_v36  ;;  %3190 = vmatprep.subr.bf16.mxu1 %v7639_v14  ;;  %v827_v54 = vadd.f32 %v826_v44, %v8246_v63  ;;  %v1079_v39 = vmax.f32 %v502_v20, 0.0  ;;  %v512_v20 = vadd.f32 %v8624_v48, %v8268_v15  ;;  %v821_v48 = vadd.f32 %v8590_v45, %v8272_v16 }
 0x113   :  { %v8653_v61 = vpop.f32.mrf.mxu0  ;;  %v8655_v38 = vpop.f32.mrf.mxu1  ;;  %2314 = vmatmul.mubr.bf16.gmra.mxu0 %v8620_v19  ;;  %2627 = vmatmul.mubr.bf16.gmra.mxu1 %v8622_v47  ;;  %v8686_v47 = vpack.c.bf16 %v1073_v33, %v1069_v25  ;;  %v1076_v19 = vmax.f32 %v500_v49, 0.0  ;;  %v7649_v33 = vld [vmem:[%s10735_s3 + $0x368] ss:$16 sps:$4 sm:$0xff]   ;;  %v514_v49 = vadd.f32 %v513_v55, %v8242_v62  ;;  %v823_v55 = vadd.f32 %v8606_v17, %v8246_v63 }
 0x114   :  { %2323 = vmatprep.mubr.bf16.mxu0 %v8646_v6  ;;  %6824 = vmatprep.mubr.msk.bf16.mxu1 %vm2133_vm3, %v8643_v43  ;;  %v1078_v43 = vmax.f32 %v813_v40, 0.0 }
 0x115   :  { %v8667_v36 = vpop.f32.mrf.mxu0  ;;  %v8669_v14 = vpop.f32.mrf.mxu1  ;;  %2878 = vmatpush2.bf16.msra.mxu0 %v7634_v59  ;;  %3191 = vmatpush2.bf16.msra.mxu1 %v7637_v30  ;;  %v7648_v59 = vld [vmem:[%s10735_s3 + $0x16c] ss:$16 sps:$4 sm:$0xff]   ;;  %v8684_v30 = vpack.c.bf16 %v1071_v21, %v1067_v23  ;;  %10843 = vst [vmem:[#allocation10_spill] sm:$0xff] %v8686_v47  ;;  %v7646_v21 = vld [vmem:[%s10735_s3 + $0x168] ss:$16 sps:$4 sm:$0xff]   ;;  %v8705_v23 = vpack.c.bf16 %v1080_v3, %v1076_v19  ;;  %v1088_v25 = vmax.f32 %v514_v49, 0.0 }
 0x116   :  { %2879 = vmatprep.subr.bf16.mxu0 %v7642_v53  ;;  %3192 = vmatprep.subr.bf16.mxu1 %v7645_v9  ;;  %v8695_v53 = vpack.c.bf16 %v1082_v11, %v1078_v43  ;;  %v811_v43 = vadd.f32 %v8533_v10, %v8272_v16  ;;  %v510_v19 = vadd.f32 %v8604_v58, %v8242_v62  ;;  %v1081_v10 = vmax.f32 %v815_v4, 0.0 }
 0x117   :  { %v8677_v12 = vpop.f32.mrf.mxu0  ;;  %v8679_v6 = vpop.f32.mrf.mxu1  ;;  %10842 = vst [vmem:[#allocation9_spill] sm:$0xff] %v8684_v30  ;;  %10845 = vst [vmem:[#allocation12_spill] sm:$0xff] %v8705_v23  ;;  %v1090_v3 = vmax.f32 %v827_v54, 0.0 }
 0x118   :  { %10844 = vst [vmem:[#allocation11_spill] sm:$0xff] %v8695_v53  ;;  %v1077_v58 = vmax.f32 %v811_v43, 0.0 }
 0x119   :  { %v523_v40 = vpop.f32.mrf.mxu0  ;;  %v836_v9 = vpop.f32.mrf.mxu1  ;;  %2880 = vmatpush2.bf16.msra.mxu0 %v7640_v24  ;;  %3193 = vmatpush2.bf16.msra.mxu1 %v7643_v1 }
 0x11a   :  { %2881 = vmatprep.subr.bf16.mxu0 %v7648_v59  ;;  %3194 = vmatprep.subr.bf16.mxu1 %v7651_v31  ;;  %v1075_v59 = vmax.f32 %v498_v5, 0.0  ;;  %v524_v43 = vadd.f32 %v523_v40, %v8242_v62 }
 0x11b   :  { %v8711_v11 = vpop.f32.mrf.mxu0  ;;  %v8713_v24 = vpop.f32.mrf.mxu1  ;;  %2324 = vmatmul.mubr.bf16.gmra.mxu0 %v8684_v30  ;;  %2637 = vmatmul.mubr.bf16.gmra.mxu1 %v8686_v47  ;;  %v1086_v47 = vmax.f32 %v823_v55, 0.0 }
 0x11c   :  { %2333 = vmatprep.mubr.bf16.mxu0 %v8705_v23  ;;  %6825 = vmatprep.mubr.msk.bf16.mxu1 %vm2133_vm3, %v8695_v53  ;;  %v1084_v23 = vmax.f32 %v510_v19, 0.0  ;;  %v8734_v4 = vpack.c.bf16 %v1079_v39, %v1075_v59  ;;  %v8736_v53 = vpack.c.bf16 %v1081_v10, %v1077_v58  ;;  %v837_v19 = vadd.f32 %v836_v9, %v8246_v63 }
 0x11d   :  { %v8724_v44 = vpop.f32.mrf.mxu0  ;;  %v8726_v1 = vpop.f32.mrf.mxu1  ;;  %2882 = vmatpush2.bf16.msra.mxu0 %v7646_v21  ;;  %3195 = vmatpush2.bf16.msra.mxu1 %v7649_v33  ;;  %v508_v21 = vadd.f32 %v8588_v13, %v8268_v15  ;;  %v825_v33 = vadd.f32 %v8626_v0, %v8272_v16  ;;  %v8742_v5 = vpack.c.bf16 %v1090_v3, %v1086_v47  ;;  %v1087_v13 = vmax.f32 %v512_v20, 0.0 }
 0x11e   :  { %10846 = vst [vmem:[#allocation13_spill] sm:$0xff] %v8734_v4  ;;  %10847 = vst [vmem:[#allocation14_spill] sm:$0xff] %v8736_v53  ;;  %v8746_v55 = vpack.c.bf16 %v1088_v25, %v1084_v23  ;;  %v520_v47 = vadd.f32 %v8667_v36, %v8242_v62  ;;  %v833_v0 = vadd.f32 %v8669_v14, %v8246_v63  ;;  %v1096_v25 = vmax.f32 %v524_v43, 0.0  ;;  %v7652_v36 = vld [vmem:[%s10735_s3 + $0x148] ss:$16 sps:$4 sm:$0xff]  }
 0x11f   :  { %v8728_v31 = vpop.f32.mrf.mxu0  ;;  %v8730_v17 = vpop.f32.mrf.mxu1  ;;  %10848 = vst [vmem:[#allocation15_spill] sm:$0xff] %v8742_v5  ;;  %v1083_v45 = vmax.f32 %v508_v21, 0.0  ;;  %v1089_v40 = vmax.f32 %v825_v33, 0.0  ;;  %v1098_v3 = vmax.f32 %v837_v19, 0.0  ;;  %v7654_v14 = vld [vmem:[%s10735_s3 + $0x14c] ss:$16 sps:$4 sm:$0xff]   ;;  %v522_v58 = vadd.f32 %v8677_v12, %v8268_v15 }
 0x120   :  { %10849 = vst [vmem:[#allocation16_spill] sm:$0xff] %v8746_v55  ;;  %v1085_v59 = vmax.f32 %v821_v48, 0.0  ;;  %v7655_v33 = vld [vmem:[%s10735_s3 + $0x348] ss:$16 sps:$4 sm:$0xff]   ;;  %v7657_v43 = vld [vmem:[%s10735_s3 + $0x34c] ss:$16 sps:$4 sm:$0xff]   ;;  %v835_v48 = vadd.f32 %v8679_v6, %v8272_v16  ;;  %2883 = vmatprep.subr.bf16.mxu0 %v7654_v14 }
 0x121   :  { %v533_v49 = vpop.f32.mrf.mxu0  ;;  %v846_v54 = vpop.f32.mrf.mxu1  ;;  %v8785_v19 = vpack.c.bf16 %v1087_v13, %v1083_v45  ;;  %2884 = vmatpush2.bf16.msra.mxu0 %v7652_v36  ;;  %3196 = vmatprep.subr.bf16.mxu1 %v7657_v43  ;;  %v1095_v45 = vmax.f32 %v522_v58, 0.0 }
 0x122   :  { %v8789_v12 = vpack.c.bf16 %v1089_v40, %v1085_v59  ;;  %3197 = vmatpush2.bf16.msra.mxu1 %v7655_v33 }
 0x123   :  { %v8750_v39 = vpop.f32.mrf.mxu0  ;;  %v8752_v10 = vpop.f32.mrf.mxu1  ;;  %2334 = vmatmul.mubr.bf16.gmra.mxu0 %v8734_v4  ;;  %2647 = vmatmul.mubr.bf16.gmra.mxu1 %v8736_v53  ;;  %10850 = vst [vmem:[#allocation17_spill] sm:$0xff] %v8785_v19  ;;  %v518_v53 = vadd.f32 %v8653_v61, %v8268_v15  ;;  %v831_v4 = vadd.f32 %v8655_v38, %v8272_v16  ;;  %v1097_v38 = vmax.f32 %v835_v48, 0.0 }
 0x124   :  { %2343 = vmatprep.mubr.bf16.mxu0 %v8746_v55  ;;  %6826 = vmatprep.mubr.msk.bf16.mxu1 %vm2133_vm3, %v8742_v5  ;;  %v1092_v5 = vmax.f32 %v520_v47, 0.0  ;;  %v1094_v55 = vmax.f32 %v833_v0, 0.0  ;;  %10851 = vst [vmem:[#allocation18_spill] sm:$0xff] %v8789_v12  ;;  %v534_v47 = vadd.f32 %v533_v49, %v8242_v62  ;;  %v847_v0 = vadd.f32 %v846_v54, %v8246_v63 }
 0x125   :  { %v8763_v9 = vpop.f32.mrf.mxu0  ;;  %v8765_v23 = vpop.f32.mrf.mxu1  ;;  %v843_v49 = vadd.f32 %v8726_v1, %v8246_v63  ;;  %v1091_v54 = vmax.f32 %v518_v53, 0.0  ;;  %v532_v53 = vadd.f32 %v8728_v31, %v8268_v15  ;;  %v528_v48 = vadd.f32 %v8711_v11, %v8268_v15 }
 0x126   :  { %v8795_v13 = vpack.c.bf16 %v1098_v3, %v1094_v55  ;;  %v8799_v6 = vpack.c.bf16 %v1096_v25, %v1092_v5  ;;  %v530_v55 = vadd.f32 %v8724_v44, %v8242_v62  ;;  %v1093_v3 = vmax.f32 %v831_v4, 0.0 }
 0x127   :  { %v8775_v20 = vpop.f32.mrf.mxu0  ;;  %v8777_v21 = vpop.f32.mrf.mxu1  ;;  %v1104_v36 = vmax.f32 %v534_v47, 0.0  ;;  %v1106_v14 = vmax.f32 %v847_v0, 0.0  ;;  %v8818_v59 = vpack.c.bf16 %v1095_v45, %v1091_v54  ;;  %v1102_v43 = vmax.f32 %v843_v49, 0.0 }
 0x128   :  { %10852 = vst [vmem:[#allocation19_spill] sm:$0xff] %v8795_v13  ;;  %10853 = vst [vmem:[#allocation20_spill] sm:$0xff] %v8799_v6  ;;  %v8824_v1 = vpack.c.bf16 %v1097_v38, %v1093_v3  ;;  %v1100_v33 = vmax.f32 %v530_v55, 0.0  ;;  %v845_v4 = vadd.f32 %v8730_v17, %v8272_v16  ;;  %v841_v55 = vadd.f32 %v8713_v24, %v8272_v16 }
 0x129   :  { %v543_v30 = vpop.f32.mrf.mxu0  ;;  %v856_v22 = vpop.f32.mrf.mxu1  ;;  %10854 = vst [vmem:[#allocation21_spill] sm:$0xff] %v8818_v59  ;;  %v853_v11 = vadd.f32 %v8765_v23, %v8246_v63  ;;  %v1099_v24 = vmax.f32 %v528_v48, 0.0  ;;  %v7660_v23 = vld [vmem:[%s10735_s3 + $0x12c] ss:$16 sps:$4 sm:$0xff]  }
 0x12a   :  { %10855 = vst [vmem:[#allocation22_spill] sm:$0xff] %v8824_v1  ;;  %v544_v47 = vadd.f32 %v543_v30, %v8242_v62  ;;  %v857_v0 = vadd.f32 %v856_v22, %v8246_v63  ;;  %v8836_v38 = vpack.c.bf16 %v1104_v36, %v1100_v33  ;;  %v1103_v30 = vmax.f32 %v532_v53, 0.0  ;;  %2885 = vmatprep.subr.bf16.mxu0 %v7660_v23 }
 0x12b   :  { %v8801_v40 = vpop.f32.mrf.mxu0  ;;  %v8803_v61 = vpop.f32.mrf.mxu1  ;;  %2344 = vmatmul.mubr.bf16.gmra.mxu0 %v8785_v19  ;;  %2657 = vmatmul.mubr.bf16.gmra.mxu1 %v8789_v12  ;;  %v540_v22 = vadd.f32 %v8763_v9, %v8242_v62  ;;  %v1105_v17 = vmax.f32 %v845_v4, 0.0  ;;  %v7658_v9 = vld [vmem:[%s10735_s3 + $0x128] ss:$16 sps:$4 sm:$0xff]   ;;  %v1101_v53 = vmax.f32 %v841_v55, 0.0  ;;  %v855_v55 = vadd.f32 %v8777_v21, %v8272_v16 }
 0x12c   :  { %2353 = vmatprep.mubr.bf16.mxu0 %v8799_v6  ;;  %6827 = vmatprep.mubr.msk.bf16.mxu1 %vm2133_vm3, %v8795_v13  ;;  %v8834_v13 = vpack.c.bf16 %v1106_v14, %v1102_v43  ;;  %10857 = vst [vmem:[#allocation24_spill] sm:$0xff] %v8836_v38  ;;  %v1112_v3 = vmax.f32 %v544_v47, 0.0  ;;  %v1114_v36 = vmax.f32 %v857_v0, 0.0  ;;  %v7661_v43 = vld [vmem:[%s10735_s3 + $0x328] ss:$16 sps:$4 sm:$0xff]   ;;  %v8873_v0 = vpack.c.bf16 %v1103_v30, %v1099_v24 }
 0x12d   :  { %v8814_v5 = vpop.f32.mrf.mxu0  ;;  %v8816_v25 = vpop.f32.mrf.mxu1  ;;  %v7663_v47 = vld [vmem:[%s10735_s3 + $0x32c] ss:$16 sps:$4 sm:$0xff]   ;;  %2886 = vmatpush2.bf16.msra.mxu0 %v7658_v9  ;;  %v538_v24 = vadd.f32 %v8750_v39, %v8268_v15 }
 0x12e   :  { %10856 = vst [vmem:[#allocation23_spill] sm:$0xff] %v8834_v13  ;;  %10858 = vst [vmem:[#allocation25_spill] sm:$0xff] %v8873_v0  ;;  %3198 = vmatprep.subr.bf16.mxu1 %v7663_v47 }
 0x12f   :  { %v8820_v58 = vpop.f32.mrf.mxu0  ;;  %v8822_v44 = vpop.f32.mrf.mxu1  ;;  %3199 = vmatpush2.bf16.msra.mxu1 %v7661_v43  ;;  %v1107_v9 = vmax.f32 %v538_v24, 0.0 }
 0x131   :  { %v553_v45 = vpop.f32.mrf.mxu0  ;;  %v866_v54 = vpop.f32.mrf.mxu1 }
 0x132   :  { %v554_v30 = vadd.f32 %v553_v45, %v8242_v62  ;;  %v550_v45 = vadd.f32 %v8814_v5, %v8242_v62 }
 0x133   :  { %v8840_v31 = vpop.f32.mrf.mxu0  ;;  %v8842_v49 = vpop.f32.mrf.mxu1  ;;  %2354 = vmatmul.mubr.bf16.gmra.mxu0 %v8818_v59  ;;  %2667 = vmatmul.mubr.bf16.gmra.mxu1 %v8824_v1  ;;  %v8875_v1 = vpack.c.bf16 %v1105_v17, %v1101_v53  ;;  %v542_v59 = vadd.f32 %v8775_v20, %v8268_v15  ;;  %v851_v20 = vadd.f32 %v8752_v10, %v8272_v16  ;;  %v1113_v10 = vmax.f32 %v855_v55, 0.0 }
 0x134   :  { %2363 = vmatprep.mubr.bf16.mxu0 %v8836_v38  ;;  %6828 = vmatprep.mubr.msk.bf16.mxu1 %vm2133_vm3, %v8834_v13  ;;  %v1108_v13 = vmax.f32 %v540_v22, 0.0  ;;  %v1110_v38 = vmax.f32 %v853_v11, 0.0  ;;  %v867_v22 = vadd.f32 %v866_v54, %v8246_v63  ;;  %v865_v55 = vadd.f32 %v8822_v44, %v8272_v16 }
 0x135   :  { %v8853_v14 = vpop.f32.mrf.mxu0  ;;  %v8855_v33 = vpop.f32.mrf.mxu1  ;;  %10859 = vst [vmem:[#allocation26_spill] sm:$0xff] %v8875_v1  ;;  %v1111_v39 = vmax.f32 %v542_v59, 0.0  ;;  %v1109_v23 = vmax.f32 %v851_v20, 0.0  ;;  %v552_v59 = vadd.f32 %v8820_v58, %v8268_v15  ;;  %v7666_v58 = vld [vmem:[%s10735_s3 + $0x10c] ss:$16 sps:$4 sm:$0xff]   ;;  %v548_v44 = vadd.f32 %v8801_v40, %v8268_v15 }
 0x136   :  { %v8881_v19 = vpack.c.bf16 %v1114_v36, %v1110_v38  ;;  %v8885_v11 = vpack.c.bf16 %v1112_v3, %v1108_v13  ;;  %v863_v13 = vadd.f32 %v8816_v25, %v8246_v63  ;;  %v1120_v3 = vmax.f32 %v554_v30, 0.0  ;;  %2887 = vmatprep.subr.bf16.mxu0 %v7666_v58 }
 0x137   :  { %v8866_v48 = vpop.f32.mrf.mxu0  ;;  %v8868_v4 = vpop.f32.mrf.mxu1  ;;  %v1122_v36 = vmax.f32 %v867_v22, 0.0  ;;  %v1116_v25 = vmax.f32 %v550_v45, 0.0  ;;  %v8912_v47 = vpack.c.bf16 %v1111_v39, %v1107_v9  ;;  %v861_v39 = vadd.f32 %v8803_v61, %v8272_v16 }
 0x138   :  { %10860 = vst [vmem:[#allocation27_spill] sm:$0xff] %v8881_v19  ;;  %10861 = vst [vmem:[#allocation28_spill] sm:$0xff] %v8885_v11  ;;  %v1118_v53 = vmax.f32 %v863_v13, 0.0  ;;  %v7664_v13 = vld [vmem:[%s10735_s3 + $0x108] ss:$16 sps:$4 sm:$0xff]   ;;  %v1119_v40 = vmax.f32 %v552_v59, 0.0 }
 0x139   :  { %v563_v6 = vpop.f32.mrf.mxu0  ;;  %v876_v12 = vpop.f32.mrf.mxu1  ;;  %10862 = vst [vmem:[#allocation29_spill] sm:$0xff] %v8912_v47  ;;  %v8924_v45 = vpack.c.bf16 %v1120_v3, %v1116_v25  ;;  %v873_v3 = vadd.f32 %v8855_v33, %v8246_v63  ;;  %v1121_v61 = vmax.f32 %v865_v55, 0.0  ;;  %2888 = vmatpush2.bf16.msra.mxu0 %v7664_v13  ;;  %v7669_v33 = vld [vmem:[%s10735_s3 + $0x30c] ss:$16 sps:$4 sm:$0xff]  }
 0x13a   :  { %v8920_v24 = vpack.c.bf16 %v1122_v36, %v1118_v53  ;;  %v564_v20 = vadd.f32 %v563_v6, %v8242_v62  ;;  %v1115_v53 = vmax.f32 %v548_v44, 0.0  ;;  %3200 = vmatprep.subr.bf16.mxu1 %v7669_v33  ;;  %v875_v44 = vadd.f32 %v8868_v4, %v8272_v16 }
 0x13b   :  { %v8891_v21 = vpop.f32.mrf.mxu0  ;;  %v8893_v17 = vpop.f32.mrf.mxu1  ;;  %2364 = vmatmul.mubr.bf16.gmra.mxu0 %v8873_v0  ;;  %2677 = vmatmul.mubr.bf16.gmra.mxu1 %v8875_v1  ;;  %10865 = vst [vmem:[#allocation32_spill] sm:$0xff] %v8924_v45 }
 0x13c   :  { %2373 = vmatprep.mubr.bf16.mxu0 %v8885_v11  ;;  %6829 = vmatprep.mubr.msk.bf16.mxu1 %vm2133_vm3, %v8881_v19  ;;  %v8914_v11 = vpack.c.bf16 %v1113_v10, %v1109_v23  ;;  %10864 = vst [vmem:[#allocation31_spill] sm:$0xff] %v8920_v24  ;;  %v877_v19 = vadd.f32 %v876_v12, %v8246_v63  ;;  %v1128_v23 = vmax.f32 %v564_v20, 0.0  ;;  %v1126_v20 = vmax.f32 %v873_v3, 0.0 }
 0x13d   :  { %v8904_v54 = vpop.f32.mrf.mxu0  ;;  %v8906_v38 = vpop.f32.mrf.mxu1  ;;  %v560_v12 = vadd.f32 %v8853_v14, %v8242_v62  ;;  %v7667_v14 = vld [vmem:[%s10735_s3 + $0x308] ss:$16 sps:$4 sm:$0xff]  }
 0x13e   :  { %10863 = vst [vmem:[#allocation30_spill] sm:$0xff] %v8914_v11  ;;  %v1130_v25 = vmax.f32 %v877_v19, 0.0  ;;  %v8964_v19 = vpack.c.bf16 %v1119_v40, %v1115_v53  ;;  %3201 = vmatpush2.bf16.msra.mxu1 %v7667_v14 }
 0x13f   :  { %v8908_v43 = vpop.f32.mrf.mxu0  ;;  %v8910_v5 = vpop.f32.mrf.mxu1  ;;  %v1124_v58 = vmax.f32 %v560_v12, 0.0 }
 0x140   :  { %10867 = vst [vmem:[#allocation33_spill] sm:$0xff] %v8964_v19  ;;  %v8972_v1 = vpack.c.bf16 %v1130_v25, %v1126_v20 }
 0x141   :  { %v573_v30 = vpop.f32.mrf.mxu0  ;;  %v886_v22 = vpop.f32.mrf.mxu1  ;;  %v8976_v3 = vpack.c.bf16 %v1128_v23, %v1124_v58  ;;  %v572_v58 = vadd.f32 %v8908_v43, %v8268_v15 }
 0x142   :  { %10869 = vst [vmem:[#allocation35_spill] sm:$0xff] %v8972_v1  ;;  %v574_v0 = vadd.f32 %v573_v30, %v8242_v62  ;;  %v887_v12 = vadd.f32 %v886_v22, %v8246_v63  ;;  %v570_v30 = vadd.f32 %v8904_v54, %v8242_v62  ;;  %v883_v22 = vadd.f32 %v8906_v38, %v8246_v63 }
 0x143   :  { %v8936_v10 = vpop.f32.mrf.mxu0  ;;  %v8938_v6 = vpop.f32.mrf.mxu1  ;;  %2374 = vmatmul.mubr.bf16.gmra.mxu0 %v8912_v47  ;;  %2687 = vmatmul.mubr.bf16.gmra.mxu1 %v8914_v11  ;;  %v562_v11 = vadd.f32 %v8866_v48, %v8268_v15  ;;  %10870 = vst [vmem:[#allocation36_spill] sm:$0xff] %v8976_v3  ;;  %v871_v48 = vadd.f32 %v8842_v49, %v8272_v16  ;;  %v1129_v49 = vmax.f32 %v875_v44, 0.0 }
 0x144   :  { %2383 = vmatprep.mubr.bf16.mxu0 %v8924_v45  ;;  %6830 = vmatprep.mubr.msk.bf16.mxu1 %vm2133_vm3, %v8920_v24  ;;  %v1117_v24 = vmax.f32 %v861_v39, 0.0  ;;  %v10866_v45 = vmov 0   ;;  %v1136_v25 = vmax.f32 %v574_v0, 0.0  ;;  %v1138_v14 = vmax.f32 %v887_v12, 0.0 }
 0x145   :  { %v8949_v36 = vpop.f32.mrf.mxu0  ;;  %v8951_v9 = vpop.f32.mrf.mxu1  ;;  %4165 = vmatprep.subr.bf16.mxu0 %v10866_v45  ;;  %4422 = vmatprep.subr.bf16.mxu1 %v10866_v45  ;;  %v1125_v53 = vmax.f32 %v871_v48, 0.0  ;;  %v885_v54 = vadd.f32 %v8910_v5, %v8272_v16  ;;  %v568_v5 = vadd.f32 %v8891_v21, %v8268_v15 }
 0x146   :  { %v8966_v13 = vpack.c.bf16 %v1121_v61, %v1117_v24  ;;  %v558_v24 = vadd.f32 %v8840_v31, %v8268_v15  ;;  %v1127_v31 = vmax.f32 %v562_v11, 0.0 }
 0x147   :  { %v8959_v59 = vpop.f32.mrf.mxu0  ;;  %v8961_v55 = vpop.f32.mrf.mxu1  ;;  %v9004_v0 = vpack.c.bf16 %v1129_v49, %v1125_v53 }
 0x148   :  { %10868 = vst [vmem:[#allocation34_spill] sm:$0xff] %v8966_v13  ;;  %v1123_v33 = vmax.f32 %v558_v24, 0.0 }
 0x149   :  { %v583_v39 = vpop.f32.mrf.mxu0  ;;  %v896_v47 = vpop.f32.mrf.mxu1  ;;  %10872 = vst [vmem:[#allocation38_spill] sm:$0xff] %v9004_v0 }
 0x14a   :  { %v897_v11 = vadd.f32 %v896_v47, %v8246_v63  ;;  %v9002_v44 = vpack.c.bf16 %v1127_v31, %v1123_v33 }
 0x14b   :  { %v8983_v4 = vpop.f32.mrf.mxu0  ;;  %v8985_v40 = vpop.f32.mrf.mxu1  ;;  %2384 = vmatmul.mubr.bf16.gmra.mxu0 %v8964_v19  ;;  %2697 = vmatmul.mubr.bf16.gmra.mxu1 %v8966_v13  ;;  %v1134_v13 = vmax.f32 %v883_v22, 0.0  ;;  %v1135_v22 = vmax.f32 %v572_v58, 0.0 }
 0x14c   :  { %2393 = vmatprep.mubr.bf16.mxu0 %v8976_v3  ;;  %6831 = vmatprep.mubr.msk.bf16.mxu1 %vm2133_vm3, %v8972_v1  ;;  %v1132_v3 = vmax.f32 %v570_v30, 0.0  ;;  %v584_v1 = vadd.f32 %v583_v39, %v8242_v62  ;;  %10871 = vst [vmem:[#allocation37_spill] sm:$0xff] %v9002_v44  ;;  %v881_v30 = vadd.f32 %v8893_v17, %v8272_v16  ;;  %v1137_v39 = vmax.f32 %v885_v54, 0.0 }
 0x14d   :  { %v589_v61 = vpop.f32.mrf.mxu0  ;;  %v902_v23 = vpop.f32.mrf.mxu1  ;;  %v9006_v48 = vpack.c.bf16 %v1138_v14, %v1134_v13  ;;  %v580_v13 = vadd.f32 %v8949_v36, %v8242_v62  ;;  %v1146_v31 = vmax.f32 %v897_v11, 0.0 }
 0x14e   :  { %v9008_v43 = vpack.c.bf16 %v1136_v25, %v1132_v3  ;;  %v893_v3 = vadd.f32 %v8951_v9, %v8246_v63  ;;  %v1144_v21 = vmax.f32 %v584_v1, 0.0  ;;  %v1131_v25 = vmax.f32 %v568_v5, 0.0 }
 0x14f   :  { %v591_v38 = vpop.f32.mrf.mxu0  ;;  %v904_v20 = vpop.f32.mrf.mxu1  ;;  %10873 = vst [vmem:[#allocation39_spill] sm:$0xff] %v9006_v48  ;;  %v1133_v14 = vmax.f32 %v881_v30, 0.0  ;;  %v1140_v58 = vmax.f32 %v580_v13, 0.0  ;;  %v582_v9 = vadd.f32 %v8959_v59, %v8268_v15  ;;  %v895_v1 = vadd.f32 %v8961_v55, %v8272_v16 }
 0x150   :  { %10874 = vst [vmem:[#allocation40_spill] sm:$0xff] %v9008_v43  ;;  %v1142_v36 = vmax.f32 %v893_v3, 0.0  ;;  %v9035_v54 = vpack.c.bf16 %v1135_v22, %v1131_v25  ;;  %v578_v59 = vadd.f32 %v8936_v10, %v8268_v15  ;;  %v891_v55 = vadd.f32 %v8938_v6, %v8272_v16 }
 0x151   :  { %v593_v12 = vpop.f32.mrf.mxu0  ;;  %v906_v24 = vpop.f32.mrf.mxu1  ;;  %v9037_v11 = vpack.c.bf16 %v1137_v39, %v1133_v14  ;;  %v9043_v13 = vpack.c.bf16 %v1144_v21, %v1140_v58  ;;  %v1143_v3 = vmax.f32 %v582_v9, 0.0  ;;  %v903_v21 = vadd.f32 %v902_v23, %v8246_v63 }
 0x152   :  { %10875 = vst [vmem:[#allocation41_spill] sm:$0xff] %v9035_v54  ;;  %v9039_v5 = vpack.c.bf16 %v1146_v31, %v1142_v36  ;;  %v594_v30 = vadd.f32 %v593_v12, %v8242_v62  ;;  %v1145_v12 = vmax.f32 %v895_v1, 0.0  ;;  %v592_v31 = vadd.f32 %v591_v38, %v8268_v15 }
 0x153   :  { %v9014_v19 = vpop.f32.mrf.mxu0  ;;  %v9016_v47 = vpop.f32.mrf.mxu1  ;;  %2394 = vmatmul.mubr.bf16.gmra.mxu0 %v9002_v44  ;;  %2707 = vmatmul.mubr.bf16.gmra.mxu1 %v9004_v0  ;;  %10876 = vst [vmem:[#allocation42_spill] sm:$0xff] %v9037_v11  ;;  %v907_v0 = vadd.f32 %v906_v24, %v8246_v63  ;;  %10878 = vst [vmem:[#allocation44_spill] sm:$0xff] %v9043_v13  ;;  %v590_v24 = vadd.f32 %v589_v61, %v8242_v62  ;;  %v1139_v36 = vmax.f32 %v578_v59, 0.0 }
 0x154   :  { %2403 = vmatprep.mubr.bf16.mxu0 %v9008_v43  ;;  %6832 = vmatprep.mubr.msk.bf16.mxu1 %vm2133_vm3, %v9006_v48  ;;  %10877 = vst [vmem:[#allocation43_spill] sm:$0xff] %v9039_v5  ;;  %v905_v25 = vadd.f32 %v904_v20, %v8272_v16  ;;  %v1152_v14 = vmax.f32 %v594_v30, 0.0  ;;  %v1141_v9 = vmax.f32 %v891_v55, 0.0  ;;  %v1151_v30 = vmax.f32 %v592_v31, 0.0 }
 0x155   :  { %v599_v17 = vpop.f32.mrf.mxu0  ;;  %v912_v49 = vpop.f32.mrf.mxu1  ;;  %v1154_v58 = vmax.f32 %v907_v0, 0.0  ;;  %v1148_v23 = vmax.f32 %v590_v24, 0.0  ;;  %v588_v24 = vadd.f32 %v8983_v4, %v8268_v15 }
 0x156   :  { %v9070_v44 = vpack.c.bf16 %v1145_v12, %v1141_v9  ;;  %v1153_v0 = vmax.f32 %v905_v25, 0.0 }
 0x157   :  { %v9027_v33 = vpop.f32.mrf.mxu0  ;;  %v9029_v53 = vpop.f32.mrf.mxu1  ;;  %v9074_v55 = vpack.c.bf16 %v1152_v14, %v1148_v23  ;;  %v1147_v25 = vmax.f32 %v588_v24, 0.0 }
 0x158   :  { %10880 = vst [vmem:[#allocation46_spill] sm:$0xff] %v9070_v44 }
 0x159   :  { %v603_v48 = vpop.f32.mrf.mxu0  ;;  %v916_v43 = vpop.f32.mrf.mxu1  ;;  %10882 = vst [vmem:[#allocation48_spill] sm:$0xff] %v9074_v55 }
 0x15b   :  { %v9049_v22 = vpop.f32.mrf.mxu0  ;;  %v9051_v39 = vpop.f32.mrf.mxu1  ;;  %2404 = vmatmul.mubr.bf16.gmra.mxu0 %v9035_v54  ;;  %2717 = vmatmul.mubr.bf16.gmra.mxu1 %v9037_v11  ;;  %v1150_v11 = vmax.f32 %v903_v21, 0.0  ;;  %v9068_v54 = vpack.c.bf16 %v1143_v3, %v1139_v36  ;;  %v600_v3 = vadd.f32 %v599_v17, %v8242_v62  ;;  %v9095_v17 = vpack.c.bf16 %v1151_v30, %v1147_v25 }
 0x15c   :  { %2413 = vmatprep.mubr.bf16.mxu0 %v9043_v13  ;;  %6833 = vmatprep.mubr.msk.bf16.mxu1 %vm2133_vm3, %v9039_v5  ;;  %v604_v13 = vadd.f32 %v603_v48, %v8242_v62  ;;  %v917_v5 = vadd.f32 %v916_v43, %v8246_v63  ;;  %v901_v48 = vadd.f32 %v8985_v40, %v8272_v16 }
 0x15d   :  { %v609_v10 = vpop.f32.mrf.mxu0  ;;  %v922_v6 = vpop.f32.mrf.mxu1  ;;  %10879 = vst [vmem:[#allocation45_spill] sm:$0xff] %v9068_v54  ;;  %v9072_v59 = vpack.c.bf16 %v1154_v58, %v1150_v11  ;;  %v913_v11 = vadd.f32 %v912_v49, %v8246_v63  ;;  %v1156_v9 = vmax.f32 %v600_v3, 0.0  ;;  %10883 = vst [vmem:[#allocation49_spill] sm:$0xff] %v9095_v17  ;;  %v598_v30 = vadd.f32 %v9014_v19, %v8268_v15 }
 0x15e   :  { %v1160_v12 = vmax.f32 %v604_v13, 0.0  ;;  %v1162_v31 = vmax.f32 %v917_v5, 0.0  ;;  %v1149_v14 = vmax.f32 %v901_v48, 0.0  ;;  %v602_v5 = vadd.f32 %v9027_v33, %v8268_v15 }
 0x15f   :  { %v9062_v1 = vpop.f32.mrf.mxu0  ;;  %v9064_v61 = vpop.f32.mrf.mxu1  ;;  %10881 = vst [vmem:[#allocation47_spill] sm:$0xff] %v9072_v59  ;;  %v1158_v23 = vmax.f32 %v913_v11, 0.0  ;;  %v915_v13 = vadd.f32 %v9029_v53, %v8272_v16  ;;  %v610_v53 = vadd.f32 %v609_v10, %v8242_v62 }
 0x160   :  { %v9097_v49 = vpack.c.bf16 %v1153_v0, %v1149_v14  ;;  %v9107_v3 = vpack.c.bf16 %v1160_v12, %v1156_v9  ;;  %v911_v0 = vadd.f32 %v9016_v47, %v8272_v16  ;;  %v1159_v19 = vmax.f32 %v602_v5, 0.0 }
 0x161   :  { %v613_v38 = vpop.f32.mrf.mxu0  ;;  %v926_v20 = vpop.f32.mrf.mxu1  ;;  %v9103_v24 = vpack.c.bf16 %v1162_v31, %v1158_v23  ;;  %v1155_v14 = vmax.f32 %v598_v30, 0.0  ;;  %v1164_v10 = vmax.f32 %v610_v53, 0.0  ;;  %v612_v5 = vadd.f32 %v9062_v1, %v8268_v15 }
 0x162   :  { %10884 = vst [vmem:[#allocation50_spill] sm:$0xff] %v9097_v49  ;;  %v614_v48 = vadd.f32 %v613_v38, %v8242_v62  ;;  %10886 = vst [vmem:[#allocation52_spill] sm:$0xff] %v9107_v3  ;;  %v923_v38 = vadd.f32 %v922_v6, %v8246_v63  ;;  %v1157_v9 = vmax.f32 %v911_v0, 0.0 }
 0x163   :  { %v9080_v21 = vpop.f32.mrf.mxu0  ;;  %v9082_v43 = vpop.f32.mrf.mxu1  ;;  %2414 = vmatmul.mubr.bf16.gmra.mxu0 %v9068_v54  ;;  %2727 = vmatmul.mubr.bf16.gmra.mxu1 %v9070_v44  ;;  %10885 = vst [vmem:[#allocation51_spill] sm:$0xff] %v9103_v24  ;;  %v927_v44 = vadd.f32 %v926_v20, %v8246_v63  ;;  %v1161_v20 = vmax.f32 %v915_v13, 0.0  ;;  %v9128_v6 = vpack.c.bf16 %v1159_v19, %v1155_v14 }
 0x164   :  { %2423 = vmatprep.mubr.bf16.mxu0 %v9074_v55  ;;  %6834 = vmatprep.mubr.msk.bf16.mxu1 %vm2133_vm3, %v9072_v59  ;;  %v1168_v31 = vmax.f32 %v614_v48, 0.0  ;;  %v925_v13 = vadd.f32 %v9064_v61, %v8272_v16  ;;  %v921_v19 = vadd.f32 %v9051_v39, %v8272_v16 }
 0x165   :  { %v619_v4 = vpop.f32.mrf.mxu0  ;;  %v932_v40 = vpop.f32.mrf.mxu1  ;;  %v1170_v25 = vmax.f32 %v927_v44, 0.0  ;;  %10887 = vst [vmem:[#allocation53_spill] sm:$0xff] %v9128_v6 }
 0x166   :  { %v9140_v53 = vpack.c.bf16 %v1168_v31, %v1164_v10  ;;  %v620_v61 = vadd.f32 %v619_v4, %v8242_v62 }
 0x167   :  { %v9091_v58 = vpop.f32.mrf.mxu0  ;;  %v9093_v36 = vpop.f32.mrf.mxu1 }
 0x168   :  { %10890 = vst [vmem:[#allocation56_spill] sm:$0xff] %v9140_v53  ;;  %v1172_v4 = vmax.f32 %v620_v61, 0.0 }
 0x169   :  { %v623_v59 = vpop.f32.mrf.mxu0  ;;  %v936_v55 = vpop.f32.mrf.mxu1 }
 0x16a   :  { %v624_v0 = vadd.f32 %v623_v59, %v8242_v62  ;;  %v933_v59 = vadd.f32 %v932_v40, %v8246_v63 }
 0x16b   :  { %v9113_v33 = vpop.f32.mrf.mxu0  ;;  %v9115_v11 = vpop.f32.mrf.mxu1  ;;  %2424 = vmatmul.mubr.bf16.gmra.mxu0 %v9095_v17  ;;  %2737 = vmatmul.mubr.bf16.gmra.mxu1 %v9097_v49  ;;  %v1166_v17 = vmax.f32 %v923_v38, 0.0  ;;  %v608_v38 = vadd.f32 %v9049_v22, %v8268_v15  ;;  %v1167_v22 = vmax.f32 %v612_v5, 0.0  ;;  %v622_v5 = vadd.f32 %v9091_v58, %v8268_v15 }
 0x16c   :  { %2433 = vmatprep.mubr.bf16.mxu0 %v9107_v3  ;;  %6835 = vmatprep.mubr.msk.bf16.mxu1 %vm2133_vm3, %v9103_v24  ;;  %v9130_v3 = vpack.c.bf16 %v1161_v20, %v1157_v9  ;;  %v937_v24 = vadd.f32 %v936_v55, %v8246_v63  ;;  %v1169_v55 = vmax.f32 %v925_v13, 0.0  ;;  %v1176_v31 = vmax.f32 %v624_v0, 0.0 }
 0x16d   :  { %v629_v47 = vpop.f32.mrf.mxu0  ;;  %v942_v12 = vpop.f32.mrf.mxu1  ;;  %v9136_v30 = vpack.c.bf16 %v1170_v25, %v1166_v17  ;;  %v1163_v14 = vmax.f32 %v608_v38, 0.0  ;;  %v1165_v9 = vmax.f32 %v921_v19, 0.0  ;;  %v935_v13 = vadd.f32 %v9093_v36, %v8272_v16 }
 0x16e   :  { %10888 = vst [vmem:[#allocation54_spill] sm:$0xff] %v9130_v3  ;;  %v1178_v25 = vmax.f32 %v937_v24, 0.0  ;;  %v9173_v61 = vpack.c.bf16 %v1176_v31, %v1172_v4  ;;  %v630_v36 = vadd.f32 %v629_v47, %v8242_v62 }
 0x16f   :  { %v9124_v23 = vpop.f32.mrf.mxu0  ;;  %v9126_v49 = vpop.f32.mrf.mxu1  ;;  %10889 = vst [vmem:[#allocation55_spill] sm:$0xff] %v9136_v30  ;;  %v9161_v40 = vpack.c.bf16 %v1167_v22, %v1163_v14  ;;  %v931_v22 = vadd.f32 %v9082_v43, %v8272_v16 }
 0x170   :  { %10894 = vst [vmem:[#allocation60_spill] sm:$0xff] %v9173_v61  ;;  %v1180_v47 = vmax.f32 %v630_v36, 0.0 }
 0x171   :  { %v633_v48 = vpop.f32.mrf.mxu0  ;;  %v946_v44 = vpop.f32.mrf.mxu1  ;;  %10891 = vst [vmem:[#allocation57_spill] sm:$0xff] %v9161_v40 }
 0x172   :  { %v634_v19 = vadd.f32 %v633_v48, %v8242_v62  ;;  %v1177_v48 = vmax.f32 %v935_v13, 0.0  ;;  %v945_v13 = vadd.f32 %v9126_v49, %v8272_v16 }
 0x173   :  { %v9146_v1 = vpop.f32.mrf.mxu0  ;;  %v9148_v20 = vpop.f32.mrf.mxu1  ;;  %2434 = vmatmul.mubr.bf16.gmra.mxu0 %v9128_v6  ;;  %2747 = vmatmul.mubr.bf16.gmra.mxu1 %v9130_v3  ;;  %v1174_v6 = vmax.f32 %v933_v59, 0.0  ;;  %v618_v59 = vadd.f32 %v9080_v21, %v8268_v15  ;;  %v1175_v21 = vmax.f32 %v622_v5, 0.0  ;;  %v632_v5 = vadd.f32 %v9124_v23, %v8268_v15 }
 0x174   :  { %2443 = vmatprep.mubr.bf16.mxu0 %v9140_v53  ;;  %6836 = vmatprep.mubr.msk.bf16.mxu1 %vm2133_vm3, %v9136_v30  ;;  %v9163_v53 = vpack.c.bf16 %v1169_v55, %v1165_v9  ;;  %v947_v30 = vadd.f32 %v946_v44, %v8246_v63  ;;  %v1184_v31 = vmax.f32 %v634_v19, 0.0  ;;  %v1173_v9 = vmax.f32 %v931_v22, 0.0 }
 0x175   :  { %v639_v39 = vpop.f32.mrf.mxu0  ;;  %v952_v17 = vpop.f32.mrf.mxu1  ;;  %v9169_v38 = vpack.c.bf16 %v1178_v25, %v1174_v6  ;;  %v943_v6 = vadd.f32 %v942_v12, %v8246_v63  ;;  %v1171_v14 = vmax.f32 %v618_v59, 0.0 }
 0x176   :  { %10892 = vst [vmem:[#allocation58_spill] sm:$0xff] %v9163_v53  ;;  %v1186_v25 = vmax.f32 %v947_v30, 0.0  ;;  %v9206_v36 = vpack.c.bf16 %v1184_v31, %v1180_v47  ;;  %v640_v49 = vadd.f32 %v639_v39, %v8242_v62 }
 0x177   :  { %v9157_v10 = vpop.f32.mrf.mxu0  ;;  %v9159_v3 = vpop.f32.mrf.mxu1  ;;  %10893 = vst [vmem:[#allocation59_spill] sm:$0xff] %v9169_v38  ;;  %v9194_v12 = vpack.c.bf16 %v1175_v21, %v1171_v14  ;;  %v941_v21 = vadd.f32 %v9115_v11, %v8272_v16 }
 0x178   :  { %10898 = vst [vmem:[#allocation64_spill] sm:$0xff] %v9206_v36  ;;  %v1188_v39 = vmax.f32 %v640_v49, 0.0 }
 0x179   :  { %v643_v0 = vpop.f32.mrf.mxu0  ;;  %v956_v24 = vpop.f32.mrf.mxu1  ;;  %10895 = vst [vmem:[#allocation61_spill] sm:$0xff] %v9194_v12 }
 0x17a   :  { %v644_v22 = vadd.f32 %v643_v0, %v8242_v62  ;;  %v1185_v0 = vmax.f32 %v945_v13, 0.0  ;;  %v955_v13 = vadd.f32 %v9159_v3, %v8272_v16 }
 0x17b   :  { %v9179_v58 = vpop.f32.mrf.mxu0  ;;  %v9181_v55 = vpop.f32.mrf.mxu1  ;;  %2444 = vmatmul.mubr.bf16.gmra.mxu0 %v9161_v40  ;;  %2757 = vmatmul.mubr.bf16.gmra.mxu1 %v9163_v53  ;;  %v1182_v40 = vmax.f32 %v943_v6, 0.0  ;;  %v628_v6 = vadd.f32 %v9113_v33, %v8268_v15  ;;  %v1183_v33 = vmax.f32 %v632_v5, 0.0  ;;  %v642_v5 = vadd.f32 %v9157_v10, %v8268_v15 }
 0x17c   :  { %2453 = vmatprep.mubr.bf16.mxu0 %v9173_v61  ;;  %6837 = vmatprep.mubr.msk.bf16.mxu1 %vm2133_vm3, %v9169_v38  ;;  %v9196_v61 = vpack.c.bf16 %v1177_v48, %v1173_v9  ;;  %v957_v38 = vadd.f32 %v956_v24, %v8246_v63  ;;  %v1192_v31 = vmax.f32 %v644_v22, 0.0  ;;  %v1181_v9 = vmax.f32 %v941_v21, 0.0 }
 0x17d   :  { %v649_v43 = vpop.f32.mrf.mxu0  ;;  %v962_v44 = vpop.f32.mrf.mxu1  ;;  %v9202_v59 = vpack.c.bf16 %v1186_v25, %v1182_v40  ;;  %v953_v40 = vadd.f32 %v952_v17, %v8246_v63  ;;  %v1179_v14 = vmax.f32 %v628_v6, 0.0 }
 0x17e   :  { %10896 = vst [vmem:[#allocation62_spill] sm:$0xff] %v9196_v61  ;;  %v1194_v25 = vmax.f32 %v957_v38, 0.0  ;;  %v9239_v49 = vpack.c.bf16 %v1192_v31, %v1188_v39  ;;  %v650_v3 = vadd.f32 %v649_v43, %v8242_v62 }
 0x17f   :  { %v9190_v4 = vpop.f32.mrf.mxu0  ;;  %v9192_v53 = vpop.f32.mrf.mxu1  ;;  %10897 = vst [vmem:[#allocation63_spill] sm:$0xff] %v9202_v59  ;;  %v9227_v17 = vpack.c.bf16 %v1183_v33, %v1179_v14  ;;  %v951_v33 = vadd.f32 %v9148_v20, %v8272_v16 }
 0x180   :  { %10902 = vst [vmem:[#allocation68_spill] sm:$0xff] %v9239_v49  ;;  %v1196_v43 = vmax.f32 %v650_v3, 0.0 }
 0x181   :  { %v653_v19 = vpop.f32.mrf.mxu0  ;;  %v966_v30 = vpop.f32.mrf.mxu1  ;;  %10899 = vst [vmem:[#allocation65_spill] sm:$0xff] %v9227_v17 }
 0x182   :  { %v654_v21 = vadd.f32 %v653_v19, %v8242_v62  ;;  %v1193_v19 = vmax.f32 %v955_v13, 0.0  ;;  %v965_v13 = vadd.f32 %v9192_v53, %v8272_v16 }
 0x183   :  { %v9212_v23 = vpop.f32.mrf.mxu0  ;;  %v9214_v48 = vpop.f32.mrf.mxu1  ;;  %2454 = vmatmul.mubr.bf16.gmra.mxu0 %v9194_v12  ;;  %2767 = vmatmul.mubr.bf16.gmra.mxu1 %v9196_v61  ;;  %v1190_v12 = vmax.f32 %v953_v40, 0.0  ;;  %v638_v40 = vadd.f32 %v9146_v1, %v8268_v15  ;;  %v1191_v1 = vmax.f32 %v642_v5, 0.0  ;;  %v652_v5 = vadd.f32 %v9190_v4, %v8268_v15 }
 0x184   :  { %2463 = vmatprep.mubr.bf16.mxu0 %v9206_v36  ;;  %6838 = vmatprep.mubr.msk.bf16.mxu1 %vm2133_vm3, %v9202_v59  ;;  %v9229_v36 = vpack.c.bf16 %v1185_v0, %v1181_v9  ;;  %v967_v59 = vadd.f32 %v966_v30, %v8246_v63  ;;  %v1200_v31 = vmax.f32 %v654_v21, 0.0  ;;  %v1189_v9 = vmax.f32 %v951_v33, 0.0 }
 0x185   :  { %v659_v11 = vpop.f32.mrf.mxu0  ;;  %v972_v24 = vpop.f32.mrf.mxu1  ;;  %v9235_v6 = vpack.c.bf16 %v1194_v25, %v1190_v12  ;;  %v963_v12 = vadd.f32 %v962_v44, %v8246_v63  ;;  %v1187_v14 = vmax.f32 %v638_v40, 0.0 }
 0x186   :  { %10900 = vst [vmem:[#allocation66_spill] sm:$0xff] %v9229_v36  ;;  %v1202_v25 = vmax.f32 %v967_v59, 0.0  ;;  %v9272_v3 = vpack.c.bf16 %v1200_v31, %v1196_v43  ;;  %v660_v53 = vadd.f32 %v659_v11, %v8242_v62 }
 0x187   :  { %v9223_v47 = vpop.f32.mrf.mxu0  ;;  %v9225_v61 = vpop.f32.mrf.mxu1  ;;  %10901 = vst [vmem:[#allocation67_spill] sm:$0xff] %v9235_v6  ;;  %v9260_v44 = vpack.c.bf16 %v1191_v1, %v1187_v14  ;;  %v961_v1 = vadd.f32 %v9181_v55, %v8272_v16 }
 0x188   :  { %10906 = vst [vmem:[#allocation72_spill] sm:$0xff] %v9272_v3  ;;  %v1204_v11 = vmax.f32 %v660_v53, 0.0 }
 0x189   :  { %v663_v22 = vpop.f32.mrf.mxu0  ;;  %v976_v38 = vpop.f32.mrf.mxu1  ;;  %10903 = vst [vmem:[#allocation69_spill] sm:$0xff] %v9260_v44 }
 0x18a   :  { %v664_v33 = vadd.f32 %v663_v22, %v8242_v62  ;;  %v1201_v22 = vmax.f32 %v965_v13, 0.0  ;;  %v975_v13 = vadd.f32 %v9225_v61, %v8272_v16 }
 0x18b   :  { %v9245_v10 = vpop.f32.mrf.mxu0  ;;  %v9247_v0 = vpop.f32.mrf.mxu1  ;;  %2464 = vmatmul.mubr.bf16.gmra.mxu0 %v9227_v17  ;;  %2777 = vmatmul.mubr.bf16.gmra.mxu1 %v9229_v36  ;;  %v1198_v17 = vmax.f32 %v963_v12, 0.0  ;;  %v648_v12 = vadd.f32 %v9179_v58, %v8268_v15  ;;  %v1199_v58 = vmax.f32 %v652_v5, 0.0  ;;  %v662_v5 = vadd.f32 %v9223_v47, %v8268_v15 }
 0x18c   :  { %2473 = vmatprep.mubr.bf16.mxu0 %v9239_v49  ;;  %6839 = vmatprep.mubr.msk.bf16.mxu1 %vm2133_vm3, %v9235_v6  ;;  %v9262_v49 = vpack.c.bf16 %v1193_v19, %v1189_v9  ;;  %v977_v6 = vadd.f32 %v976_v38, %v8246_v63  ;;  %v1208_v31 = vmax.f32 %v664_v33, 0.0  ;;  %v1197_v9 = vmax.f32 %v961_v1, 0.0 }
 0x18d   :  { %v669_v20 = vpop.f32.mrf.mxu0  ;;  %v982_v30 = vpop.f32.mrf.mxu1  ;;  %v9268_v40 = vpack.c.bf16 %v1202_v25, %v1198_v17  ;;  %v973_v17 = vadd.f32 %v972_v24, %v8246_v63  ;;  %v1195_v14 = vmax.f32 %v648_v12, 0.0 }
 0x18e   :  { %10904 = vst [vmem:[#allocation70_spill] sm:$0xff] %v9262_v49  ;;  %v1210_v25 = vmax.f32 %v977_v6, 0.0  ;;  %v9305_v53 = vpack.c.bf16 %v1208_v31, %v1204_v11  ;;  %v670_v61 = vadd.f32 %v669_v20, %v8242_v62 }
 0x18f   :  { %v9256_v39 = vpop.f32.mrf.mxu0  ;;  %v9258_v36 = vpop.f32.mrf.mxu1  ;;  %10905 = vst [vmem:[#allocation71_spill] sm:$0xff] %v9268_v40  ;;  %v9293_v24 = vpack.c.bf16 %v1199_v58, %v1195_v14  ;;  %v971_v58 = vadd.f32 %v9214_v48, %v8272_v16 }
 0x190   :  { %10910 = vst [vmem:[#allocation76_spill] sm:$0xff] %v9305_v53 }
 0x191   :  { %v673_v21 = vpop.f32.mrf.mxu0  ;;  %v986_v59 = vpop.f32.mrf.mxu1  ;;  %10907 = vst [vmem:[#allocation73_spill] sm:$0xff] %v9293_v24 }
 0x192   :  { %v674_v1 = vadd.f32 %v673_v21, %v8242_v62  ;;  %v1209_v21 = vmax.f32 %v975_v13, 0.0  ;;  %v985_v13 = vadd.f32 %v9258_v36, %v8272_v16 }
 0x193   :  { %v9278_v4 = vpop.f32.mrf.mxu0  ;;  %v9280_v19 = vpop.f32.mrf.mxu1  ;;  %2474 = vmatmul.mubr.bf16.gmra.mxu0 %v9260_v44  ;;  %2787 = vmatmul.mubr.bf16.gmra.mxu1 %v9262_v49  ;;  %v1206_v44 = vmax.f32 %v973_v17, 0.0  ;;  %v658_v17 = vadd.f32 %v9212_v23, %v8268_v15  ;;  %v1207_v23 = vmax.f32 %v662_v5, 0.0  ;;  %v672_v5 = vadd.f32 %v9256_v39, %v8268_v15 }
 0x194   :  { %2483 = vmatprep.mubr.bf16.mxu0 %v9272_v3  ;;  %6840 = vmatprep.mubr.msk.bf16.mxu1 %vm2133_vm3, %v9268_v40  ;;  %v9295_v3 = vpack.c.bf16 %v1201_v22, %v1197_v9  ;;  %v987_v40 = vadd.f32 %v986_v59, %v8246_v63  ;;  %v1216_v31 = vmax.f32 %v674_v1, 0.0  ;;  %v1205_v9 = vmax.f32 %v971_v58, 0.0 }
 0x195   :  { %v679_v55 = vpop.f32.mrf.mxu0  ;;  %v992_v38 = vpop.f32.mrf.mxu1  ;;  %v9301_v12 = vpack.c.bf16 %v1210_v25, %v1206_v44  ;;  %v983_v44 = vadd.f32 %v982_v30, %v8246_v63  ;;  %v1203_v14 = vmax.f32 %v658_v17, 0.0  ;;  %v1212_v30 = vmax.f32 %v670_v61, 0.0 }
 0x196   :  { %10908 = vst [vmem:[#allocation74_spill] sm:$0xff] %v9295_v3  ;;  %v1218_v25 = vmax.f32 %v987_v40, 0.0  ;;  %v680_v36 = vadd.f32 %v679_v55, %v8242_v62 }
 0x197   :  { %v9289_v43 = vpop.f32.mrf.mxu0  ;;  %v9291_v49 = vpop.f32.mrf.mxu1  ;;  %10909 = vst [vmem:[#allocation75_spill] sm:$0xff] %v9301_v12  ;;  %v9342_v61 = vpack.c.bf16 %v1216_v31, %v1212_v30  ;;  %v1481_v31 = vld [vmem:[%s10738_s4] sm:$0xf] }
 0x198   :  { %v995_v30 = vadd.f32 %v9291_v49, %v8272_v16  ;;  %v678_v49 = vadd.f32 %v9278_v4, %v8268_v15 }
 0x199   :  { %v683_v33 = vpop.f32.mrf.mxu0  ;;  %v996_v6 = vpop.f32.mrf.mxu1  ;;  %10914 = vst [vmem:[#allocation80_spill] sm:$0xff] %v9342_v61 }
 0x19a   :  { %v684_v58 = vadd.f32 %v683_v33, %v8242_v62  ;;  %v1217_v33 = vmax.f32 %v985_v13, 0.0 }
 0x19b   :  { %v9311_v47 = vpop.f32.mrf.mxu0  ;;  %v9313_v22 = vpop.f32.mrf.mxu1  ;;  %2484 = vmatmul.mubr.bf16.gmra.mxu0 %v9293_v24  ;;  %2797 = vmatmul.mubr.bf16.gmra.mxu1 %v9295_v3  ;;  %v1214_v3 = vmax.f32 %v983_v44, 0.0  ;;  %v9332_v24 = vpack.c.bf16 %v1209_v21, %v1205_v9  ;;  %v668_v44 = vadd.f32 %v9245_v10, %v8268_v15  ;;  %v1215_v10 = vmax.f32 %v672_v5, 0.0 }
 0x19c   :  { %2493 = vmatprep.mubr.bf16.mxu0 %v9305_v53  ;;  %6841 = vmatprep.mubr.msk.bf16.mxu1 %vm2133_vm3, %v9301_v12  ;;  %v9330_v53 = vpack.c.bf16 %v1207_v23, %v1203_v14  ;;  %v997_v12 = vadd.f32 %v996_v6, %v8246_v63  ;;  %v981_v23 = vadd.f32 %v9247_v0, %v8272_v16 }
 0x19d   :  { %v9322_v48 = vpop.f32.mrf.mxu0  ;;  %v9324_v59 = vpop.f32.mrf.mxu1  ;;  %10912 = vst [vmem:[#allocation78_spill] sm:$0xff] %v9332_v24  ;;  %v9338_v17 = vpack.c.bf16 %v1218_v25, %v1214_v3  ;;  %v993_v3 = vadd.f32 %v992_v38, %v8246_v63  ;;  %v1224_v25 = vmax.f32 %v684_v58, 0.0  ;;  %v1211_v55 = vmax.f32 %v668_v44, 0.0 }
 0x19e   :  { %10911 = vst [vmem:[#allocation77_spill] sm:$0xff] %v9330_v53  ;;  %v1226_v14 = vmax.f32 %v997_v12, 0.0  ;;  %v1213_v9 = vmax.f32 %v981_v23, 0.0  ;;  %v682_v38 = vadd.f32 %v9289_v43, %v8268_v15  ;;  %v10916_v12 = vsub.s32 1, %v8222_v51 }
 0x19f   :  { %v9326_v11 = vpop.f32.mrf.mxu0  ;;  %v9328_v20 = vpop.f32.mrf.mxu1  ;;  %10913 = vst [vmem:[#allocation79_spill] sm:$0xff] %v9338_v17  ;;  %v9382_v44 = vpack.c.bf16 %v1215_v10, %v1211_v55  ;;  %v991_v23 = vadd.f32 %v9280_v19, %v8272_v16  ;;  %v1225_v55 = vmax.f32 %v995_v30, 0.0  ;;  %v690_v4 = vadd.f32 %v9322_v48, %v8242_v62 }
 0x1a0   :  { %v9380_v58 = vrot.slane %v1481_v31, %v10916_v12  ;;  %v9384_v43 = vpack.c.bf16 %v1217_v33, %v1213_v9  ;;  %v1223_v10 = vmax.f32 %v682_v38, 0.0  ;;  %v1003_v19 = vadd.f32 %v9324_v59, %v8246_v63 }
 0x1a1   :  { %v693_v1 = vpop.f32.mrf.mxu0  ;;  %v1006_v40 = vpop.f32.mrf.mxu1  ;;  %10917 = vst [vmem:[#allocation81_spill] sm:$0xff] %v9382_v44  ;;  %v692_v59 = vadd.f32 %v9326_v11, %v8268_v15 }
 0x1a2   :  { %10918 = vst [vmem:[#allocation82_spill] sm:$0xff] %v9384_v43 }
 0x1a3   :  { %v9348_v39 = vpop.f32.mrf.mxu0  ;;  %v9350_v21 = vpop.f32.mrf.mxu1  ;;  %2494 = vmatmul.mubr.bf16.gmra.mxu0 %v9330_v53  ;;  %2807 = vmatmul.mubr.bf16.gmra.mxu1 %v9332_v24  ;;  %v10915_v24 = vsub.s32 0, %v8222_v51  ;;  %v1007_v51 = vadd.f32 %v1006_v40, %v8246_v63  ;;  %v1221_v40 = vmax.f32 %v991_v23, 0.0  ;;  %v1230_v23 = vmax.f32 %v1003_v19, 0.0 }
 0x1a4   :  { %2503 = vmatprep.mubr.bf16.mxu0 %v9342_v61  ;;  %6842 = vmatprep.mubr.msk.bf16.mxu1 %vm2133_vm3, %v9338_v17  ;;  %v1220_v17 = vmax.f32 %v680_v36, 0.0  ;;  %v1222_v61 = vmax.f32 %v993_v3, 0.0 }
 0x1a5   :  { %v9359_v0 = vpop.f32.mrf.mxu0  ;;  %v9361_v6 = vpop.f32.mrf.mxu1  ;;  %v9376_v53 = vrot.slane %v1481_v31, %v10915_v24  ;;  %v694_v24 = vadd.f32 %v693_v1, %v8242_v62  ;;  %v1219_v1 = vmax.f32 %v678_v49, 0.0  ;;  %v1234_v38 = vmax.f32 %v1007_v51, 0.0 }
 0x1a6   :  { %v9390_v54 = vpack.c.bf16 %v1226_v14, %v1222_v61  ;;  %v9394_v31 = vpack.c.bf16 %v1224_v25, %v1220_v17  ;;  %v9409_v48 = vpack.c.bf16 %v1225_v55, %v1221_v40  ;;  %v1228_v49 = vmax.f32 %v690_v4, 0.0 }
 0x1a7   :  { %v9370_v5 = vpop.f32.mrf.mxu0  ;;  %v9372_v13 = vpop.f32.mrf.mxu1  ;;  %v1232_v14 = vmax.f32 %v694_v24, 0.0  ;;  %v9407_v12 = vpack.c.bf16 %v1223_v10, %v1219_v1  ;;  %v688_v51 = vadd.f32 %v9311_v47, %v8268_v15  ;;  %v1005_v24 = vadd.f32 %v9328_v20, %v8272_v16 }
 0x1a8   :  { %10919 = vst [vmem:[#allocation83_spill] sm:$0xff] %v9390_v54  ;;  %10920 = vst [vmem:[#allocation84_spill] sm:$0xff] %v9394_v31  ;;  %v1231_v47 = vmax.f32 %v692_v59, 0.0  ;;  %v700_v20 = vadd.f32 %v9359_v0, %v8242_v62 }
 0x1a9   :  { %v703_v36 = vpop.f32.mrf.mxu0  ;;  %v1016_v3 = vpop.f32.mrf.mxu1  ;;  %v9423_v19 = vpack.c.bf16 %v1232_v14, %v1228_v49 }
 0x1aa   :  { %v704_v10 = vadd.f32 %v703_v36, %v8242_v62  ;;  %v1017_v55 = vadd.f32 %v1016_v3, %v8246_v63  ;;  %v1013_v36 = vadd.f32 %v9361_v6, %v8246_v63  ;;  %v1233_v62 = vmax.f32 %v1005_v24, 0.0 }
 0x1ab   :  { %v2265_v33 = vpop.f32.mrf.mxu0  ;;  %2504 = vmatmul.mubr.bf16.gmra.mxu0 %v9382_v44  ;;  %v2578_v9 = vpop.f32.mrf.mxu1  ;;  %2817 = vmatmul.mubr.bf16.gmra.mxu1 %v9384_v43 }
 0x1ac   :  { %2513 = vmatprep.mubr.bf16.mxu0 %v9394_v31  ;;  %6843 = vmatprep.mubr.msk.bf16.mxu1 %vm2133_vm3, %v9390_v54  ;;  %v2266_v17 = vadd.f32 %v2265_v33, %v9376_v53  ;;  %v1242_v0 = vmax.f32 %v1017_v55, 0.0 }
 0x1ad   :  { %v2267_v61 = vpop.f32.mrf.mxu0  ;;  %v2580_v25 = vpop.f32.mrf.mxu1 }
 0x1ae   :  { %v2268_v30 = vadd.f32 %v2267_v61, %v9380_v58  ;;  %v2579_v31 = vadd.f32 %v2578_v9, %v2266_v17  ;;  %v9420_v9 = vpack.c.bf16 %v1234_v38, %v1230_v23  ;;  %v1227_v23 = vmax.f32 %v688_v51, 0.0 }
 0x1af   :  { %v2269_v43 = vpop.f32.mrf.mxu0  ;;  %v2582_v54 = vpop.f32.mrf.mxu1  ;;  %v1015_v51 = vadd.f32 %v9372_v13, %v8272_v16 }
 0x1b0   :  { %v2581_v44 = vadd.f32 %v2580_v25, %v2268_v30  ;;  %v2270_v33 = vadd.f32 %v2269_v43, %v9376_v53  ;;  %v1001_v43 = vadd.f32 %v9313_v22, %v8272_v16  ;;  %v1240_v22 = vmax.f32 %v704_v10, 0.0 }
 0x1b1   :  { %v2271_v1 = vpop.f32.mrf.mxu0  ;;  %v2584_v11 = vpop.f32.mrf.mxu1 }
 0x1b2   :  { %v2583_v40 = vadd.f32 %v2582_v54, %v2270_v33  ;;  %v2272_v4 = vadd.f32 %v2271_v1, %v9380_v58  ;;  %v3483_v54 = vmax.f32 %v2579_v31, 0.0  ;;  %v3484_v63 = vmax.f32 %v2581_v44, 0.0 }
 0x1b3   :  { %v2275_v3 = vpop.f32.mrf.mxu0  ;;  %2514 = vmatmul.mubr.bf16.gmra.mxu0 %v9407_v12  ;;  %v2588_v17 = vpop.f32.mrf.mxu1  ;;  %2827 = vmatmul.mubr.bf16.gmra.mxu1 %v9409_v48  ;;  %v1229_v33 = vmax.f32 %v1001_v43, 0.0  ;;  %v1236_v1 = vmax.f32 %v700_v20, 0.0  ;;  %v9443_v44 = vpack.c.bf16 %v1231_v47, %v1227_v23  ;;  %v698_v47 = vadd.f32 %v9348_v39, %v8268_v15 }
 0x1b4   :  { %v3487_v61 = vmax.f32 %v2583_v40, 0.0  ;;  %v2585_v25 = vadd.f32 %v2584_v11, %v2272_v4  ;;  %v2276_v14 = vadd.f32 %v2275_v3, %v9376_v53  ;;  %2523 = vmatprep.mubr.bf16.mxu0 %v9423_v19  ;;  %6844 = vmatprep.mubr.msk.bf16.mxu1 %vm2133_vm3, %v9420_v9  ;;  %v1238_v4 = vmax.f32 %v1013_v36, 0.0 }
 0x1b5   :  { %v2277_v6 = vpop.f32.mrf.mxu0  ;;  %v2590_v38 = vpop.f32.mrf.mxu1  ;;  %v9445_v55 = vpack.c.bf16 %v1233_v62, %v1229_v33  ;;  %v1241_v39 = vmax.f32 %v1015_v51, 0.0  ;;  %v1235_v23 = vmax.f32 %v698_v47, 0.0 }
 0x1b6   :  { %v9437_v30 = vpack.c.bf16 %v3487_v61, %v3483_v54  ;;  %v3488_v59 = vmax.f32 %v2585_v25, 0.0  ;;  %v2589_v49 = vadd.f32 %v2588_v17, %v2276_v14  ;;  %v2278_v31 = vadd.f32 %v2277_v6, %v9380_v58 }
 0x1b7   :  { %v2279_v11 = vpop.f32.mrf.mxu0  ;;  %v2592_v40 = vpop.f32.mrf.mxu1  ;;  %v702_v17 = vadd.f32 %v9370_v5, %v8268_v15  ;;  %v9451_v54 = vpack.c.bf16 %v1242_v0, %v1238_v4  ;;  %v9454_v25 = vpack.c.bf16 %v1240_v22, %v1236_v1  ;;  %v1011_v14 = vadd.f32 %v9350_v21, %v8272_v16 }
 0x1b8   :  { %v2591_v3 = vadd.f32 %v2590_v38, %v2278_v31  ;;  %v2280_v24 = vadd.f32 %v2279_v11, %v9376_v53  ;;  %v9441_v10 = vpack.c.bf16 %v3488_v59, %v3484_v63  ;;  %v3491_v13 = vmax.f32 %v2589_v49, 0.0 }
 0x1b9   :  { %v2281_v43 = vpop.f32.mrf.mxu0  ;;  %v2594_v20 = vpop.f32.mrf.mxu1  ;;  %v1239_v15 = vmax.f32 %v702_v17, 0.0  ;;  %v1237_v33 = vmax.f32 %v1011_v14, 0.0 }
 0x1ba   :  { %v2593_v36 = vadd.f32 %v2592_v40, %v2280_v24  ;;  %v2282_v61 = vadd.f32 %v2281_v43, %v9380_v58  ;;  %v3492_v22 = vmax.f32 %v2591_v3, 0.0 }
 0x1bb   :  { %v2285_v62 = vpop.f32.mrf.mxu0  ;;  %2524 = vmatmul.mubr.bf16.gmra.mxu0 %v9443_v44  ;;  %v2598_v5 = vpop.f32.mrf.mxu1  ;;  %2837 = vmatmul.mubr.bf16.gmra.mxu1 %v9445_v55  ;;  %v9472_v17 = vpack.c.bf16 %v1239_v15, %v1235_v23  ;;  %v9474_v3 = vpack.c.bf16 %v1241_v39, %v1237_v33 }
 0x1bc   :  { %v3495_v0 = vmax.f32 %v2593_v36, 0.0  ;;  %v2595_v63 = vadd.f32 %v2594_v20, %v2282_v61  ;;  %v2286_v6 = vadd.f32 %v2285_v62, %v9376_v53  ;;  %2533 = vmatprep.mubr.bf16.mxu0 %v9454_v25  ;;  %6845 = vmatprep.mubr.msk.bf16.mxu1 %vm2133_vm3, %v9451_v54 }
 0x1bd   :  { %v2287_v16 = vpop.f32.mrf.mxu0  ;;  %v2600_v21 = vpop.f32.mrf.mxu1 }
 0x1be   :  { %v9466_v38 = vpack.c.bf16 %v3495_v0, %v3491_v13  ;;  %v3496_v59 = vmax.f32 %v2595_v63, 0.0  ;;  %v2599_v31 = vadd.f32 %v2598_v5, %v2286_v6  ;;  %v2288_v49 = vadd.f32 %v2287_v16, %v9380_v58 }
 0x1bf   :  { %v2289_v1 = vpop.f32.mrf.mxu0  ;;  %v2602_v11 = vpop.f32.mrf.mxu1 }
 0x1c0   :  { %v2601_v40 = vadd.f32 %v2600_v21, %v2288_v49  ;;  %v2290_v4 = vadd.f32 %v2289_v1, %v9376_v53  ;;  %v9470_v24 = vpack.c.bf16 %v3496_v59, %v3492_v22  ;;  %v3499_v14 = vmax.f32 %v2599_v31, 0.0  ;;  %v7671_v1 = vld [vmem:[%s10737_s5 + $0xb8] sm:$0xff]  }
 0x1c1   :  { %v2291_v51 = vpop.f32.mrf.mxu0  ;;  %v2604_v43 = vpop.f32.mrf.mxu1 }
 0x1c2   :  { %v2603_v20 = vadd.f32 %v2602_v11, %v2290_v4  ;;  %v2292_v36 = vadd.f32 %v2291_v51, %v9380_v58  ;;  %v3500_v0 = vmax.f32 %v2601_v40, 0.0 }
 0x1c3   :  { %v2295_v61 = vpop.f32.mrf.mxu0  ;;  %2534 = vmatmul.mubr.bf16.gmra.mxu0 %v9472_v17  ;;  %v2608_v47 = vpop.f32.mrf.mxu1  ;;  %2847 = vmatmul.mubr.bf16.gmra.mxu1 %v9474_v3 }
 0x1c4   :  { %v3503_v62 = vmax.f32 %v2603_v20, 0.0  ;;  %v2605_v5 = vadd.f32 %v2604_v43, %v2292_v36  ;;  %v2296_v13 = vadd.f32 %v2295_v61, %v9376_v53  ;;  %2889 = vmatprep.mubr.bf16.mxu0 %v8287_v29  ;;  %6847 = vmatprep.mubr.msk.bf16.mxu1 %vm2133_vm3, %v8283_v26  ;;  %v7670_v26 = vld [vmem:[%s10737_s5 + $0x38] sm:$0xff]  }
 0x1c5   :  { %v2297_v63 = vpop.f32.mrf.mxu0  ;;  %v2610_v6 = vpop.f32.mrf.mxu1 }
 0x1c6   :  { %v9483_v15 = vpack.c.bf16 %v3503_v62, %v3499_v14  ;;  %v3504_v39 = vmax.f32 %v2605_v5, 0.0  ;;  %v2609_v22 = vadd.f32 %v2608_v47, %v2296_v13  ;;  %v2298_v16 = vadd.f32 %v2297_v63, %v9380_v58 }
 0x1c7   :  { %v2299_v21 = vpop.f32.mrf.mxu0  ;;  %v2612_v59 = vpop.f32.mrf.mxu1 }
 0x1c8   :  { %v2611_v31 = vadd.f32 %v2610_v6, %v2298_v16  ;;  %v2300_v49 = vadd.f32 %v2299_v21, %v9376_v53  ;;  %v9487_v23 = vpack.c.bf16 %v3504_v39, %v3500_v0  ;;  %v3507_v43 = vmax.f32 %v2609_v22, 0.0 }
 0x1c9   :  { %v2301_v29 = vpop.f32.mrf.mxu0  ;;  %v2614_v33 = vpop.f32.mrf.mxu1 }
 0x1ca   :  { %v2613_v11 = vadd.f32 %v2612_v59, %v2300_v49  ;;  %v2302_v40 = vadd.f32 %v2301_v29, %v9380_v58  ;;  %v3508_v47 = vmax.f32 %v2611_v31, 0.0  ;;  %v7674_v59 = vld [vmem:[%s10737_s5 + $0x28] sm:$0xff]  }
 0x1cb   :  { %v2305_v4 = vpop.f32.mrf.mxu0  ;;  %v2618_v51 = vpop.f32.mrf.mxu1  ;;  %2890 = vmatmul.mubr.bf16.vlgmr.msra.gmra.mxu0 %v8314_v50  ;;  %3203 = vmatmul.mubr.bf16.vlgmr.msra.gmra.mxu1 %v8316_v56  ;;  %v7672_v50 = vld [vmem:[%s10737_s5 + $0x30] sm:$0xff]   ;;  %v7675_v31 = vld [vmem:[%s10737_s5 + $0xa8] sm:$0xff]  }
 0x1cc   :  { %v3511_v20 = vmax.f32 %v2613_v11, 0.0  ;;  %v2615_v36 = vadd.f32 %v2614_v33, %v2302_v40  ;;  %v2306_v61 = vadd.f32 %v2305_v4, %v9376_v53  ;;  %2899 = vmatprep.mubr.bf16.mxu0 %v8332_v52  ;;  %6848 = vmatprep.mubr.msk.bf16.mxu1 %vm2133_vm3, %v8328_v2  ;;  %v7673_v56 = vld [vmem:[%s10737_s5 + $0xb0] sm:$0xff]  }
 0x1cd   :  { %4166 = vmatpush1.bf16.msra.mxu0 %v7670_v26  ;;  %v2307_v14 = vpop.f32.mrf.mxu0  ;;  %v2620_v62 = vpop.f32.mrf.mxu1  ;;  %4423 = vmatpush1.bf16.msra.mxu1 %v7671_v1 }
 0x1ce   :  { %v9508_v5 = vpack.c.bf16 %v3511_v20, %v3507_v43  ;;  %v3512_v13 = vmax.f32 %v2615_v36, 0.0  ;;  %v2619_v52 = vadd.f32 %v2618_v51, %v2306_v61  ;;  %v2308_v0 = vadd.f32 %v2307_v14, %v9380_v58  ;;  %4167 = vmatprep.subr.bf16.mxu0 %v10866_v45  ;;  %4424 = vmatprep.subr.bf16.mxu1 %v10866_v45 }
 0x1cf   :  { %v2309_v2 = vpop.f32.mrf.mxu0  ;;  %v2622_v63 = vpop.f32.mrf.mxu1 }
 0x1d0   :  { %v2621_v6 = vadd.f32 %v2620_v62, %v2308_v0  ;;  %v2310_v39 = vadd.f32 %v2309_v2, %v9376_v53  ;;  %v9514_v22 = vpack.c.bf16 %v3512_v13, %v3508_v47  ;;  %v3515_v1 = vmax.f32 %v2619_v52, 0.0  ;;  %v7678_v0 = vld [vmem:[%s10737_s5 + $0x18] sm:$0xff]  }
 0x1d1   :  { %v2311_v16 = vpop.f32.mrf.mxu0  ;;  %v2624_v21 = vpop.f32.mrf.mxu1  ;;  %4168 = vmatpush1.bf16.msra.mxu0 %v7672_v50  ;;  %4425 = vmatpush1.bf16.msra.mxu1 %v7673_v56  ;;  %v7679_v2 = vld [vmem:[%s10737_s5 + $0x98] sm:$0xff]  }
 0x1d2   :  { %v2623_v49 = vadd.f32 %v2622_v63, %v2310_v39  ;;  %v2312_v29 = vadd.f32 %v2311_v16, %v9380_v58  ;;  %4169 = vmatprep.subr.bf16.mxu0 %v10866_v45  ;;  %4426 = vmatprep.subr.bf16.mxu1 %v10866_v45  ;;  %v3516_v51 = vmax.f32 %v2621_v6, 0.0 }
 0x1d3   :  { %v2315_v33 = vpop.f32.mrf.mxu0  ;;  %v2628_v26 = vpop.f32.mrf.mxu1  ;;  %2900 = vmatmul.mubr.bf16.gmra.mxu0 %v8369_v34  ;;  %3213 = vmatmul.mubr.bf16.gmra.mxu1 %v8371_v35  ;;  %v7676_v34 = vld [vmem:[%s10737_s5 + $0x20] sm:$0xff]  }
 0x1d4   :  { %v3519_v11 = vmax.f32 %v2623_v49, 0.0  ;;  %v2625_v40 = vadd.f32 %v2624_v21, %v2312_v29  ;;  %v2316_v4 = vadd.f32 %v2315_v33, %v9376_v53  ;;  %2909 = vmatprep.mubr.bf16.mxu0 %v8395_v60  ;;  %6849 = vmatprep.mubr.msk.bf16.mxu1 %vm2133_vm3, %v8392_v18  ;;  %v7677_v35 = vld [vmem:[%s10737_s5 + $0xa0] sm:$0xff]  }
 0x1d5   :  { %v2317_v43 = vpop.f32.mrf.mxu0  ;;  %v2630_v20 = vpop.f32.mrf.mxu1  ;;  %4170 = vmatpush1.bf16.msra.mxu0 %v7674_v59  ;;  %4427 = vmatpush1.bf16.msra.mxu1 %v7675_v31 }
 0x1d6   :  { %v9537_v36 = vpack.c.bf16 %v3519_v11, %v3515_v1  ;;  %v3520_v61 = vmax.f32 %v2625_v40, 0.0  ;;  %v2629_v60 = vadd.f32 %v2628_v26, %v2316_v4  ;;  %v2318_v47 = vadd.f32 %v2317_v43, %v9380_v58  ;;  %4171 = vmatprep.subr.bf16.mxu0 %v10866_v45  ;;  %4428 = vmatprep.subr.bf16.mxu1 %v10866_v45 }
 0x1d7   :  { %v2319_v18 = vpop.f32.mrf.mxu0  ;;  %v2632_v14 = vpop.f32.mrf.mxu1 }
 0x1d8   :  { %v2631_v62 = vadd.f32 %v2630_v20, %v2318_v47  ;;  %v2320_v50 = vadd.f32 %v2319_v18, %v9376_v53  ;;  %v9543_v56 = vpack.c.bf16 %v3520_v61, %v3516_v51  ;;  %v3523_v21 = vmax.f32 %v2629_v60, 0.0  ;;  %v7682_v61 = vld [vmem:[%s10737_s5 + $0x8] sm:$0xff]  }
 0x1d9   :  { %v2321_v13 = vpop.f32.mrf.mxu0  ;;  %v2634_v52 = vpop.f32.mrf.mxu1  ;;  %4172 = vmatpush1.bf16.msra.mxu0 %v7676_v34  ;;  %4429 = vmatpush1.bf16.msra.mxu1 %v7677_v35  ;;  %v7683_v60 = vld [vmem:[%s10737_s5 + $0x88] sm:$0xff]  }
 0x1da   :  { %v2633_v63 = vadd.f32 %v2632_v14, %v2320_v50  ;;  %v2322_v6 = vadd.f32 %v2321_v13, %v9380_v58  ;;  %4173 = vmatprep.subr.bf16.mxu0 %v10866_v45  ;;  %4430 = vmatprep.subr.bf16.mxu1 %v10866_v45  ;;  %v3524_v29 = vmax.f32 %v2631_v62, 0.0 }
 0x1db   :  { %v2325_v39 = vpop.f32.mrf.mxu0  ;;  %v2638_v16 = vpop.f32.mrf.mxu1  ;;  %2910 = vmatmul.mubr.bf16.gmra.mxu0 %v8440_v41  ;;  %3223 = vmatmul.mubr.bf16.gmra.mxu1 %v8442_v42  ;;  %v7680_v41 = vld [vmem:[%s10737_s5 + $0x10] sm:$0xff]  }
 0x1dc   :  { %v3527_v59 = vmax.f32 %v2633_v63, 0.0  ;;  %v2635_v31 = vadd.f32 %v2634_v52, %v2322_v6  ;;  %v2326_v49 = vadd.f32 %v2325_v39, %v9376_v53  ;;  %2919 = vmatprep.mubr.bf16.mxu0 %v8458_v8  ;;  %6850 = vmatprep.mubr.msk.bf16.mxu1 %vm2133_vm3, %v8448_v46  ;;  %v7681_v42 = vld [vmem:[%s10737_s5 + $0x90] sm:$0xff]  }
 0x1dd   :  { %v2327_v33 = vpop.f32.mrf.mxu0  ;;  %v2640_v26 = vpop.f32.mrf.mxu1  ;;  %4174 = vmatpush1.bf16.msra.mxu0 %v7678_v0  ;;  %4431 = vmatpush1.bf16.msra.mxu1 %v7679_v2 }
 0x1de   :  { %v9566_v1 = vpack.c.bf16 %v3527_v59, %v3523_v21  ;;  %v3528_v11 = vmax.f32 %v2635_v31, 0.0  ;;  %v2639_v8 = vadd.f32 %v2638_v16, %v2326_v49  ;;  %v2328_v40 = vadd.f32 %v2327_v33, %v9380_v58  ;;  %4175 = vmatprep.subr.bf16.mxu0 %v10866_v45  ;;  %4432 = vmatprep.subr.bf16.mxu1 %v10866_v45 }
 0x1df   :  { %v2329_v46 = vpop.f32.mrf.mxu0  ;;  %v2642_v4 = vpop.f32.mrf.mxu1 }
 0x1e0   :  { %v2641_v51 = vadd.f32 %v2640_v26, %v2328_v40  ;;  %v2330_v43 = vadd.f32 %v2329_v46, %v9376_v53  ;;  %v9572_v20 = vpack.c.bf16 %v3528_v11, %v3524_v29  ;;  %v3531_v50 = vmax.f32 %v2639_v8, 0.0 }
 0x1e1   :  { %v2331_v34 = vpop.f32.mrf.mxu0  ;;  %v2644_v35 = vpop.f32.mrf.mxu1  ;;  %4176 = vmatpush1.bf16.msra.mxu0 %v7680_v41  ;;  %4433 = vmatpush1.bf16.msra.mxu1 %v7681_v42  ;;  %v7686_v42 = vld [vmem:[%s10737_s5 + $0x78] sm:$0xff]  }
 0x1e2   :  { %v2643_v47 = vadd.f32 %v2642_v4, %v2330_v43  ;;  %v2332_v18 = vadd.f32 %v2331_v34, %v9380_v58  ;;  %4177 = vmatprep.subr.bf16.mxu0 %v10866_v45  ;;  %4434 = vmatprep.subr.bf16.mxu1 %v10866_v45  ;;  %v3532_v2 = vmax.f32 %v2641_v51, 0.0 }
 0x1e3   :  { %v2335_v14 = vpop.f32.mrf.mxu0  ;;  %v2648_v62 = vpop.f32.mrf.mxu1  ;;  %2920 = vmatmul.mubr.bf16.gmra.mxu0 %v8495_v27  ;;  %3233 = vmatmul.mubr.bf16.gmra.mxu1 %v8497_v28  ;;  %v7684_v27 = vld [vmem:[%s10737_s5] sm:$0xff]  }
 0x1e4   :  { %v3535_v13 = vmax.f32 %v2643_v47, 0.0  ;;  %v2645_v52 = vadd.f32 %v2644_v35, %v2332_v18  ;;  %v2336_v0 = vadd.f32 %v2335_v14, %v9376_v53  ;;  %2929 = vmatprep.mubr.bf16.mxu0 %v8521_v57  ;;  %6851 = vmatprep.mubr.msk.bf16.mxu1 %vm2133_vm3, %v8518_v37  ;;  %v7685_v28 = vld [vmem:[%s10737_s5 + $0x80] sm:$0xff]   ;;  %v7687_v37 = vld [vmem:[%s10737_s5 + $0xf8] ss:$0 sps:$4 sm:$0x33]  }
 0x1e5   :  { %v2337_v63 = vpop.f32.mrf.mxu0  ;;  %v2650_v6 = vpop.f32.mrf.mxu1  ;;  %4178 = vmatpush1.bf16.msra.mxu0 %v7682_v61  ;;  %4435 = vmatpush1.bf16.msra.mxu1 %v7683_v60  ;;  %v4163_v40 = vsel %vm2218_vm2, %v7687_v37, 0  ;;  %v10921_v61 = vld [vmem:[#allocation4_spill] sm:$0xff]  ;;  %v10922_v60 = vld [vmem:[#allocation3_spill] sm:$0xff] }
 0x1e6   :  { %v9595_v39 = vpack.c.bf16 %v3535_v13, %v3531_v50  ;;  %v3536_v16 = vmax.f32 %v2645_v52, 0.0  ;;  %v2649_v57 = vadd.f32 %v2648_v62, %v2336_v0  ;;  %v2338_v21 = vadd.f32 %v2337_v63, %v9380_v58  ;;  %4179 = vmatprep.subr.bf16.mxu0 %v10866_v45  ;;  %4436 = vmatprep.subr.bf16.mxu1 %v10866_v45 }
 0x1e7   :  { %v2339_v59 = vpop.f32.mrf.mxu0  ;;  %v2652_v31 = vpop.f32.mrf.mxu1 }
 0x1e8   :  { %v2651_v49 = vadd.f32 %v2650_v6, %v2338_v21  ;;  %v2340_v29 = vadd.f32 %v2339_v59, %v9376_v53  ;;  %v9604_v33 = vpack.c.bf16 %v3536_v16, %v3532_v2  ;;  %v3539_v51 = vmax.f32 %v2649_v57, 0.0  ;;  %v7690_v57 = vld [vmem:[%s10737_s5 + $0x68] sm:$0xff]  }
 0x1e9   :  { %v2341_v26 = vpop.f32.mrf.mxu0  ;;  %v2654_v41 = vpop.f32.mrf.mxu1  ;;  %4180 = vmatpush1.bf16.msra.mxu0 %v7684_v27  ;;  %4437 = vmatpush1.bf16.msra.mxu1 %v7685_v28  ;;  %v7691_v21 = vld [vmem:[%s10737_s5 + $0xe8] sm:$0xff]  }
 0x1ea   :  { %v2653_v11 = vadd.f32 %v2652_v31, %v2340_v29  ;;  %v2342_v8 = vadd.f32 %v2341_v26, %v9380_v58  ;;  %4181 = vmatprep.subr.bf16.mxu0 %v10866_v45  ;;  %4438 = vmatprep.subr.bf16.mxu1 %v10866_v45  ;;  %v3540_v47 = vmax.f32 %v2651_v49, 0.0  ;;  %v10923_v29 = vld [vmem:[#allocation5_spill] sm:$0xff]  ;;  %v10924_v26 = vld [vmem:[#allocation6_spill] sm:$0xff] }
 0x1eb   :  { %v2345_v46 = vpop.f32.mrf.mxu0  ;;  %v2658_v4 = vpop.f32.mrf.mxu1  ;;  %2930 = vmatmul.mubr.bf16.gmra.mxu0 %v8566_v7  ;;  %3243 = vmatmul.mubr.bf16.gmra.mxu1 %v8568_v32  ;;  %v7688_v7 = vld [vmem:[%s10737_s5 + $0x70] sm:$0xff]  }
 0x1ec   :  { %v3543_v43 = vmax.f32 %v2653_v11, 0.0  ;;  %v2655_v34 = vadd.f32 %v2654_v41, %v2342_v8  ;;  %v2346_v35 = vadd.f32 %v2345_v46, %v9376_v53  ;;  %2939 = vmatprep.mubr.bf16.mxu0 %v10921_v61  ;;  %6852 = vmatprep.mubr.msk.bf16.mxu1 %vm2133_vm3, %v10922_v60  ;;  %v7689_v32 = vld [vmem:[%s10737_s5 + $0xf0] sm:$0xff]   ;;  %v10926_v46 = vld [vmem:[#allocation7_spill] sm:$0xff] }
 0x1ed   :  { %v2347_v18 = vpop.f32.mrf.mxu0  ;;  %v2660_v14 = vpop.f32.mrf.mxu1  ;;  %4182 = vmatpush2.bf16.msra.mxu0 %v7686_v42  ;;  %4439 = vmatpush2.bf16.msra.mxu1 %v4163_v40  ;;  %v10925_v40 = vld [vmem:[#allocation8_spill] sm:$0xff] }
 0x1ee   :  { %v9625_v62 = vpack.c.bf16 %v3543_v43, %v3539_v51  ;;  %v3544_v50 = vmax.f32 %v2655_v34, 0.0  ;;  %v2659_v13 = vadd.f32 %v2658_v4, %v2346_v35  ;;  %v2348_v52 = vadd.f32 %v2347_v18, %v9380_v58  ;;  %4183 = vmatprep.subr.bf16.mxu0 %v10866_v45  ;;  %4440 = vmatprep.subr.bf16.mxu1 %v10866_v45  ;;  %v7692_v34 = vld [vmem:[%s10737_s5 + $0x60] sm:$0xff]  }
 0x1ef   :  { %v2349_v0 = vpop.f32.mrf.mxu0  ;;  %v2662_v2 = vpop.f32.mrf.mxu1  ;;  %v7693_v35 = vld [vmem:[%s10737_s5 + $0xe0] sm:$0xff]  }
 0x1f0   :  { %v2661_v63 = vadd.f32 %v2660_v14, %v2348_v52  ;;  %v2350_v6 = vadd.f32 %v2349_v0, %v9376_v53  ;;  %v9631_v27 = vpack.c.bf16 %v3544_v50, %v3540_v47  ;;  %v3547_v41 = vmax.f32 %v2659_v13, 0.0 }
 0x1f1   :  { %v2351_v28 = vpop.f32.mrf.mxu0  ;;  %v2664_v16 = vpop.f32.mrf.mxu1  ;;  %4184 = vmatpush2.bf16.msra.mxu0 %v7688_v7  ;;  %4441 = vmatpush2.bf16.msra.mxu1 %v7689_v32 }
 0x1f2   :  { %v2663_v37 = vadd.f32 %v2662_v2, %v2350_v6  ;;  %v2352_v59 = vadd.f32 %v2351_v28, %v9380_v58  ;;  %4185 = vmatprep.subr.bf16.mxu0 %v10866_v45  ;;  %4442 = vmatprep.subr.bf16.mxu1 %v10866_v45  ;;  %v3548_v4 = vmax.f32 %v2661_v63, 0.0  ;;  %v7694_v2 = vld [vmem:[%s10737_s5 + $0x58] sm:$0xff]  }
 0x1f3   :  { %v2355_v31 = vpop.f32.mrf.mxu0  ;;  %v2668_v49 = vpop.f32.mrf.mxu1  ;;  %2940 = vmatmul.mubr.bf16.gmra.mxu0 %v10923_v29  ;;  %3253 = vmatmul.mubr.bf16.gmra.mxu1 %v10924_v26  ;;  %v7695_v28 = vld [vmem:[%s10737_s5 + $0xd8] sm:$0xff]   ;;  %v10929_v26 = vld [vmem:[#allocation12_spill] sm:$0xff] }
 0x1f4   :  { %v3551_v42 = vmax.f32 %v2663_v37, 0.0  ;;  %v2665_v11 = vadd.f32 %v2664_v16, %v2352_v59  ;;  %v2356_v8 = vadd.f32 %v2355_v31, %v9376_v53  ;;  %2949 = vmatprep.mubr.bf16.mxu0 %v10925_v40  ;;  %6853 = vmatprep.mubr.msk.bf16.mxu1 %vm2133_vm3, %v10926_v46  ;;  %v10928_v37 = vld [vmem:[#allocation10_spill] sm:$0xff] }
 0x1f5   :  { %v2357_v51 = vpop.f32.mrf.mxu0  ;;  %v2670_v43 = vpop.f32.mrf.mxu1  ;;  %4186 = vmatpush2.bf16.msra.mxu0 %v7690_v57  ;;  %4443 = vmatpush2.bf16.msra.mxu1 %v7691_v21  ;;  %v10927_v21 = vld [vmem:[#allocation9_spill] sm:$0xff] }
 0x1f6   :  { %v9654_v61 = vpack.c.bf16 %v3551_v42, %v3547_v41  ;;  %v3552_v60 = vmax.f32 %v2665_v11, 0.0  ;;  %v2669_v47 = vadd.f32 %v2668_v49, %v2356_v8  ;;  %v2358_v18 = vadd.f32 %v2357_v51, %v9380_v58  ;;  %4187 = vmatprep.subr.bf16.mxu0 %v10866_v45  ;;  %4444 = vmatprep.subr.bf16.mxu1 %v10866_v45  ;;  %v10930_v41 = vld [vmem:[#allocation11_spill] sm:$0xff] }
 0x1f7   :  { %v2359_v14 = vpop.f32.mrf.mxu0  ;;  %v2672_v7 = vpop.f32.mrf.mxu1 }
 0x1f8   :  { %v2671_v32 = vadd.f32 %v2670_v43, %v2358_v18  ;;  %v2360_v50 = vadd.f32 %v2359_v14, %v9376_v53  ;;  %v9660_v13 = vpack.c.bf16 %v3552_v60, %v3548_v4  ;;  %v3555_v59 = vmax.f32 %v2669_v47, 0.0 }
 0x1f9   :  { %v2361_v52 = vpop.f32.mrf.mxu0  ;;  %v2674_v0 = vpop.f32.mrf.mxu1  ;;  %4188 = vmatpush2.bf16.msra.mxu0 %v7692_v34  ;;  %4445 = vmatpush2.bf16.msra.mxu1 %v7693_v35 }
 0x1fa   :  { %v2673_v63 = vadd.f32 %v2672_v7, %v2360_v50  ;;  %v2362_v6 = vadd.f32 %v2361_v52, %v9380_v58  ;;  %4189 = vmatprep.subr.bf16.mxu0 %v10866_v45  ;;  %4446 = vmatprep.subr.bf16.mxu1 %v10866_v45  ;;  %v3556_v42 = vmax.f32 %v2671_v32, 0.0 }
 0x1fb   :  { %v2365_v16 = vpop.f32.mrf.mxu0  ;;  %v2678_v57 = vpop.f32.mrf.mxu1  ;;  %2950 = vmatmul.mubr.bf16.gmra.mxu0 %v10927_v21  ;;  %3263 = vmatmul.mubr.bf16.gmra.mxu1 %v10928_v37  ;;  %v10934_v21 = vld [vmem:[#allocation15_spill] sm:$0xff] }
 0x1fc   :  { %v3559_v31 = vmax.f32 %v2673_v63, 0.0  ;;  %v2675_v49 = vadd.f32 %v2674_v0, %v2362_v6  ;;  %v2366_v29 = vadd.f32 %v2365_v16, %v9376_v53  ;;  %2959 = vmatprep.mubr.bf16.mxu0 %v10929_v26  ;;  %6854 = vmatprep.mubr.msk.bf16.mxu1 %vm2133_vm3, %v10930_v41  ;;  %v10931_v0 = vld [vmem:[#allocation13_spill] sm:$0xff] }
 0x1fd   :  { %v2367_v11 = vpop.f32.mrf.mxu0  ;;  %v2680_v8 = vpop.f32.mrf.mxu1  ;;  %4190 = vmatpush2.bf16.msra.mxu0 %v7694_v2  ;;  %4447 = vmatpush2.bf16.msra.mxu1 %v7695_v28  ;;  %v10932_v2 = vld [vmem:[#allocation14_spill] sm:$0xff] }
 0x1fe   :  { %v9677_v40 = vpack.c.bf16 %v3559_v31, %v3555_v59  ;;  %v3560_v46 = vmax.f32 %v2675_v49, 0.0  ;;  %v2679_v4 = vadd.f32 %v2678_v57, %v2366_v29  ;;  %v2368_v51 = vadd.f32 %v2367_v11, %v9380_v58  ;;  %4191 = vmatprep.subr.bf16.mxu0 %v10866_v45  ;;  %4448 = vmatprep.subr.bf16.mxu1 %v10866_v45  ;;  %v10933_v57 = vld [vmem:[#allocation16_spill] sm:$0xff] }
 0x1ff   :  { %v2369_v43 = vpop.f32.mrf.mxu0  ;;  %v2682_v34 = vpop.f32.mrf.mxu1 }
 0x200   :  { %v2681_v35 = vadd.f32 %v2680_v8, %v2368_v51  ;;  %v2370_v60 = vadd.f32 %v2369_v43, %v9376_v53  ;;  %v9683_v47 = vpack.c.bf16 %v3560_v46, %v3556_v42  ;;  %v3563_v63 = vmax.f32 %v2679_v4, 0.0  ;;  %v7696_v42 = vld [vmem:[%s10737_s5 + $0x50] sm:$0xff]  }
 0x201   :  { %v2371_v18 = vpop.f32.mrf.mxu0  ;;  %v2684_v14 = vpop.f32.mrf.mxu1  ;;  %4192 = vmatpush2.bf16.msra.mxu0 %v7696_v42  ;;  %v7697_v51 = vld [vmem:[%s10737_s5 + $0xd0] sm:$0xff]  }
 0x202   :  { %v2683_v7 = vadd.f32 %v2682_v34, %v2370_v60  ;;  %v2372_v32 = vadd.f32 %v2371_v18, %v9380_v58  ;;  %v3564_v37 = vmax.f32 %v2681_v35, 0.0  ;;  %4193 = vmatprep.subr.bf16.mxu0 %v10866_v45  ;;  %4449 = vmatpush2.bf16.msra.mxu1 %v7697_v51 }
 0x203   :  { %v2375_v50 = vpop.f32.mrf.mxu0  ;;  %v2688_v52 = vpop.f32.mrf.mxu1  ;;  %2960 = vmatmul.mubr.bf16.gmra.mxu0 %v10931_v0  ;;  %3273 = vmatmul.mubr.bf16.gmra.mxu1 %v10932_v2 }
 0x204   :  { %v3567_v6 = vmax.f32 %v2683_v7, 0.0  ;;  %v2685_v28 = vadd.f32 %v2684_v14, %v2372_v32  ;;  %v2376_v16 = vadd.f32 %v2375_v50, %v9376_v53  ;;  %2969 = vmatprep.mubr.bf16.mxu0 %v10933_v57  ;;  %6855 = vmatprep.mubr.msk.bf16.mxu1 %vm2133_vm3, %v10934_v21  ;;  %v10935_v32 = vld [vmem:[#allocation17_spill] sm:$0xff]  ;;  %v10936_v50 = vld [vmem:[#allocation18_spill] sm:$0xff] }
 0x205   :  { %v2377_v59 = vpop.f32.mrf.mxu0  ;;  %v2690_v31 = vpop.f32.mrf.mxu1  ;;  %4450 = vmatprep.subr.bf16.mxu1 %v10866_v45 }
 0x206   :  { %v9692_v49 = vpack.c.bf16 %v3567_v6, %v3563_v63  ;;  %v3568_v29 = vmax.f32 %v2685_v28, 0.0  ;;  %v2689_v26 = vadd.f32 %v2688_v52, %v2376_v16  ;;  %v2378_v41 = vadd.f32 %v2377_v59, %v9380_v58  ;;  %v10937_v6 = vld [vmem:[#allocation20_spill] sm:$0xff]  ;;  %v10938_v28 = vld [vmem:[#allocation19_spill] sm:$0xff] }
 0x207   :  { %v2379_v11 = vpop.f32.mrf.mxu0  ;;  %v2692_v8 = vpop.f32.mrf.mxu1 }
 0x208   :  { %v2691_v46 = vadd.f32 %v2690_v31, %v2378_v41  ;;  %v2380_v4 = vadd.f32 %v2379_v11, %v9376_v53  ;;  %v9702_v43 = vpack.c.bf16 %v3568_v29, %v3564_v37  ;;  %v3571_v52 = vmax.f32 %v2689_v26, 0.0 }
 0x209   :  { %v2381_v34 = vpop.f32.mrf.mxu0  ;;  %v2694_v35 = vpop.f32.mrf.mxu1 }
 0x20a   :  { %v2693_v60 = vadd.f32 %v2692_v8, %v2380_v4  ;;  %v2382_v18 = vadd.f32 %v2381_v34, %v9380_v58  ;;  %v3572_v16 = vmax.f32 %v2691_v46, 0.0 }
 0x20b   :  { %v2385_v14 = vpop.f32.mrf.mxu0  ;;  %v2698_v7 = vpop.f32.mrf.mxu1  ;;  %2970 = vmatmul.mubr.bf16.gmra.mxu0 %v10935_v32  ;;  %3283 = vmatmul.mubr.bf16.gmra.mxu1 %v10936_v50 }
 0x20c   :  { %v3575_v0 = vmax.f32 %v2693_v60, 0.0  ;;  %v2695_v2 = vadd.f32 %v2694_v35, %v2382_v18  ;;  %v2386_v63 = vadd.f32 %v2385_v14, %v9376_v53  ;;  %2979 = vmatprep.mubr.bf16.mxu0 %v10937_v6  ;;  %6856 = vmatprep.mubr.msk.bf16.mxu1 %vm2133_vm3, %v10938_v28  ;;  %v10939_v18 = vld [vmem:[#allocation21_spill] sm:$0xff]  ;;  %v10940_v14 = vld [vmem:[#allocation22_spill] sm:$0xff] }
 0x20d   :  { %v2387_v57 = vpop.f32.mrf.mxu0  ;;  %v2700_v21 = vpop.f32.mrf.mxu1 }
 0x20e   :  { %v9713_v37 = vpack.c.bf16 %v3575_v0, %v3571_v52  ;;  %v3576_v59 = vmax.f32 %v2695_v2, 0.0  ;;  %v2699_v31 = vadd.f32 %v2698_v7, %v2386_v63  ;;  %v2388_v29 = vadd.f32 %v2387_v57, %v9380_v58  ;;  %v10941_v0 = vld [vmem:[#allocation24_spill] sm:$0xff]  ;;  %v10942_v2 = vld [vmem:[#allocation23_spill] sm:$0xff] }
 0x20f   :  { %v2389_v26 = vpop.f32.mrf.mxu0  ;;  %v2702_v41 = vpop.f32.mrf.mxu1 }
 0x210   :  { %v2701_v42 = vadd.f32 %v2700_v21, %v2388_v29  ;;  %v2390_v11 = vadd.f32 %v2389_v26, %v9376_v53  ;;  %v9717_v8 = vpack.c.bf16 %v3576_v59, %v3572_v16  ;;  %v3579_v7 = vmax.f32 %v2699_v31, 0.0  ;;  %v7698_v31 = vld [vmem:[%s10737_s5 + $0x48] sm:$0xff]  }
 0x211   :  { %v2391_v4 = vpop.f32.mrf.mxu0  ;;  %v2704_v51 = vpop.f32.mrf.mxu1  ;;  %4194 = vmatpush2.bf16.msra.mxu0 %v7698_v31 }
 0x212   :  { %v2703_v46 = vadd.f32 %v2702_v41, %v2390_v11  ;;  %v2392_v34 = vadd.f32 %v2391_v4, %v9380_v58  ;;  %v3580_v63 = vmax.f32 %v2701_v42, 0.0  ;;  %v7699_v42 = vld [vmem:[%s10737_s5 + $0xc8] sm:$0xff]   ;;  %4195 = vmatprep.subr.bf16.mxu0 %v10866_v45 }
 0x213   :  { %v2395_v35 = vpop.f32.mrf.mxu0  ;;  %v2708_v60 = vpop.f32.mrf.mxu1  ;;  %2980 = vmatmul.mubr.bf16.gmra.mxu0 %v10939_v18  ;;  %3293 = vmatmul.mubr.bf16.gmra.mxu1 %v10940_v14  ;;  %v10943_v14 = vld [vmem:[#allocation25_spill] sm:$0xff] }
 0x214   :  { %v3583_v32 = vmax.f32 %v2703_v46, 0.0  ;;  %v2705_v50 = vadd.f32 %v2704_v51, %v2392_v34  ;;  %v2396_v52 = vadd.f32 %v2395_v35, %v9376_v53  ;;  %2989 = vmatprep.mubr.bf16.mxu0 %v10941_v0  ;;  %6857 = vmatprep.mubr.msk.bf16.mxu1 %vm2133_vm3, %v10942_v2  ;;  %v10945_v2 = vld [vmem:[#allocation28_spill] sm:$0xff] }
 0x215   :  { %v2397_v6 = vpop.f32.mrf.mxu0  ;;  %v2710_v28 = vpop.f32.mrf.mxu1  ;;  %4451 = vmatpush2.bf16.msra.mxu1 %v7699_v42 }
 0x216   :  { %v9726_v16 = vpack.c.bf16 %v3583_v32, %v3579_v7  ;;  %v3584_v57 = vmax.f32 %v2705_v50, 0.0  ;;  %v2709_v21 = vadd.f32 %v2708_v60, %v2396_v52  ;;  %v2398_v59 = vadd.f32 %v2397_v6, %v9380_v58  ;;  %v10944_v7 = vld [vmem:[#allocation26_spill] sm:$0xff]  ;;  %4452 = vmatprep.subr.bf16.mxu1 %v10866_v45 }
 0x217   :  { %v2399_v29 = vpop.f32.mrf.mxu0  ;;  %v2712_v26 = vpop.f32.mrf.mxu1  ;;  %v7700_v45 = vld [vmem:[%s10737_s5 + $0x40] sm:$0xff]  }
 0x218   :  { %v2711_v41 = vadd.f32 %v2710_v28, %v2398_v59  ;;  %v2400_v11 = vadd.f32 %v2399_v29, %v9376_v53  ;;  %v9736_v4 = vpack.c.bf16 %v3584_v57, %v3580_v63  ;;  %v3587_v32 = vmax.f32 %v2709_v21, 0.0  ;;  %v10946_v63 = vld [vmem:[#allocation27_spill] sm:$0xff]  ;;  %4196 = vmatpush2.bf16.msra.mxu0 %v7700_v45 }
 0x219   :  { %v2401_v51 = vpop.f32.mrf.mxu0  ;;  %v2714_v46 = vpop.f32.mrf.mxu1 }
 0x21a   :  { %v2713_v34 = vadd.f32 %v2712_v26, %v2400_v11  ;;  %v2402_v35 = vadd.f32 %v2401_v51, %v9380_v58  ;;  %v3588_v6 = vmax.f32 %v2711_v41, 0.0 }
 0x21b   :  { %v2405_v60 = vpop.f32.mrf.mxu0  ;;  %v2718_v18 = vpop.f32.mrf.mxu1  ;;  %2990 = vmatmul.mubr.bf16.gmra.mxu0 %v10943_v14  ;;  %3303 = vmatmul.mubr.bf16.gmra.mxu1 %v10944_v7  ;;  %v10949_v7 = vld [vmem:[#allocation29_spill] sm:$0xff] }
 0x21c   :  { %v3591_v50 = vmax.f32 %v2713_v34, 0.0  ;;  %v2715_v52 = vadd.f32 %v2714_v46, %v2402_v35  ;;  %v2406_v0 = vadd.f32 %v2405_v60, %v9376_v53  ;;  %2999 = vmatprep.mubr.bf16.mxu0 %v10945_v2  ;;  %6858 = vmatprep.mubr.msk.bf16.mxu1 %vm2133_vm3, %v10946_v63  ;;  %v10951_v63 = vld [vmem:[#allocation32_spill] sm:$0xff] }
 0x21d   :  { %v2407_v28 = vpop.f32.mrf.mxu0  ;;  %v2720_v57 = vpop.f32.mrf.mxu1 }
 0x21e   :  { %v9747_v59 = vpack.c.bf16 %v3591_v50, %v3587_v32  ;;  %v3592_v31 = vmax.f32 %v2715_v52, 0.0  ;;  %v2719_v29 = vadd.f32 %v2718_v18, %v2406_v0  ;;  %v2408_v21 = vadd.f32 %v2407_v28, %v9380_v58  ;;  %v10950_v32 = vld [vmem:[#allocation30_spill] sm:$0xff] }
 0x21f   :  { %v2409_v26 = vpop.f32.mrf.mxu0  ;;  %v2722_v11 = vpop.f32.mrf.mxu1 }
 0x220   :  { %10947 = vst [vmem:[#allocation4_spill] sm:$0xff] %v9747_v59  ;;  %v2721_v42 = vadd.f32 %v2720_v57, %v2408_v21  ;;  %v2410_v51 = vadd.f32 %v2409_v26, %v9376_v53  ;;  %v9751_v46 = vpack.c.bf16 %v3592_v31, %v3588_v6  ;;  %v3595_v50 = vmax.f32 %v2719_v29, 0.0  ;;  %v10952_v6 = vld [vmem:[#allocation31_spill] sm:$0xff]  ;;  %v7701_v29 = vld [vmem:[%s10737_s5 + $0xc0] sm:$0xff]  }
 0x221   :  { %v2411_v34 = vpop.f32.mrf.mxu0  ;;  %v2724_v35 = vpop.f32.mrf.mxu1  ;;  %4453 = vmatpush2.bf16.msra.mxu1 %v7701_v29 }
 0x222   :  { %10948 = vst [vmem:[#allocation3_spill] sm:$0xff] %v9751_v46  ;;  %v2723_v41 = vadd.f32 %v2722_v11, %v2410_v51  ;;  %v2412_v60 = vadd.f32 %v2411_v34, %v9380_v58  ;;  %v3596_v28 = vmax.f32 %v2721_v42, 0.0 }
 0x223   :  { %v2415_v14 = vpop.f32.mrf.mxu0  ;;  %v2728_v18 = vpop.f32.mrf.mxu1  ;;  %3000 = vmatmul.mubr.bf16.gmra.mxu0 %v10949_v7  ;;  %3313 = vmatmul.mubr.bf16.gmra.mxu1 %v10950_v32 }
 0x224   :  { %v3599_v52 = vmax.f32 %v2723_v41, 0.0  ;;  %v2725_v0 = vadd.f32 %v2724_v35, %v2412_v60  ;;  %v2416_v2 = vadd.f32 %v2415_v14, %v9376_v53  ;;  %3009 = vmatprep.mubr.bf16.mxu0 %v10951_v63  ;;  %6859 = vmatprep.mubr.msk.bf16.mxu1 %vm2133_vm3, %v10952_v6 }
 0x225   :  { %v2417_v57 = vpop.f32.mrf.mxu0  ;;  %v2730_v31 = vpop.f32.mrf.mxu1 }
 0x226   :  { %v9763_v21 = vpack.c.bf16 %v3599_v52, %v3595_v50  ;;  %v3600_v26 = vmax.f32 %v2725_v0, 0.0  ;;  %v2729_v11 = vadd.f32 %v2728_v18, %v2416_v2  ;;  %v2418_v51 = vadd.f32 %v2417_v57, %v9380_v58  ;;  %v10955_v52 = vld [vmem:[#allocation33_spill] sm:$0xff]  ;;  %v10956_v0 = vld [vmem:[#allocation34_spill] sm:$0xff] }
 0x227   :  { %v2419_v34 = vpop.f32.mrf.mxu0  ;;  %v2732_v35 = vpop.f32.mrf.mxu1 }
 0x228   :  { %10953 = vst [vmem:[#allocation5_spill] sm:$0xff] %v9763_v21  ;;  %v2731_v41 = vadd.f32 %v2730_v31, %v2418_v51  ;;  %v2420_v60 = vadd.f32 %v2419_v34, %v9376_v53  ;;  %v9770_v42 = vpack.c.bf16 %v3600_v26, %v3596_v28  ;;  %v3603_v2 = vmax.f32 %v2729_v11, 0.0  ;;  %v10957_v31 = vld [vmem:[#allocation36_spill] sm:$0xff]  ;;  %v10958_v28 = vld [vmem:[#allocation35_spill] sm:$0xff] }
 0x229   :  { %v2421_v14 = vpop.f32.mrf.mxu0  ;;  %v2734_v45 = vpop.f32.mrf.mxu1 }
 0x22a   :  { %10954 = vst [vmem:[#allocation6_spill] sm:$0xff] %v9770_v42  ;;  %v2733_v7 = vadd.f32 %v2732_v35, %v2420_v60  ;;  %v2422_v32 = vadd.f32 %v2421_v14, %v9380_v58  ;;  %v3604_v26 = vmax.f32 %v2731_v41, 0.0 }
 0x22b   :  { %v2425_v18 = vpop.f32.mrf.mxu0  ;;  %v2738_v50 = vpop.f32.mrf.mxu1  ;;  %3010 = vmatmul.mubr.bf16.gmra.mxu0 %v10955_v52  ;;  %3323 = vmatmul.mubr.bf16.gmra.mxu1 %v10956_v0 }
 0x22c   :  { %v3607_v63 = vmax.f32 %v2733_v7, 0.0  ;;  %v2735_v6 = vadd.f32 %v2734_v45, %v2422_v32  ;;  %v2426_v57 = vadd.f32 %v2425_v18, %v9376_v53  ;;  %3019 = vmatprep.mubr.bf16.mxu0 %v10957_v31  ;;  %6860 = vmatprep.mubr.msk.bf16.mxu1 %vm2133_vm3, %v10958_v28 }
 0x22d   :  { %v2427_v51 = vpop.f32.mrf.mxu0  ;;  %v2740_v29 = vpop.f32.mrf.mxu1 }
 0x22e   :  { %v9779_v34 = vpack.c.bf16 %v3607_v63, %v3603_v2  ;;  %v3608_v35 = vmax.f32 %v2735_v6, 0.0  ;;  %v2739_v60 = vadd.f32 %v2738_v50, %v2426_v57  ;;  %v2428_v14 = vadd.f32 %v2427_v51, %v9380_v58  ;;  %v10961_v2 = vld [vmem:[#allocation37_spill] sm:$0xff]  ;;  %v10962_v63 = vld [vmem:[#allocation38_spill] sm:$0xff] }
 0x22f   :  { %v2429_v52 = vpop.f32.mrf.mxu0  ;;  %v2742_v11 = vpop.f32.mrf.mxu1 }
 0x230   :  { %10959 = vst [vmem:[#allocation8_spill] sm:$0xff] %v9779_v34  ;;  %v2741_v7 = vadd.f32 %v2740_v29, %v2428_v14  ;;  %v2430_v45 = vadd.f32 %v2429_v52, %v9376_v53  ;;  %v9783_v32 = vpack.c.bf16 %v3608_v35, %v3604_v26  ;;  %v3611_v50 = vmax.f32 %v2739_v60, 0.0  ;;  %v10963_v29 = vld [vmem:[#allocation40_spill] sm:$0xff]  ;;  %v10964_v26 = vld [vmem:[#allocation39_spill] sm:$0xff] }
 0x231   :  { %v2431_v18 = vpop.f32.mrf.mxu0  ;;  %v2744_v0 = vpop.f32.mrf.mxu1 }
 0x232   :  { %10960 = vst [vmem:[#allocation7_spill] sm:$0xff] %v9783_v32  ;;  %v2743_v31 = vadd.f32 %v2742_v11, %v2430_v45  ;;  %v2432_v41 = vadd.f32 %v2431_v18, %v9380_v58  ;;  %v3612_v35 = vmax.f32 %v2741_v7, 0.0 }
 0x233   :  { %v2435_v28 = vpop.f32.mrf.mxu0  ;;  %v2748_v21 = vpop.f32.mrf.mxu1  ;;  %3020 = vmatmul.mubr.bf16.gmra.mxu0 %v10961_v2  ;;  %3333 = vmatmul.mubr.bf16.gmra.mxu1 %v10962_v63 }
 0x234   :  { %v3615_v6 = vmax.f32 %v2743_v31, 0.0  ;;  %v2745_v57 = vadd.f32 %v2744_v0, %v2432_v41  ;;  %v2436_v51 = vadd.f32 %v2435_v28, %v9376_v53  ;;  %3029 = vmatprep.mubr.bf16.mxu0 %v10963_v29  ;;  %6861 = vmatprep.mubr.msk.bf16.mxu1 %vm2133_vm3, %v10964_v26 }
 0x235   :  { %v2437_v14 = vpop.f32.mrf.mxu0  ;;  %v2750_v52 = vpop.f32.mrf.mxu1 }
 0x236   :  { %v9792_v11 = vpack.c.bf16 %v3615_v6, %v3611_v50  ;;  %v3616_v45 = vmax.f32 %v2745_v57, 0.0  ;;  %v2749_v18 = vadd.f32 %v2748_v21, %v2436_v51  ;;  %v2438_v2 = vadd.f32 %v2437_v14, %v9380_v58  ;;  %v10967_v50 = vld [vmem:[#allocation41_spill] sm:$0xff]  ;;  %v10968_v6 = vld [vmem:[#allocation42_spill] sm:$0xff] }
 0x237   :  { %v2439_v63 = vpop.f32.mrf.mxu0  ;;  %v2752_v60 = vpop.f32.mrf.mxu1 }
 0x238   :  { %10965 = vst [vmem:[#allocation9_spill] sm:$0xff] %v9792_v11  ;;  %v2751_v31 = vadd.f32 %v2750_v52, %v2438_v2  ;;  %v2440_v0 = vadd.f32 %v2439_v63, %v9376_v53  ;;  %v9796_v41 = vpack.c.bf16 %v3616_v45, %v3612_v35  ;;  %v3619_v21 = vmax.f32 %v2749_v18, 0.0  ;;  %v10969_v52 = vld [vmem:[#allocation44_spill] sm:$0xff]  ;;  %v10970_v35 = vld [vmem:[#allocation43_spill] sm:$0xff] }
 0x239   :  { %v2441_v28 = vpop.f32.mrf.mxu0  ;;  %v2754_v29 = vpop.f32.mrf.mxu1 }
 0x23a   :  { %10966 = vst [vmem:[#allocation10_spill] sm:$0xff] %v9796_v41  ;;  %v2753_v34 = vadd.f32 %v2752_v60, %v2440_v0  ;;  %v2442_v7 = vadd.f32 %v2441_v28, %v9380_v58  ;;  %v3620_v45 = vmax.f32 %v2751_v31, 0.0 }
 0x23b   :  { %v2445_v26 = vpop.f32.mrf.mxu0  ;;  %v2758_v32 = vpop.f32.mrf.mxu1  ;;  %3030 = vmatmul.mubr.bf16.gmra.mxu0 %v10967_v50  ;;  %3343 = vmatmul.mubr.bf16.gmra.mxu1 %v10968_v6 }
 0x23c   :  { %v3623_v57 = vmax.f32 %v2753_v34, 0.0  ;;  %v2755_v51 = vadd.f32 %v2754_v29, %v2442_v7  ;;  %v2446_v14 = vadd.f32 %v2445_v26, %v9376_v53  ;;  %3039 = vmatprep.mubr.bf16.mxu0 %v10969_v52  ;;  %6862 = vmatprep.mubr.msk.bf16.mxu1 %vm2133_vm3, %v10970_v35 }
 0x23d   :  { %v2447_v2 = vpop.f32.mrf.mxu0  ;;  %v2760_v63 = vpop.f32.mrf.mxu1 }
 0x23e   :  { %v9805_v60 = vpack.c.bf16 %v3623_v57, %v3619_v21  ;;  %v3624_v0 = vmax.f32 %v2755_v51, 0.0  ;;  %v2759_v28 = vadd.f32 %v2758_v32, %v2446_v14  ;;  %v2448_v50 = vadd.f32 %v2447_v2, %v9380_v58  ;;  %v10973_v21 = vld [vmem:[#allocation45_spill] sm:$0xff]  ;;  %v10974_v57 = vld [vmem:[#allocation46_spill] sm:$0xff] }
 0x23f   :  { %v2449_v6 = vpop.f32.mrf.mxu0  ;;  %v2762_v18 = vpop.f32.mrf.mxu1 }
 0x240   :  { %10971 = vst [vmem:[#allocation12_spill] sm:$0xff] %v9805_v60  ;;  %v2761_v34 = vadd.f32 %v2760_v63, %v2448_v50  ;;  %v2450_v29 = vadd.f32 %v2449_v6, %v9376_v53  ;;  %v9809_v7 = vpack.c.bf16 %v3624_v0, %v3620_v45  ;;  %v3627_v32 = vmax.f32 %v2759_v28, 0.0  ;;  %v10975_v63 = vld [vmem:[#allocation48_spill] sm:$0xff]  ;;  %v10976_v45 = vld [vmem:[#allocation47_spill] sm:$0xff] }
 0x241   :  { %v2451_v26 = vpop.f32.mrf.mxu0  ;;  %v2764_v52 = vpop.f32.mrf.mxu1 }
 0x242   :  { %10972 = vst [vmem:[#allocation11_spill] sm:$0xff] %v9809_v7  ;;  %v2763_v11 = vadd.f32 %v2762_v18, %v2450_v29  ;;  %v2452_v31 = vadd.f32 %v2451_v26, %v9380_v58  ;;  %v3628_v0 = vmax.f32 %v2761_v34, 0.0 }
 0x243   :  { %v2455_v35 = vpop.f32.mrf.mxu0  ;;  %v2768_v41 = vpop.f32.mrf.mxu1  ;;  %3040 = vmatmul.mubr.bf16.gmra.mxu0 %v10973_v21  ;;  %3353 = vmatmul.mubr.bf16.gmra.mxu1 %v10974_v57 }
 0x244   :  { %v3631_v51 = vmax.f32 %v2763_v11, 0.0  ;;  %v2765_v14 = vadd.f32 %v2764_v52, %v2452_v31  ;;  %v2456_v2 = vadd.f32 %v2455_v35, %v9376_v53  ;;  %3049 = vmatprep.mubr.bf16.mxu0 %v10975_v63  ;;  %6863 = vmatprep.mubr.msk.bf16.mxu1 %vm2133_vm3, %v10976_v45 }
 0x245   :  { %v2457_v50 = vpop.f32.mrf.mxu0  ;;  %v2770_v6 = vpop.f32.mrf.mxu1 }
 0x246   :  { %v9818_v18 = vpack.c.bf16 %v3631_v51, %v3627_v32  ;;  %v3632_v29 = vmax.f32 %v2765_v14, 0.0  ;;  %v2769_v26 = vadd.f32 %v2768_v41, %v2456_v2  ;;  %v2458_v21 = vadd.f32 %v2457_v50, %v9380_v58  ;;  %v10979_v32 = vld [vmem:[#allocation49_spill] sm:$0xff]  ;;  %v10980_v51 = vld [vmem:[#allocation50_spill] sm:$0xff] }
 0x247   :  { %v2459_v57 = vpop.f32.mrf.mxu0  ;;  %v2772_v28 = vpop.f32.mrf.mxu1 }
 0x248   :  { %10977 = vst [vmem:[#allocation13_spill] sm:$0xff] %v9818_v18  ;;  %v2771_v11 = vadd.f32 %v2770_v6, %v2458_v21  ;;  %v2460_v52 = vadd.f32 %v2459_v57, %v9376_v53  ;;  %v9822_v31 = vpack.c.bf16 %v3632_v29, %v3628_v0  ;;  %v3635_v41 = vmax.f32 %v2769_v26, 0.0  ;;  %v10981_v6 = vld [vmem:[#allocation52_spill] sm:$0xff]  ;;  %v10982_v0 = vld [vmem:[#allocation51_spill] sm:$0xff] }
 0x249   :  { %v2461_v35 = vpop.f32.mrf.mxu0  ;;  %v2774_v63 = vpop.f32.mrf.mxu1 }
 0x24a   :  { %10978 = vst [vmem:[#allocation14_spill] sm:$0xff] %v9822_v31  ;;  %v2773_v60 = vadd.f32 %v2772_v28, %v2460_v52  ;;  %v2462_v34 = vadd.f32 %v2461_v35, %v9380_v58  ;;  %v3636_v29 = vmax.f32 %v2771_v11, 0.0 }
 0x24b   :  { %v2465_v45 = vpop.f32.mrf.mxu0  ;;  %v2778_v7 = vpop.f32.mrf.mxu1  ;;  %3050 = vmatmul.mubr.bf16.gmra.mxu0 %v10979_v32  ;;  %3363 = vmatmul.mubr.bf16.gmra.mxu1 %v10980_v51 }
 0x24c   :  { %v3639_v14 = vmax.f32 %v2773_v60, 0.0  ;;  %v2775_v2 = vadd.f32 %v2774_v63, %v2462_v34  ;;  %v2466_v50 = vadd.f32 %v2465_v45, %v9376_v53  ;;  %3059 = vmatprep.mubr.bf16.mxu0 %v10981_v6  ;;  %6864 = vmatprep.mubr.msk.bf16.mxu1 %vm2133_vm3, %v10982_v0 }
 0x24d   :  { %v2467_v21 = vpop.f32.mrf.mxu0  ;;  %v2780_v57 = vpop.f32.mrf.mxu1 }
 0x24e   :  { %v9831_v28 = vpack.c.bf16 %v3639_v14, %v3635_v41  ;;  %v3640_v52 = vmax.f32 %v2775_v2, 0.0  ;;  %v2779_v35 = vadd.f32 %v2778_v7, %v2466_v50  ;;  %v2468_v32 = vadd.f32 %v2467_v21, %v9380_v58  ;;  %v10985_v41 = vld [vmem:[#allocation53_spill] sm:$0xff]  ;;  %v10986_v14 = vld [vmem:[#allocation54_spill] sm:$0xff] }
 0x24f   :  { %v2469_v51 = vpop.f32.mrf.mxu0  ;;  %v2782_v26 = vpop.f32.mrf.mxu1 }
 0x250   :  { %10983 = vst [vmem:[#allocation16_spill] sm:$0xff] %v9831_v28  ;;  %v2781_v60 = vadd.f32 %v2780_v57, %v2468_v32  ;;  %v2470_v63 = vadd.f32 %v2469_v51, %v9376_v53  ;;  %v9835_v34 = vpack.c.bf16 %v3640_v52, %v3636_v29  ;;  %v3643_v7 = vmax.f32 %v2779_v35, 0.0  ;;  %v10987_v57 = vld [vmem:[#allocation56_spill] sm:$0xff]  ;;  %v10988_v29 = vld [vmem:[#allocation55_spill] sm:$0xff] }
 0x251   :  { %v2471_v45 = vpop.f32.mrf.mxu0  ;;  %v2784_v6 = vpop.f32.mrf.mxu1 }
 0x252   :  { %10984 = vst [vmem:[#allocation15_spill] sm:$0xff] %v9835_v34  ;;  %v2783_v18 = vadd.f32 %v2782_v26, %v2470_v63  ;;  %v2472_v11 = vadd.f32 %v2471_v45, %v9380_v58  ;;  %v3644_v52 = vmax.f32 %v2781_v60, 0.0 }
 0x253   :  { %v2475_v0 = vpop.f32.mrf.mxu0  ;;  %v2788_v31 = vpop.f32.mrf.mxu1  ;;  %3060 = vmatmul.mubr.bf16.gmra.mxu0 %v10985_v41  ;;  %3373 = vmatmul.mubr.bf16.gmra.mxu1 %v10986_v14 }
 0x254   :  { %v3647_v2 = vmax.f32 %v2783_v18, 0.0  ;;  %v2785_v50 = vadd.f32 %v2784_v6, %v2472_v11  ;;  %v2476_v21 = vadd.f32 %v2475_v0, %v9376_v53  ;;  %3069 = vmatprep.mubr.bf16.mxu0 %v10987_v57  ;;  %6865 = vmatprep.mubr.msk.bf16.mxu1 %vm2133_vm3, %v10988_v29 }
 0x255   :  { %v2477_v32 = vpop.f32.mrf.mxu0  ;;  %v2790_v51 = vpop.f32.mrf.mxu1 }
 0x256   :  { %v9844_v26 = vpack.c.bf16 %v3647_v2, %v3643_v7  ;;  %v3648_v63 = vmax.f32 %v2785_v50, 0.0  ;;  %v2789_v45 = vadd.f32 %v2788_v31, %v2476_v21  ;;  %v2478_v41 = vadd.f32 %v2477_v32, %v9380_v58  ;;  %v10991_v7 = vld [vmem:[#allocation57_spill] sm:$0xff]  ;;  %v10992_v2 = vld [vmem:[#allocation58_spill] sm:$0xff] }
 0x257   :  { %v2479_v14 = vpop.f32.mrf.mxu0  ;;  %v2792_v35 = vpop.f32.mrf.mxu1 }
 0x258   :  { %10989 = vst [vmem:[#allocation17_spill] sm:$0xff] %v9844_v26  ;;  %v2791_v18 = vadd.f32 %v2790_v51, %v2478_v41  ;;  %v2480_v6 = vadd.f32 %v2479_v14, %v9376_v53  ;;  %v9848_v11 = vpack.c.bf16 %v3648_v63, %v3644_v52  ;;  %v3651_v31 = vmax.f32 %v2789_v45, 0.0  ;;  %v10993_v51 = vld [vmem:[#allocation60_spill] sm:$0xff]  ;;  %v10994_v52 = vld [vmem:[#allocation59_spill] sm:$0xff] }
 0x259   :  { %v2481_v0 = vpop.f32.mrf.mxu0  ;;  %v2794_v57 = vpop.f32.mrf.mxu1 }
 0x25a   :  { %10990 = vst [vmem:[#allocation18_spill] sm:$0xff] %v9848_v11  ;;  %v2793_v28 = vadd.f32 %v2792_v35, %v2480_v6  ;;  %v2482_v60 = vadd.f32 %v2481_v0, %v9380_v58  ;;  %v3652_v63 = vmax.f32 %v2791_v18, 0.0 }
 0x25b   :  { %v2485_v29 = vpop.f32.mrf.mxu0  ;;  %v2798_v34 = vpop.f32.mrf.mxu1  ;;  %3070 = vmatmul.mubr.bf16.gmra.mxu0 %v10991_v7  ;;  %3383 = vmatmul.mubr.bf16.gmra.mxu1 %v10992_v2 }
 0x25c   :  { %v3655_v50 = vmax.f32 %v2793_v28, 0.0  ;;  %v2795_v21 = vadd.f32 %v2794_v57, %v2482_v60  ;;  %v2486_v32 = vadd.f32 %v2485_v29, %v9376_v53  ;;  %3079 = vmatprep.mubr.bf16.mxu0 %v10993_v51  ;;  %6866 = vmatprep.mubr.msk.bf16.mxu1 %vm2133_vm3, %v10994_v52 }
 0x25d   :  { %v2487_v41 = vpop.f32.mrf.mxu0  ;;  %v2800_v14 = vpop.f32.mrf.mxu1 }
 0x25e   :  { %v9857_v35 = vpack.c.bf16 %v3655_v50, %v3651_v31  ;;  %v3656_v6 = vmax.f32 %v2795_v21, 0.0  ;;  %v2799_v0 = vadd.f32 %v2798_v34, %v2486_v32  ;;  %v2488_v7 = vadd.f32 %v2487_v41, %v9380_v58  ;;  %v10997_v31 = vld [vmem:[#allocation61_spill] sm:$0xff]  ;;  %v10998_v50 = vld [vmem:[#allocation62_spill] sm:$0xff] }
 0x25f   :  { %v2489_v2 = vpop.f32.mrf.mxu0  ;;  %v2802_v45 = vpop.f32.mrf.mxu1 }
 0x260   :  { %10995 = vst [vmem:[#allocation20_spill] sm:$0xff] %v9857_v35  ;;  %v2801_v28 = vadd.f32 %v2800_v14, %v2488_v7  ;;  %v2490_v57 = vadd.f32 %v2489_v2, %v9376_v53  ;;  %v9861_v60 = vpack.c.bf16 %v3656_v6, %v3652_v63  ;;  %v3659_v34 = vmax.f32 %v2799_v0, 0.0  ;;  %v10999_v14 = vld [vmem:[#allocation64_spill] sm:$0xff]  ;;  %v11000_v63 = vld [vmem:[#allocation63_spill] sm:$0xff] }
 0x261   :  { %v2491_v29 = vpop.f32.mrf.mxu0  ;;  %v2804_v51 = vpop.f32.mrf.mxu1 }
 0x262   :  { %10996 = vst [vmem:[#allocation19_spill] sm:$0xff] %v9861_v60  ;;  %v2803_v26 = vadd.f32 %v2802_v45, %v2490_v57  ;;  %v2492_v18 = vadd.f32 %v2491_v29, %v9380_v58  ;;  %v3660_v6 = vmax.f32 %v2801_v28, 0.0 }
 0x263   :  { %v2495_v52 = vpop.f32.mrf.mxu0  ;;  %v2808_v11 = vpop.f32.mrf.mxu1  ;;  %3080 = vmatmul.mubr.bf16.gmra.mxu0 %v10997_v31  ;;  %3393 = vmatmul.mubr.bf16.gmra.mxu1 %v10998_v50 }
 0x264   :  { %v3663_v21 = vmax.f32 %v2803_v26, 0.0  ;;  %v2805_v32 = vadd.f32 %v2804_v51, %v2492_v18  ;;  %v2496_v41 = vadd.f32 %v2495_v52, %v9376_v53  ;;  %3089 = vmatprep.mubr.bf16.mxu0 %v10999_v14  ;;  %6867 = vmatprep.mubr.msk.bf16.mxu1 %vm2133_vm3, %v11000_v63 }
 0x265   :  { %v2497_v7 = vpop.f32.mrf.mxu0  ;;  %v2810_v2 = vpop.f32.mrf.mxu1 }
 0x266   :  { %v9870_v45 = vpack.c.bf16 %v3663_v21, %v3659_v34  ;;  %v3664_v57 = vmax.f32 %v2805_v32, 0.0  ;;  %v2809_v29 = vadd.f32 %v2808_v11, %v2496_v41  ;;  %v2498_v31 = vadd.f32 %v2497_v7, %v9380_v58  ;;  %v11003_v34 = vld [vmem:[#allocation65_spill] sm:$0xff]  ;;  %v11004_v21 = vld [vmem:[#allocation66_spill] sm:$0xff] }
 0x267   :  { %v2499_v50 = vpop.f32.mrf.mxu0  ;;  %v2812_v0 = vpop.f32.mrf.mxu1 }
 0x268   :  { %11001 = vst [vmem:[#allocation21_spill] sm:$0xff] %v9870_v45  ;;  %v2811_v26 = vadd.f32 %v2810_v2, %v2498_v31  ;;  %v2500_v51 = vadd.f32 %v2499_v50, %v9376_v53  ;;  %v9874_v18 = vpack.c.bf16 %v3664_v57, %v3660_v6  ;;  %v3667_v11 = vmax.f32 %v2809_v29, 0.0  ;;  %v11005_v2 = vld [vmem:[#allocation68_spill] sm:$0xff]  ;;  %v11006_v6 = vld [vmem:[#allocation67_spill] sm:$0xff] }
 0x269   :  { %v2501_v52 = vpop.f32.mrf.mxu0  ;;  %v2814_v14 = vpop.f32.mrf.mxu1 }
 0x26a   :  { %11002 = vst [vmem:[#allocation22_spill] sm:$0xff] %v9874_v18  ;;  %v2813_v35 = vadd.f32 %v2812_v0, %v2500_v51  ;;  %v2502_v28 = vadd.f32 %v2501_v52, %v9380_v58  ;;  %v3668_v57 = vmax.f32 %v2811_v26, 0.0 }
 0x26b   :  { %v2505_v63 = vpop.f32.mrf.mxu0  ;;  %v2818_v60 = vpop.f32.mrf.mxu1  ;;  %3090 = vmatmul.mubr.bf16.gmra.mxu0 %v11003_v34  ;;  %3403 = vmatmul.mubr.bf16.gmra.mxu1 %v11004_v21 }
 0x26c   :  { %v3671_v32 = vmax.f32 %v2813_v35, 0.0  ;;  %v2815_v41 = vadd.f32 %v2814_v14, %v2502_v28  ;;  %v2506_v7 = vadd.f32 %v2505_v63, %v9376_v53  ;;  %3099 = vmatprep.mubr.bf16.mxu0 %v11005_v2  ;;  %6868 = vmatprep.mubr.msk.bf16.mxu1 %vm2133_vm3, %v11006_v6 }
 0x26d   :  { %v2507_v31 = vpop.f32.mrf.mxu0  ;;  %v2820_v50 = vpop.f32.mrf.mxu1 }
 0x26e   :  { %v9883_v0 = vpack.c.bf16 %v3671_v32, %v3667_v11  ;;  %v3672_v51 = vmax.f32 %v2815_v41, 0.0  ;;  %v2819_v52 = vadd.f32 %v2818_v60, %v2506_v7  ;;  %v2508_v34 = vadd.f32 %v2507_v31, %v9380_v58  ;;  %v11009_v11 = vld [vmem:[#allocation69_spill] sm:$0xff]  ;;  %v11010_v32 = vld [vmem:[#allocation70_spill] sm:$0xff] }
 0x26f   :  { %v2509_v21 = vpop.f32.mrf.mxu0  ;;  %v2822_v29 = vpop.f32.mrf.mxu1 }
 0x270   :  { %11007 = vst [vmem:[#allocation24_spill] sm:$0xff] %v9883_v0  ;;  %v2821_v35 = vadd.f32 %v2820_v50, %v2508_v34  ;;  %v2510_v14 = vadd.f32 %v2509_v21, %v9376_v53  ;;  %v9887_v28 = vpack.c.bf16 %v3672_v51, %v3668_v57  ;;  %v3675_v60 = vmax.f32 %v2819_v52, 0.0  ;;  %v11011_v50 = vld [vmem:[#allocation72_spill] sm:$0xff]  ;;  %v11012_v57 = vld [vmem:[#allocation71_spill] sm:$0xff] }
 0x271   :  { %v2511_v63 = vpop.f32.mrf.mxu0  ;;  %v2824_v2 = vpop.f32.mrf.mxu1 }
 0x272   :  { %11008 = vst [vmem:[#allocation23_spill] sm:$0xff] %v9887_v28  ;;  %v2823_v45 = vadd.f32 %v2822_v29, %v2510_v14  ;;  %v2512_v26 = vadd.f32 %v2511_v63, %v9380_v58  ;;  %v3676_v51 = vmax.f32 %v2821_v35, 0.0 }
 0x273   :  { %v2515_v6 = vpop.f32.mrf.mxu0  ;;  %v2828_v18 = vpop.f32.mrf.mxu1  ;;  %3100 = vmatmul.mubr.bf16.gmra.mxu0 %v11009_v11  ;;  %3413 = vmatmul.mubr.bf16.gmra.mxu1 %v11010_v32 }
 0x274   :  { %v3679_v41 = vmax.f32 %v2823_v45, 0.0  ;;  %v2825_v7 = vadd.f32 %v2824_v2, %v2512_v26  ;;  %v2516_v31 = vadd.f32 %v2515_v6, %v9376_v53  ;;  %3109 = vmatprep.mubr.bf16.mxu0 %v11011_v50  ;;  %6869 = vmatprep.mubr.msk.bf16.mxu1 %vm2133_vm3, %v11012_v57 }
 0x275   :  { %v2517_v34 = vpop.f32.mrf.mxu0  ;;  %v2830_v21 = vpop.f32.mrf.mxu1 }
 0x276   :  { %v9896_v29 = vpack.c.bf16 %v3679_v41, %v3675_v60  ;;  %v3680_v14 = vmax.f32 %v2825_v7, 0.0  ;;  %v2829_v63 = vadd.f32 %v2828_v18, %v2516_v31  ;;  %v2518_v11 = vadd.f32 %v2517_v34, %v9380_v58  ;;  %v11015_v60 = vld [vmem:[#allocation73_spill] sm:$0xff]  ;;  %v11016_v41 = vld [vmem:[#allocation74_spill] sm:$0xff] }
 0x277   :  { %v2519_v32 = vpop.f32.mrf.mxu0  ;;  %v2832_v52 = vpop.f32.mrf.mxu1 }
 0x278   :  { %11013 = vst [vmem:[#allocation25_spill] sm:$0xff] %v9896_v29  ;;  %v2831_v45 = vadd.f32 %v2830_v21, %v2518_v11  ;;  %v2520_v2 = vadd.f32 %v2519_v32, %v9376_v53  ;;  %v9900_v26 = vpack.c.bf16 %v3680_v14, %v3676_v51  ;;  %v3683_v18 = vmax.f32 %v2829_v63, 0.0  ;;  %v11017_v21 = vld [vmem:[#allocation76_spill] sm:$0xff]  ;;  %v11018_v51 = vld [vmem:[#allocation75_spill] sm:$0xff] }
 0x279   :  { %v2521_v6 = vpop.f32.mrf.mxu0  ;;  %v2834_v50 = vpop.f32.mrf.mxu1 }
 0x27a   :  { %11014 = vst [vmem:[#allocation26_spill] sm:$0xff] %v9900_v26  ;;  %v2833_v0 = vadd.f32 %v2832_v52, %v2520_v2  ;;  %v2522_v35 = vadd.f32 %v2521_v6, %v9380_v58  ;;  %v3684_v14 = vmax.f32 %v2831_v45, 0.0 }
 0x27b   :  { %v2525_v57 = vpop.f32.mrf.mxu0  ;;  %v2838_v28 = vpop.f32.mrf.mxu1  ;;  %3110 = vmatmul.mubr.bf16.gmra.mxu0 %v11015_v60  ;;  %3423 = vmatmul.mubr.bf16.gmra.mxu1 %v11016_v41 }
 0x27c   :  { %v3687_v7 = vmax.f32 %v2833_v0, 0.0  ;;  %v2835_v31 = vadd.f32 %v2834_v50, %v2522_v35  ;;  %v2526_v34 = vadd.f32 %v2525_v57, %v9376_v53  ;;  %3119 = vmatprep.mubr.bf16.mxu0 %v11017_v21  ;;  %6870 = vmatprep.mubr.msk.bf16.mxu1 %vm2133_vm3, %v11018_v51 }
 0x27d   :  { %v2527_v11 = vpop.f32.mrf.mxu0  ;;  %v2840_v32 = vpop.f32.mrf.mxu1 }
 0x27e   :  { %v9909_v52 = vpack.c.bf16 %v3687_v7, %v3683_v18  ;;  %v3688_v2 = vmax.f32 %v2835_v31, 0.0  ;;  %v2839_v6 = vadd.f32 %v2838_v28, %v2526_v34  ;;  %v2528_v60 = vadd.f32 %v2527_v11, %v9380_v58  ;;  %v11021_v18 = vld [vmem:[#allocation77_spill] sm:$0xff]  ;;  %v11022_v7 = vld [vmem:[#allocation78_spill] sm:$0xff] }
 0x27f   :  { %v2529_v41 = vpop.f32.mrf.mxu0  ;;  %v2842_v63 = vpop.f32.mrf.mxu1 }
 0x280   :  { %11019 = vst [vmem:[#allocation28_spill] sm:$0xff] %v9909_v52  ;;  %v2841_v0 = vadd.f32 %v2840_v32, %v2528_v60  ;;  %v2530_v50 = vadd.f32 %v2529_v41, %v9376_v53  ;;  %v9913_v35 = vpack.c.bf16 %v3688_v2, %v3684_v14  ;;  %v3691_v28 = vmax.f32 %v2839_v6, 0.0  ;;  %v11023_v32 = vld [vmem:[#allocation80_spill] sm:$0xff]  ;;  %v11024_v14 = vld [vmem:[#allocation79_spill] sm:$0xff] }
 0x281   :  { %v2531_v57 = vpop.f32.mrf.mxu0  ;;  %v2844_v21 = vpop.f32.mrf.mxu1 }
 0x282   :  { %11020 = vst [vmem:[#allocation27_spill] sm:$0xff] %v9913_v35  ;;  %v2843_v29 = vadd.f32 %v2842_v63, %v2530_v50  ;;  %v2532_v45 = vadd.f32 %v2531_v57, %v9380_v58  ;;  %v3692_v2 = vmax.f32 %v2841_v0, 0.0  ;;  %v11027_v35 = vld [vmem:[#allocation81_spill] sm:$0xff] }
 0x283   :  { %v2535_v51 = vpop.f32.mrf.mxu0  ;;  %v2848_v26 = vpop.f32.mrf.mxu1  ;;  %3120 = vmatmul.mubr.bf16.gmra.mxu0 %v11021_v18  ;;  %3433 = vmatmul.mubr.bf16.gmra.mxu1 %v11022_v7 }
 0x284   :  { %v3695_v31 = vmax.f32 %v2843_v29, 0.0  ;;  %v2845_v34 = vadd.f32 %v2844_v21, %v2532_v45  ;;  %v2536_v11 = vadd.f32 %v2535_v51, %v9376_v53  ;;  %3129 = vmatprep.mubr.bf16.mxu0 %v11023_v32  ;;  %6871 = vmatprep.mubr.msk.bf16.mxu1 %vm2133_vm3, %v11024_v14 }
 0x285   :  { %v2537_v60 = vpop.f32.mrf.mxu0  ;;  %v2850_v41 = vpop.f32.mrf.mxu1 }
 0x286   :  { %v9922_v63 = vpack.c.bf16 %v3695_v31, %v3691_v28  ;;  %v3696_v50 = vmax.f32 %v2845_v34, 0.0  ;;  %v2849_v57 = vadd.f32 %v2848_v26, %v2536_v11  ;;  %v2538_v18 = vadd.f32 %v2537_v60, %v9380_v58  ;;  %v11028_v31 = vld [vmem:[#allocation82_spill] sm:$0xff]  ;;  %v11029_v60 = vld [vmem:[#allocation84_spill] sm:$0xff] }
 0x287   :  { %v2539_v7 = vpop.f32.mrf.mxu0  ;;  %v2852_v6 = vpop.f32.mrf.mxu1 }
 0x288   :  { %11025 = vst [vmem:[#allocation29_spill] sm:$0xff] %v9922_v63  ;;  %v2851_v29 = vadd.f32 %v2850_v41, %v2538_v18  ;;  %v2540_v21 = vadd.f32 %v2539_v7, %v9376_v53  ;;  %v9926_v45 = vpack.c.bf16 %v3696_v50, %v3692_v2  ;;  %v3699_v26 = vmax.f32 %v2849_v57, 0.0  ;;  %v11030_v41 = vld [vmem:[#allocation83_spill] sm:$0xff] }
 0x289   :  { %v2541_v51 = vpop.f32.mrf.mxu0  ;;  %v2854_v32 = vpop.f32.mrf.mxu1  ;;  %v10833_v50 = vmov 0.0  }
 0x28a   :  { %11026 = vst [vmem:[#allocation30_spill] sm:$0xff] %v9926_v45  ;;  %v2853_v52 = vadd.f32 %v2852_v6, %v2540_v21  ;;  %v2542_v0 = vadd.f32 %v2541_v51, %v9380_v58  ;;  %7213 = vmatprep.subr.bf16.mxu0 %v10833_v50  ;;  %7221 = vmatprep.subr.bf16.mxu1 %v10833_v50  ;;  %v3700_v58 = vmax.f32 %v2851_v29, 0.0  ;;  %v7758_v29 = vld [vmem:[%s10738_s4] sm:$0xf] }
 0x28b   :  { %v2891_v14 = vpop.f32.mrf.mxu0  ;;  %3130 = vmatmul.mubr.bf16.gmra.mxu0 %v11027_v35  ;;  %v3204_v28 = vpop.f32.mrf.mxu1  ;;  %3443 = vmatmul.mubr.bf16.gmra.mxu1 %v11028_v31 }
 0x28c   :  { %v3703_v34 = vmax.f32 %v2853_v52, 0.0  ;;  %v2855_v11 = vadd.f32 %v2854_v32, %v2542_v0  ;;  %3139 = vmatprep.mubr.bf16.mxu0 %v11029_v60  ;;  %6872 = vmatprep.mubr.msk.bf16.mxu1 %vm2133_vm3, %v11030_v41  ;;  %v11033_v0 = vld [vmem:[#allocation2_spill] sm:$0xff] }
 0x28d   :  { %v2893_v53 = vpop.f32.mrf.mxu0  ;;  %v3206_v2 = vpop.f32.mrf.mxu1  ;;  %v11034_v31 = vsub.s32 3, %v11033_v0  ;;  %v11035_v50 = vsub.s32 2, %v11033_v0 }
 0x28e   :  { %v9936_v35 = vpack.c.bf16 %v3703_v34, %v3699_v26  ;;  %v3704_v18 = vmax.f32 %v2855_v11, 0.0 }
 0x28f   :  { %v2895_v7 = vpop.f32.mrf.mxu0  ;;  %v3208_v57 = vpop.f32.mrf.mxu1  ;;  %v9949_v26 = vrot.slane %v7758_v29, %v11034_v31 }
 0x290   :  { %11031 = vst [vmem:[#allocation32_spill] sm:$0xff] %v9936_v35  ;;  %v9938_v52 = vpack.c.bf16 %v3704_v18, %v3700_v58  ;;  %v9958_v35 = vrot.slane %v7758_v29, %v11035_v50 }
 0x291   :  { %v2897_v6 = vpop.f32.mrf.mxu0  ;;  %v3210_v21 = vpop.f32.mrf.mxu1 }
 0x292   :  { %11032 = vst [vmem:[#allocation31_spill] sm:$0xff] %v9938_v52 }
 0x293   :  { %v2901_v51 = vpop.f32.mrf.mxu0  ;;  %3140 = vmatmul.mubr.bf16.gmra.mxu0 %v9407_v12  ;;  %v9941_v32 = vpop.f32.mrf.mxu1  ;;  %3453 = vmatmul.mubr.bf16.gmra.mxu1 %v9409_v48  ;;  %v2898_v12 = vadd.f32 %v2897_v6, %v9949_v26  ;;  %v2894_v48 = vadd.f32 %v2893_v53, %v9949_v26  ;;  %v2896_v6 = vadd.f32 %v2895_v7, %v9958_v35 }
 0x294   :  { %3149 = vmatprep.mubr.bf16.mxu0 %v9423_v19  ;;  %6873 = vmatprep.mubr.msk.bf16.mxu1 %vm2133_vm3, %v9420_v9 }
 0x295   :  { %v2903_v34 = vpop.f32.mrf.mxu0  ;;  %v3216_v11 = vpop.f32.mrf.mxu1  ;;  %v3211_v31 = vadd.f32 %v3210_v21, %v2898_v12  ;;  %v3207_v19 = vadd.f32 %v3206_v2, %v2894_v48  ;;  %v2892_v21 = vadd.f32 %v2891_v14, %v9958_v35  ;;  %v3209_v45 = vadd.f32 %v3208_v57, %v2896_v6 }
 0x297   :  { %v2905_v60 = vpop.f32.mrf.mxu0  ;;  %v3218_v41 = vpop.f32.mrf.mxu1  ;;  %v3490_v29 = vmax.f32 %v3211_v31, 0.0  ;;  %v3486_v63 = vmax.f32 %v3207_v19, 0.0  ;;  %v3205_v48 = vadd.f32 %v3204_v28, %v2892_v21  ;;  %v3489_v57 = vmax.f32 %v3209_v45, 0.0 }
 0x299   :  { %v2907_v58 = vpop.f32.mrf.mxu0  ;;  %v3220_v18 = vpop.f32.mrf.mxu1  ;;  %v3485_v31 = vmax.f32 %v3205_v48, 0.0 }
 0x29a   :  { %v2908_v0 = vadd.f32 %v2907_v58, %v9949_v26 }
 0x29b   :  { %v9960_v52 = vpop.f32.mrf.mxu0  ;;  %3150 = vmatmul.mubr.bf16.gmra.mxu0 %v9443_v44  ;;  %v9963_v9 = vpop.f32.mrf.mxu1  ;;  %3463 = vmatmul.mubr.bf16.gmra.mxu1 %v9445_v55  ;;  %v2904_v55 = vadd.f32 %v2903_v34, %v9949_v26  ;;  %v2906_v34 = vadd.f32 %v2905_v60, %v9958_v35 }
 0x29c   :  { %3159 = vmatprep.mubr.bf16.mxu0 %v9454_v25  ;;  %6874 = vmatprep.mubr.msk.bf16.mxu1 %vm2133_vm3, %v9451_v54  ;;  %v3710_v25 = vpack.c.bf16 %v3490_v29, %v3486_v63  ;;  %v3221_v42 = vadd.f32 %v3220_v18, %v2908_v0  ;;  %v7702_v54 = vld [vmem:[%s10739_s7 + $0x8] sm:$0x3f]   ;;  %v7703_v63 = vld [vmem:[%s10739_s7 + $0x18] sm:$0x3f]   ;;  %v3709_v29 = vpack.c.bf16 %v3489_v57, %v3485_v31 }
 0x29d   :  { %v2913_v53 = vpop.f32.mrf.mxu0  ;;  %v3226_v50 = vpop.f32.mrf.mxu1  ;;  %v3217_v58 = vadd.f32 %v3216_v11, %v2904_v55  ;;  %v3219_v60 = vadd.f32 %v3218_v41, %v2906_v34  ;;  %v4789_v21 = vsel %vm380_vm0, %v7702_v54, 0 }
 0x29e   :  { %v3498_v19 = vmax.f32 %v3221_v42, 0.0 }
 0x29f   :  { %v2915_v44 = vpop.f32.mrf.mxu0  ;;  %v3228_v12 = vpop.f32.mrf.mxu1  ;;  %v3494_v6 = vmax.f32 %v3217_v58, 0.0  ;;  %v3497_v41 = vmax.f32 %v3219_v60, 0.0  ;;  %v2912_v58 = vadd.f32 %v9960_v52, %v9958_v35 }
 0x2a0   :  { %v2916_v54 = vadd.f32 %v2915_v44, %v9958_v35 }
 0x2a1   :  { %v2917_v2 = vpop.f32.mrf.mxu0  ;;  %v3230_v7 = vpop.f32.mrf.mxu1  ;;  %v3714_v46 = vpack.c.bf16 %v3498_v19, %v3494_v6  ;;  %v3225_v6 = vadd.f32 %v9963_v9, %v2912_v58 }
 0x2a2   :  { %v3229_v31 = vadd.f32 %v3228_v12, %v2916_v54 }
 0x2a3   :  { %v9976_v59 = vpop.f32.mrf.mxu0  ;;  %3160 = vmatmul.mubr.bf16.gmra.mxu0 %v9472_v17  ;;  %v9979_v14 = vpop.f32.mrf.mxu1  ;;  %3473 = vmatmul.mubr.bf16.gmra.mxu1 %v9474_v3  ;;  %v2902_v17 = vadd.f32 %v2901_v51, %v9958_v35  ;;  %v2918_v3 = vadd.f32 %v2917_v2, %v9949_v26  ;;  %v4854_v51 = vsel %vm380_vm0, %v7703_v63, 0  ;;  %v11036_v63 = vmov 0.0  }
 0x2a4   :  { %4197 = vmatprep.mubr.bf16.mxu0 %v9441_v10  ;;  %6908 = vmatprep.mubr.msk.bf16.mxu1 %vm2133_vm3, %v3710_v25  ;;  %v2914_v10 = vadd.f32 %v2913_v53, %v9949_v26  ;;  %v3501_v9 = vmax.f32 %v3225_v6, 0.0 }
 0x2a5   :  { %v2923_v28 = vpop.f32.mrf.mxu0  ;;  %v3236_v18 = vpop.f32.mrf.mxu1  ;;  %v3215_v25 = vadd.f32 %v9941_v32, %v2902_v17  ;;  %v3231_v48 = vadd.f32 %v3230_v7, %v2918_v3 }
 0x2a6   :  { %v3227_v53 = vadd.f32 %v3226_v50, %v2914_v10 }
 0x2a7   :  { %v2925_v45 = vpop.f32.mrf.mxu0  ;;  %v3238_v11 = vpop.f32.mrf.mxu1  ;;  %v3493_v7 = vmax.f32 %v3215_v25, 0.0  ;;  %v3506_v34 = vmax.f32 %v3231_v48, 0.0 }
 0x2a8   :  { %v2926_v12 = vadd.f32 %v2925_v45, %v9958_v35 }
 0x2a9   :  { %v2927_v0 = vpop.f32.mrf.mxu0  ;;  %v3240_v55 = vpop.f32.mrf.mxu1  ;;  %v3713_v17 = vpack.c.bf16 %v3497_v41, %v3493_v7 }
 0x2ab   :  { %v9994_v42 = vpop.f32.mrf.mxu0  ;;  %v9996_v2 = vpop.f32.mrf.mxu1  ;;  %4198 = vmatmul.mubr.bf16.vlgmr.msra.gmra.mxu0 %v9437_v30  ;;  %4455 = vmatmul.mubr.bf16.vlgmr.msra.gmra.mxu1 %v3709_v29  ;;  %v2928_v30 = vadd.f32 %v2927_v0, %v9949_v26  ;;  %v3505_v29 = vmax.f32 %v3229_v31, 0.0 }
 0x2ac   :  { %4205 = vmatprep.mubr.bf16.mxu0 %v9470_v24  ;;  %6909 = vmatprep.mubr.msk.bf16.mxu1 %vm2133_vm3, %v3714_v46  ;;  %v3502_v24 = vmax.f32 %v3227_v53, 0.0  ;;  %v2924_v46 = vadd.f32 %v2923_v28, %v9949_v26  ;;  %v2932_v6 = vadd.f32 %v9994_v42, %v9958_v35 }
 0x2ad   :  { %v2933_v32 = vpop.f32.mrf.mxu0  ;;  %v3246_v57 = vpop.f32.mrf.mxu1  ;;  %7214 = vmatpush3.bf16.msra.mxu0 %v4789_v21  ;;  %7222 = vmatpush3.bf16.msra.mxu1 %v4854_v51  ;;  %v3241_v52 = vadd.f32 %v3240_v55, %v2928_v30  ;;  %v2922_v51 = vadd.f32 %v9976_v59, %v9958_v35  ;;  %v3717_v54 = vpack.c.bf16 %v3505_v29, %v3501_v9 }
 0x2ae   :  { %7215 = vmatprep.subr.bf16.mxu0 %v11036_v63  ;;  %7223 = vmatprep.subr.bf16.mxu1 %v11036_v63  ;;  %v3718_v60 = vpack.c.bf16 %v3506_v34, %v3502_v24  ;;  %v3237_v0 = vadd.f32 %v3236_v18, %v2924_v46  ;;  %v2934_v18 = vadd.f32 %v2933_v32, %v9949_v26 }
 0x2af   :  { %v2935_v50 = vpop.f32.mrf.mxu0  ;;  %v3248_v44 = vpop.f32.mrf.mxu1  ;;  %v3514_v48 = vmax.f32 %v3241_v52, 0.0  ;;  %v3235_v30 = vadd.f32 %v9979_v14, %v2922_v51 }
 0x2b0   :  { %v3510_v53 = vmax.f32 %v3237_v0, 0.0  ;;  %v3247_v59 = vadd.f32 %v3246_v57, %v2934_v18 }
 0x2b1   :  { %v2937_v19 = vpop.f32.mrf.mxu0  ;;  %v3250_v3 = vpop.f32.mrf.mxu1 }
 0x2b2   :  { %v2938_v55 = vadd.f32 %v2937_v19, %v9949_v26  ;;  %v3722_v34 = vpack.c.bf16 %v3514_v48, %v3510_v53  ;;  %v3518_v52 = vmax.f32 %v3247_v59, 0.0  ;;  %v3245_v48 = vadd.f32 %v9996_v2, %v2932_v6 }
 0x2b3   :  { %v10009_v10 = vpop.f32.mrf.mxu0  ;;  %v10011_v21 = vpop.f32.mrf.mxu1  ;;  %4206 = vmatmul.mubr.bf16.gmra.mxu0 %v9466_v38  ;;  %4463 = vmatmul.mubr.bf16.gmra.mxu1 %v3713_v17 }
 0x2b4   :  { %4213 = vmatprep.mubr.bf16.mxu0 %v9487_v23  ;;  %6910 = vmatprep.mubr.msk.bf16.mxu1 %vm2133_vm3, %v3718_v60  ;;  %v3239_v23 = vadd.f32 %v3238_v11, %v2926_v12  ;;  %v3251_v45 = vadd.f32 %v3250_v3, %v2938_v55  ;;  %v2936_v11 = vadd.f32 %v2935_v50, %v9958_v35  ;;  %v3509_v3 = vmax.f32 %v3235_v30, 0.0 }
 0x2b5   :  { %v2943_v28 = vpop.f32.mrf.mxu0  ;;  %v3256_v25 = vpop.f32.mrf.mxu1 }
 0x2b6   :  { %v3513_v32 = vmax.f32 %v3239_v23, 0.0  ;;  %v3522_v19 = vmax.f32 %v3251_v45, 0.0  ;;  %v2944_v57 = vadd.f32 %v2943_v28, %v9949_v26  ;;  %v3249_v29 = vadd.f32 %v3248_v44, %v2936_v11 }
 0x2b7   :  { %v2945_v41 = vpop.f32.mrf.mxu0  ;;  %v3258_v38 = vpop.f32.mrf.mxu1  ;;  %v3517_v23 = vmax.f32 %v3245_v48, 0.0 }
 0x2b8   :  { %v3726_v9 = vpack.c.bf16 %v3522_v19, %v3518_v52  ;;  %v3257_v42 = vadd.f32 %v3256_v25, %v2944_v57  ;;  %v3521_v28 = vmax.f32 %v3249_v29, 0.0  ;;  %v2946_v44 = vadd.f32 %v2945_v41, %v9958_v35 }
 0x2b9   :  { %v2947_v7 = vpop.f32.mrf.mxu0  ;;  %v3260_v58 = vpop.f32.mrf.mxu1 }
 0x2ba   :  { %v2948_v14 = vadd.f32 %v2947_v7, %v9949_v26  ;;  %v2942_v7 = vadd.f32 %v10009_v10, %v9958_v35  ;;  %v3259_v45 = vadd.f32 %v3258_v38, %v2946_v44 }
 0x2bb   :  { %v10022_v24 = vpop.f32.mrf.mxu0  ;;  %v10024_v31 = vpop.f32.mrf.mxu1  ;;  %4214 = vmatmul.mubr.bf16.gmra.mxu0 %v9483_v15  ;;  %4471 = vmatmul.mubr.bf16.gmra.mxu1 %v3717_v54 }
 0x2bc   :  { %4221 = vmatprep.mubr.bf16.mxu0 %v9514_v22  ;;  %6911 = vmatprep.mubr.msk.bf16.mxu1 %vm2133_vm3, %v3722_v34  ;;  %v3721_v22 = vpack.c.bf16 %v3513_v32, %v3509_v3  ;;  %v3261_v50 = vadd.f32 %v3260_v58, %v2948_v14  ;;  %v3526_v34 = vmax.f32 %v3257_v42, 0.0  ;;  %v3255_v11 = vadd.f32 %v10011_v21, %v2942_v7 }
 0x2bd   :  { %v2953_v46 = vpop.f32.mrf.mxu0  ;;  %v3266_v17 = vpop.f32.mrf.mxu1 }
 0x2be   :  { %v3530_v54 = vmax.f32 %v3261_v50, 0.0  ;;  %v2954_v25 = vadd.f32 %v2953_v46, %v9949_v26  ;;  %v3529_v46 = vmax.f32 %v3259_v45, 0.0  ;;  %v3525_v57 = vmax.f32 %v3255_v11, 0.0 }
 0x2bf   :  { %v2955_v60 = vpop.f32.mrf.mxu0  ;;  %v3268_v15 = vpop.f32.mrf.mxu1 }
 0x2c0   :  { %v3730_v32 = vpack.c.bf16 %v3530_v54, %v3526_v34  ;;  %v3267_v10 = vadd.f32 %v3266_v17, %v2954_v25  ;;  %v2956_v38 = vadd.f32 %v2955_v60, %v9958_v35 }
 0x2c1   :  { %v2957_v0 = vpop.f32.mrf.mxu0  ;;  %v3270_v12 = vpop.f32.mrf.mxu1 }
 0x2c2   :  { %v2958_v2 = vadd.f32 %v2957_v0, %v9949_v26  ;;  %v3534_v0 = vmax.f32 %v3267_v10, 0.0 }
 0x2c3   :  { %v10035_v55 = vpop.f32.mrf.mxu0  ;;  %v10037_v51 = vpop.f32.mrf.mxu1  ;;  %4222 = vmatmul.mubr.bf16.gmra.mxu0 %v9508_v5  ;;  %4479 = vmatmul.mubr.bf16.gmra.mxu1 %v3721_v22  ;;  %v2952_v22 = vadd.f32 %v10022_v24, %v9958_v35 }
 0x2c4   :  { %4229 = vmatprep.mubr.bf16.mxu0 %v9543_v56  ;;  %6912 = vmatprep.mubr.msk.bf16.mxu1 %vm2133_vm3, %v3726_v9  ;;  %v3725_v56 = vpack.c.bf16 %v3521_v28, %v3517_v23  ;;  %v3271_v41 = vadd.f32 %v3270_v12, %v2958_v2  ;;  %v3269_v12 = vadd.f32 %v3268_v15, %v2956_v38 }
 0x2c5   :  { %v2963_v53 = vpop.f32.mrf.mxu0  ;;  %v3276_v18 = vpop.f32.mrf.mxu1  ;;  %v3265_v42 = vadd.f32 %v10024_v31, %v2952_v22  ;;  %v2962_v34 = vadd.f32 %v10035_v55, %v9958_v35 }
 0x2c6   :  { %v3538_v52 = vmax.f32 %v3271_v41, 0.0  ;;  %v2964_v17 = vadd.f32 %v2963_v53, %v9949_v26  ;;  %v3537_v53 = vmax.f32 %v3269_v12, 0.0 }
 0x2c7   :  { %v2965_v58 = vpop.f32.mrf.mxu0  ;;  %v3278_v5 = vpop.f32.mrf.mxu1  ;;  %v3533_v7 = vmax.f32 %v3265_v42, 0.0  ;;  %v3275_v41 = vadd.f32 %v10037_v51, %v2962_v34 }
 0x2c8   :  { %v3734_v48 = vpack.c.bf16 %v3538_v52, %v3534_v0  ;;  %v3277_v24 = vadd.f32 %v3276_v18, %v2964_v17  ;;  %v2966_v15 = vadd.f32 %v2965_v58, %v9958_v35 }
 0x2c9   :  { %v2967_v30 = vpop.f32.mrf.mxu0  ;;  %v3280_v59 = vpop.f32.mrf.mxu1 }
 0x2ca   :  { %v2968_v21 = vadd.f32 %v2967_v30, %v9949_v26  ;;  %v3279_v45 = vadd.f32 %v3278_v5, %v2966_v15 }
 0x2cb   :  { %v10048_v19 = vpop.f32.mrf.mxu0  ;;  %v10050_v14 = vpop.f32.mrf.mxu1  ;;  %4230 = vmatmul.mubr.bf16.gmra.mxu0 %v9537_v36  ;;  %4487 = vmatmul.mubr.bf16.gmra.mxu1 %v3725_v56  ;;  %v3542_v56 = vmax.f32 %v3277_v24, 0.0 }
 0x2cc   :  { %4237 = vmatprep.mubr.bf16.mxu0 %v9572_v20  ;;  %6913 = vmatprep.mubr.msk.bf16.mxu1 %vm2133_vm3, %v3730_v32  ;;  %v3729_v20 = vpack.c.bf16 %v3529_v46, %v3525_v57  ;;  %v3281_v60 = vadd.f32 %v3280_v59, %v2968_v21  ;;  %v3545_v46 = vmax.f32 %v3279_v45, 0.0  ;;  %v3541_v21 = vmax.f32 %v3275_v41, 0.0 }
 0x2cd   :  { %v2973_v3 = vpop.f32.mrf.mxu0  ;;  %v3286_v6 = vpop.f32.mrf.mxu1  ;;  %v2972_v57 = vadd.f32 %v10048_v19, %v9958_v35 }
 0x2ce   :  { %v3546_v23 = vmax.f32 %v3281_v60, 0.0  ;;  %v2974_v18 = vadd.f32 %v2973_v3, %v9949_v26 }
 0x2cf   :  { %v2975_v29 = vpop.f32.mrf.mxu0  ;;  %v3288_v36 = vpop.f32.mrf.mxu1 }
 0x2d0   :  { %v3738_v32 = vpack.c.bf16 %v3546_v23, %v3542_v56  ;;  %v3287_v55 = vadd.f32 %v3286_v6, %v2974_v18  ;;  %v2976_v5 = vadd.f32 %v2975_v29, %v9958_v35 }
 0x2d1   :  { %v2977_v9 = vpop.f32.mrf.mxu0  ;;  %v3290_v50 = vpop.f32.mrf.mxu1 }
 0x2d2   :  { %v2978_v31 = vadd.f32 %v2977_v9, %v9949_v26  ;;  %v3550_v0 = vmax.f32 %v3287_v55, 0.0  ;;  %v3289_v17 = vadd.f32 %v3288_v36, %v2976_v5 }
 0x2d3   :  { %v10061_v28 = vpop.f32.mrf.mxu0  ;;  %v10063_v44 = vpop.f32.mrf.mxu1  ;;  %4238 = vmatmul.mubr.bf16.gmra.mxu0 %v9566_v1  ;;  %4495 = vmatmul.mubr.bf16.gmra.mxu1 %v3729_v20 }
 0x2d4   :  { %4245 = vmatprep.mubr.bf16.mxu0 %v9604_v33  ;;  %6914 = vmatprep.mubr.msk.bf16.mxu1 %vm2133_vm3, %v3734_v48  ;;  %v3733_v33 = vpack.c.bf16 %v3537_v53, %v3533_v7  ;;  %v3291_v58 = vadd.f32 %v3290_v50, %v2978_v31  ;;  %v3285_v50 = vadd.f32 %v10050_v14, %v2972_v57  ;;  %v3553_v42 = vmax.f32 %v3289_v17, 0.0 }
 0x2d5   :  { %v2983_v54 = vpop.f32.mrf.mxu0  ;;  %v3296_v2 = vpop.f32.mrf.mxu1  ;;  %v2982_v23 = vadd.f32 %v10061_v28, %v9958_v35 }
 0x2d6   :  { %v3554_v52 = vmax.f32 %v3291_v58, 0.0  ;;  %v2984_v6 = vadd.f32 %v2983_v54, %v9949_v26  ;;  %v3549_v54 = vmax.f32 %v3285_v50, 0.0 }
 0x2d7   :  { %v2985_v25 = vpop.f32.mrf.mxu0  ;;  %v3298_v1 = vpop.f32.mrf.mxu1  ;;  %v3295_v45 = vadd.f32 %v10063_v44, %v2982_v23 }
 0x2d8   :  { %v3742_v9 = vpack.c.bf16 %v3554_v52, %v3550_v0  ;;  %v3297_v19 = vadd.f32 %v3296_v2, %v2984_v6  ;;  %v2986_v36 = vadd.f32 %v2985_v25, %v9958_v35 }
 0x2d9   :  { %v2987_v30 = vpop.f32.mrf.mxu0  ;;  %v3300_v59 = vpop.f32.mrf.mxu1 }
 0x2da   :  { %v2988_v51 = vadd.f32 %v2987_v30, %v9949_v26  ;;  %v3558_v7 = vmax.f32 %v3297_v19, 0.0  ;;  %v3299_v34 = vadd.f32 %v3298_v1, %v2986_v36 }
 0x2db   :  { %v10074_v11 = vpop.f32.mrf.mxu0  ;;  %v10076_v10 = vpop.f32.mrf.mxu1  ;;  %4246 = vmatmul.mubr.bf16.gmra.mxu0 %v9595_v39  ;;  %4503 = vmatmul.mubr.bf16.gmra.mxu1 %v3733_v33 }
 0x2dc   :  { %4253 = vmatprep.mubr.bf16.mxu0 %v9631_v27  ;;  %6915 = vmatprep.mubr.msk.bf16.mxu1 %vm2133_vm3, %v3738_v32  ;;  %v3737_v27 = vpack.c.bf16 %v3545_v46, %v3541_v21  ;;  %v3301_v29 = vadd.f32 %v3300_v59, %v2988_v51  ;;  %v3561_v32 = vmax.f32 %v3299_v34, 0.0  ;;  %v3557_v46 = vmax.f32 %v3295_v45, 0.0 }
 0x2dd   :  { %v2993_v38 = vpop.f32.mrf.mxu0  ;;  %v3306_v3 = vpop.f32.mrf.mxu1  ;;  %v2992_v5 = vadd.f32 %v10074_v11, %v9958_v35 }
 0x2de   :  { %v3562_v15 = vmax.f32 %v3301_v29, 0.0  ;;  %v2994_v2 = vadd.f32 %v2993_v38, %v9949_v26 }
 0x2df   :  { %v2995_v22 = vpop.f32.mrf.mxu0  ;;  %v3308_v39 = vpop.f32.mrf.mxu1  ;;  %v3305_v6 = vadd.f32 %v10076_v10, %v2992_v5 }
 0x2e0   :  { %v3746_v33 = vpack.c.bf16 %v3562_v15, %v3558_v7  ;;  %v3307_v28 = vadd.f32 %v3306_v3, %v2994_v2  ;;  %v2996_v1 = vadd.f32 %v2995_v22, %v9958_v35 }
 0x2e1   :  { %v2997_v20 = vpop.f32.mrf.mxu0  ;;  %v3310_v12 = vpop.f32.mrf.mxu1  ;;  %v3565_v50 = vmax.f32 %v3305_v6, 0.0 }
 0x2e2   :  { %v2998_v14 = vadd.f32 %v2997_v20, %v9949_v26  ;;  %v3566_v52 = vmax.f32 %v3307_v28, 0.0  ;;  %v3309_v51 = vadd.f32 %v3308_v39, %v2996_v1 }
 0x2e3   :  { %v10087_v48 = vpop.f32.mrf.mxu0  ;;  %v10089_v60 = vpop.f32.mrf.mxu1  ;;  %4254 = vmatmul.mubr.bf16.gmra.mxu0 %v9625_v62  ;;  %4511 = vmatmul.mubr.bf16.gmra.mxu1 %v3737_v27 }
 0x2e4   :  { %4261 = vmatprep.mubr.bf16.mxu0 %v9660_v13  ;;  %6916 = vmatprep.mubr.msk.bf16.mxu1 %vm2133_vm3, %v3742_v9  ;;  %v3741_v13 = vpack.c.bf16 %v3553_v42, %v3549_v54  ;;  %v3311_v25 = vadd.f32 %v3310_v12, %v2998_v14  ;;  %v3569_v20 = vmax.f32 %v3309_v51, 0.0  ;;  %v3002_v19 = vadd.f32 %v10087_v48, %v9958_v35 }
 0x2e5   :  { %v3003_v24 = vpop.f32.mrf.mxu0  ;;  %v3316_v53 = vpop.f32.mrf.mxu1 }
 0x2e6   :  { %v3570_v55 = vmax.f32 %v3311_v25, 0.0  ;;  %v3004_v3 = vadd.f32 %v3003_v24, %v9949_v26 }
 0x2e7   :  { %v3005_v31 = vpop.f32.mrf.mxu0  ;;  %v3318_v62 = vpop.f32.mrf.mxu1 }
 0x2e8   :  { %v3750_v0 = vpack.c.bf16 %v3570_v55, %v3566_v52  ;;  %v3317_v11 = vadd.f32 %v3316_v53, %v3004_v3  ;;  %v3006_v39 = vadd.f32 %v3005_v31, %v9958_v35  ;;  %v3315_v31 = vadd.f32 %v10089_v60, %v3002_v19 }
 0x2e9   :  { %v3007_v56 = vpop.f32.mrf.mxu0  ;;  %v3320_v18 = vpop.f32.mrf.mxu1 }
 0x2ea   :  { %v3008_v44 = vadd.f32 %v3007_v56, %v9949_v26  ;;  %v3574_v36 = vmax.f32 %v3317_v11, 0.0  ;;  %v3319_v53 = vadd.f32 %v3318_v62, %v3006_v39  ;;  %v3573_v25 = vmax.f32 %v3315_v31, 0.0 }
 0x2eb   :  { %v10100_v30 = vpop.f32.mrf.mxu0  ;;  %v10102_v59 = vpop.f32.mrf.mxu1  ;;  %4262 = vmatmul.mubr.bf16.gmra.mxu0 %v9654_v61  ;;  %4519 = vmatmul.mubr.bf16.gmra.mxu1 %v3741_v13 }
 0x2ec   :  { %4269 = vmatprep.mubr.bf16.mxu0 %v9683_v47  ;;  %6917 = vmatprep.mubr.msk.bf16.mxu1 %vm2133_vm3, %v3746_v33  ;;  %v3745_v47 = vpack.c.bf16 %v3561_v32, %v3557_v46  ;;  %v3321_v22 = vadd.f32 %v3320_v18, %v3008_v44  ;;  %v3577_v13 = vmax.f32 %v3319_v53, 0.0  ;;  %v7704_v33 = vld [vmem:[%s10739_s7] sm:$0xff]  }
 0x2ed   :  { %v3013_v58 = vpop.f32.mrf.mxu0  ;;  %v3326_v41 = vpop.f32.mrf.mxu1  ;;  %7216 = vmatpush3.bf16.msra.mxu0 %v7704_v33 }
 0x2ee   :  { %v3578_v29 = vmax.f32 %v3321_v22, 0.0  ;;  %v3014_v24 = vadd.f32 %v3013_v58, %v9949_v26  ;;  %v3753_v58 = vpack.c.bf16 %v3577_v13, %v3573_v25  ;;  %7229 = vmatprep.subr.bf16.mxu0 %v11036_v63 }
 0x2ef   :  { %v3015_v38 = vpop.f32.mrf.mxu0  ;;  %v3328_v61 = vpop.f32.mrf.mxu1 }
 0x2f0   :  { %v3754_v54 = vpack.c.bf16 %v3578_v29, %v3574_v36  ;;  %v3327_v48 = vadd.f32 %v3326_v41, %v3014_v24  ;;  %v3016_v62 = vadd.f32 %v3015_v38, %v9958_v35  ;;  %v11037_v36 = vld [vmem:[#allocation3_spill] sm:$0xff] }
 0x2f1   :  { %v3017_v21 = vpop.f32.mrf.mxu0  ;;  %v3330_v57 = vpop.f32.mrf.mxu1 }
 0x2f2   :  { %v3018_v10 = vadd.f32 %v3017_v21, %v9949_v26  ;;  %v3582_v32 = vmax.f32 %v3327_v48, 0.0  ;;  %v3329_v41 = vadd.f32 %v3328_v61, %v3016_v62 }
 0x2f3   :  { %v10113_v27 = vpop.f32.mrf.mxu0  ;;  %v10115_v17 = vpop.f32.mrf.mxu1  ;;  %4270 = vmatmul.mubr.bf16.gmra.mxu0 %v9677_v40  ;;  %4527 = vmatmul.mubr.bf16.gmra.mxu1 %v3745_v47 }
 0x2f4   :  { %4277 = vmatprep.mubr.bf16.mxu0 %v9702_v43  ;;  %6918 = vmatprep.mubr.msk.bf16.mxu1 %vm2133_vm3, %v3750_v0  ;;  %v3749_v43 = vpack.c.bf16 %v3569_v20, %v3565_v50  ;;  %v3331_v23 = vadd.f32 %v3330_v57, %v3018_v10  ;;  %v3585_v61 = vmax.f32 %v3329_v41, 0.0  ;;  %v3022_v22 = vadd.f32 %v10113_v27, %v9958_v35 }
 0x2f5   :  { %v3023_v12 = vpop.f32.mrf.mxu0  ;;  %v3336_v9 = vpop.f32.mrf.mxu1 }
 0x2f6   :  { %v3586_v18 = vmax.f32 %v3331_v23, 0.0  ;;  %v3024_v1 = vadd.f32 %v3023_v12, %v9949_v26  ;;  %v3335_v50 = vadd.f32 %v10115_v17, %v3022_v22 }
 0x2f7   :  { %v3025_v42 = vpop.f32.mrf.mxu0  ;;  %v3338_v40 = vpop.f32.mrf.mxu1 }
 0x2f8   :  { %v3758_v46 = vpack.c.bf16 %v3586_v18, %v3582_v32  ;;  %v3337_v3 = vadd.f32 %v3336_v9, %v3024_v1  ;;  %v3026_v47 = vadd.f32 %v3025_v42, %v9958_v35 }
 0x2f9   :  { %v3027_v15 = vpop.f32.mrf.mxu0  ;;  %v3340_v14 = vpop.f32.mrf.mxu1 }
 0x2fa   :  { %v3028_v60 = vadd.f32 %v3027_v15, %v9949_v26  ;;  %v3590_v11 = vmax.f32 %v3337_v3, 0.0  ;;  %v3339_v39 = vadd.f32 %v3338_v40, %v3026_v47 }
 0x2fb   :  { %v10126_v7 = vpop.f32.mrf.mxu0  ;;  %v10128_v2 = vpop.f32.mrf.mxu1  ;;  %4278 = vmatmul.mubr.bf16.gmra.mxu0 %v9692_v49  ;;  %4535 = vmatmul.mubr.bf16.gmra.mxu1 %v3749_v43  ;;  %v7705_v49 = vld [vmem:[%s10739_s7 + $0x10] sm:$0xff]  }
 0x2fc   :  { %4285 = vmatprep.mubr.bf16.mxu0 %v9717_v8  ;;  %6919 = vmatprep.mubr.msk.bf16.mxu1 %vm2133_vm3, %v3754_v54  ;;  %v3012_v8 = vadd.f32 %v10100_v30, %v9958_v35  ;;  %v3341_v5 = vadd.f32 %v3340_v14, %v3028_v60  ;;  %v3593_v24 = vmax.f32 %v3339_v39, 0.0  ;;  %v3589_v14 = vmax.f32 %v3335_v50, 0.0 }
 0x2fd   :  { %v3033_v34 = vpop.f32.mrf.mxu0  ;;  %v3346_v56 = vpop.f32.mrf.mxu1  ;;  %7224 = vmatpush3.bf16.msra.mxu1 %v7705_v49  ;;  %v3032_v54 = vadd.f32 %v10126_v7, %v9958_v35 }
 0x2fe   :  { %7237 = vmatprep.subr.bf16.mxu1 %v11036_v63  ;;  %v3325_v38 = vadd.f32 %v10102_v59, %v3012_v8  ;;  %v3594_v57 = vmax.f32 %v3341_v5, 0.0  ;;  %v3034_v20 = vadd.f32 %v3033_v34, %v9949_v26  ;;  %v3761_v13 = vpack.c.bf16 %v3593_v24, %v3589_v14  ;;  %v11038_v8 = vld [vmem:[#allocation4_spill] sm:$0xff] }
 0x2ff   :  { %v3035_v45 = vpop.f32.mrf.mxu0  ;;  %v3348_v28 = vpop.f32.mrf.mxu1  ;;  %v3345_v33 = vadd.f32 %v10128_v2, %v3032_v54 }
 0x300   :  { %v3581_v0 = vmax.f32 %v3325_v38, 0.0  ;;  %v3762_v29 = vpack.c.bf16 %v3594_v57, %v3590_v11  ;;  %v3347_v27 = vadd.f32 %v3346_v56, %v3034_v20  ;;  %v3036_v40 = vadd.f32 %v3035_v45, %v9958_v35  ;;  %v11039_v45 = vld [vmem:[#allocation6_spill] sm:$0xff]  ;;  %v11040_v11 = vld [vmem:[#allocation5_spill] sm:$0xff]  ;;  %v11041_v20 = vld [vmem:[#allocation7_spill] sm:$0xff] }
 0x301   :  { %v3037_v55 = vpop.f32.mrf.mxu0  ;;  %v3350_v44 = vpop.f32.mrf.mxu1 }
 0x302   :  { %v3038_v59 = vadd.f32 %v3037_v55, %v9949_v26  ;;  %v3598_v31 = vmax.f32 %v3347_v27, 0.0  ;;  %v3349_v62 = vadd.f32 %v3348_v28, %v3036_v40  ;;  %v3597_v55 = vmax.f32 %v3345_v33, 0.0 }
 0x303   :  { %v10147_v30 = vpop.f32.mrf.mxu0  ;;  %v10149_v52 = vpop.f32.mrf.mxu1  ;;  %4286 = vmatmul.mubr.bf16.gmra.mxu0 %v9713_v37  ;;  %4543 = vmatmul.mubr.bf16.gmra.mxu1 %v3753_v58 }
 0x304   :  { %4293 = vmatprep.mubr.bf16.mxu0 %v9736_v4  ;;  %6920 = vmatprep.mubr.msk.bf16.mxu1 %vm2133_vm3, %v3758_v46  ;;  %v3757_v4 = vpack.c.bf16 %v3585_v61, %v3581_v0  ;;  %v3351_v10 = vadd.f32 %v3350_v44, %v3038_v59  ;;  %v3601_v32 = vmax.f32 %v3349_v62, 0.0  ;;  %v3042_v44 = vadd.f32 %v10147_v30, %v9958_v35 }
 0x305   :  { %v3043_v51 = vpop.f32.mrf.mxu0  ;;  %v3356_v21 = vpop.f32.mrf.mxu1 }
 0x306   :  { %v3602_v15 = vmax.f32 %v3351_v10, 0.0  ;;  %v3044_v48 = vadd.f32 %v3043_v51, %v9949_v26  ;;  %v3765_v61 = vpack.c.bf16 %v3601_v32, %v3597_v55  ;;  %v3355_v0 = vadd.f32 %v10149_v52, %v3042_v44 }
 0x307   :  { %v3045_v6 = vpop.f32.mrf.mxu0  ;;  %v3358_v37 = vpop.f32.mrf.mxu1 }
 0x308   :  { %v3766_v18 = vpack.c.bf16 %v3602_v15, %v3598_v31  ;;  %v3357_v7 = vadd.f32 %v3356_v21, %v3044_v48  ;;  %v3046_v28 = vadd.f32 %v3045_v6, %v9958_v35  ;;  %v11042_v48 = vld [vmem:[#allocation8_spill] sm:$0xff] }
 0x309   :  { %v3047_v12 = vpop.f32.mrf.mxu0  ;;  %v3360_v9 = vpop.f32.mrf.mxu1 }
 0x30a   :  { %v3048_v17 = vadd.f32 %v3047_v12, %v9949_v26  ;;  %v3606_v38 = vmax.f32 %v3357_v7, 0.0  ;;  %v3359_v47 = vadd.f32 %v3358_v37, %v3046_v28 }
 0x30b   :  { %v10160_v19 = vpop.f32.mrf.mxu0  ;;  %v10162_v42 = vpop.f32.mrf.mxu1  ;;  %4294 = vmatmul.mubr.bf16.gmra.mxu0 %v9726_v16  ;;  %4551 = vmatmul.mubr.bf16.gmra.mxu1 %v3757_v4 }
 0x30c   :  { %4301 = vmatprep.mubr.bf16.mxu0 %v11037_v36  ;;  %6921 = vmatprep.mubr.msk.bf16.mxu1 %vm2133_vm3, %v3762_v29  ;;  %v3361_v60 = vadd.f32 %v3360_v9, %v3048_v17  ;;  %v3609_v4 = vmax.f32 %v3359_v47, 0.0  ;;  %v3605_v29 = vmax.f32 %v3355_v0, 0.0  ;;  %v3052_v10 = vadd.f32 %v10160_v19, %v9958_v35 }
 0x30d   :  { %v3053_v43 = vpop.f32.mrf.mxu0  ;;  %v3366_v53 = vpop.f32.mrf.mxu1 }
 0x30e   :  { %v3610_v41 = vmax.f32 %v3361_v60, 0.0  ;;  %v3054_v3 = vadd.f32 %v3053_v43, %v9949_v26  ;;  %v3769_v40 = vpack.c.bf16 %v3609_v4, %v3605_v29  ;;  %v3365_v54 = vadd.f32 %v10162_v42, %v3052_v10 }
 0x30f   :  { %v3055_v23 = vpop.f32.mrf.mxu0  ;;  %v3368_v16 = vpop.f32.mrf.mxu1 }
 0x310   :  { %v3770_v57 = vpack.c.bf16 %v3610_v41, %v3606_v38  ;;  %v3367_v30 = vadd.f32 %v3366_v53, %v3054_v3  ;;  %v3056_v37 = vadd.f32 %v3055_v23, %v9958_v35  ;;  %v3613_v60 = vmax.f32 %v3365_v54, 0.0  ;;  %v11044_v3 = vld [vmem:[#allocation9_spill] sm:$0xff] }
 0x311   :  { %v3057_v34 = vpop.f32.mrf.mxu0  ;;  %v3370_v56 = vpop.f32.mrf.mxu1 }
 0x312   :  { %v3058_v2 = vadd.f32 %v3057_v34, %v9949_v26  ;;  %v3614_v36 = vmax.f32 %v3367_v30, 0.0  ;;  %v3369_v43 = vadd.f32 %v3368_v16, %v3056_v37 }
 0x313   :  { %v10173_v49 = vpop.f32.mrf.mxu0  ;;  %v10175_v25 = vpop.f32.mrf.mxu1  ;;  %4302 = vmatmul.mubr.bf16.gmra.mxu0 %v11038_v8  ;;  %4559 = vmatmul.mubr.bf16.gmra.mxu1 %v3761_v13  ;;  %v11043_v13 = vld [vmem:[#allocation10_spill] sm:$0xff] }
 0x314   :  { %4309 = vmatprep.mubr.bf16.mxu0 %v11039_v45  ;;  %6922 = vmatprep.mubr.msk.bf16.mxu1 %vm2133_vm3, %v3766_v18  ;;  %v3371_v59 = vadd.f32 %v3370_v56, %v3058_v2  ;;  %v3617_v62 = vmax.f32 %v3369_v43, 0.0  ;;  %v3062_v33 = vadd.f32 %v10173_v49, %v9958_v35 }
 0x315   :  { %v3063_v1 = vpop.f32.mrf.mxu0  ;;  %v3376_v58 = vpop.f32.mrf.mxu1 }
 0x316   :  { %v3618_v9 = vmax.f32 %v3371_v59, 0.0  ;;  %v3064_v24 = vadd.f32 %v3063_v1, %v9949_v26  ;;  %v3773_v28 = vpack.c.bf16 %v3617_v62, %v3613_v60  ;;  %v3375_v44 = vadd.f32 %v10175_v25, %v3062_v33 }
 0x317   :  { %v3065_v46 = vpop.f32.mrf.mxu0  ;;  %v3378_v5 = vpop.f32.mrf.mxu1 }
 0x318   :  { %v3774_v17 = vpack.c.bf16 %v3618_v9, %v3614_v36  ;;  %v3377_v19 = vadd.f32 %v3376_v58, %v3064_v24  ;;  %v3066_v16 = vadd.f32 %v3065_v46, %v9958_v35  ;;  %v3621_v59 = vmax.f32 %v3375_v44, 0.0  ;;  %v11046_v24 = vld [vmem:[#allocation12_spill] sm:$0xff] }
 0x319   :  { %v3067_v51 = vpop.f32.mrf.mxu0  ;;  %v3380_v21 = vpop.f32.mrf.mxu1 }
 0x31a   :  { %v3068_v52 = vadd.f32 %v3067_v51, %v9949_v26  ;;  %v3622_v45 = vmax.f32 %v3377_v19, 0.0  ;;  %v3379_v1 = vadd.f32 %v3378_v5, %v3066_v16 }
 0x31b   :  { %v10186_v22 = vpop.f32.mrf.mxu0  ;;  %v10188_v6 = vpop.f32.mrf.mxu1  ;;  %4310 = vmatmul.mubr.bf16.gmra.mxu0 %v11040_v11  ;;  %4567 = vmatmul.mubr.bf16.gmra.mxu1 %v3765_v61  ;;  %v11045_v61 = vld [vmem:[#allocation11_spill] sm:$0xff] }
 0x31c   :  { %4317 = vmatprep.mubr.bf16.mxu0 %v11041_v20  ;;  %6923 = vmatprep.mubr.msk.bf16.mxu1 %vm2133_vm3, %v3770_v57  ;;  %v3381_v14 = vadd.f32 %v3380_v21, %v3068_v52  ;;  %v3625_v47 = vmax.f32 %v3379_v1, 0.0  ;;  %v3072_v0 = vadd.f32 %v10186_v22, %v9958_v35 }
 0x31d   :  { %v3073_v39 = vpop.f32.mrf.mxu0  ;;  %v3386_v12 = vpop.f32.mrf.mxu1 }
 0x31e   :  { %v3626_v18 = vmax.f32 %v3381_v14, 0.0  ;;  %v3074_v32 = vadd.f32 %v3073_v39, %v9949_v26  ;;  %v3777_v37 = vpack.c.bf16 %v3625_v47, %v3621_v59  ;;  %v3385_v10 = vadd.f32 %v10188_v6, %v3072_v0 }
 0x31f   :  { %v3075_v50 = vpop.f32.mrf.mxu0  ;;  %v3388_v27 = vpop.f32.mrf.mxu1 }
 0x320   :  { %v3778_v2 = vpack.c.bf16 %v3626_v18, %v3622_v45  ;;  %v3387_v49 = vadd.f32 %v3386_v12, %v3074_v32  ;;  %v3076_v5 = vadd.f32 %v3075_v50, %v9958_v35  ;;  %v3629_v14 = vmax.f32 %v3385_v10, 0.0  ;;  %v11048_v32 = vld [vmem:[#allocation13_spill] sm:$0xff] }
 0x321   :  { %v3077_v53 = vpop.f32.mrf.mxu0  ;;  %v3390_v15 = vpop.f32.mrf.mxu1 }
 0x322   :  { %v3078_v42 = vadd.f32 %v3077_v53, %v9949_v26  ;;  %v3630_v20 = vmax.f32 %v3387_v49, 0.0  ;;  %v3389_v39 = vadd.f32 %v3388_v27, %v3076_v5 }
 0x323   :  { %v10199_v23 = vpop.f32.mrf.mxu0  ;;  %v10201_v31 = vpop.f32.mrf.mxu1  ;;  %4318 = vmatmul.mubr.bf16.gmra.mxu0 %v11042_v48  ;;  %4575 = vmatmul.mubr.bf16.gmra.mxu1 %v3769_v40  ;;  %v11047_v40 = vld [vmem:[#allocation14_spill] sm:$0xff] }
 0x324   :  { %4325 = vmatprep.mubr.bf16.mxu0 %v11043_v13  ;;  %6924 = vmatprep.mubr.msk.bf16.mxu1 %vm2133_vm3, %v3774_v17  ;;  %v3391_v55 = vadd.f32 %v3390_v15, %v3078_v42  ;;  %v3633_v43 = vmax.f32 %v3389_v39, 0.0  ;;  %v3082_v54 = vadd.f32 %v10199_v23, %v9958_v35 }
 0x325   :  { %v3083_v34 = vpop.f32.mrf.mxu0  ;;  %v3396_v56 = vpop.f32.mrf.mxu1 }
 0x326   :  { %v3634_v57 = vmax.f32 %v3391_v55, 0.0  ;;  %v3084_v4 = vadd.f32 %v3083_v34, %v9949_v26  ;;  %v3781_v16 = vpack.c.bf16 %v3633_v43, %v3629_v14  ;;  %v3395_v33 = vadd.f32 %v10201_v31, %v3082_v54 }
 0x327   :  { %v3085_v8 = vpop.f32.mrf.mxu0  ;;  %v3398_v7 = vpop.f32.mrf.mxu1 }
 0x328   :  { %v3782_v52 = vpack.c.bf16 %v3634_v57, %v3630_v20  ;;  %v3397_v22 = vadd.f32 %v3396_v56, %v3084_v4  ;;  %v3086_v27 = vadd.f32 %v3085_v8, %v9958_v35  ;;  %v3637_v55 = vmax.f32 %v3395_v33, 0.0  ;;  %v11050_v4 = vld [vmem:[#allocation16_spill] sm:$0xff] }
 0x329   :  { %v3087_v58 = vpop.f32.mrf.mxu0  ;;  %v3400_v41 = vpop.f32.mrf.mxu1 }
 0x32a   :  { %v3088_v25 = vadd.f32 %v3087_v58, %v9949_v26  ;;  %v3638_v13 = vmax.f32 %v3397_v22, 0.0  ;;  %v3399_v34 = vadd.f32 %v3398_v7, %v3086_v27 }
 0x32b   :  { %v10212_v46 = vpop.f32.mrf.mxu0  ;;  %v10214_v38 = vpop.f32.mrf.mxu1  ;;  %4326 = vmatmul.mubr.bf16.gmra.mxu0 %v11044_v3  ;;  %4583 = vmatmul.mubr.bf16.gmra.mxu1 %v3773_v28  ;;  %v11049_v28 = vld [vmem:[#allocation15_spill] sm:$0xff] }
 0x32c   :  { %4333 = vmatprep.mubr.bf16.mxu0 %v11045_v61  ;;  %6925 = vmatprep.mubr.msk.bf16.mxu1 %vm2133_vm3, %v3778_v2  ;;  %v3401_v29 = vadd.f32 %v3400_v41, %v3088_v25  ;;  %v3641_v1 = vmax.f32 %v3399_v34, 0.0  ;;  %v3092_v44 = vadd.f32 %v10212_v46, %v9958_v35 }
 0x32d   :  { %v3093_v51 = vpop.f32.mrf.mxu0  ;;  %v3406_v21 = vpop.f32.mrf.mxu1 }
 0x32e   :  { %v3642_v17 = vmax.f32 %v3401_v29, 0.0  ;;  %v3094_v62 = vadd.f32 %v3093_v51, %v9949_v26  ;;  %v3785_v5 = vpack.c.bf16 %v3641_v1, %v3637_v55  ;;  %v3405_v0 = vadd.f32 %v10214_v38, %v3092_v44 }
 0x32f   :  { %v3095_v11 = vpop.f32.mrf.mxu0  ;;  %v3408_v30 = vpop.f32.mrf.mxu1 }
 0x330   :  { %v3786_v42 = vpack.c.bf16 %v3642_v17, %v3638_v13  ;;  %v3407_v23 = vadd.f32 %v3406_v21, %v3094_v62  ;;  %v3096_v7 = vadd.f32 %v3095_v11, %v9958_v35  ;;  %v3645_v29 = vmax.f32 %v3405_v0, 0.0  ;;  %v11052_v62 = vld [vmem:[#allocation17_spill] sm:$0xff] }
 0x331   :  { %v3097_v12 = vpop.f32.mrf.mxu0  ;;  %v3410_v9 = vpop.f32.mrf.mxu1 }
 0x332   :  { %v3098_v6 = vadd.f32 %v3097_v12, %v9949_v26  ;;  %v3646_v61 = vmax.f32 %v3407_v23, 0.0  ;;  %v3409_v51 = vadd.f32 %v3408_v30, %v3096_v7 }
 0x333   :  { %v10225_v50 = vpop.f32.mrf.mxu0  ;;  %v10227_v36 = vpop.f32.mrf.mxu1  ;;  %4334 = vmatmul.mubr.bf16.gmra.mxu0 %v11046_v24  ;;  %4591 = vmatmul.mubr.bf16.gmra.mxu1 %v3777_v37  ;;  %v11051_v37 = vld [vmem:[#allocation18_spill] sm:$0xff] }
 0x334   :  { %4341 = vmatprep.mubr.bf16.mxu0 %v11047_v40  ;;  %6926 = vmatprep.mubr.msk.bf16.mxu1 %vm2133_vm3, %v3782_v52  ;;  %v3411_v60 = vadd.f32 %v3410_v9, %v3098_v6  ;;  %v3649_v39 = vmax.f32 %v3409_v51, 0.0  ;;  %v3102_v10 = vadd.f32 %v10225_v50, %v9958_v35 }
 0x335   :  { %v3103_v53 = vpop.f32.mrf.mxu0  ;;  %v3416_v15 = vpop.f32.mrf.mxu1 }
 0x336   :  { %v3650_v2 = vmax.f32 %v3411_v60, 0.0  ;;  %v3104_v47 = vadd.f32 %v3103_v53, %v9949_v26  ;;  %v3789_v27 = vpack.c.bf16 %v3649_v39, %v3645_v29  ;;  %v3415_v54 = vadd.f32 %v10227_v36, %v3102_v10 }
 0x337   :  { %v3105_v48 = vpop.f32.mrf.mxu0  ;;  %v3418_v19 = vpop.f32.mrf.mxu1 }
 0x338   :  { %v3790_v25 = vpack.c.bf16 %v3650_v2, %v3646_v61  ;;  %v3417_v46 = vadd.f32 %v3416_v15, %v3104_v47  ;;  %v3106_v30 = vadd.f32 %v3105_v48, %v9958_v35  ;;  %v3653_v60 = vmax.f32 %v3415_v54, 0.0  ;;  %v11054_v47 = vld [vmem:[#allocation20_spill] sm:$0xff] }
 0x339   :  { %v3107_v56 = vpop.f32.mrf.mxu0  ;;  %v3420_v18 = vpop.f32.mrf.mxu1 }
 0x33a   :  { %v3108_v31 = vadd.f32 %v3107_v56, %v9949_v26  ;;  %v3654_v40 = vmax.f32 %v3417_v46, 0.0  ;;  %v3419_v53 = vadd.f32 %v3418_v19, %v3106_v30 }
 0x33b   :  { %v10238_v8 = vpop.f32.mrf.mxu0  ;;  %v10240_v45 = vpop.f32.mrf.mxu1  ;;  %4342 = vmatmul.mubr.bf16.gmra.mxu0 %v11048_v32  ;;  %4599 = vmatmul.mubr.bf16.gmra.mxu1 %v3781_v16  ;;  %v11053_v16 = vld [vmem:[#allocation19_spill] sm:$0xff] }
 0x33c   :  { %4349 = vmatprep.mubr.bf16.mxu0 %v11049_v28  ;;  %6927 = vmatprep.mubr.msk.bf16.mxu1 %vm2133_vm3, %v3786_v42  ;;  %v3421_v59 = vadd.f32 %v3420_v18, %v3108_v31  ;;  %v3657_v34 = vmax.f32 %v3419_v53, 0.0  ;;  %v3112_v33 = vadd.f32 %v10238_v8, %v9958_v35 }
 0x33d   :  { %v3113_v58 = vpop.f32.mrf.mxu0  ;;  %v3426_v41 = vpop.f32.mrf.mxu1 }
 0x33e   :  { %v3658_v52 = vmax.f32 %v3421_v59, 0.0  ;;  %v3114_v43 = vadd.f32 %v3113_v58, %v9949_v26  ;;  %v3793_v7 = vpack.c.bf16 %v3657_v34, %v3653_v60  ;;  %v3425_v44 = vadd.f32 %v10240_v45, %v3112_v33 }
 0x33f   :  { %v3115_v3 = vpop.f32.mrf.mxu0  ;;  %v3428_v49 = vpop.f32.mrf.mxu1 }
 0x340   :  { %v3794_v6 = vpack.c.bf16 %v3658_v52, %v3654_v40  ;;  %v3427_v50 = vadd.f32 %v3426_v41, %v3114_v43  ;;  %v3116_v19 = vadd.f32 %v3115_v3, %v9958_v35  ;;  %v3661_v59 = vmax.f32 %v3425_v44, 0.0  ;;  %v11056_v43 = vld [vmem:[#allocation21_spill] sm:$0xff] }
 0x341   :  { %v3117_v21 = vpop.f32.mrf.mxu0  ;;  %v3430_v57 = vpop.f32.mrf.mxu1 }
 0x342   :  { %v3118_v38 = vadd.f32 %v3117_v21, %v9949_v26  ;;  %v3662_v28 = vmax.f32 %v3427_v50, 0.0  ;;  %v3429_v58 = vadd.f32 %v3428_v49, %v3116_v19 }
 0x343   :  { %v10251_v11 = vpop.f32.mrf.mxu0  ;;  %v10253_v20 = vpop.f32.mrf.mxu1  ;;  %4350 = vmatmul.mubr.bf16.gmra.mxu0 %v11050_v4  ;;  %4607 = vmatmul.mubr.bf16.gmra.mxu1 %v3785_v5  ;;  %v11055_v5 = vld [vmem:[#allocation22_spill] sm:$0xff] }
 0x344   :  { %4357 = vmatprep.mubr.bf16.mxu0 %v11051_v37  ;;  %6928 = vmatprep.mubr.msk.bf16.mxu1 %vm2133_vm3, %v3790_v25  ;;  %v3431_v14 = vadd.f32 %v3430_v57, %v3118_v38  ;;  %v3665_v51 = vmax.f32 %v3429_v58, 0.0  ;;  %v3122_v0 = vadd.f32 %v10251_v11, %v9958_v35 }
 0x345   :  { %v3123_v12 = vpop.f32.mrf.mxu0  ;;  %v3436_v9 = vpop.f32.mrf.mxu1 }
 0x346   :  { %v3666_v42 = vmax.f32 %v3431_v14, 0.0  ;;  %v3124_v1 = vadd.f32 %v3123_v12, %v9949_v26  ;;  %v3797_v30 = vpack.c.bf16 %v3665_v51, %v3661_v59  ;;  %v3435_v10 = vadd.f32 %v10253_v20, %v3122_v0 }
 0x347   :  { %v3125_v24 = vpop.f32.mrf.mxu0  ;;  %v3438_v22 = vpop.f32.mrf.mxu1 }
 0x348   :  { %v3798_v31 = vpack.c.bf16 %v3666_v42, %v3662_v28  ;;  %v3437_v8 = vadd.f32 %v3436_v9, %v3124_v1  ;;  %v3126_v49 = vadd.f32 %v3125_v24, %v9958_v35  ;;  %v3669_v14 = vmax.f32 %v3435_v10, 0.0  ;;  %v11058_v1 = vld [vmem:[#allocation24_spill] sm:$0xff] }
 0x349   :  { %v3127_v15 = vpop.f32.mrf.mxu0  ;;  %v3440_v17 = vpop.f32.mrf.mxu1 }
 0x34a   :  { %v3128_v36 = vadd.f32 %v3127_v15, %v9949_v26  ;;  %v3670_v37 = vmax.f32 %v3437_v8, 0.0  ;;  %v3439_v12 = vadd.f32 %v3438_v22, %v3126_v49 }
 0x34b   :  { %v10264_v48 = vpop.f32.mrf.mxu0  ;;  %v10266_v13 = vpop.f32.mrf.mxu1  ;;  %4358 = vmatmul.mubr.bf16.gmra.mxu0 %v11052_v62  ;;  %4615 = vmatmul.mubr.bf16.gmra.mxu1 %v3789_v27  ;;  %v11057_v27 = vld [vmem:[#allocation23_spill] sm:$0xff] }
 0x34c   :  { %4365 = vmatprep.mubr.bf16.mxu0 %v11053_v16  ;;  %6929 = vmatprep.mubr.msk.bf16.mxu1 %vm2133_vm3, %v3794_v6  ;;  %v3441_v55 = vadd.f32 %v3440_v17, %v3128_v36  ;;  %v3673_v53 = vmax.f32 %v3439_v12, 0.0  ;;  %v3132_v54 = vadd.f32 %v10264_v48, %v9958_v35 }
 0x34d   :  { %v3133_v56 = vpop.f32.mrf.mxu0  ;;  %v3446_v18 = vpop.f32.mrf.mxu1 }
 0x34e   :  { %v3674_v25 = vmax.f32 %v3441_v55, 0.0  ;;  %v3134_v39 = vadd.f32 %v3133_v56, %v9949_v26  ;;  %v3801_v19 = vpack.c.bf16 %v3673_v53, %v3669_v14  ;;  %v3445_v33 = vadd.f32 %v10266_v13, %v3132_v54 }
 0x34f   :  { %v3135_v32 = vpop.f32.mrf.mxu0  ;;  %v3448_v23 = vpop.f32.mrf.mxu1 }
 0x350   :  { %v3802_v38 = vpack.c.bf16 %v3674_v25, %v3670_v37  ;;  %v3447_v11 = vadd.f32 %v3446_v18, %v3134_v39  ;;  %v3136_v22 = vadd.f32 %v3135_v32, %v9958_v35  ;;  %v3677_v55 = vmax.f32 %v3445_v33, 0.0  ;;  %v11060_v37 = vld [vmem:[#allocation25_spill] sm:$0xff] }
 0x351   :  { %v3137_v41 = vpop.f32.mrf.mxu0  ;;  %v3450_v2 = vpop.f32.mrf.mxu1 }
 0x352   :  { %v3138_v45 = vadd.f32 %v3137_v41, %v9949_v26  ;;  %v3678_v16 = vmax.f32 %v3447_v11, 0.0  ;;  %v3449_v56 = vadd.f32 %v3448_v23, %v3136_v22 }
 0x353   :  { %v10277_v3 = vpop.f32.mrf.mxu0  ;;  %v10279_v61 = vpop.f32.mrf.mxu1  ;;  %4366 = vmatmul.mubr.bf16.gmra.mxu0 %v11054_v47  ;;  %4623 = vmatmul.mubr.bf16.gmra.mxu1 %v3793_v7  ;;  %v11059_v7 = vld [vmem:[#allocation26_spill] sm:$0xff] }
 0x354   :  { %4373 = vmatprep.mubr.bf16.mxu0 %v11055_v5  ;;  %6930 = vmatprep.mubr.msk.bf16.mxu1 %vm2133_vm3, %v3798_v31  ;;  %v3451_v29 = vadd.f32 %v3450_v2, %v3138_v45  ;;  %v3681_v58 = vmax.f32 %v3449_v56, 0.0  ;;  %v3142_v44 = vadd.f32 %v10277_v3, %v9958_v35 }
 0x355   :  { %v3143_v21 = vpop.f32.mrf.mxu0  ;;  %v3456_v57 = vpop.f32.mrf.mxu1 }
 0x356   :  { %v3682_v6 = vmax.f32 %v3451_v29, 0.0  ;;  %v3144_v34 = vadd.f32 %v3143_v21, %v9949_v26  ;;  %v3805_v49 = vpack.c.bf16 %v3681_v58, %v3677_v55  ;;  %v3455_v0 = vadd.f32 %v10279_v61, %v3142_v44  ;;  %v10340_v44 = vld [vmem:[%s10740_s6] ss:$0 sm:$0xff] }
 0x357   :  { %v3145_v4 = vpop.f32.mrf.mxu0  ;;  %v3458_v46 = vpop.f32.mrf.mxu1 }
 0x358   :  { %v3806_v36 = vpack.c.bf16 %v3682_v6, %v3678_v16  ;;  %v3457_v48 = vadd.f32 %v3456_v57, %v3144_v34  ;;  %v3146_v23 = vadd.f32 %v3145_v4, %v9958_v35  ;;  %v3685_v29 = vmax.f32 %v3455_v0, 0.0  ;;  %v11062_v16 = vld [vmem:[#allocation28_spill] sm:$0xff] }
 0x359   :  { %v3147_v9 = vpop.f32.mrf.mxu0  ;;  %v3460_v52 = vpop.f32.mrf.mxu1 }
 0x35a   :  { %v3148_v20 = vadd.f32 %v3147_v9, %v9949_v26  ;;  %v3686_v5 = vmax.f32 %v3457_v48, 0.0  ;;  %v3459_v21 = vadd.f32 %v3458_v46, %v3146_v23 }
 0x35b   :  { %v10290_v24 = vpop.f32.mrf.mxu0  ;;  %v10292_v40 = vpop.f32.mrf.mxu1  ;;  %4374 = vmatmul.mubr.bf16.gmra.mxu0 %v11056_v43  ;;  %4631 = vmatmul.mubr.bf16.gmra.mxu1 %v3797_v30  ;;  %v11061_v30 = vld [vmem:[#allocation27_spill] sm:$0xff] }
 0x35c   :  { %4381 = vmatprep.mubr.bf16.mxu0 %v11057_v27  ;;  %6931 = vmatprep.mubr.msk.bf16.mxu1 %vm2133_vm3, %v3802_v38  ;;  %v3461_v60 = vadd.f32 %v3460_v52, %v3148_v20  ;;  %v3689_v12 = vmax.f32 %v3459_v21, 0.0  ;;  %v3152_v10 = vadd.f32 %v10290_v24, %v9958_v35  ;;  %v11063_v24 = vld [vmem:[#allocation30_spill] sm:$0xff] }
 0x35d   :  { %v3153_v15 = vpop.f32.mrf.mxu0  ;;  %v3466_v17 = vpop.f32.mrf.mxu1 }
 0x35e   :  { %v3690_v31 = vmax.f32 %v3461_v60, 0.0  ;;  %v3154_v51 = vadd.f32 %v3153_v15, %v9949_v26  ;;  %v3809_v22 = vpack.c.bf16 %v3689_v12, %v3685_v29  ;;  %v3465_v54 = vadd.f32 %v10292_v40, %v3152_v10 }
 0x35f   :  { %v3155_v62 = vpop.f32.mrf.mxu0  ;;  %v3468_v50 = vpop.f32.mrf.mxu1 }
 0x360   :  { %v3810_v45 = vpack.c.bf16 %v3690_v31, %v3686_v5  ;;  %v3467_v3 = vadd.f32 %v3466_v17, %v3154_v51  ;;  %v3156_v46 = vadd.f32 %v3155_v62, %v9958_v35 }
 0x361   :  { %v3157_v18 = vpop.f32.mrf.mxu0  ;;  %v3470_v42 = vpop.f32.mrf.mxu1 }
 0x362   :  { %v3158_v13 = vadd.f32 %v3157_v18, %v9949_v26  ;;  %v3694_v27 = vmax.f32 %v3467_v3, 0.0  ;;  %v3469_v15 = vadd.f32 %v3468_v50, %v3156_v46 }
 0x363   :  { %v10303_v32 = vpop.f32.mrf.mxu0  ;;  %v10305_v28 = vpop.f32.mrf.mxu1  ;;  %4382 = vmatmul.mubr.bf16.gmra.mxu0 %v11058_v1  ;;  %4639 = vmatmul.mubr.bf16.gmra.mxu1 %v3801_v19 }
 0x364   :  { %4389 = vmatprep.mubr.bf16.mxu0 %v11059_v7  ;;  %6932 = vmatprep.mubr.msk.bf16.mxu1 %vm2133_vm3, %v3806_v36  ;;  %v3471_v59 = vadd.f32 %v3470_v42, %v3158_v13  ;;  %v3697_v56 = vmax.f32 %v3469_v15, 0.0  ;;  %v3693_v36 = vmax.f32 %v3465_v54, 0.0  ;;  %v3162_v40 = vadd.f32 %v10303_v32, %v9958_v35  ;;  %v11064_v13 = vld [vmem:[#allocation29_spill] sm:$0xff] }
 0x365   :  { %v3163_v41 = vpop.f32.mrf.mxu0  ;;  %v3476_v2 = vpop.f32.mrf.mxu1 }
 0x366   :  { %v3698_v38 = vmax.f32 %v3471_v59, 0.0  ;;  %v3164_v53 = vadd.f32 %v3163_v41, %v9949_v26  ;;  %v3813_v48 = vpack.c.bf16 %v3697_v56, %v3693_v36  ;;  %v7709_v36 = vld [vmem:[%s10739_s7 + $0x30] sm:$0xff]  }
 0x367   :  { %v3165_v47 = vpop.f32.mrf.mxu0  ;;  %v3478_v8 = vpop.f32.mrf.mxu1 }
 0x368   :  { %v3814_v20 = vpack.c.bf16 %v3698_v38, %v3694_v27  ;;  %v3477_v19 = vadd.f32 %v3476_v2, %v3164_v53  ;;  %v3475_v2 = vadd.f32 %v10305_v28, %v3162_v40 }
 0x369   :  { %v3167_v57 = vpop.f32.mrf.mxu0  ;;  %v3480_v25 = vpop.f32.mrf.mxu1 }
 0x36a   :  { %v3168_v61 = vadd.f32 %v3167_v57, %v9949_v26  ;;  %v3166_v26 = vadd.f32 %v3165_v47, %v9958_v35  ;;  %v3702_v1 = vmax.f32 %v3477_v19, 0.0  ;;  %v11065_v35 = vld [vmem:[#allocation31_spill] sm:$0xff]  ;;  %v3701_v51 = vmax.f32 %v3475_v2, 0.0 }
 0x36b   :  { %v10316_v4 = vpop.f32.mrf.mxu0  ;;  %4390 = vmatmul.mubr.bf16.gmra.mxu0 %v11060_v37  ;;  %v10319_v39 = vpop.f32.mrf.mxu1  ;;  %4647 = vmatmul.mubr.bf16.gmra.mxu1 %v3805_v49 }
 0x36c   :  { %4397 = vmatprep.mubr.bf16.mxu0 %v11061_v30  ;;  %6933 = vmatprep.mubr.msk.bf16.mxu1 %vm2133_vm3, %v3810_v45  ;;  %v3481_v14 = vadd.f32 %v3480_v25, %v3168_v61  ;;  %v3479_v7 = vadd.f32 %v3478_v8, %v3166_v26  ;;  %v4200_v49 = vadd.f32 %v10340_v44, %v10316_v4  ;;  %v7706_v4 = vld [vmem:[%s10739_s7 + $0x28] sm:$0x3f]  }
 0x36d   :  { %v4201_v9 = vpop.f32.mrf.mxu0  ;;  %v4458_v52 = vpop.f32.mrf.mxu1 }
 0x36e   :  { %v3706_v42 = vmax.f32 %v3481_v14, 0.0  ;;  %v3705_v32 = vmax.f32 %v3479_v7, 0.0  ;;  %v4457_v30 = vadd.f32 %v10319_v39, %v4200_v49  ;;  %v11066_v9 = vld [vmem:[#allocation32_spill] sm:$0xff]  ;;  %v7712_v7 = vld [vmem:[%s10739_s7 + $0x58] sm:$0x3f]  }
 0x36f   :  { %v4202_v43 = vpop.f32.mrf.mxu0  ;;  %v4459_v11 = vpop.f32.mrf.mxu1 }
 0x370   :  { %v3818_v41 = vpack.c.bf16 %v3706_v42, %v3702_v1  ;;  %v4203_v47 = vadd.f32 %v10340_v44, %v4202_v43  ;;  %v3817_v45 = vpack.c.bf16 %v3705_v32, %v3701_v51  ;;  %v7707_v43 = vld [vmem:[%s10739_s7 + $0x38] sm:$0x3f]   ;;  %v7708_v42 = vld [vmem:[%s10739_s7 + $0x20] sm:$0xff]  }
 0x371   :  { %v4204_v17 = vpop.f32.mrf.mxu0  ;;  %v4461_v6 = vpop.f32.mrf.mxu1  ;;  %v4984_v19 = vsel %vm380_vm0, %v7707_v43, 0 }
 0x372   :  { %v4460_v59 = vadd.f32 %v4459_v11, %v4203_v47  ;;  %v4679_v11 = vmax.f32 %v4457_v30, 0.0 }
 0x373   :  { %v4207_v62 = vpop.f32.mrf.mxu0  ;;  %4398 = vmatmul.mubr.bf16.gmra.mxu0 %v11062_v16  ;;  %v4464_v34 = vpop.f32.mrf.mxu1  ;;  %4655 = vmatmul.mubr.bf16.gmra.mxu1 %v3809_v22 }
 0x374   :  { %4405 = vmatprep.mubr.bf16.mxu0 %v11063_v24  ;;  %6934 = vmatprep.mubr.msk.bf16.mxu1 %vm2133_vm3, %v3814_v20  ;;  %v4208_v21 = vadd.f32 %v10340_v44, %v4207_v62  ;;  %v4680_v38 = vmax.f32 %v4460_v59, 0.0  ;;  %v4919_v20 = vsel %vm380_vm0, %v7706_v4, 0 }
 0x375   :  { %v4209_v50 = vpop.f32.mrf.mxu0  ;;  %v4466_v18 = vpop.f32.mrf.mxu1 }
 0x376   :  { %v4465_v12 = vadd.f32 %v4464_v34, %v4208_v21  ;;  %v4735_v14 = vpack.c.bf16 %v4680_v38, %v4679_v11 }
 0x377   :  { %v4210_v60 = vpop.f32.mrf.mxu0  ;;  %v4467_v33 = vpop.f32.mrf.mxu1 }
 0x378   :  { %v4211_v8 = vadd.f32 %v10340_v44, %v4210_v60  ;;  %v4681_v27 = vmax.f32 %v4465_v12, 0.0 }
 0x379   :  { %v4212_v58 = vpop.f32.mrf.mxu0  ;;  %v4469_v23 = vpop.f32.mrf.mxu1 }
 0x37a   :  { %v4468_v0 = vadd.f32 %v4467_v33, %v4211_v8 }
 0x37b   :  { %v4215_v31 = vpop.f32.mrf.mxu0  ;;  %4406 = vmatmul.mubr.bf16.gmra.mxu0 %v11064_v13  ;;  %v4472_v55 = vpop.f32.mrf.mxu1  ;;  %4663 = vmatmul.mubr.bf16.gmra.mxu1 %v3813_v48  ;;  %v7710_v48 = vld [vmem:[%s10739_s7 + $0x48] sm:$0x3f]  }
 0x37c   :  { %4413 = vmatprep.mubr.bf16.mxu0 %v11065_v35  ;;  %6935 = vmatprep.mubr.msk.bf16.mxu1 %vm2133_vm3, %v3818_v41  ;;  %v4682_v61 = vmax.f32 %v4468_v0, 0.0  ;;  %v4216_v53 = vadd.f32 %v10340_v44, %v4215_v31  ;;  %v5049_v8 = vsel %vm380_vm0, %v7710_v48, 0 }
 0x37d   :  { %v4217_v28 = vpop.f32.mrf.mxu0  ;;  %v4474_v5 = vpop.f32.mrf.mxu1 }
 0x37e   :  { %v4736_v54 = vpack.c.bf16 %v4682_v61, %v4681_v27  ;;  %v4473_v56 = vadd.f32 %v4472_v55, %v4216_v53  ;;  %v5114_v28 = vsel %vm380_vm0, %v7712_v7, 0 }
 0x37f   :  { %v4218_v57 = vpop.f32.mrf.mxu0  ;;  %v4475_v25 = vpop.f32.mrf.mxu1 }
 0x380   :  { %v4219_v39 = vadd.f32 %v10340_v44, %v4218_v57  ;;  %v4683_v58 = vmax.f32 %v4473_v56, 0.0  ;;  %v7717_v56 = vld [vmem:[%s10739_s7 + $0x70] sm:$0xff]  }
 0x381   :  { %v4220_v37 = vpop.f32.mrf.mxu0  ;;  %v4477_v3 = vpop.f32.mrf.mxu1 }
 0x382   :  { %v4476_v62 = vadd.f32 %v4475_v25, %v4219_v39  ;;  %v7711_v25 = vld [vmem:[%s10739_s7 + $0x40] sm:$0xff]   ;;  %v7714_v3 = vld [vmem:[%s10739_s7 + $0x68] sm:$0x3f]  }
 0x383   :  { %v4223_v46 = vpop.f32.mrf.mxu0  ;;  %4414 = vmatmul.mubr.bf16.gmra.mxu0 %v11066_v9  ;;  %v4480_v52 = vpop.f32.mrf.mxu1  ;;  %4671 = vmatmul.mubr.bf16.gmra.mxu1 %v3817_v45  ;;  %v7713_v45 = vld [vmem:[%s10739_s7 + $0x50] sm:$0xff]   ;;  %v5179_v39 = vsel %vm380_vm0, %v7714_v3, 0 }
 0x384   :  { %7217 = vmatprep.mubr.msk.bf16.mxu0 %vm7762_vm4, %v11036_v63  ;;  %7225 = vmatprep.mubr.msk.bf16.mxu1 %vm7762_vm4, %v11036_v63  ;;  %v4224_v22 = vadd.f32 %v10340_v44, %v4223_v46  ;;  %v4684_v40 = vmax.f32 %v4476_v62, 0.0 }
 0x385   :  { %v4225_v29 = vpop.f32.mrf.mxu0  ;;  %v4482_v10 = vpop.f32.mrf.mxu1 }
 0x386   :  { %v4481_v26 = vadd.f32 %v4480_v52, %v4224_v22  ;;  %v4737_v55 = vpack.c.bf16 %v4684_v40, %v4683_v58  ;;  %v7716_v10 = vld [vmem:[%s10739_s7 + $0x78] sm:$0x3f]  }
 0x387   :  { %v4226_v15 = vpop.f32.mrf.mxu0  ;;  %v4483_v17 = vpop.f32.mrf.mxu1 }
 0x388   :  { %v4227_v6 = vadd.f32 %v10340_v44, %v4226_v15  ;;  %v4685_v23 = vmax.f32 %v4481_v26, 0.0  ;;  %v7715_v15 = vld [vmem:[%s10739_s7 + $0x60] sm:$0xff]  }
 0x389   :  { %v4228_v16 = vpop.f32.mrf.mxu0  ;;  %v4485_v34 = vpop.f32.mrf.mxu1 }
 0x38a   :  { %v4484_v24 = vadd.f32 %v4483_v17, %v4227_v6 }
 0x38b   :  { %v4231_v50 = vpop.f32.mrf.mxu0  ;;  %v4488_v18 = vpop.f32.mrf.mxu1  ;;  %7218 = vmatmul.mubr.msk.bf16.vlgmr.msra.gmra.mxu0 %vm295_vm1, %v4735_v14  ;;  %7226 = vmatmul.mubr.msk.bf16.vlgmr.msra.gmra.mxu1 %vm295_vm1, %v4736_v54  ;;  %v5244_v14 = vsel %vm380_vm0, %v7716_v10, 0 }
 0x38c   :  { %7230 = vmatpush3.bf16.msra.mxu0 %v4919_v20  ;;  %7238 = vmatpush3.bf16.msra.mxu1 %v4984_v19  ;;  %v4686_v60 = vmax.f32 %v4484_v24, 0.0  ;;  %v4232_v41 = vadd.f32 %v10340_v44, %v4231_v50  ;;  %v7718_v50 = vld [vmem:[%s10739_s7 + $0x88] sm:$0x3f]  }
 0x38d   :  { %v4233_v33 = vpop.f32.mrf.mxu0  ;;  %v4490_v1 = vpop.f32.mrf.mxu1  ;;  %7231 = vmatprep.subr.bf16.mxu0 %v11036_v63  ;;  %7239 = vmatprep.subr.bf16.mxu1 %v11036_v63  ;;  %v5309_v7 = vsel %vm380_vm0, %v7718_v50, 0 }
 0x38e   :  { %7233 = vmatprep.mubr.msk.bf16.mxu0 %vm7762_vm4, %v11036_v63  ;;  %7241 = vmatprep.mubr.msk.bf16.mxu1 %vm7762_vm4, %v11036_v63  ;;  %v4738_v35 = vpack.c.bf16 %v4686_v60, %v4685_v23  ;;  %v4489_v51 = vadd.f32 %v4488_v18, %v4232_v41 }
 0x38f   :  { %v4234_v2 = vpop.f32.mrf.mxu0  ;;  %v4491_v31 = vpop.f32.mrf.mxu1 }
 0x390   :  { %v4235_v13 = vadd.f32 %v10340_v44, %v4234_v2  ;;  %7232 = vmatpush3.bf16.msra.mxu0 %v7708_v42  ;;  %7240 = vmatpush3.bf16.msra.mxu1 %v7709_v36  ;;  %v4687_v30 = vmax.f32 %v4489_v51, 0.0 }
 0x391   :  { %v4236_v32 = vpop.f32.mrf.mxu0  ;;  %v4493_v47 = vpop.f32.mrf.mxu1  ;;  %7245 = vmatprep.subr.bf16.mxu0 %v11036_v63  ;;  %7253 = vmatprep.subr.bf16.mxu1 %v11036_v63 }
 0x392   :  { %v4492_v5 = vadd.f32 %v4491_v31, %v4235_v13  ;;  %v7720_v32 = vld [vmem:[%s10739_s7 + $0x98] sm:$0x3f]  }
 0x393   :  { %v4239_v49 = vpop.f32.mrf.mxu0  ;;  %v4496_v21 = vpop.f32.mrf.mxu1  ;;  %7234 = vmatmul.mubr.msk.bf16.vlgmr.msra.gmra.mxu0 %vm295_vm1, %v4737_v55  ;;  %7242 = vmatmul.mubr.msk.bf16.vlgmr.msra.gmra.mxu1 %vm295_vm1, %v4738_v35  ;;  %v7719_v55 = vld [vmem:[%s10739_s7 + $0x80] sm:$0xff]  }
 0x394   :  { %v4240_v57 = vadd.f32 %v10340_v44, %v4239_v49  ;;  %7246 = vmatpush3.bf16.msra.mxu0 %v5049_v8  ;;  %7254 = vmatpush3.bf16.msra.mxu1 %v5114_v28  ;;  %v4688_v59 = vmax.f32 %v4492_v5, 0.0 }
 0x395   :  { %v4241_v0 = vpop.f32.mrf.mxu0  ;;  %v4498_v37 = vpop.f32.mrf.mxu1  ;;  %7247 = vmatprep.subr.bf16.mxu0 %v11036_v63  ;;  %7249 = vmatprep.mubr.msk.bf16.mxu0 %vm7762_vm4, %v11036_v63 }
 0x396   :  { %7255 = vmatprep.subr.bf16.mxu1 %v11036_v63  ;;  %7257 = vmatprep.mubr.msk.bf16.mxu1 %vm7762_vm4, %v11036_v63  ;;  %v4497_v9 = vadd.f32 %v4496_v21, %v4240_v57  ;;  %v4739_v4 = vpack.c.bf16 %v4688_v59, %v4687_v30 }
 0x397   :  { %v4242_v12 = vpop.f32.mrf.mxu0  ;;  %v4499_v46 = vpop.f32.mrf.mxu1 }
 0x398   :  { %v4243_v52 = vadd.f32 %v10340_v44, %v4242_v12  ;;  %7248 = vmatpush3.bf16.msra.mxu0 %v7711_v25  ;;  %7256 = vmatpush3.bf16.msra.mxu1 %v7713_v45  ;;  %v4689_v27 = vmax.f32 %v4497_v9, 0.0  ;;  %v5374_v25 = vsel %vm380_vm0, %v7720_v32, 0  ;;  %v7721_v12 = vld [vmem:[%s10739_s7 + $0x90] sm:$0xff]   ;;  %v7722_v9 = vld [vmem:[%s10739_s7 + $0xa8] sm:$0x3f]  }
 0x399   :  { %v4244_v38 = vpop.f32.mrf.mxu0  ;;  %v4501_v61 = vpop.f32.mrf.mxu1  ;;  %7261 = vmatprep.subr.bf16.mxu0 %v11036_v63  ;;  %7269 = vmatprep.subr.bf16.mxu1 %v11036_v63 }
 0x39a   :  { %v4500_v29 = vadd.f32 %v4499_v46, %v4243_v52 }
 0x39b   :  { %v4247_v43 = vpop.f32.mrf.mxu0  ;;  %v4504_v11 = vpop.f32.mrf.mxu1  ;;  %7250 = vmatmul.mubr.msk.bf16.vlgmr.msra.gmra.mxu0 %vm295_vm1, %v4739_v4 }
 0x39c   :  { %v4690_v53 = vmax.f32 %v4500_v29, 0.0  ;;  %v4248_v22 = vadd.f32 %v10340_v44, %v4247_v43  ;;  %7262 = vmatpush3.bf16.msra.mxu0 %v5179_v39  ;;  %7265 = vmatprep.mubr.msk.bf16.mxu0 %vm7762_vm4, %v11036_v63 }
 0x39d   :  { %v4249_v17 = vpop.f32.mrf.mxu0  ;;  %v4506_v6 = vpop.f32.mrf.mxu1  ;;  %7263 = vmatprep.subr.bf16.mxu0 %v11036_v63 }
 0x39e   :  { %v4740_v20 = vpack.c.bf16 %v4690_v53, %v4689_v27  ;;  %v4505_v16 = vadd.f32 %v4504_v11, %v4248_v22  ;;  %v5439_v11 = vsel %vm380_vm0, %v7722_v9, 0 }
 0x39f   :  { %v4250_v54 = vpop.f32.mrf.mxu0  ;;  %v4507_v62 = vpop.f32.mrf.mxu1 }
 0x3a0   :  { %v4251_v34 = vadd.f32 %v10340_v44, %v4250_v54  ;;  %7258 = vmatmul.mubr.msk.bf16.vlgmr.msra.gmra.mxu1 %vm295_vm1, %v4740_v20  ;;  %7264 = vmatpush3.bf16.msra.mxu0 %v7715_v15  ;;  %v4691_v36 = vmax.f32 %v4505_v16, 0.0  ;;  %v7723_v20 = vld [vmem:[%s10739_s7 + $0xa0] sm:$0xff]   ;;  %v7724_v54 = vld [vmem:[%s10739_s7 + $0xb8] sm:$0x3f]  }
 0x3a1   :  { %v4252_v19 = vpop.f32.mrf.mxu0  ;;  %v4509_v24 = vpop.f32.mrf.mxu1  ;;  %7270 = vmatpush3.bf16.msra.mxu1 %v5244_v14  ;;  %7273 = vmatprep.mubr.msk.bf16.mxu1 %vm7762_vm4, %v11036_v63 }
 0x3a2   :  { %v4508_v26 = vadd.f32 %v4507_v62, %v4251_v34  ;;  %7271 = vmatprep.subr.bf16.mxu1 %v11036_v63  ;;  %7277 = vmatprep.subr.bf16.mxu0 %v11036_v63 }
 0x3a3   :  { %v4255_v18 = vpop.f32.mrf.mxu0  ;;  %v4512_v42 = vpop.f32.mrf.mxu1 }
 0x3a4   :  { %v4692_v40 = vmax.f32 %v4508_v26, 0.0  ;;  %v4256_v60 = vadd.f32 %v10340_v44, %v4255_v18  ;;  %v5504_v18 = vsel %vm380_vm0, %v7724_v54, 0 }
 0x3a5   :  { %v4257_v33 = vpop.f32.mrf.mxu0  ;;  %v4514_v1 = vpop.f32.mrf.mxu1  ;;  %7272 = vmatpush3.bf16.msra.mxu1 %v7717_v56 }
 0x3a6   :  { %v4741_v48 = vpack.c.bf16 %v4692_v40, %v4691_v36  ;;  %7285 = vmatprep.subr.bf16.mxu1 %v11036_v63  ;;  %v4513_v41 = vadd.f32 %v4512_v42, %v4256_v60 }
 0x3a7   :  { %v4258_v58 = vpop.f32.mrf.mxu0  ;;  %v4515_v23 = vpop.f32.mrf.mxu1 }
 0x3a8   :  { %v4259_v2 = vadd.f32 %v10340_v44, %v4258_v58  ;;  %7266 = vmatmul.mubr.msk.bf16.vlgmr.msra.gmra.mxu0 %vm295_vm1, %v4741_v48  ;;  %v4693_v28 = vmax.f32 %v4513_v41, 0.0  ;;  %v7725_v48 = vld [vmem:[%s10739_s7 + $0xb0] sm:$0xff]   ;;  %v7726_v58 = vld [vmem:[%s10739_s7 + $0xc8] sm:$0x3f]  }
 0x3a9   :  { %v4260_v31 = vpop.f32.mrf.mxu0  ;;  %v4517_v13 = vpop.f32.mrf.mxu1  ;;  %7278 = vmatpush3.bf16.msra.mxu0 %v5309_v7  ;;  %7281 = vmatprep.mubr.msk.bf16.mxu0 %vm7762_vm4, %v11036_v63 }
 0x3aa   :  { %v4516_v35 = vadd.f32 %v4515_v23, %v4259_v2  ;;  %7279 = vmatprep.subr.bf16.mxu0 %v11036_v63 }
 0x3ab   :  { %v4263_v47 = vpop.f32.mrf.mxu0  ;;  %v4520_v8 = vpop.f32.mrf.mxu1 }
 0x3ac   :  { %v4694_v5 = vmax.f32 %v4516_v35, 0.0  ;;  %v4264_v51 = vadd.f32 %v10340_v44, %v4263_v47  ;;  %v5569_v47 = vsel %vm380_vm0, %v7726_v58, 0 }
 0x3ad   :  { %v4265_v49 = vpop.f32.mrf.mxu0  ;;  %v4522_v21 = vpop.f32.mrf.mxu1  ;;  %7280 = vmatpush3.bf16.msra.mxu0 %v7719_v55 }
 0x3ae   :  { %v4742_v57 = vpack.c.bf16 %v4694_v5, %v4693_v28  ;;  %7293 = vmatprep.subr.bf16.mxu0 %v11036_v63  ;;  %v4521_v0 = vadd.f32 %v4520_v8, %v4264_v51 }
 0x3af   :  { %v4266_v45 = vpop.f32.mrf.mxu0  ;;  %v4523_v59 = vpop.f32.mrf.mxu1 }
 0x3b0   :  { %v4267_v37 = vadd.f32 %v10340_v44, %v4266_v45  ;;  %7274 = vmatmul.mubr.msk.bf16.vlgmr.msra.gmra.mxu1 %vm295_vm1, %v4742_v57  ;;  %v4695_v38 = vmax.f32 %v4521_v0, 0.0  ;;  %v7727_v57 = vld [vmem:[%s10739_s7 + $0xc0] sm:$0xff]   ;;  %v7728_v45 = vld [vmem:[%s10739_s7 + $0xd8] sm:$0x3f]  }
 0x3b1   :  { %v4268_v3 = vpop.f32.mrf.mxu0  ;;  %v4525_v30 = vpop.f32.mrf.mxu1  ;;  %7286 = vmatpush3.bf16.msra.mxu1 %v5374_v25  ;;  %7289 = vmatprep.mubr.msk.bf16.mxu1 %vm7762_vm4, %v11036_v63 }
 0x3b2   :  { %v4524_v46 = vadd.f32 %v4523_v59, %v4267_v37  ;;  %7287 = vmatprep.subr.bf16.mxu1 %v11036_v63 }
 0x3b3   :  { %v4271_v52 = vpop.f32.mrf.mxu0  ;;  %v4528_v4 = vpop.f32.mrf.mxu1 }
 0x3b4   :  { %v4696_v61 = vmax.f32 %v4524_v46, 0.0  ;;  %v4272_v39 = vadd.f32 %v10340_v44, %v4271_v52  ;;  %v5634_v52 = vsel %vm380_vm0, %v7728_v45, 0 }
 0x3b5   :  { %v4273_v29 = vpop.f32.mrf.mxu0  ;;  %v4530_v10 = vpop.f32.mrf.mxu1  ;;  %7288 = vmatpush3.bf16.msra.mxu1 %v7721_v12 }
 0x3b6   :  { %v4743_v43 = vpack.c.bf16 %v4696_v61, %v4695_v38  ;;  %7301 = vmatprep.subr.bf16.mxu1 %v11036_v63  ;;  %v4529_v22 = vadd.f32 %v4528_v4, %v4272_v39 }
 0x3b7   :  { %v4274_v27 = vpop.f32.mrf.mxu0  ;;  %v4531_v53 = vpop.f32.mrf.mxu1 }
 0x3b8   :  { %v4275_v15 = vadd.f32 %v10340_v44, %v4274_v27  ;;  %7282 = vmatmul.mubr.msk.bf16.vlgmr.msra.gmra.mxu0 %vm295_vm1, %v4743_v43  ;;  %v4697_v34 = vmax.f32 %v4529_v22, 0.0  ;;  %v7729_v43 = vld [vmem:[%s10739_s7 + $0xd0] sm:$0xff]   ;;  %v7730_v27 = vld [vmem:[%s10739_s7 + $0xe8] sm:$0x3f]  }
 0x3b9   :  { %v4276_v17 = vpop.f32.mrf.mxu0  ;;  %v4533_v6 = vpop.f32.mrf.mxu1  ;;  %7294 = vmatpush3.bf16.msra.mxu0 %v5439_v11  ;;  %7297 = vmatprep.mubr.msk.bf16.mxu0 %vm7762_vm4, %v11036_v63 }
 0x3ba   :  { %v4532_v14 = vadd.f32 %v4531_v53, %v4275_v15  ;;  %7295 = vmatprep.subr.bf16.mxu0 %v11036_v63 }
 0x3bb   :  { %v4279_v62 = vpop.f32.mrf.mxu0  ;;  %v4536_v16 = vpop.f32.mrf.mxu1 }
 0x3bc   :  { %v4698_v19 = vmax.f32 %v4532_v14, 0.0  ;;  %v4280_v24 = vadd.f32 %v10340_v44, %v4279_v62  ;;  %v5699_v62 = vsel %vm380_vm0, %v7730_v27, 0 }
 0x3bd   :  { %v4281_v56 = vpop.f32.mrf.mxu0  ;;  %v4538_v26 = vpop.f32.mrf.mxu1  ;;  %7296 = vmatpush3.bf16.msra.mxu0 %v7723_v20 }
 0x3be   :  { %v4744_v50 = vpack.c.bf16 %v4698_v19, %v4697_v34  ;;  %7309 = vmatprep.subr.bf16.mxu0 %v11036_v63  ;;  %v4537_v40 = vadd.f32 %v4536_v16, %v4280_v24 }
 0x3bf   :  { %v4282_v42 = vpop.f32.mrf.mxu0  ;;  %v4539_v36 = vpop.f32.mrf.mxu1 }
 0x3c0   :  { %v4283_v60 = vadd.f32 %v10340_v44, %v4282_v42  ;;  %7290 = vmatmul.mubr.msk.bf16.vlgmr.msra.gmra.mxu1 %vm295_vm1, %v4744_v50  ;;  %v4699_v2 = vmax.f32 %v4537_v40, 0.0  ;;  %v7731_v50 = vld [vmem:[%s10739_s7 + $0xe0] sm:$0xff]   ;;  %v7732_v42 = vld [vmem:[%s10739_s7 + $0xf8] sm:$0x3f]  }
 0x3c1   :  { %v4284_v33 = vpop.f32.mrf.mxu0  ;;  %v4541_v1 = vpop.f32.mrf.mxu1  ;;  %7302 = vmatpush3.bf16.msra.mxu1 %v5504_v18  ;;  %7305 = vmatprep.mubr.msk.bf16.mxu1 %vm7762_vm4, %v11036_v63 }
 0x3c2   :  { %v4540_v7 = vadd.f32 %v4539_v36, %v4283_v60  ;;  %7303 = vmatprep.subr.bf16.mxu1 %v11036_v63 }
 0x3c3   :  { %v4287_v23 = vpop.f32.mrf.mxu0  ;;  %v4544_v41 = vpop.f32.mrf.mxu1 }
 0x3c4   :  { %v4700_v31 = vmax.f32 %v4540_v7, 0.0  ;;  %v4288_v13 = vadd.f32 %v10340_v44, %v4287_v23  ;;  %v5764_v23 = vsel %vm380_vm0, %v7732_v42, 0 }
 0x3c5   :  { %v4289_v55 = vpop.f32.mrf.mxu0  ;;  %v4546_v35 = vpop.f32.mrf.mxu1  ;;  %7304 = vmatpush3.bf16.msra.mxu1 %v7725_v48 }
 0x3c6   :  { %v4745_v32 = vpack.c.bf16 %v4700_v31, %v4699_v2  ;;  %7317 = vmatprep.subr.bf16.mxu1 %v11036_v63  ;;  %v4545_v5 = vadd.f32 %v4544_v41, %v4288_v13 }
 0x3c7   :  { %v4290_v8 = vpop.f32.mrf.mxu0  ;;  %v4547_v28 = vpop.f32.mrf.mxu1 }
 0x3c8   :  { %v4291_v51 = vadd.f32 %v10340_v44, %v4290_v8  ;;  %7298 = vmatmul.mubr.msk.bf16.vlgmr.msra.gmra.mxu0 %vm295_vm1, %v4745_v32  ;;  %v4701_v37 = vmax.f32 %v4545_v5, 0.0  ;;  %v7733_v32 = vld [vmem:[%s10739_s7 + $0xf0] sm:$0xff]   ;;  %v7734_v8 = vld [vmem:[%s10739_s7 + $0x108] sm:$0x3f]  }
 0x3c9   :  { %v4292_v49 = vpop.f32.mrf.mxu0  ;;  %v4549_v21 = vpop.f32.mrf.mxu1  ;;  %7310 = vmatpush3.bf16.msra.mxu0 %v5569_v47  ;;  %7313 = vmatprep.mubr.msk.bf16.mxu0 %vm7762_vm4, %v11036_v63 }
 0x3ca   :  { %v4548_v25 = vadd.f32 %v4547_v28, %v4291_v51  ;;  %7311 = vmatprep.subr.bf16.mxu0 %v11036_v63 }
 0x3cb   :  { %v4295_v59 = vpop.f32.mrf.mxu0  ;;  %v4552_v0 = vpop.f32.mrf.mxu1 }
 0x3cc   :  { %v4702_v3 = vmax.f32 %v4548_v25, 0.0  ;;  %v4296_v30 = vadd.f32 %v10340_v44, %v4295_v59  ;;  %v5829_v59 = vsel %vm380_vm0, %v7734_v8, 0 }
 0x3cd   :  { %v4297_v12 = vpop.f32.mrf.mxu0  ;;  %v4554_v46 = vpop.f32.mrf.mxu1  ;;  %7312 = vmatpush3.bf16.msra.mxu0 %v7727_v57 }
 0x3ce   :  { %v4746_v9 = vpack.c.bf16 %v4702_v3, %v4701_v37  ;;  %7325 = vmatprep.subr.bf16.mxu0 %v11036_v63  ;;  %v4553_v61 = vadd.f32 %v4552_v0, %v4296_v30 }
 0x3cf   :  { %v4298_v4 = vpop.f32.mrf.mxu0  ;;  %v4555_v38 = vpop.f32.mrf.mxu1 }
 0x3d0   :  { %v4299_v39 = vadd.f32 %v10340_v44, %v4298_v4  ;;  %7306 = vmatmul.mubr.msk.bf16.vlgmr.msra.gmra.mxu1 %vm295_vm1, %v4746_v9  ;;  %v4703_v15 = vmax.f32 %v4553_v61, 0.0  ;;  %v7735_v9 = vld [vmem:[%s10739_s7 + $0x100] sm:$0xff]   ;;  %v7736_v4 = vld [vmem:[%s10739_s7 + $0x118] sm:$0x3f]  }
 0x3d1   :  { %v4300_v29 = vpop.f32.mrf.mxu0  ;;  %v4557_v10 = vpop.f32.mrf.mxu1  ;;  %7318 = vmatpush3.bf16.msra.mxu1 %v5634_v52  ;;  %7321 = vmatprep.mubr.msk.bf16.mxu1 %vm7762_vm4, %v11036_v63 }
 0x3d2   :  { %v4556_v11 = vadd.f32 %v4555_v38, %v4299_v39  ;;  %7319 = vmatprep.subr.bf16.mxu1 %v11036_v63 }
 0x3d3   :  { %v4303_v53 = vpop.f32.mrf.mxu0  ;;  %v4560_v22 = vpop.f32.mrf.mxu1 }
 0x3d4   :  { %v4704_v17 = vmax.f32 %v4556_v11, 0.0  ;;  %v4304_v6 = vadd.f32 %v10340_v44, %v4303_v53  ;;  %v5894_v53 = vsel %vm380_vm0, %v7736_v4, 0 }
 0x3d5   :  { %v4305_v20 = vpop.f32.mrf.mxu0  ;;  %v4562_v14 = vpop.f32.mrf.mxu1  ;;  %7320 = vmatpush3.bf16.msra.mxu1 %v7729_v43 }
 0x3d6   :  { %v4747_v54 = vpack.c.bf16 %v4704_v17, %v4703_v15  ;;  %7333 = vmatprep.subr.bf16.mxu1 %v11036_v63  ;;  %v4561_v19 = vadd.f32 %v4560_v22, %v4304_v6 }
 0x3d7   :  { %v4306_v16 = vpop.f32.mrf.mxu0  ;;  %v4563_v34 = vpop.f32.mrf.mxu1 }
 0x3d8   :  { %v4307_v24 = vadd.f32 %v10340_v44, %v4306_v16  ;;  %7314 = vmatmul.mubr.msk.bf16.vlgmr.msra.gmra.mxu0 %vm295_vm1, %v4747_v54  ;;  %v4705_v60 = vmax.f32 %v4561_v19, 0.0  ;;  %v7737_v54 = vld [vmem:[%s10739_s7 + $0x110] sm:$0xff]   ;;  %v7738_v16 = vld [vmem:[%s10739_s7 + $0x128] sm:$0x3f]  }
 0x3d9   :  { %v4308_v56 = vpop.f32.mrf.mxu0  ;;  %v4565_v26 = vpop.f32.mrf.mxu1  ;;  %7326 = vmatpush3.bf16.msra.mxu0 %v5699_v62  ;;  %7329 = vmatprep.mubr.msk.bf16.mxu0 %vm7762_vm4, %v11036_v63 }
 0x3da   :  { %v4564_v18 = vadd.f32 %v4563_v34, %v4307_v24  ;;  %7327 = vmatprep.subr.bf16.mxu0 %v11036_v63 }
 0x3db   :  { %v4311_v36 = vpop.f32.mrf.mxu0  ;;  %v4568_v40 = vpop.f32.mrf.mxu1 }
 0x3dc   :  { %v4706_v33 = vmax.f32 %v4564_v18, 0.0  ;;  %v4312_v1 = vadd.f32 %v10340_v44, %v4311_v36  ;;  %v5959_v36 = vsel %vm380_vm0, %v7738_v16, 0 }
 0x3dd   :  { %v4313_v48 = vpop.f32.mrf.mxu0  ;;  %v4570_v7 = vpop.f32.mrf.mxu1  ;;  %7328 = vmatpush3.bf16.msra.mxu0 %v7731_v50 }
 0x3de   :  { %v4748_v58 = vpack.c.bf16 %v4706_v33, %v4705_v60  ;;  %7341 = vmatprep.subr.bf16.mxu0 %v11036_v63  ;;  %v4569_v31 = vadd.f32 %v4568_v40, %v4312_v1 }
 0x3df   :  { %v4314_v41 = vpop.f32.mrf.mxu0  ;;  %v4571_v2 = vpop.f32.mrf.mxu1 }
 0x3e0   :  { %v4315_v13 = vadd.f32 %v10340_v44, %v4314_v41  ;;  %7322 = vmatmul.mubr.msk.bf16.vlgmr.msra.gmra.mxu1 %vm295_vm1, %v4748_v58  ;;  %v4707_v51 = vmax.f32 %v4569_v31, 0.0  ;;  %v7739_v58 = vld [vmem:[%s10739_s7 + $0x120] sm:$0xff]   ;;  %v7740_v41 = vld [vmem:[%s10739_s7 + $0x138] sm:$0x3f]  }
 0x3e1   :  { %v4316_v55 = vpop.f32.mrf.mxu0  ;;  %v4573_v35 = vpop.f32.mrf.mxu1  ;;  %7334 = vmatpush3.bf16.msra.mxu1 %v5764_v23  ;;  %7337 = vmatprep.mubr.msk.bf16.mxu1 %vm7762_vm4, %v11036_v63 }
 0x3e2   :  { %v4572_v47 = vadd.f32 %v4571_v2, %v4315_v13  ;;  %7335 = vmatprep.subr.bf16.mxu1 %v11036_v63 }
 0x3e3   :  { %v4319_v28 = vpop.f32.mrf.mxu0  ;;  %v4576_v5 = vpop.f32.mrf.mxu1 }
 0x3e4   :  { %v4708_v49 = vmax.f32 %v4572_v47, 0.0  ;;  %v4320_v21 = vadd.f32 %v10340_v44, %v4319_v28  ;;  %v6024_v28 = vsel %vm380_vm0, %v7740_v41, 0 }
 0x3e5   :  { %v4321_v57 = vpop.f32.mrf.mxu0  ;;  %v4578_v25 = vpop.f32.mrf.mxu1  ;;  %7336 = vmatpush3.bf16.msra.mxu1 %v7733_v32 }
 0x3e6   :  { %v4749_v45 = vpack.c.bf16 %v4708_v49, %v4707_v51  ;;  %7349 = vmatprep.subr.bf16.mxu1 %v11036_v63  ;;  %v4577_v3 = vadd.f32 %v4576_v5, %v4320_v21 }
 0x3e7   :  { %v4322_v0 = vpop.f32.mrf.mxu0  ;;  %v4579_v37 = vpop.f32.mrf.mxu1 }
 0x3e8   :  { %v4323_v30 = vadd.f32 %v10340_v44, %v4322_v0  ;;  %7330 = vmatmul.mubr.msk.bf16.vlgmr.msra.gmra.mxu0 %vm295_vm1, %v4749_v45  ;;  %v4709_v39 = vmax.f32 %v4577_v3, 0.0  ;;  %v7741_v45 = vld [vmem:[%s10739_s7 + $0x130] sm:$0xff]   ;;  %v7742_v0 = vld [vmem:[%s10739_s7 + $0x148] sm:$0x3f]  }
 0x3e9   :  { %v4324_v12 = vpop.f32.mrf.mxu0  ;;  %v4581_v46 = vpop.f32.mrf.mxu1  ;;  %7342 = vmatpush3.bf16.msra.mxu0 %v5829_v59  ;;  %7345 = vmatprep.mubr.msk.bf16.mxu0 %vm7762_vm4, %v11036_v63 }
 0x3ea   :  { %v4580_v52 = vadd.f32 %v4579_v37, %v4323_v30  ;;  %7343 = vmatprep.subr.bf16.mxu0 %v11036_v63 }
 0x3eb   :  { %v4327_v38 = vpop.f32.mrf.mxu0  ;;  %v4584_v61 = vpop.f32.mrf.mxu1 }
 0x3ec   :  { %v4710_v29 = vmax.f32 %v4580_v52, 0.0  ;;  %v4328_v10 = vadd.f32 %v10340_v44, %v4327_v38  ;;  %v6089_v38 = vsel %vm380_vm0, %v7742_v0, 0 }
 0x3ed   :  { %v4329_v43 = vpop.f32.mrf.mxu0  ;;  %v4586_v11 = vpop.f32.mrf.mxu1  ;;  %7344 = vmatpush3.bf16.msra.mxu0 %v7735_v9 }
 0x3ee   :  { %v4750_v27 = vpack.c.bf16 %v4710_v29, %v4709_v39  ;;  %7357 = vmatprep.subr.bf16.mxu0 %v11036_v63  ;;  %v4585_v17 = vadd.f32 %v4584_v61, %v4328_v10 }
 0x3ef   :  { %v4330_v22 = vpop.f32.mrf.mxu0  ;;  %v4587_v15 = vpop.f32.mrf.mxu1 }
 0x3f0   :  { %v4331_v6 = vadd.f32 %v10340_v44, %v4330_v22  ;;  %7338 = vmatmul.mubr.msk.bf16.vlgmr.msra.gmra.mxu1 %vm295_vm1, %v4750_v27  ;;  %v4711_v24 = vmax.f32 %v4585_v17, 0.0  ;;  %v7743_v27 = vld [vmem:[%s10739_s7 + $0x140] sm:$0xff]   ;;  %v7744_v22 = vld [vmem:[%s10739_s7 + $0x158] sm:$0x3f]  }
 0x3f1   :  { %v4332_v20 = vpop.f32.mrf.mxu0  ;;  %v4589_v14 = vpop.f32.mrf.mxu1  ;;  %7350 = vmatpush3.bf16.msra.mxu1 %v5894_v53  ;;  %7353 = vmatprep.mubr.msk.bf16.mxu1 %vm7762_vm4, %v11036_v63 }
 0x3f2   :  { %v4588_v62 = vadd.f32 %v4587_v15, %v4331_v6  ;;  %7351 = vmatprep.subr.bf16.mxu1 %v11036_v63 }
 0x3f3   :  { %v4335_v34 = vpop.f32.mrf.mxu0  ;;  %v4592_v19 = vpop.f32.mrf.mxu1 }
 0x3f4   :  { %v4712_v56 = vmax.f32 %v4588_v62, 0.0  ;;  %v4336_v26 = vadd.f32 %v10340_v44, %v4335_v34  ;;  %v6154_v34 = vsel %vm380_vm0, %v7744_v22, 0 }
 0x3f5   :  { %v4337_v50 = vpop.f32.mrf.mxu0  ;;  %v4594_v18 = vpop.f32.mrf.mxu1  ;;  %7352 = vmatpush3.bf16.msra.mxu1 %v7737_v54 }
 0x3f6   :  { %v4751_v42 = vpack.c.bf16 %v4712_v56, %v4711_v24  ;;  %7365 = vmatprep.subr.bf16.mxu1 %v11036_v63  ;;  %v4593_v33 = vadd.f32 %v4592_v19, %v4336_v26 }
 0x3f7   :  { %v4338_v40 = vpop.f32.mrf.mxu0  ;;  %v4595_v60 = vpop.f32.mrf.mxu1 }
 0x3f8   :  { %v4339_v1 = vadd.f32 %v10340_v44, %v4338_v40  ;;  %7346 = vmatmul.mubr.msk.bf16.vlgmr.msra.gmra.mxu0 %vm295_vm1, %v4751_v42  ;;  %v4713_v13 = vmax.f32 %v4593_v33, 0.0  ;;  %v7745_v42 = vld [vmem:[%s10739_s7 + $0x150] sm:$0xff]   ;;  %v7746_v40 = vld [vmem:[%s10739_s7 + $0x168] sm:$0x3f]  }
 0x3f9   :  { %v4340_v48 = vpop.f32.mrf.mxu0  ;;  %v4597_v7 = vpop.f32.mrf.mxu1  ;;  %7358 = vmatpush3.bf16.msra.mxu0 %v5959_v36  ;;  %7361 = vmatprep.mubr.msk.bf16.mxu0 %vm7762_vm4, %v11036_v63 }
 0x3fa   :  { %v4596_v23 = vadd.f32 %v4595_v60, %v4339_v1  ;;  %7359 = vmatprep.subr.bf16.mxu0 %v11036_v63 }
 0x3fb   :  { %v4343_v2 = vpop.f32.mrf.mxu0  ;;  %v4600_v31 = vpop.f32.mrf.mxu1 }
 0x3fc   :  { %v4714_v55 = vmax.f32 %v4596_v23, 0.0  ;;  %v4344_v35 = vadd.f32 %v10340_v44, %v4343_v2  ;;  %v6219_v2 = vsel %vm380_vm0, %v7746_v40, 0 }
 0x3fd   :  { %v4345_v32 = vpop.f32.mrf.mxu0  ;;  %v4602_v47 = vpop.f32.mrf.mxu1  ;;  %7360 = vmatpush3.bf16.msra.mxu0 %v7739_v58 }
 0x3fe   :  { %v4752_v8 = vpack.c.bf16 %v4714_v55, %v4713_v13  ;;  %7373 = vmatprep.subr.bf16.mxu0 %v11036_v63  ;;  %v4601_v49 = vadd.f32 %v4600_v31, %v4344_v35 }
 0x3ff   :  { %v4346_v5 = vpop.f32.mrf.mxu0  ;;  %v4603_v51 = vpop.f32.mrf.mxu1 }
 0x400   :  { %v4347_v21 = vadd.f32 %v10340_v44, %v4346_v5  ;;  %7354 = vmatmul.mubr.msk.bf16.vlgmr.msra.gmra.mxu1 %vm295_vm1, %v4752_v8  ;;  %v4715_v30 = vmax.f32 %v4601_v49, 0.0  ;;  %v7747_v8 = vld [vmem:[%s10739_s7 + $0x160] sm:$0xff]   ;;  %v7748_v5 = vld [vmem:[%s10739_s7 + $0x178] sm:$0x3f]  }
 0x401   :  { %v4348_v57 = vpop.f32.mrf.mxu0  ;;  %v4605_v25 = vpop.f32.mrf.mxu1  ;;  %7366 = vmatpush3.bf16.msra.mxu1 %v6024_v28  ;;  %7369 = vmatprep.mubr.msk.bf16.mxu1 %vm7762_vm4, %v11036_v63 }
 0x402   :  { %v4604_v59 = vadd.f32 %v4603_v51, %v4347_v21  ;;  %7367 = vmatprep.subr.bf16.mxu1 %v11036_v63  ;;  %v10652_v57 = vld [vmem:[%s10740_s6] ss:$0 sm:$0xff] }
 0x403   :  { %v4351_v37 = vpop.f32.mrf.mxu0  ;;  %v4608_v3 = vpop.f32.mrf.mxu1 }
 0x404   :  { %v4716_v12 = vmax.f32 %v4604_v59, 0.0  ;;  %v4352_v46 = vadd.f32 %v10340_v44, %v4351_v37  ;;  %v6284_v37 = vsel %vm380_vm0, %v7748_v5, 0 }
 0x405   :  { %v4353_v9 = vpop.f32.mrf.mxu0  ;;  %v4610_v52 = vpop.f32.mrf.mxu1  ;;  %7368 = vmatpush3.bf16.msra.mxu1 %v7741_v45 }
 0x406   :  { %v4753_v4 = vpack.c.bf16 %v4716_v12, %v4715_v30  ;;  %7381 = vmatprep.subr.bf16.mxu1 %v11036_v63  ;;  %v4609_v29 = vadd.f32 %v4608_v3, %v4352_v46 }
 0x407   :  { %v4354_v61 = vpop.f32.mrf.mxu0  ;;  %v4611_v39 = vpop.f32.mrf.mxu1 }
 0x408   :  { %v4355_v10 = vadd.f32 %v10340_v44, %v4354_v61  ;;  %7362 = vmatmul.mubr.msk.bf16.vlgmr.msra.gmra.mxu0 %vm295_vm1, %v4753_v4  ;;  %v4717_v6 = vmax.f32 %v4609_v29, 0.0  ;;  %v7749_v4 = vld [vmem:[%s10739_s7 + $0x170] sm:$0xff]   ;;  %v7750_v61 = vld [vmem:[%s10739_s7 + $0x188] sm:$0x3f]  }
 0x409   :  { %v4356_v43 = vpop.f32.mrf.mxu0  ;;  %v4613_v11 = vpop.f32.mrf.mxu1  ;;  %7374 = vmatpush3.bf16.msra.mxu0 %v6089_v38  ;;  %7377 = vmatprep.mubr.msk.bf16.mxu0 %vm7762_vm4, %v11036_v63 }
 0x40a   :  { %v4612_v53 = vadd.f32 %v4611_v39, %v4355_v10  ;;  %7375 = vmatprep.subr.bf16.mxu0 %v11036_v63 }
 0x40b   :  { %v4359_v15 = vpop.f32.mrf.mxu0  ;;  %v4616_v17 = vpop.f32.mrf.mxu1 }
 0x40c   :  { %v4718_v20 = vmax.f32 %v4612_v53, 0.0  ;;  %v4360_v14 = vadd.f32 %v10340_v44, %v4359_v15  ;;  %v6349_v15 = vsel %vm380_vm0, %v7750_v61, 0 }
 0x40d   :  { %v4361_v54 = vpop.f32.mrf.mxu0  ;;  %v4618_v62 = vpop.f32.mrf.mxu1  ;;  %7376 = vmatpush3.bf16.msra.mxu0 %v7743_v27 }
 0x40e   :  { %v4754_v16 = vpack.c.bf16 %v4718_v20, %v4717_v6  ;;  %7389 = vmatprep.subr.bf16.mxu0 %v11036_v63  ;;  %v4617_v56 = vadd.f32 %v4616_v17, %v4360_v14 }
 0x40f   :  { %v4362_v19 = vpop.f32.mrf.mxu0  ;;  %v4619_v24 = vpop.f32.mrf.mxu1 }
 0x410   :  { %v4363_v26 = vadd.f32 %v10340_v44, %v4362_v19  ;;  %7370 = vmatmul.mubr.msk.bf16.vlgmr.msra.gmra.mxu1 %vm295_vm1, %v4754_v16  ;;  %v4719_v1 = vmax.f32 %v4617_v56, 0.0  ;;  %v7751_v16 = vld [vmem:[%s10739_s7 + $0x180] sm:$0xff]   ;;  %v7752_v19 = vld [vmem:[%s10739_s7 + $0x198] sm:$0x3f]  }
 0x411   :  { %v4364_v50 = vpop.f32.mrf.mxu0  ;;  %v4621_v18 = vpop.f32.mrf.mxu1  ;;  %7382 = vmatpush3.bf16.msra.mxu1 %v6154_v34  ;;  %7385 = vmatprep.mubr.msk.bf16.mxu1 %vm7762_vm4, %v11036_v63 }
 0x412   :  { %v4620_v36 = vadd.f32 %v4619_v24, %v4363_v26  ;;  %7383 = vmatprep.subr.bf16.mxu1 %v11036_v63 }
 0x413   :  { %v4367_v60 = vpop.f32.mrf.mxu0  ;;  %v4624_v33 = vpop.f32.mrf.mxu1 }
 0x414   :  { %v4720_v48 = vmax.f32 %v4620_v36, 0.0  ;;  %v4368_v7 = vadd.f32 %v10340_v44, %v4367_v60  ;;  %v6414_v60 = vsel %vm380_vm0, %v7752_v19, 0 }
 0x415   :  { %v4369_v58 = vpop.f32.mrf.mxu0  ;;  %v4626_v23 = vpop.f32.mrf.mxu1  ;;  %7384 = vmatpush3.bf16.msra.mxu1 %v7745_v42 }
 0x416   :  { %v4755_v41 = vpack.c.bf16 %v4720_v48, %v4719_v1  ;;  %7397 = vmatprep.subr.bf16.mxu1 %v11036_v63  ;;  %v4625_v55 = vadd.f32 %v4624_v33, %v4368_v7 }
 0x417   :  { %v4370_v31 = vpop.f32.mrf.mxu0  ;;  %v4627_v13 = vpop.f32.mrf.mxu1 }
 0x418   :  { %v4371_v35 = vadd.f32 %v10340_v44, %v4370_v31  ;;  %7378 = vmatmul.mubr.msk.bf16.vlgmr.msra.gmra.mxu0 %vm295_vm1, %v4755_v41  ;;  %v4721_v49 = vmax.f32 %v4625_v55, 0.0  ;;  %v7753_v41 = vld [vmem:[%s10739_s7 + $0x190] sm:$0xff]   ;;  %v7754_v31 = vld [vmem:[%s10739_s7 + $0x1a8] sm:$0x3f]  }
 0x419   :  { %v4372_v32 = vpop.f32.mrf.mxu0  ;;  %v4629_v47 = vpop.f32.mrf.mxu1  ;;  %7390 = vmatpush3.bf16.msra.mxu0 %v6219_v2  ;;  %7393 = vmatprep.mubr.msk.bf16.mxu0 %vm7762_vm4, %v11036_v63 }
 0x41a   :  { %v4628_v28 = vadd.f32 %v4627_v13, %v4371_v35  ;;  %7391 = vmatprep.subr.bf16.mxu0 %v11036_v63 }
 0x41b   :  { %v4375_v44 = vpop.f32.mrf.mxu0  ;;  %v4632_v51 = vpop.f32.mrf.mxu1 }
 0x41c   :  { %v4722_v21 = vmax.f32 %v4628_v28, 0.0  ;;  %v4376_v25 = vadd.f32 %v10652_v57, %v4375_v44  ;;  %v6479_v44 = vsel %vm380_vm0, %v7754_v31, 0 }
 0x41d   :  { %v4377_v45 = vpop.f32.mrf.mxu0  ;;  %v4634_v59 = vpop.f32.mrf.mxu1  ;;  %7392 = vmatpush3.bf16.msra.mxu0 %v7747_v8 }
 0x41e   :  { %v4756_v0 = vpack.c.bf16 %v4722_v21, %v4721_v49  ;;  %7405 = vmatprep.subr.bf16.mxu0 %v11036_v63  ;;  %v4633_v12 = vadd.f32 %v4632_v51, %v4376_v25 }
 0x41f   :  { %v4378_v3 = vpop.f32.mrf.mxu0  ;;  %v4635_v30 = vpop.f32.mrf.mxu1 }
 0x420   :  { %v4379_v46 = vadd.f32 %v10652_v57, %v4378_v3  ;;  %7386 = vmatmul.mubr.msk.bf16.vlgmr.msra.gmra.mxu1 %vm295_vm1, %v4756_v0  ;;  %v4723_v10 = vmax.f32 %v4633_v12, 0.0  ;;  %v7755_v0 = vld [vmem:[%s10739_s7 + $0x1a0] sm:$0xff]   ;;  %v7756_v3 = vld [vmem:[%s10739_s7 + $0x1b8] sm:$0x3f]  }
 0x421   :  { %v4380_v9 = vpop.f32.mrf.mxu0  ;;  %v4637_v52 = vpop.f32.mrf.mxu1  ;;  %7398 = vmatpush3.bf16.msra.mxu1 %v6284_v37  ;;  %7401 = vmatprep.mubr.msk.bf16.mxu1 %vm7762_vm4, %v11036_v63 }
 0x422   :  { %v4636_v38 = vadd.f32 %v4635_v30, %v4379_v46  ;;  %7399 = vmatprep.subr.bf16.mxu1 %v11036_v63 }
 0x423   :  { %v4383_v39 = vpop.f32.mrf.mxu0  ;;  %v4640_v29 = vpop.f32.mrf.mxu1 }
 0x424   :  { %v4724_v43 = vmax.f32 %v4636_v38, 0.0  ;;  %v4384_v11 = vadd.f32 %v10652_v57, %v4383_v39  ;;  %v6544_v39 = vsel %vm380_vm0, %v7756_v3, 0 }
 0x425   :  { %v4385_v27 = vpop.f32.mrf.mxu0  ;;  %v4642_v53 = vpop.f32.mrf.mxu1  ;;  %7400 = vmatpush3.bf16.msra.mxu1 %v7749_v4 }
 0x426   :  { %v4757_v22 = vpack.c.bf16 %v4724_v43, %v4723_v10  ;;  %7413 = vmatprep.subr.bf16.mxu1 %v11036_v63  ;;  %v4641_v20 = vadd.f32 %v4640_v29, %v4384_v11 }
 0x427   :  { %v4386_v17 = vpop.f32.mrf.mxu0  ;;  %v4643_v6 = vpop.f32.mrf.mxu1 }
 0x428   :  { %v4387_v14 = vadd.f32 %v10652_v57, %v4386_v17  ;;  %7394 = vmatmul.mubr.msk.bf16.vlgmr.msra.gmra.mxu0 %vm295_vm1, %v4757_v22  ;;  %v4725_v26 = vmax.f32 %v4641_v20, 0.0  ;;  %v7757_v22 = vld [vmem:[%s10739_s7 + $0x1b0] sm:$0xff]  }
 0x429   :  { %v4388_v54 = vpop.f32.mrf.mxu0  ;;  %v4645_v62 = vpop.f32.mrf.mxu1  ;;  %7406 = vmatpush3.bf16.msra.mxu0 %v6349_v15  ;;  %7409 = vmatprep.mubr.msk.bf16.mxu0 %vm7762_vm4, %v11036_v63 }
 0x42a   :  { %v4644_v34 = vadd.f32 %v4643_v6, %v4387_v14  ;;  %7407 = vmatprep.subr.bf16.mxu0 %v11036_v63 }
 0x42b   :  { %v4391_v24 = vpop.f32.mrf.mxu0  ;;  %v4648_v56 = vpop.f32.mrf.mxu1 }
 0x42c   :  { %v4726_v50 = vmax.f32 %v4644_v34, 0.0  ;;  %v4392_v18 = vadd.f32 %v10652_v57, %v4391_v24 }
 0x42d   :  { %v4393_v42 = vpop.f32.mrf.mxu0  ;;  %v4650_v36 = vpop.f32.mrf.mxu1  ;;  %7408 = vmatpush3.bf16.msra.mxu0 %v7751_v16 }
 0x42e   :  { %v4758_v40 = vpack.c.bf16 %v4726_v50, %v4725_v26  ;;  %7421 = vmatprep.subr.bf16.mxu0 %v11036_v63  ;;  %v4649_v48 = vadd.f32 %v4648_v56, %v4392_v18 }
 0x42f   :  { %v4394_v33 = vpop.f32.mrf.mxu0  ;;  %v4651_v1 = vpop.f32.mrf.mxu1 }
 0x430   :  { %v4395_v7 = vadd.f32 %v10652_v57, %v4394_v33  ;;  %7402 = vmatmul.mubr.msk.bf16.vlgmr.msra.gmra.mxu1 %vm295_vm1, %v4758_v40  ;;  %v4727_v35 = vmax.f32 %v4649_v48, 0.0 }
 0x431   :  { %v4396_v58 = vpop.f32.mrf.mxu0  ;;  %v4653_v23 = vpop.f32.mrf.mxu1  ;;  %7414 = vmatpush3.bf16.msra.mxu1 %v6414_v60  ;;  %7417 = vmatprep.mubr.msk.bf16.mxu1 %vm7762_vm4, %v11036_v63 }
 0x432   :  { %v4652_v2 = vadd.f32 %v4651_v1, %v4395_v7  ;;  %7415 = vmatprep.subr.bf16.mxu1 %v11036_v63 }
 0x433   :  { %v4399_v13 = vpop.f32.mrf.mxu0  ;;  %v4656_v55 = vpop.f32.mrf.mxu1 }
 0x434   :  { %v4728_v32 = vmax.f32 %v4652_v2, 0.0  ;;  %v4400_v47 = vadd.f32 %v10652_v57, %v4399_v13 }
 0x435   :  { %v4401_v8 = vpop.f32.mrf.mxu0  ;;  %v4658_v28 = vpop.f32.mrf.mxu1  ;;  %7416 = vmatpush3.bf16.msra.mxu1 %v7753_v41 }
 0x436   :  { %v4759_v5 = vpack.c.bf16 %v4728_v32, %v4727_v35  ;;  %7429 = vmatprep.subr.bf16.mxu1 %v11036_v63  ;;  %v4657_v21 = vadd.f32 %v4656_v55, %v4400_v47 }
 0x437   :  { %v4402_v51 = vpop.f32.mrf.mxu0  ;;  %v4659_v49 = vpop.f32.mrf.mxu1 }
 0x438   :  { %v4403_v25 = vadd.f32 %v10652_v57, %v4402_v51  ;;  %7410 = vmatmul.mubr.msk.bf16.vlgmr.msra.gmra.mxu0 %vm295_vm1, %v4759_v5  ;;  %v4729_v46 = vmax.f32 %v4657_v21, 0.0 }
 0x439   :  { %v4404_v45 = vpop.f32.mrf.mxu0  ;;  %v4661_v59 = vpop.f32.mrf.mxu1  ;;  %7422 = vmatpush3.bf16.msra.mxu0 %v6479_v44  ;;  %7425 = vmatprep.mubr.msk.bf16.mxu0 %vm7762_vm4, %v11036_v63 }
 0x43a   :  { %v4660_v37 = vadd.f32 %v4659_v49, %v4403_v25  ;;  %7423 = vmatprep.subr.bf16.mxu0 %v11036_v63 }
 0x43b   :  { %v4407_v30 = vpop.f32.mrf.mxu0  ;;  %v4664_v12 = vpop.f32.mrf.mxu1 }
 0x43c   :  { %v4730_v9 = vmax.f32 %v4660_v37, 0.0  ;;  %v4408_v52 = vadd.f32 %v10652_v57, %v4407_v30 }
 0x43d   :  { %v4409_v4 = vpop.f32.mrf.mxu0  ;;  %v4666_v38 = vpop.f32.mrf.mxu1  ;;  %7424 = vmatpush3.bf16.msra.mxu0 %v7755_v0 }
 0x43e   :  { %v4760_v61 = vpack.c.bf16 %v4730_v9, %v4729_v46  ;;  %v4665_v43 = vadd.f32 %v4664_v12, %v4408_v52 }
 0x43f   :  { %v4410_v29 = vpop.f32.mrf.mxu0  ;;  %v4667_v10 = vpop.f32.mrf.mxu1 }
 0x440   :  { %v4411_v11 = vadd.f32 %v10652_v57, %v4410_v29  ;;  %7418 = vmatmul.mubr.msk.bf16.vlgmr.msra.gmra.mxu1 %vm295_vm1, %v4760_v61  ;;  %v4731_v20 = vmax.f32 %v4665_v43, 0.0 }
 0x441   :  { %v4412_v27 = vpop.f32.mrf.mxu0  ;;  %v4669_v53 = vpop.f32.mrf.mxu1  ;;  %7430 = vmatpush3.bf16.msra.mxu1 %v6544_v39  ;;  %7433 = vmatprep.mubr.msk.bf16.mxu1 %vm7762_vm4, %v11036_v63 }
 0x442   :  { %v4668_v15 = vadd.f32 %v4667_v10, %v4411_v11  ;;  %7431 = vmatprep.subr.bf16.mxu1 %v11036_v63  ;;  %v6936_v63 = vld [vmem:[%s10741_s8] ss:$0 sm:$0xff] }
 0x443   :  { %v4415_v17 = vpop.f32.mrf.mxu0  ;;  %v4672_v6 = vpop.f32.mrf.mxu1 }
 0x444   :  { %v4732_v14 = vmax.f32 %v4668_v15, 0.0  ;;  %v4416_v54 = vadd.f32 %v10652_v57, %v4415_v17 }
 0x445   :  { %v4417_v62 = vpop.f32.mrf.mxu0  ;;  %v4674_v16 = vpop.f32.mrf.mxu1  ;;  %7432 = vmatpush3.bf16.msra.mxu1 %v7757_v22 }
 0x446   :  { %v4761_v34 = vpack.c.bf16 %v4732_v14, %v4731_v20  ;;  %v4673_v56 = vadd.f32 %v4672_v6, %v4416_v54 }
 0x447   :  { %v4418_v19 = vpop.f32.mrf.mxu0  ;;  %v4675_v24 = vpop.f32.mrf.mxu1 }
 0x448   :  { %v4419_v26 = vadd.f32 %v10652_v57, %v4418_v19  ;;  %7426 = vmatmul.mubr.msk.bf16.vlgmr.msra.gmra.mxu0 %vm295_vm1, %v4761_v34  ;;  %v4733_v60 = vmax.f32 %v4673_v56, 0.0 }
 0x449   :  { %v4420_v50 = vpop.f32.mrf.mxu0  ;;  %v4677_v18 = vpop.f32.mrf.mxu1 }
 0x44a   :  { %v4676_v42 = vadd.f32 %v4675_v24, %v4419_v26 }
 0x44b   :  { %v4825_v36 = vpop.f32.mrf.mxu0  ;;  %v4890_v40 = vpop.f32.mrf.mxu1 }
 0x44c   :  { %v4734_v33 = vmax.f32 %v4676_v42, 0.0  ;;  %v4832_v1 = vadd.f32 %v6936_v63, %v4825_v36 }
 0x44d   :  { %v7219_v48 = vpop.f32.mrf.mxu0  ;;  %v7227_v7 = vpop.f32.mrf.mxu1 }
 0x44e   :  { %v4762_v58 = vpack.c.bf16 %v4734_v33, %v4733_v60  ;;  %v4897_v23 = vadd.f32 %v4890_v40, %v4832_v1 }
 0x44f   :  { %v4828_v41 = vpop.f32.mrf.mxu0  ;;  %v4893_v57 = vpop.f32.mrf.mxu1 }
 0x450   :  { %v4833_v2 = vadd.f32 %v6936_v63, %v4828_v41  ;;  %7434 = vmatmul.mubr.msk.bf16.vlgmr.msra.gmra.mxu1 %vm295_vm1, %v4762_v58 }
 0x451   :  { %v7220_v31 = vpop.f32.mrf.mxu0  ;;  %v7228_v13 = vpop.f32.mrf.mxu1 }
 0x452   :  { %v4898_v55 = vadd.f32 %v4893_v57, %v4833_v2 }
 0x453   :  { %v4955_v35 = vpop.f32.mrf.mxu0  ;;  %v5020_v32 = vpop.f32.mrf.mxu1 }
 0x454   :  { %v4962_v47 = vadd.f32 %v4955_v35, %v4897_v23 }
 0x455   :  { %v7235_v8 = vpop.f32.mrf.mxu0  ;;  %v7243_v28 = vpop.f32.mrf.mxu1 }
 0x456   :  { %v5027_v5 = vadd.f32 %v5020_v32, %v4962_v47 }
 0x457   :  { %v4958_v44 = vpop.f32.mrf.mxu0  ;;  %v5023_v51 = vpop.f32.mrf.mxu1 }
 0x458   :  { %v4963_v49 = vadd.f32 %v4958_v44, %v4898_v55 }
 0x459   :  { %v7236_v21 = vpop.f32.mrf.mxu0  ;;  %v7244_v25 = vpop.f32.mrf.mxu1 }
 0x45a   :  { %v5028_v45 = vadd.f32 %v5023_v51, %v4963_v49 }
 0x45b   :  { %v5085_v59 = vpop.f32.mrf.mxu0 }
 0x45c   :  { %v5092_v0 = vadd.f32 %v5085_v59, %v5027_v5 }
 0x45d   :  { %v7251_v37 = vpop.f32.mrf.mxu0 }
 0x45f   :  { %v5088_v3 = vpop.f32.mrf.mxu0 }
 0x460   :  { %v5093_v30 = vadd.f32 %v5088_v3, %v5028_v45  ;;  %v5150_v12 = vpop.f32.mrf.mxu1 }
 0x461   :  { %v5157_v46 = vadd.f32 %v5150_v12, %v5092_v0  ;;  %v7252_v9 = vpop.f32.mrf.mxu0 }
 0x462   :  { %v7259_v52 = vpop.f32.mrf.mxu1 }
 0x464   :  { %v5153_v4 = vpop.f32.mrf.mxu1 }
 0x465   :  { %v5158_v38 = vadd.f32 %v5153_v4, %v5093_v30 }
 0x466   :  { %v7260_v61 = vpop.f32.mrf.mxu1 }
 0x468   :  { %v5215_v39 = vpop.f32.mrf.mxu0 }
 0x469   :  { %v5222_v29 = vadd.f32 %v5215_v39, %v5157_v46 }
 0x46a   :  { %v7267_v10 = vpop.f32.mrf.mxu0 }
 0x46c   :  { %v5218_v43 = vpop.f32.mrf.mxu0 }
 0x46d   :  { %v5223_v11 = vadd.f32 %v5218_v43, %v5158_v38 }
 0x46e   :  { %v7268_v27 = vpop.f32.mrf.mxu0 }
 0x470   :  { %v5280_v53 = vpop.f32.mrf.mxu1 }
 0x471   :  { %v5287_v22 = vadd.f32 %v5280_v53, %v5222_v29 }
 0x472   :  { %v7275_v15 = vpop.f32.mrf.mxu1 }
 0x474   :  { %v5283_v17 = vpop.f32.mrf.mxu1 }
 0x475   :  { %v5288_v6 = vadd.f32 %v5283_v17, %v5223_v11 }
 0x476   :  { %v7276_v20 = vpop.f32.mrf.mxu1 }
 0x478   :  { %v5345_v14 = vpop.f32.mrf.mxu0 }
 0x479   :  { %v5352_v54 = vadd.f32 %v5345_v14, %v5287_v22 }
 0x47a   :  { %v7283_v62 = vpop.f32.mrf.mxu0 }
 0x47c   :  { %v5348_v16 = vpop.f32.mrf.mxu0 }
 0x47d   :  { %v5353_v34 = vadd.f32 %v5348_v16, %v5288_v6 }
 0x47e   :  { %v7284_v19 = vpop.f32.mrf.mxu0 }
 0x480   :  { %v5410_v24 = vpop.f32.mrf.mxu1 }
 0x481   :  { %v5417_v56 = vadd.f32 %v5410_v24, %v5352_v54 }
 0x482   :  { %v7291_v26 = vpop.f32.mrf.mxu1 }
 0x484   :  { %v5413_v50 = vpop.f32.mrf.mxu1 }
 0x485   :  { %v5418_v18 = vadd.f32 %v5413_v50, %v5353_v34 }
 0x486   :  { %v7292_v63 = vpop.f32.mrf.mxu1 }
 0x488   :  { %v5475_v42 = vpop.f32.mrf.mxu0 }
 0x489   :  { %v5482_v36 = vadd.f32 %v5475_v42, %v5417_v56 }
 0x48a   :  { %v7299_v40 = vpop.f32.mrf.mxu0 }
 0x48c   :  { %v5478_v60 = vpop.f32.mrf.mxu0 }
 0x48d   :  { %v5483_v33 = vadd.f32 %v5478_v60, %v5418_v18 }
 0x48e   :  { %v7300_v1 = vpop.f32.mrf.mxu0 }
 0x490   :  { %v5540_v48 = vpop.f32.mrf.mxu1 }
 0x491   :  { %v5547_v7 = vadd.f32 %v5540_v48, %v5482_v36 }
 0x492   :  { %v7307_v58 = vpop.f32.mrf.mxu1 }
 0x494   :  { %v5543_v23 = vpop.f32.mrf.mxu1 }
 0x495   :  { %v5548_v41 = vadd.f32 %v5543_v23, %v5483_v33 }
 0x496   :  { %v7308_v57 = vpop.f32.mrf.mxu1 }
 0x498   :  { %v5605_v2 = vpop.f32.mrf.mxu0 }
 0x499   :  { %v5612_v31 = vadd.f32 %v5605_v2, %v5547_v7 }
 0x49a   :  { %v7315_v13 = vpop.f32.mrf.mxu0 }
 0x49c   :  { %v5608_v55 = vpop.f32.mrf.mxu0 }
 0x49d   :  { %v5613_v35 = vadd.f32 %v5608_v55, %v5548_v41 }
 0x49e   :  { %v7316_v32 = vpop.f32.mrf.mxu0 }
 0x4a0   :  { %v5670_v47 = vpop.f32.mrf.mxu1 }
 0x4a1   :  { %v5677_v8 = vadd.f32 %v5670_v47, %v5612_v31 }
 0x4a2   :  { %v7323_v28 = vpop.f32.mrf.mxu1 }
 0x4a4   :  { %v5673_v5 = vpop.f32.mrf.mxu1 }
 0x4a5   :  { %v5678_v44 = vadd.f32 %v5673_v5, %v5613_v35 }
 0x4a6   :  { %v7324_v51 = vpop.f32.mrf.mxu1 }
 0x4a8   :  { %v5735_v49 = vpop.f32.mrf.mxu0 }
 0x4a9   :  { %v5742_v21 = vadd.f32 %v5735_v49, %v5677_v8 }
 0x4aa   :  { %v7331_v25 = vpop.f32.mrf.mxu0 }
 0x4ac   :  { %v5738_v45 = vpop.f32.mrf.mxu0 }
 0x4ad   :  { %v5743_v59 = vadd.f32 %v5738_v45, %v5678_v44 }
 0x4ae   :  { %v7332_v0 = vpop.f32.mrf.mxu0 }
 0x4b0   :  { %v5800_v37 = vpop.f32.mrf.mxu1 }
 0x4b1   :  { %v5807_v3 = vadd.f32 %v5800_v37, %v5742_v21 }
 0x4b2   :  { %v7339_v30 = vpop.f32.mrf.mxu1 }
 0x4b4   :  { %v5803_v12 = vpop.f32.mrf.mxu1 }
 0x4b5   :  { %v5808_v46 = vadd.f32 %v5803_v12, %v5743_v59 }
 0x4b6   :  { %v7340_v9 = vpop.f32.mrf.mxu1 }
 0x4b8   :  { %v5865_v52 = vpop.f32.mrf.mxu0 }
 0x4b9   :  { %v5872_v4 = vadd.f32 %v5865_v52, %v5807_v3 }
 0x4ba   :  { %v7347_v38 = vpop.f32.mrf.mxu0 }
 0x4bc   :  { %v5868_v61 = vpop.f32.mrf.mxu0 }
 0x4bd   :  { %v5873_v39 = vadd.f32 %v5868_v61, %v5808_v46 }
 0x4be   :  { %v7348_v29 = vpop.f32.mrf.mxu0 }
 0x4c0   :  { %v5930_v10 = vpop.f32.mrf.mxu1 }
 0x4c1   :  { %v5937_v23 = vadd.f32 %v5930_v10, %v5872_v4 }
 0x4c2   :  { %v7355_v43 = vpop.f32.mrf.mxu1 }
 0x4c4   :  { %v5933_v11 = vpop.f32.mrf.mxu1 }
 0x4c5   :  { %v5938_v31 = vadd.f32 %v5933_v11, %v5873_v39 }
 0x4c6   :  { %v7356_v27 = vpop.f32.mrf.mxu1 }
 0x4c8   :  { %v5995_v53 = vpop.f32.mrf.mxu0 }
 0x4c9   :  { %v6002_v57 = vadd.f32 %v5995_v53, %v5937_v23 }
 0x4ca   :  { %v7363_v22 = vpop.f32.mrf.mxu0 }
 0x4cc   :  { %v5998_v15 = vpop.f32.mrf.mxu0 }
 0x4cd   :  { %v6003_v35 = vadd.f32 %v5998_v15, %v5938_v31 }
 0x4ce   :  { %v7364_v17 = vpop.f32.mrf.mxu0 }
 0x4d0   :  { %v6060_v6 = vpop.f32.mrf.mxu1 }
 0x4d1   :  { %v6067_v13 = vadd.f32 %v6060_v6, %v6002_v57 }
 0x4d2   :  { %v7371_v20 = vpop.f32.mrf.mxu1 }
 0x4d4   :  { %v6063_v14 = vpop.f32.mrf.mxu1 }
 0x4d5   :  { %v6068_v8 = vadd.f32 %v6063_v14, %v6003_v35 }
 0x4d6   :  { %v7372_v54 = vpop.f32.mrf.mxu1 }
 0x4d8   :  { %v6125_v62 = vpop.f32.mrf.mxu0 }
 0x4d9   :  { %v6132_v32 = vadd.f32 %v6125_v62, %v6067_v13 }
 0x4da   :  { %v7379_v16 = vpop.f32.mrf.mxu0 }
 0x4dc   :  { %v6128_v34 = vpop.f32.mrf.mxu0 }
 0x4dd   :  { %v6133_v44 = vadd.f32 %v6128_v34, %v6068_v8 }
 0x4de   :  { %v7380_v19 = vpop.f32.mrf.mxu0 }
 0x4e0   :  { %v6190_v24 = vpop.f32.mrf.mxu1 }
 0x4e1   :  { %v6197_v28 = vadd.f32 %v6190_v24, %v6132_v32 }
 0x4e2   :  { %v7387_v56 = vpop.f32.mrf.mxu1 }
 0x4e4   :  { %v6193_v26 = vpop.f32.mrf.mxu1 }
 0x4e5   :  { %v6198_v21 = vadd.f32 %v6193_v26, %v6133_v44 }
 0x4e6   :  { %v7388_v50 = vpop.f32.mrf.mxu1 }
 0x4e8   :  { %v6255_v18 = vpop.f32.mrf.mxu0 }
 0x4e9   :  { %v6262_v51 = vadd.f32 %v6255_v18, %v6197_v28 }
 0x4ea   :  { %v7395_v63 = vpop.f32.mrf.mxu0 }
 0x4ec   :  { %v6258_v42 = vpop.f32.mrf.mxu0 }
 0x4ed   :  { %v6263_v59 = vadd.f32 %v6258_v42, %v6198_v21 }
 0x4ee   :  { %v7396_v36 = vpop.f32.mrf.mxu0 }
 0x4f0   :  { %v6320_v40 = vpop.f32.mrf.mxu1 }
 0x4f1   :  { %v6327_v25 = vadd.f32 %v6320_v40, %v6262_v51 }
 0x4f2   :  { %v7403_v60 = vpop.f32.mrf.mxu1 }
 0x4f4   :  { %v6323_v33 = vpop.f32.mrf.mxu1 }
 0x4f5   :  { %v6328_v3 = vadd.f32 %v6323_v33, %v6263_v59 }
 0x4f6   :  { %v7404_v1 = vpop.f32.mrf.mxu1 }
 0x4f8   :  { %v6385_v48 = vpop.f32.mrf.mxu0 }
 0x4f9   :  { %v6392_v0 = vadd.f32 %v6385_v48, %v6327_v25 }
 0x4fa   :  { %v7411_v7 = vpop.f32.mrf.mxu0 }
 0x4fc   :  { %v6388_v58 = vpop.f32.mrf.mxu0 }
 0x4fd   :  { %v6393_v46 = vadd.f32 %v6388_v58, %v6328_v3 }
 0x4fe   :  { %v7412_v41 = vpop.f32.mrf.mxu0 }
 0x500   :  { %v6450_v2 = vpop.f32.mrf.mxu1 }
 0x501   :  { %v6457_v30 = vadd.f32 %v6450_v2, %v6392_v0 }
 0x502   :  { %v7419_v55 = vpop.f32.mrf.mxu1 }
 0x504   :  { %v6453_v47 = vpop.f32.mrf.mxu1 }
 0x505   :  { %v6458_v4 = vadd.f32 %v6453_v47, %v6393_v46 }
 0x506   :  { %v7420_v5 = vpop.f32.mrf.mxu1 }
 0x508   :  { %v6515_v49 = vpop.f32.mrf.mxu0 }
 0x509   :  { %v6522_v9 = vadd.f32 %v6515_v49, %v6457_v30 }
 0x50a   :  { %v7427_v45 = vpop.f32.mrf.mxu0 }
 0x50c   :  { %v6518_v37 = vpop.f32.mrf.mxu0 }
 0x50d   :  { %v6523_v39 = vadd.f32 %v6518_v37, %v6458_v4 }
 0x50e   :  { %v7428_v12 = vpop.f32.mrf.mxu0 }
 0x510   :  { %v6580_v52 = vpop.f32.mrf.mxu1 }
 0x511   :  { %v6587_v38 = vadd.f32 %v6580_v52, %v6522_v9 }
 0x512   :  { %v7435_v61 = vpop.f32.mrf.mxu1 }
 0x513   :  { %6589 = vst [vmem:[%s10742_s9] sm:$0xff] %v6587_v38 }
 0x514   :  { %v6583_v29 = vpop.f32.mrf.mxu1 }
 0x515   :  { %v6588_v10 = vadd.f32 %v6583_v29, %v6523_v39 }
 0x516   :  { %v7436_v43 = vpop.f32.mrf.mxu1 }
 0x517   :  { %6590 = vst [vmem:[%s10742_s9 + $0x8] sm:$0xff] %v6588_v10 }

</bundles_post_ra>
